<compile_context>
chip_gen: v5e
topology: v5e:2x2
jax: 0.10.0
libtpu: 0.0.40
codegen_flags: <defaults>
</compile_context>

<pallas_src>
import functools

import jax
import jax.numpy as jnp
import numpy as np
from jax import lax
from jax.experimental import pallas as pl
from jax.experimental.pallas import tpu as pltpu

MIN_NORM = 1e-15
PROJ_EPS = 4e-3        # HGCN PoincareBall eps for float32
ARTANH_CLAMP = 1e-7    # f32-safe stand-in for HGCN's 1e-15 clamp (documented deviation)
CURV = 1.0
F32 = jnp.float32
LANE = 128


# ----------------------- kernel-side Poincare helpers (axis-aware) -----------------------

def _rsum(x, axis):
    return jnp.sum(x, axis=axis, keepdims=True)


def _k_norm(x, axis):
    return jnp.sqrt(_rsum(x * x, axis))


def _k_artanh(x):
    x = jnp.clip(x, -1.0 + ARTANH_CLAMP, 1.0 - ARTANH_CLAMP)
    return 0.5 * (jnp.log(1.0 + x) - jnp.log(1.0 - x))


def _k_proj(x, axis):
    norm = jnp.maximum(_k_norm(x, axis), MIN_NORM)
    maxnorm = 1.0 - PROJ_EPS          # c = 1
    return jnp.where(norm > maxnorm, x * (maxnorm / norm), x)


def _k_expmap0(u, axis):
    n = jnp.maximum(_k_norm(u, axis), MIN_NORM)
    return jnp.tanh(n) * u / n


def _k_logmap0(p, axis):
    n = jnp.maximum(_k_norm(p, axis), MIN_NORM)
    return _k_artanh(n) * p / n


def _k_mobius_add(x, y, axis):
    x2 = _rsum(x * x, axis)
    y2 = _rsum(y * y, axis)
    xy = _rsum(x * y, axis)
    num = (1.0 + 2.0 * xy + y2) * x + (1.0 - x2) * y
    den = 1.0 + 2.0 * xy + x2 * y2
    return num / jnp.maximum(den, MIN_NORM)


def _k_softmax(x, axis):
    m = jnp.max(x, axis=axis, keepdims=True)
    e = jnp.exp(x - m)
    return e / _rsum(e, axis)


# ---------------------------------------- Pallas kernel ----------------------------------------

def coattention_kernel(s_ref, c_ref, wlT_ref, wsT_ref, wcT_ref, whs_ref, whc_ref,
                       cs_ref, ss_ref, cc_ref, sc_ref, cdsd_ref, out_ref):
    s_in = s_ref[...]                     # (Bb, Ns, D) f32
    c_in = c_ref[...]                     # (Bb, Nc, D) f32
    Bb, Ns, D = s_in.shape
    Nc = c_in.shape[1]
    P = out_ref.shape[-1]                 # lane-dense packed output width (multiple of 128)

    wlT = wlT_ref[...]                    # (D, D)  pre-transposed weights
    wsT = wsT_ref[...]                    # (D, K)
    wcT = wcT_ref[...]                    # (D, K)
    whs = whs_ref[...]                    # (1, K)
    whc = whc_ref[...]                    # (1, K)
    cdsd = cdsd_ref[...]                  # (2D, D) == [Cd ; -Sd]  (fused D-side real DFT)

    # grid-invariant DFT row matrices (fetched once; Bb copies are tiny at these shapes)
    cs_b = jnp.broadcast_to(cs_ref[...], (Bb, Ns, Ns))
    ss_b = jnp.broadcast_to(ss_ref[...], (Bb, Ns, Ns))
    cc_b = jnp.broadcast_to(cc_ref[...], (Bb, Nc, Nc))
    sc_b = jnp.broadcast_to(sc_ref[...], (Bb, Nc, Nc))

    def rowmat(x2d, w2d):
        # (rows, D') @ (D', K'): f32 operands, f32 accumulation on the MXU.
        return jnp.dot(x2d, w2d, preferred_element_type=F32)

    def mobius_matvec(x, mT):
        # HGCN mobius_matvec(m, x); mT = m.T is passed pre-transposed (no in-kernel m.T).
        b, n, d = x.shape
        k = mT.shape[1]
        x_norm = jnp.maximum(_k_norm(x, -1), MIN_NORM)
        mx = rowmat(x.reshape(b * n, d), mT).reshape(b, n, k)
        mx_norm = jnp.maximum(_k_norm(mx, -1), MIN_NORM)
        res = jnp.tanh(mx_norm / x_norm * _k_artanh(x_norm)) * mx / mx_norm
        all_zero = jnp.sum(jnp.abs(mx), axis=-1, keepdims=True) == 0.0
        return jnp.where(all_zero, jnp.zeros_like(res), res)

    def fourier(x, c_rows, s_rows):
        # logmap0 -> Re(fft2) via real-DFT matmuls (fused D-side) -> expmap0 -> proj.
        b, n, d = x.shape
        xe = _k_logmap0(x, -1)
        a1 = jnp.einsum('bnm,bmd->bnd', c_rows, xe, preferred_element_type=F32)
        a2 = jnp.einsum('bnm,bmd->bnd', s_rows, xe, preferred_element_type=F32)
        a = jnp.concatenate([a1, a2], axis=-1)                          # (b, n, 2D)
        xf = rowmat(a.reshape(b * n, 2 * d), cdsd).reshape(b, n, d)      # CnX@Cd - SnX@Sd
        return _k_proj(_k_expmap0(xf, -1), -1)

    s = fourier(s_in, cs_b, ss_b)         # (Bb, Ns, D) points on the ball
    c = fourier(c_in, cc_b, sc_b)         # (Bb, Nc, D)

    # proj over the sequence axis (== PyTorch's proj of the transposed reps, transpose-free)
    s2 = _k_proj(s, -2)                   # (Bb, Ns, D)
    c2 = _k_proj(c, -2)                   # (Bb, Nc, D)

    # --- affinity matrix L: computed ONCE, transposed for the Hs branch ---
    Le0 = _k_logmap0(_k_proj(mobius_matvec(c, wlT), -1), -1)        # (Bb, Nc, D)
    s_ax_e = _k_logmap0(s2, -2)                                     # (Bb, Ns, D)
    l_raw = jnp.einsum('bnd,bmd->bnm', Le0, s_ax_e,
                       preferred_element_type=F32)                  # (Bb, Nc, Ns)
    L_e = _k_logmap0(_k_proj(_k_expmap0(jnp.tanh(l_raw), -1), -1), -1)   # ops over Ns (last)
    L_eT = jnp.swapaxes(L_e, -1, -2)                                # (Bb, Ns, Nc) single transpose

    # --- shared mobius matvecs, K=128 kept on the lane dim (dedup: Hs_a==Hc_b, Hs_b==Hc_a) ---
    P_s = _k_proj(mobius_matvec(s2, wsT), -2)     # (Bb, Ns, K)
    P_c = _k_proj(mobius_matvec(c2, wcT), -2)     # (Bb, Nc, K)
    P_s_e = _k_logmap0(P_s, -2)
    P_c_e = _k_logmap0(P_c, -2)

    def coattend(P_a, P_other_e, L_mix):
        hb = jnp.einsum('bnm,bmk->bnk', L_mix, P_other_e, preferred_element_type=F32)
        hb = _k_proj(_k_expmap0(hb, -2), -2)
        h = _k_proj(_k_mobius_add(P_a, hb, -2), -2)
        return _k_proj(_k_expmap0(jnp.tanh(_k_logmap0(h, -2)), -2), -2)

    Hs = coattend(P_s, P_c_e, L_eT)               # (Bb, Ns, K)
    Hc = coattend(P_c, P_s_e, L_e)                # (Bb, Nc, K)

    def attention(H, wh):
        # mobius_matvec(wh, H) with output dim 1 -> f32 VPU multiply + lane reduce.
        x_norm = jnp.maximum(_k_norm(H, -1), MIN_NORM)                # (Bb, N, 1)
        mx = jnp.sum(H * wh, axis=-1, keepdims=True)                  # (Bb, N, 1)
        mx_norm = jnp.maximum(jnp.abs(mx), MIN_NORM)
        a = jnp.tanh(mx_norm / x_norm * _k_artanh(x_norm)) * mx / mx_norm
        a = jnp.where(mx == 0.0, jnp.zeros_like(a), a)
        a = _k_proj(a, -2)
        a = _k_proj(_k_expmap0(_k_softmax(_k_logmap0(a, -2), -2), -2), -2)
        return a                                                      # (Bb, N, 1)

    As = attention(Hs, whs)               # (Bb, Ns, 1)
    Ac = attention(Hc, whc)               # (Bb, Nc, 1)

    s_e = _k_logmap0(s, -1)
    c_e = _k_logmap0(c, -1)
    co_s = jnp.sum(_k_logmap0(As, -2) * s_e, axis=1, keepdims=True)   # (Bb, 1, D)
    co_c = jnp.sum(_k_logmap0(Ac, -2) * c_e, axis=1, keepdims=True)   # (Bb, 1, D)

    def to_lanes(a_col, n):
        # (Bb, n, 1) sublane-layout attention -> (Bb, 1, n) lane layout via an identity
        # mask multiply + sublane reduce (robust, no minor-dim reshape needed).
        row = lax.broadcasted_iota(jnp.int32, (n, n), 0)
        col = lax.broadcasted_iota(jnp.int32, (n, n), 1)
        eye = (row == col).astype(F32)
        return jnp.sum(a_col * eye[None, :, :], axis=1, keepdims=True)

    as_l = to_lanes(As, Ns)               # (Bb, 1, Ns)
    ac_l = to_lanes(Ac, Nc)               # (Bb, 1, Nc)

    # single lane-dense packed store: [co_s | co_c | As | Ac | zero pad] -> (Bb, 1, P)
    parts = [co_s, co_c, as_l, ac_l]
    pad = P - (2 * D + Ns + Nc)
    if pad > 0:
        parts.append(jnp.zeros((Bb, 1, pad), F32))
    out_ref[...] = jnp.concatenate(parts, axis=-1)


# ------------------------------------------- wrapper -------------------------------------------

def _dft_real_imag(n):
    idx = jnp.arange(n, dtype=jnp.float32)
    ang = -2.0 * jnp.pi * jnp.outer(idx, idx) / n
    return jnp.cos(ang), jnp.sin(ang)


def _round_up(x, m):
    return ((x + m - 1) // m) * m


@functools.partial(jax.jit, static_argnames=("block_b",))
def coattention_forward(sentence_rep, comment_rep, Wl, Ws, Wc, whs, whc, *, block_b=None):
    B, Ns, D = sentence_rep.shape
    _, Nc, _ = comment_rep.shape
    K = Ws.shape[0]

    if block_b is None:
        # Fill the MXU M dimension (target ~256 flattened rows on v6e/v7x, >=128 on v5e)
        # while keeping >= 2 grid steps so both v7x TensorCores get "parallel" work.
        target = max(1, -(-256 // max(Ns, Nc)))
        block_b = min(target, max(1, B // 2)) if B > 1 else B
        while B % block_b:
            block_b -= 1
    assert B % block_b == 0, "batch must be divisible by block_b (pad upstream if needed)"
    grid = (B // block_b,)

    # Host-side transposes are free; kernel never transposes a weight tile.
    WlT, WsT, WcT = Wl.T, Ws.T, Wc.T

    # Real-DFT matrices (f32: bf16 was rolled back after failing the golden check).
    Cs, Ss = _dft_real_imag(Ns)
    Cc, Sc = _dft_real_imag(Nc)
    Cd, Sd = _dft_real_imag(D)
    CdSd = jnp.concatenate([Cd, -Sd], axis=0)        # (2D, D): fused D-side Re-DFT

    P = _round_up(2 * D + Ns + Nc, LANE)             # lane-dense packed output width

    def rep_spec(n):
        return pl.BlockSpec((block_b, n, D), lambda b: (b, 0, 0))

    def inv_spec(shape):
        # grid-invariant tile: constant index_map -> not re-fetched across grid steps.
        # TODO(synk): on v7x, single-buffer these (pl.Buffered(1)) or DMA once into scratch
        # to halve the invariant VMEM footprint when Ns/Nc/D are scaled up.
        return pl.BlockSpec(shape, lambda b: (0, 0))

    in_specs = [
        rep_spec(Ns), rep_spec(Nc),
        inv_spec((D, D)), inv_spec((D, K)), inv_spec((D, K)),
        inv_spec((1, K)), inv_spec((1, K)),
        inv_spec((Ns, Ns)), inv_spec((Ns, Ns)),
        inv_spec((Nc, Nc)), inv_spec((Nc, Nc)),
        inv_spec((2 * D, D)),
    ]
    out_specs = pl.BlockSpec((block_b, 1, P), lambda b: (b, 0, 0))
    out_shape = jax.ShapeDtypeStruct((B, 1, P), jnp.float32)

    packed = pl.pallas_call(
        coattention_kernel,
        out_shape=out_shape,
        grid_spec=pltpu.PrefetchScalarGridSpec(
            num_scalar_prefetch=0, grid=grid,
            in_specs=in_specs, out_specs=out_specs),
        compiler_params=pltpu.CompilerParams(
            dimension_semantics=("parallel",),
            vmem_limit_bytes=32 * 1024 * 1024),     # generation-safe (v7x headroom)
    )(sentence_rep, comment_rep, WlT, WsT, WcT, whs, whc, Cs, Ss, Cc, Sc, CdSd)

    flat = packed[:, 0, :]                           # (B, P)
    co_sc = flat[:, :2 * D]                          # (B, 2D)
    As = flat[:, 2 * D:2 * D + Ns][:, None, :]       # (B, 1, Ns)
    Ac = flat[:, 2 * D + Ns:2 * D + Ns + Nc][:, None, :]  # (B, 1, Nc)
    return co_sc, As, Ac


# --------------------------------- pure-JAX reference (golden, f32/HIGHEST) ---------------------------------

def _ref_norm(x):
    return jnp.sqrt(jnp.sum(x * x, axis=-1, keepdims=True))


def _ref_artanh(x):
    x = jnp.clip(x, -1.0 + ARTANH_CLAMP, 1.0 - ARTANH_CLAMP)
    return 0.5 * (jnp.log(1.0 + x) - jnp.log(1.0 - x))


def _ref_proj(x, c=CURV):
    norm = jnp.maximum(_ref_norm(x), MIN_NORM)
    maxnorm = (1.0 - PROJ_EPS) / jnp.sqrt(c)
    return jnp.where(norm > maxnorm, x / norm * maxnorm, x)


def _ref_expmap0(u, c=CURV):
    sqrt_c = jnp.sqrt(c)
    n = jnp.maximum(_ref_norm(u), MIN_NORM)
    return jnp.tanh(sqrt_c * n) * u / (sqrt_c * n)


def _ref_logmap0(p, c=CURV):
    sqrt_c = jnp.sqrt(c)
    n = jnp.maximum(_ref_norm(p), MIN_NORM)
    return _ref_artanh(sqrt_c * n) * p / (sqrt_c * n)


def _ref_mobius_add(x, y, c=CURV):
    x2 = jnp.sum(x * x, axis=-1, keepdims=True)
    y2 = jnp.sum(y * y, axis=-1, keepdims=True)
    xy = jnp.sum(x * y, axis=-1, keepdims=True)
    num = (1.0 + 2.0 * c * xy + c * y2) * x + (1.0 - c * x2) * y
    den = 1.0 + 2.0 * c * xy + c * c * x2 * y2
    return num / jnp.maximum(den, MIN_NORM)


def _ref_mm(a, b):
    return jnp.matmul(a, b, precision=lax.Precision.HIGHEST)


def _ref_mobius_matvec(m, x, c=CURV):
    sqrt_c = jnp.sqrt(c)
    x_norm = jnp.maximum(_ref_norm(x), MIN_NORM)
    mx = _ref_mm(x, m.T)
    mx_norm = jnp.maximum(_ref_norm(mx), MIN_NORM)
    res = jnp.tanh(mx_norm / x_norm * _ref_artanh(sqrt_c * x_norm)) * mx / (mx_norm * sqrt_c)
    all_zero = jnp.sum(jnp.abs(mx), axis=-1, keepdims=True) == 0.0
    return jnp.where(all_zero, jnp.zeros_like(res), res)


def _ref_softmax(x):
    m = jnp.max(x, axis=-1, keepdims=True)
    e = jnp.exp(x - m)
    return e / jnp.sum(e, axis=-1, keepdims=True)


def coattention_reference(s, c, Wl, Ws, Wc, whs, whc):
    s = _ref_logmap0(s)
    s = jnp.real(jnp.fft.fft2(s)).astype(jnp.float32)
    c = _ref_logmap0(c)
    c = jnp.real(jnp.fft.fft2(c)).astype(jnp.float32)
    s = _ref_proj(_ref_expmap0(s))
    c = _ref_proj(_ref_expmap0(c))

    s_t = _ref_proj(jnp.swapaxes(s, 1, 2))
    c_t = _ref_proj(jnp.swapaxes(c, 1, 2))

    L = _ref_proj(_ref_mobius_matvec(Wl, c))
    L_e = _ref_logmap0(L)
    s_t_e = _ref_logmap0(s_t)
    L = jnp.tanh(_ref_mm(L_e, s_t_e))
    L = _ref_proj(_ref_expmap0(L))
    L_e = _ref_logmap0(L)

    s2 = jnp.swapaxes(s_t, -1, -2)
    c2 = jnp.swapaxes(c_t, -1, -2)

    Hs_a = _ref_proj(jnp.swapaxes(_ref_mobius_matvec(Ws, s2), -1, -2))
    Hs_b = _ref_proj(jnp.swapaxes(_ref_mobius_matvec(Wc, c2), -1, -2))
    Hs_b = _ref_proj(_ref_expmap0(_ref_mm(_ref_logmap0(Hs_b), L_e)))
    Hs = _ref_proj(_ref_mobius_add(Hs_a, Hs_b))
    Hs = _ref_proj(_ref_expmap0(jnp.tanh(_ref_logmap0(Hs))))

    Hc_a = _ref_proj(jnp.swapaxes(_ref_mobius_matvec(Wc, c2), -1, -2))
    Hc_b = _ref_proj(jnp.swapaxes(_ref_mobius_matvec(Ws, s2), -1, -2))
    Hc_b = _ref_proj(_ref_expmap0(_ref_mm(_ref_logmap0(Hc_b), jnp.swapaxes(L_e, -1, -2))))
    Hc = _ref_proj(_ref_mobius_add(Hc_a, Hc_b))
    Hc = _ref_proj(_ref_expmap0(jnp.tanh(_ref_logmap0(Hc))))

    As = _ref_proj(jnp.swapaxes(_ref_mobius_matvec(whs, jnp.swapaxes(Hs, -1, -2)), -1, -2))
    As = _ref_proj(_ref_expmap0(_ref_softmax(_ref_logmap0(As))))
    Ac = _ref_proj(jnp.swapaxes(_ref_mobius_matvec(whc, jnp.swapaxes(Hc, -1, -2)), -1, -2))
    Ac = _ref_proj(_ref_expmap0(_ref_softmax(_ref_logmap0(Ac))))

    co_s = _ref_mm(_ref_logmap0(As), _ref_logmap0(s))
    co_c = _ref_mm(_ref_logmap0(Ac), _ref_logmap0(c))
    co_sc = jnp.concatenate([co_s, co_c], axis=-1)
    return jnp.squeeze(co_sc, axis=1), As, Ac


# --------------------------------------------- main ---------------------------------------------

if __name__ == "__main__":
    # small shapes consistent with the module (latent_dim shrunk to 32, k kept at 128)
    B, Ns, Nc, D, K = 4, 8, 16, 32, 128

    key = jax.random.PRNGKey(0)
    ks = jax.random.split(key, 8)

    # inputs: valid points on the Poincare ball
    s_tan = 0.3 * jax.random.normal(ks[0], (B, Ns, D), jnp.float32)
    c_tan = 0.3 * jax.random.normal(ks[1], (B, Nc, D), jnp.float32)
    sentence_rep = _ref_proj(_ref_expmap0(s_tan))
    comment_rep = _ref_proj(_ref_expmap0(c_tan))

    # deterministic parameter init mimicking torch.randn in __init__
    Wl = jax.random.normal(ks[2], (D, D), jnp.float32)
    Wc = jax.random.normal(ks[3], (K, D), jnp.float32)
    Ws = jax.random.normal(ks[4], (K, D), jnp.float32)
    whs = jax.random.normal(ks[5], (1, K), jnp.float32)
    whc = jax.random.normal(ks[6], (1, K), jnp.float32)
    # TODO(synk): concat_m1 / concat_m2 / concat_b and the HypAct maps are never used in forward.

    # block_b=2 keeps 2 grid steps at B=4 (v7x megacore); default heuristic picks it too.
    co_sc, As, Ac = coattention_forward(sentence_rep, comment_rep,
                                        Wl, Ws, Wc, whs, whc, block_b=2)
    jax.block_until_ready((co_sc, As, Ac))

    assert co_sc.shape == (B, 2 * D)
    assert As.shape == (B, 1, Ns)
    assert Ac.shape == (B, 1, Nc)

    co_r, As_r, Ac_r = coattention_reference(sentence_rep, comment_rep, Wl, Ws, Wc, whs, whc)
    # Kernel now runs f32 matmuls and exact divisions; the only deviations from the exact-FFT
    # Precision.HIGHEST reference are f32 rounding through the artanh-boundary chains
    # (expected <~1e-3), so a 2e-2 tolerance has ample margin.
    np.testing.assert_allclose(np.asarray(co_sc), np.asarray(co_r), rtol=2e-2, atol=2e-2)
    np.testing.assert_allclose(np.asarray(As), np.asarray(As_r), rtol=2e-2, atol=2e-2)
    np.testing.assert_allclose(np.asarray(Ac), np.asarray(Ac_r), rtol=2e-2, atol=2e-2)

    print("KERNEL_OK")
</pallas_src>

<mosaic_0001>
module attributes {stable_mosaic.version = 11 : i64} {
  func.func @coattention_kernel(%arg0: i32, %arg1: memref<2x8x32xf32, #tpu.memory_space<vmem>>, %arg2: memref<2x16x32xf32, #tpu.memory_space<vmem>>, %arg3: memref<32x32xf32, #tpu.memory_space<vmem>>, %arg4: memref<32x128xf32, #tpu.memory_space<vmem>>, %arg5: memref<32x128xf32, #tpu.memory_space<vmem>>, %arg6: memref<1x128xf32, #tpu.memory_space<vmem>>, %arg7: memref<1x128xf32, #tpu.memory_space<vmem>>, %arg8: memref<8x8xf32, #tpu.memory_space<vmem>>, %arg9: memref<8x8xf32, #tpu.memory_space<vmem>>, %arg10: memref<16x16xf32, #tpu.memory_space<vmem>>, %arg11: memref<16x16xf32, #tpu.memory_space<vmem>>, %arg12: memref<64x32xf32, #tpu.memory_space<vmem>>, %arg13: memref<2x1x128xf32, #tpu.memory_space<vmem>>) attributes {dimension_semantics = [#tpu.dimension_semantics<parallel>], iteration_bounds = array<i64: 2>, scalar_prefetch = 0 : i64, scratch_operands = 0 : i64, tpu.core_type = #tpu.core_type<tc>, window_params = [{transform_indices = @transform_0, window_bounds = array<i64: 2, 8, 32>}, {transform_indices = @transform_1, window_bounds = array<i64: 2, 16, 32>}, {pipeline_mode = #tpu.pipeline_mode<synchronous>, transform_indices = @transform_2, window_bounds = array<i64: 32, 32>}, {pipeline_mode = #tpu.pipeline_mode<synchronous>, transform_indices = @transform_3, window_bounds = array<i64: 32, 128>}, {pipeline_mode = #tpu.pipeline_mode<synchronous>, transform_indices = @transform_4, window_bounds = array<i64: 32, 128>}, {pipeline_mode = #tpu.pipeline_mode<synchronous>, transform_indices = @transform_5, window_bounds = array<i64: 1, 128>}, {pipeline_mode = #tpu.pipeline_mode<synchronous>, transform_indices = @transform_6, window_bounds = array<i64: 1, 128>}, {pipeline_mode = #tpu.pipeline_mode<synchronous>, transform_indices = @transform_7, window_bounds = array<i64: 8, 8>}, {pipeline_mode = #tpu.pipeline_mode<synchronous>, transform_indices = @transform_8, window_bounds = array<i64: 8, 8>}, {pipeline_mode = #tpu.pipeline_mode<synchronous>, transform_indices = @transform_9, window_bounds = array<i64: 16, 16>}, {pipeline_mode = #tpu.pipeline_mode<synchronous>, transform_indices = @transform_10, window_bounds = array<i64: 16, 16>}, {pipeline_mode = #tpu.pipeline_mode<synchronous>, transform_indices = @transform_11, window_bounds = array<i64: 64, 32>}, {transform_indices = @transform_12, window_bounds = array<i64: 2, 1, 128>}]} {
    %c0 = arith.constant 0 : index
    %c0_0 = arith.constant 0 : index
    %c0_1 = arith.constant 0 : index
    %0 = vector.load %arg1[%c0, %c0_0, %c0_1] : memref<2x8x32xf32, #tpu.memory_space<vmem>>, vector<2x8x32xf32>
    %c0_2 = arith.constant 0 : index
    %c0_3 = arith.constant 0 : index
    %c0_4 = arith.constant 0 : index
    %1 = vector.load %arg2[%c0_2, %c0_3, %c0_4] : memref<2x16x32xf32, #tpu.memory_space<vmem>>, vector<2x16x32xf32>
    %c0_5 = arith.constant 0 : index
    %c0_6 = arith.constant 0 : index
    %2 = vector.load %arg3[%c0_5, %c0_6] : memref<32x32xf32, #tpu.memory_space<vmem>>, vector<32x32xf32>
    %c0_7 = arith.constant 0 : index
    %c0_8 = arith.constant 0 : index
    %3 = vector.load %arg4[%c0_7, %c0_8] : memref<32x128xf32, #tpu.memory_space<vmem>>, vector<32x128xf32>
    %c0_9 = arith.constant 0 : index
    %c0_10 = arith.constant 0 : index
    %4 = vector.load %arg5[%c0_9, %c0_10] : memref<32x128xf32, #tpu.memory_space<vmem>>, vector<32x128xf32>
    %c0_11 = arith.constant 0 : index
    %c0_12 = arith.constant 0 : index
    %5 = vector.load %arg6[%c0_11, %c0_12] : memref<1x128xf32, #tpu.memory_space<vmem>>, vector<1x128xf32>
    %c0_13 = arith.constant 0 : index
    %c0_14 = arith.constant 0 : index
    %6 = vector.load %arg7[%c0_13, %c0_14] : memref<1x128xf32, #tpu.memory_space<vmem>>, vector<1x128xf32>
    %c0_15 = arith.constant 0 : index
    %c0_16 = arith.constant 0 : index
    %7 = vector.load %arg12[%c0_15, %c0_16] : memref<64x32xf32, #tpu.memory_space<vmem>>, vector<64x32xf32>
    %c0_17 = arith.constant 0 : index
    %c0_18 = arith.constant 0 : index
    %8 = vector.load %arg8[%c0_17, %c0_18] : memref<8x8xf32, #tpu.memory_space<vmem>>, vector<8x8xf32>
    %9 = vector.shape_cast %8 : vector<8x8xf32> to vector<1x8x8xf32>
    %10 = vector.broadcast %9 : vector<1x8x8xf32> to vector<2x8x8xf32>
    %c0_19 = arith.constant 0 : index
    %c0_20 = arith.constant 0 : index
    %11 = vector.load %arg9[%c0_19, %c0_20] : memref<8x8xf32, #tpu.memory_space<vmem>>, vector<8x8xf32>
    %12 = vector.shape_cast %11 : vector<8x8xf32> to vector<1x8x8xf32>
    %13 = vector.broadcast %12 : vector<1x8x8xf32> to vector<2x8x8xf32>
    %c0_21 = arith.constant 0 : index
    %c0_22 = arith.constant 0 : index
    %14 = vector.load %arg10[%c0_21, %c0_22] : memref<16x16xf32, #tpu.memory_space<vmem>>, vector<16x16xf32>
    %15 = vector.shape_cast %14 : vector<16x16xf32> to vector<1x16x16xf32>
    %16 = vector.broadcast %15 : vector<1x16x16xf32> to vector<2x16x16xf32>
    %c0_23 = arith.constant 0 : index
    %c0_24 = arith.constant 0 : index
    %17 = vector.load %arg11[%c0_23, %c0_24] : memref<16x16xf32, #tpu.memory_space<vmem>>, vector<16x16xf32>
    %18 = vector.shape_cast %17 : vector<16x16xf32> to vector<1x16x16xf32>
    %19 = vector.broadcast %18 : vector<1x16x16xf32> to vector<2x16x16xf32>
    %20 = arith.mulf %0, %0 : vector<2x8x32xf32>
    %cst = arith.constant dense<0.000000e+00> : vector<2x8xf32>
    %21 = vector.multi_reduction <add>, %20, %cst [2] : vector<2x8x32xf32> to vector<2x8xf32>
    %22 = vector.shape_cast %21 : vector<2x8xf32> to vector<2x8x1xf32>
    %23 = math.sqrt %22 : vector<2x8x1xf32>
    %cst_25 = arith.constant 1.000000e-15 : f32
    %24 = vector.broadcast %cst_25 : f32 to vector<2x8x1xf32>
    %25 = arith.maximumf %23, %24 : vector<2x8x1xf32>
    %cst_26 = arith.constant -0.99999988 : f32
    %cst_27 = arith.constant 0.99999988 : f32
    %26 = vector.broadcast %cst_26 : f32 to vector<2x8x1xf32>
    %27 = arith.maximumf %26, %25 : vector<2x8x1xf32>
    %28 = vector.broadcast %cst_27 : f32 to vector<2x8x1xf32>
    %29 = arith.minimumf %28, %27 : vector<2x8x1xf32>
    %cst_28 = arith.constant 1.000000e+00 : f32
    %30 = vector.broadcast %cst_28 : f32 to vector<2x8x1xf32>
    %31 = arith.addf %30, %29 : vector<2x8x1xf32>
    %32 = math.log %31 : vector<2x8x1xf32>
    %cst_29 = arith.constant 1.000000e+00 : f32
    %33 = vector.broadcast %cst_29 : f32 to vector<2x8x1xf32>
    %34 = arith.subf %33, %29 : vector<2x8x1xf32>
    %35 = math.log %34 : vector<2x8x1xf32>
    %36 = arith.subf %32, %35 : vector<2x8x1xf32>
    %cst_30 = arith.constant 5.000000e-01 : f32
    %37 = vector.broadcast %cst_30 : f32 to vector<2x8x1xf32>
    %38 = arith.mulf %37, %36 : vector<2x8x1xf32>
    %39 = vector.broadcast %38 : vector<2x8x1xf32> to vector<2x8x32xf32>
    %40 = arith.mulf %39, %0 : vector<2x8x32xf32>
    %41 = vector.broadcast %25 : vector<2x8x1xf32> to vector<2x8x32xf32>
    %42 = arith.divf %40, %41 : vector<2x8x32xf32>
    "tpu.trace_start"() <{level = 10 : i32, message = "bnm,bmd->bnd"}> : () -> ()
    %cst_31 = arith.constant dense<0.000000e+00> : vector<2x8x32xf32>
    %43 = tpu.matmul %10, %42, %cst_31 {dimension_numbers = #tpu.dot_dimension_numbers<[2], [1], [1], [2], [0, 0, 0, 1, 1, 2], [0], [0]>} : vector<2x8x8xf32>, vector<2x8x32xf32>, vector<2x8x32xf32> -> vector<2x8x32xf32>
    %cst_32 = arith.constant dense<0.000000e+00> : vector<2x8x32xf32>
    %44 = tpu.matmul %13, %42, %cst_32 {dimension_numbers = #tpu.dot_dimension_numbers<[2], [1], [1], [2], [0, 0, 0, 1, 1, 2], [0], [0]>} : vector<2x8x8xf32>, vector<2x8x32xf32>, vector<2x8x32xf32> -> vector<2x8x32xf32>
    "tpu.trace_stop"() : () -> ()
    %45 = tpu.concatenate %43, %44 in 2 : vector<2x8x32xf32>, vector<2x8x32xf32> -> vector<2x8x64xf32>
    %46 = vector.shape_cast %45 : vector<2x8x64xf32> to vector<16x64xf32>
    %cst_33 = arith.constant dense<0.000000e+00> : vector<16x32xf32>
    %47 = tpu.matmul %46, %7, %cst_33 {dimension_numbers = #tpu.dot_dimension_numbers<[1], [0], [0], [1], [0, 0, 1, 1], [], []>} : vector<16x64xf32>, vector<64x32xf32>, vector<16x32xf32> -> vector<16x32xf32>
    %48 = vector.shape_cast %47 : vector<16x32xf32> to vector<2x8x32xf32>
    %49 = arith.mulf %48, %48 : vector<2x8x32xf32>
    %cst_34 = arith.constant dense<0.000000e+00> : vector<2x8xf32>
    %50 = vector.multi_reduction <add>, %49, %cst_34 [2] : vector<2x8x32xf32> to vector<2x8xf32>
    %51 = vector.shape_cast %50 : vector<2x8xf32> to vector<2x8x1xf32>
    %52 = math.sqrt %51 : vector<2x8x1xf32>
    %cst_35 = arith.constant 1.000000e-15 : f32
    %53 = vector.broadcast %cst_35 : f32 to vector<2x8x1xf32>
    %54 = arith.maximumf %52, %53 : vector<2x8x1xf32>
    %55 = math.tanh %54 : vector<2x8x1xf32>
    %56 = vector.broadcast %55 : vector<2x8x1xf32> to vector<2x8x32xf32>
    %57 = arith.mulf %56, %48 : vector<2x8x32xf32>
    %58 = vector.broadcast %54 : vector<2x8x1xf32> to vector<2x8x32xf32>
    %59 = arith.divf %57, %58 : vector<2x8x32xf32>
    %60 = arith.mulf %59, %59 : vector<2x8x32xf32>
    %cst_36 = arith.constant dense<0.000000e+00> : vector<2x8xf32>
    %61 = vector.multi_reduction <add>, %60, %cst_36 [2] : vector<2x8x32xf32> to vector<2x8xf32>
    %62 = vector.shape_cast %61 : vector<2x8xf32> to vector<2x8x1xf32>
    %63 = math.sqrt %62 : vector<2x8x1xf32>
    %cst_37 = arith.constant 1.000000e-15 : f32
    %64 = vector.broadcast %cst_37 : f32 to vector<2x8x1xf32>
    %65 = arith.maximumf %63, %64 : vector<2x8x1xf32>
    %cst_38 = arith.constant 0.995999991 : f32
    %66 = vector.broadcast %cst_38 : f32 to vector<2x8x1xf32>
    %67 = arith.cmpf ogt, %65, %66 : vector<2x8x1xf32>
    %cst_39 = arith.constant 0.995999991 : f32
    %68 = vector.broadcast %cst_39 : f32 to vector<2x8x1xf32>
    %69 = arith.divf %68, %65 : vector<2x8x1xf32>
    %70 = vector.broadcast %69 : vector<2x8x1xf32> to vector<2x8x32xf32>
    %71 = arith.mulf %59, %70 : vector<2x8x32xf32>
    %72 = vector.shape_cast %67 : vector<2x8x1xi1> to vector<2x8x1xi1>
    %73 = vector.broadcast %72 : vector<2x8x1xi1> to vector<2x8x32xi1>
    %74 = arith.select %73, %71, %59 : vector<2x8x32xi1>, vector<2x8x32xf32>
    %75 = arith.mulf %1, %1 : vector<2x16x32xf32>
    %cst_40 = arith.constant dense<0.000000e+00> : vector<2x16xf32>
    %76 = vector.multi_reduction <add>, %75, %cst_40 [2] : vector<2x16x32xf32> to vector<2x16xf32>
    %77 = vector.shape_cast %76 : vector<2x16xf32> to vector<2x16x1xf32>
    %78 = math.sqrt %77 : vector<2x16x1xf32>
    %cst_41 = arith.constant 1.000000e-15 : f32
    %79 = vector.broadcast %cst_41 : f32 to vector<2x16x1xf32>
    %80 = arith.maximumf %78, %79 : vector<2x16x1xf32>
    %cst_42 = arith.constant -0.99999988 : f32
    %cst_43 = arith.constant 0.99999988 : f32
    %81 = vector.broadcast %cst_42 : f32 to vector<2x16x1xf32>
    %82 = arith.maximumf %81, %80 : vector<2x16x1xf32>
    %83 = vector.broadcast %cst_43 : f32 to vector<2x16x1xf32>
    %84 = arith.minimumf %83, %82 : vector<2x16x1xf32>
    %cst_44 = arith.constant 1.000000e+00 : f32
    %85 = vector.broadcast %cst_44 : f32 to vector<2x16x1xf32>
    %86 = arith.addf %85, %84 : vector<2x16x1xf32>
    %87 = math.log %86 : vector<2x16x1xf32>
    %cst_45 = arith.constant 1.000000e+00 : f32
    %88 = vector.broadcast %cst_45 : f32 to vector<2x16x1xf32>
    %89 = arith.subf %88, %84 : vector<2x16x1xf32>
    %90 = math.log %89 : vector<2x16x1xf32>
    %91 = arith.subf %87, %90 : vector<2x16x1xf32>
    %cst_46 = arith.constant 5.000000e-01 : f32
    %92 = vector.broadcast %cst_46 : f32 to vector<2x16x1xf32>
    %93 = arith.mulf %92, %91 : vector<2x16x1xf32>
    %94 = vector.broadcast %93 : vector<2x16x1xf32> to vector<2x16x32xf32>
    %95 = arith.mulf %94, %1 : vector<2x16x32xf32>
    %96 = vector.broadcast %80 : vector<2x16x1xf32> to vector<2x16x32xf32>
    %97 = arith.divf %95, %96 : vector<2x16x32xf32>
    "tpu.trace_start"() <{level = 10 : i32, message = "bnm,bmd->bnd"}> : () -> ()
    %cst_47 = arith.constant dense<0.000000e+00> : vector<2x16x32xf32>
    %98 = tpu.matmul %16, %97, %cst_47 {dimension_numbers = #tpu.dot_dimension_numbers<[2], [1], [1], [2], [0, 0, 0, 1, 1, 2], [0], [0]>} : vector<2x16x16xf32>, vector<2x16x32xf32>, vector<2x16x32xf32> -> vector<2x16x32xf32>
    %cst_48 = arith.constant dense<0.000000e+00> : vector<2x16x32xf32>
    %99 = tpu.matmul %19, %97, %cst_48 {dimension_numbers = #tpu.dot_dimension_numbers<[2], [1], [1], [2], [0, 0, 0, 1, 1, 2], [0], [0]>} : vector<2x16x16xf32>, vector<2x16x32xf32>, vector<2x16x32xf32> -> vector<2x16x32xf32>
    "tpu.trace_stop"() : () -> ()
    %100 = tpu.concatenate %98, %99 in 2 : vector<2x16x32xf32>, vector<2x16x32xf32> -> vector<2x16x64xf32>
    %101 = vector.shape_cast %100 : vector<2x16x64xf32> to vector<32x64xf32>
    %cst_49 = arith.constant dense<0.000000e+00> : vector<32x32xf32>
    %102 = tpu.matmul %101, %7, %cst_49 {dimension_numbers = #tpu.dot_dimension_numbers<[1], [0], [0], [1], [0, 0, 1, 1], [], []>} : vector<32x64xf32>, vector<64x32xf32>, vector<32x32xf32> -> vector<32x32xf32>
    %103 = vector.shape_cast %102 : vector<32x32xf32> to vector<2x16x32xf32>
    %104 = arith.mulf %103, %103 : vector<2x16x32xf32>
    %cst_50 = arith.constant dense<0.000000e+00> : vector<2x16xf32>
    %105 = vector.multi_reduction <add>, %104, %cst_50 [2] : vector<2x16x32xf32> to vector<2x16xf32>
    %106 = vector.shape_cast %105 : vector<2x16xf32> to vector<2x16x1xf32>
    %107 = math.sqrt %106 : vector<2x16x1xf32>
    %cst_51 = arith.constant 1.000000e-15 : f32
    %108 = vector.broadcast %cst_51 : f32 to vector<2x16x1xf32>
    %109 = arith.maximumf %107, %108 : vector<2x16x1xf32>
    %110 = math.tanh %109 : vector<2x16x1xf32>
    %111 = vector.broadcast %110 : vector<2x16x1xf32> to vector<2x16x32xf32>
    %112 = arith.mulf %111, %103 : vector<2x16x32xf32>
    %113 = vector.broadcast %109 : vector<2x16x1xf32> to vector<2x16x32xf32>
    %114 = arith.divf %112, %113 : vector<2x16x32xf32>
    %115 = arith.mulf %114, %114 : vector<2x16x32xf32>
    %cst_52 = arith.constant dense<0.000000e+00> : vector<2x16xf32>
    %116 = vector.multi_reduction <add>, %115, %cst_52 [2] : vector<2x16x32xf32> to vector<2x16xf32>
    %117 = vector.shape_cast %116 : vector<2x16xf32> to vector<2x16x1xf32>
    %118 = math.sqrt %117 : vector<2x16x1xf32>
    %cst_53 = arith.constant 1.000000e-15 : f32
    %119 = vector.broadcast %cst_53 : f32 to vector<2x16x1xf32>
    %120 = arith.maximumf %118, %119 : vector<2x16x1xf32>
    %cst_54 = arith.constant 0.995999991 : f32
    %121 = vector.broadcast %cst_54 : f32 to vector<2x16x1xf32>
    %122 = arith.cmpf ogt, %120, %121 : vector<2x16x1xf32>
    %cst_55 = arith.constant 0.995999991 : f32
    %123 = vector.broadcast %cst_55 : f32 to vector<2x16x1xf32>
    %124 = arith.divf %123, %120 : vector<2x16x1xf32>
    %125 = vector.broadcast %124 : vector<2x16x1xf32> to vector<2x16x32xf32>
    %126 = arith.mulf %114, %125 : vector<2x16x32xf32>
    %127 = vector.shape_cast %122 : vector<2x16x1xi1> to vector<2x16x1xi1>
    %128 = vector.broadcast %127 : vector<2x16x1xi1> to vector<2x16x32xi1>
    %129 = arith.select %128, %126, %114 : vector<2x16x32xi1>, vector<2x16x32xf32>
    %130 = arith.mulf %74, %74 : vector<2x8x32xf32>
    %cst_56 = arith.constant dense<0.000000e+00> : vector<2x32xf32>
    %131 = vector.multi_reduction <add>, %130, %cst_56 [1] : vector<2x8x32xf32> to vector<2x32xf32>
    %132 = vector.shape_cast %131 : vector<2x32xf32> to vector<2x1x32xf32>
    %133 = math.sqrt %132 : vector<2x1x32xf32>
    %cst_57 = arith.constant 1.000000e-15 : f32
    %134 = vector.broadcast %cst_57 : f32 to vector<2x1x32xf32>
    %135 = arith.maximumf %133, %134 : vector<2x1x32xf32>
    %cst_58 = arith.constant 0.995999991 : f32
    %136 = vector.broadcast %cst_58 : f32 to vector<2x1x32xf32>
    %137 = arith.cmpf ogt, %135, %136 : vector<2x1x32xf32>
    %cst_59 = arith.constant 0.995999991 : f32
    %138 = vector.broadcast %cst_59 : f32 to vector<2x1x32xf32>
    %139 = arith.divf %138, %135 : vector<2x1x32xf32>
    %140 = vector.broadcast %139 : vector<2x1x32xf32> to vector<2x8x32xf32>
    %141 = arith.mulf %74, %140 : vector<2x8x32xf32>
    %142 = vector.shape_cast %137 : vector<2x1x32xi1> to vector<2x1x32xi1>
    %143 = vector.broadcast %142 : vector<2x1x32xi1> to vector<2x8x32xi1>
    %144 = arith.select %143, %141, %74 : vector<2x8x32xi1>, vector<2x8x32xf32>
    %145 = arith.mulf %129, %129 : vector<2x16x32xf32>
    %cst_60 = arith.constant dense<0.000000e+00> : vector<2x32xf32>
    %146 = vector.multi_reduction <add>, %145, %cst_60 [1] : vector<2x16x32xf32> to vector<2x32xf32>
    %147 = vector.shape_cast %146 : vector<2x32xf32> to vector<2x1x32xf32>
    %148 = math.sqrt %147 : vector<2x1x32xf32>
    %cst_61 = arith.constant 1.000000e-15 : f32
    %149 = vector.broadcast %cst_61 : f32 to vector<2x1x32xf32>
    %150 = arith.maximumf %148, %149 : vector<2x1x32xf32>
    %cst_62 = arith.constant 0.995999991 : f32
    %151 = vector.broadcast %cst_62 : f32 to vector<2x1x32xf32>
    %152 = arith.cmpf ogt, %150, %151 : vector<2x1x32xf32>
    %cst_63 = arith.constant 0.995999991 : f32
    %153 = vector.broadcast %cst_63 : f32 to vector<2x1x32xf32>
    %154 = arith.divf %153, %150 : vector<2x1x32xf32>
    %155 = vector.broadcast %154 : vector<2x1x32xf32> to vector<2x16x32xf32>
    %156 = arith.mulf %129, %155 : vector<2x16x32xf32>
    %157 = vector.shape_cast %152 : vector<2x1x32xi1> to vector<2x1x32xi1>
    %158 = vector.broadcast %157 : vector<2x1x32xi1> to vector<2x16x32xi1>
    %159 = arith.select %158, %156, %129 : vector<2x16x32xi1>, vector<2x16x32xf32>
    %160 = arith.mulf %129, %129 : vector<2x16x32xf32>
    %cst_64 = arith.constant dense<0.000000e+00> : vector<2x16xf32>
    %161 = vector.multi_reduction <add>, %160, %cst_64 [2] : vector<2x16x32xf32> to vector<2x16xf32>
    %162 = vector.shape_cast %161 : vector<2x16xf32> to vector<2x16x1xf32>
    %163 = math.sqrt %162 : vector<2x16x1xf32>
    %cst_65 = arith.constant 1.000000e-15 : f32
    %164 = vector.broadcast %cst_65 : f32 to vector<2x16x1xf32>
    %165 = arith.maximumf %163, %164 : vector<2x16x1xf32>
    %166 = vector.shape_cast %129 : vector<2x16x32xf32> to vector<32x32xf32>
    %cst_66 = arith.constant dense<0.000000e+00> : vector<32x32xf32>
    %167 = tpu.matmul %166, %2, %cst_66 {dimension_numbers = #tpu.dot_dimension_numbers<[1], [0], [0], [1], [0, 0, 1, 1], [], []>} : vector<32x32xf32>, vector<32x32xf32>, vector<32x32xf32> -> vector<32x32xf32>
    %168 = vector.shape_cast %167 : vector<32x32xf32> to vector<2x16x32xf32>
    %169 = arith.mulf %168, %168 : vector<2x16x32xf32>
    %cst_67 = arith.constant dense<0.000000e+00> : vector<2x16xf32>
    %170 = vector.multi_reduction <add>, %169, %cst_67 [2] : vector<2x16x32xf32> to vector<2x16xf32>
    %171 = vector.shape_cast %170 : vector<2x16xf32> to vector<2x16x1xf32>
    %172 = math.sqrt %171 : vector<2x16x1xf32>
    %cst_68 = arith.constant 1.000000e-15 : f32
    %173 = vector.broadcast %cst_68 : f32 to vector<2x16x1xf32>
    %174 = arith.maximumf %172, %173 : vector<2x16x1xf32>
    %175 = arith.divf %174, %165 : vector<2x16x1xf32>
    %cst_69 = arith.constant -0.99999988 : f32
    %cst_70 = arith.constant 0.99999988 : f32
    %176 = vector.broadcast %cst_69 : f32 to vector<2x16x1xf32>
    %177 = arith.maximumf %176, %165 : vector<2x16x1xf32>
    %178 = vector.broadcast %cst_70 : f32 to vector<2x16x1xf32>
    %179 = arith.minimumf %178, %177 : vector<2x16x1xf32>
    %cst_71 = arith.constant 1.000000e+00 : f32
    %180 = vector.broadcast %cst_71 : f32 to vector<2x16x1xf32>
    %181 = arith.addf %180, %179 : vector<2x16x1xf32>
    %182 = math.log %181 : vector<2x16x1xf32>
    %cst_72 = arith.constant 1.000000e+00 : f32
    %183 = vector.broadcast %cst_72 : f32 to vector<2x16x1xf32>
    %184 = arith.subf %183, %179 : vector<2x16x1xf32>
    %185 = math.log %184 : vector<2x16x1xf32>
    %186 = arith.subf %182, %185 : vector<2x16x1xf32>
    %cst_73 = arith.constant 5.000000e-01 : f32
    %187 = vector.broadcast %cst_73 : f32 to vector<2x16x1xf32>
    %188 = arith.mulf %187, %186 : vector<2x16x1xf32>
    %189 = arith.mulf %175, %188 : vector<2x16x1xf32>
    %190 = math.tanh %189 : vector<2x16x1xf32>
    %191 = vector.broadcast %190 : vector<2x16x1xf32> to vector<2x16x32xf32>
    %192 = arith.mulf %191, %168 : vector<2x16x32xf32>
    %193 = vector.broadcast %174 : vector<2x16x1xf32> to vector<2x16x32xf32>
    %194 = arith.divf %192, %193 : vector<2x16x32xf32>
    %195 = math.absf %168 : vector<2x16x32xf32>
    %cst_74 = arith.constant dense<0.000000e+00> : vector<2x16xf32>
    %196 = vector.multi_reduction <add>, %195, %cst_74 [2] : vector<2x16x32xf32> to vector<2x16xf32>
    %197 = vector.shape_cast %196 : vector<2x16xf32> to vector<2x16x1xf32>
    %cst_75 = arith.constant 0.000000e+00 : f32
    %198 = vector.broadcast %cst_75 : f32 to vector<2x16x1xf32>
    %199 = arith.cmpf oeq, %197, %198 : vector<2x16x1xf32>
    %cst_76 = arith.constant 0.000000e+00 : f32
    %200 = vector.broadcast %cst_76 : f32 to vector<2x16x32xf32>
    %201 = vector.shape_cast %199 : vector<2x16x1xi1> to vector<2x16x1xi1>
    %202 = vector.broadcast %201 : vector<2x16x1xi1> to vector<2x16x32xi1>
    %203 = arith.select %202, %200, %194 : vector<2x16x32xi1>, vector<2x16x32xf32>
    %204 = arith.mulf %203, %203 : vector<2x16x32xf32>
    %cst_77 = arith.constant dense<0.000000e+00> : vector<2x16xf32>
    %205 = vector.multi_reduction <add>, %204, %cst_77 [2] : vector<2x16x32xf32> to vector<2x16xf32>
    %206 = vector.shape_cast %205 : vector<2x16xf32> to vector<2x16x1xf32>
    %207 = math.sqrt %206 : vector<2x16x1xf32>
    %cst_78 = arith.constant 1.000000e-15 : f32
    %208 = vector.broadcast %cst_78 : f32 to vector<2x16x1xf32>
    %209 = arith.maximumf %207, %208 : vector<2x16x1xf32>
    %cst_79 = arith.constant 0.995999991 : f32
    %210 = vector.broadcast %cst_79 : f32 to vector<2x16x1xf32>
    %211 = arith.cmpf ogt, %209, %210 : vector<2x16x1xf32>
    %cst_80 = arith.constant 0.995999991 : f32
    %212 = vector.broadcast %cst_80 : f32 to vector<2x16x1xf32>
    %213 = arith.divf %212, %209 : vector<2x16x1xf32>
    %214 = vector.broadcast %213 : vector<2x16x1xf32> to vector<2x16x32xf32>
    %215 = arith.mulf %203, %214 : vector<2x16x32xf32>
    %216 = vector.shape_cast %211 : vector<2x16x1xi1> to vector<2x16x1xi1>
    %217 = vector.broadcast %216 : vector<2x16x1xi1> to vector<2x16x32xi1>
    %218 = arith.select %217, %215, %203 : vector<2x16x32xi1>, vector<2x16x32xf32>
    %219 = arith.mulf %218, %218 : vector<2x16x32xf32>
    %cst_81 = arith.constant dense<0.000000e+00> : vector<2x16xf32>
    %220 = vector.multi_reduction <add>, %219, %cst_81 [2] : vector<2x16x32xf32> to vector<2x16xf32>
    %221 = vector.shape_cast %220 : vector<2x16xf32> to vector<2x16x1xf32>
    %222 = math.sqrt %221 : vector<2x16x1xf32>
    %cst_82 = arith.constant 1.000000e-15 : f32
    %223 = vector.broadcast %cst_82 : f32 to vector<2x16x1xf32>
    %224 = arith.maximumf %222, %223 : vector<2x16x1xf32>
    %cst_83 = arith.constant -0.99999988 : f32
    %cst_84 = arith.constant 0.99999988 : f32
    %225 = vector.broadcast %cst_83 : f32 to vector<2x16x1xf32>
    %226 = arith.maximumf %225, %224 : vector<2x16x1xf32>
    %227 = vector.broadcast %cst_84 : f32 to vector<2x16x1xf32>
    %228 = arith.minimumf %227, %226 : vector<2x16x1xf32>
    %cst_85 = arith.constant 1.000000e+00 : f32
    %229 = vector.broadcast %cst_85 : f32 to vector<2x16x1xf32>
    %230 = arith.addf %229, %228 : vector<2x16x1xf32>
    %231 = math.log %230 : vector<2x16x1xf32>
    %cst_86 = arith.constant 1.000000e+00 : f32
    %232 = vector.broadcast %cst_86 : f32 to vector<2x16x1xf32>
    %233 = arith.subf %232, %228 : vector<2x16x1xf32>
    %234 = math.log %233 : vector<2x16x1xf32>
    %235 = arith.subf %231, %234 : vector<2x16x1xf32>
    %cst_87 = arith.constant 5.000000e-01 : f32
    %236 = vector.broadcast %cst_87 : f32 to vector<2x16x1xf32>
    %237 = arith.mulf %236, %235 : vector<2x16x1xf32>
    %238 = vector.broadcast %237 : vector<2x16x1xf32> to vector<2x16x32xf32>
    %239 = arith.mulf %238, %218 : vector<2x16x32xf32>
    %240 = vector.broadcast %224 : vector<2x16x1xf32> to vector<2x16x32xf32>
    %241 = arith.divf %239, %240 : vector<2x16x32xf32>
    %242 = arith.mulf %144, %144 : vector<2x8x32xf32>
    %cst_88 = arith.constant dense<0.000000e+00> : vector<2x32xf32>
    %243 = vector.multi_reduction <add>, %242, %cst_88 [1] : vector<2x8x32xf32> to vector<2x32xf32>
    %244 = vector.shape_cast %243 : vector<2x32xf32> to vector<2x1x32xf32>
    %245 = math.sqrt %244 : vector<2x1x32xf32>
    %cst_89 = arith.constant 1.000000e-15 : f32
    %246 = vector.broadcast %cst_89 : f32 to vector<2x1x32xf32>
    %247 = arith.maximumf %245, %246 : vector<2x1x32xf32>
    %cst_90 = arith.constant -0.99999988 : f32
    %cst_91 = arith.constant 0.99999988 : f32
    %248 = vector.broadcast %cst_90 : f32 to vector<2x1x32xf32>
    %249 = arith.maximumf %248, %247 : vector<2x1x32xf32>
    %250 = vector.broadcast %cst_91 : f32 to vector<2x1x32xf32>
    %251 = arith.minimumf %250, %249 : vector<2x1x32xf32>
    %cst_92 = arith.constant 1.000000e+00 : f32
    %252 = vector.broadcast %cst_92 : f32 to vector<2x1x32xf32>
    %253 = arith.addf %252, %251 : vector<2x1x32xf32>
    %254 = math.log %253 : vector<2x1x32xf32>
    %cst_93 = arith.constant 1.000000e+00 : f32
    %255 = vector.broadcast %cst_93 : f32 to vector<2x1x32xf32>
    %256 = arith.subf %255, %251 : vector<2x1x32xf32>
    %257 = math.log %256 : vector<2x1x32xf32>
    %258 = arith.subf %254, %257 : vector<2x1x32xf32>
    %cst_94 = arith.constant 5.000000e-01 : f32
    %259 = vector.broadcast %cst_94 : f32 to vector<2x1x32xf32>
    %260 = arith.mulf %259, %258 : vector<2x1x32xf32>
    %261 = vector.broadcast %260 : vector<2x1x32xf32> to vector<2x8x32xf32>
    %262 = arith.mulf %261, %144 : vector<2x8x32xf32>
    %263 = vector.broadcast %247 : vector<2x1x32xf32> to vector<2x8x32xf32>
    %264 = arith.divf %262, %263 : vector<2x8x32xf32>
    "tpu.trace_start"() <{level = 10 : i32, message = "bnd,bmd->bnm"}> : () -> ()
    %cst_95 = arith.constant dense<0.000000e+00> : vector<2x16x8xf32>
    %265 = tpu.matmul %241, %264, %cst_95 {dimension_numbers = #tpu.dot_dimension_numbers<[2], [2], [1], [1], [0, 0, 0, 1, 1, 1], [0], [0]>} : vector<2x16x32xf32>, vector<2x8x32xf32>, vector<2x16x8xf32> -> vector<2x16x8xf32>
    "tpu.trace_stop"() : () -> ()
    %266 = math.tanh %265 : vector<2x16x8xf32>
    %267 = arith.mulf %266, %266 : vector<2x16x8xf32>
    %cst_96 = arith.constant dense<0.000000e+00> : vector<2x16xf32>
    %268 = vector.multi_reduction <add>, %267, %cst_96 [2] : vector<2x16x8xf32> to vector<2x16xf32>
    %269 = vector.shape_cast %268 : vector<2x16xf32> to vector<2x16x1xf32>
    %270 = math.sqrt %269 : vector<2x16x1xf32>
    %cst_97 = arith.constant 1.000000e-15 : f32
    %271 = vector.broadcast %cst_97 : f32 to vector<2x16x1xf32>
    %272 = arith.maximumf %270, %271 : vector<2x16x1xf32>
    %273 = math.tanh %272 : vector<2x16x1xf32>
    %274 = vector.broadcast %273 : vector<2x16x1xf32> to vector<2x16x8xf32>
    %275 = arith.mulf %274, %266 : vector<2x16x8xf32>
    %276 = vector.broadcast %272 : vector<2x16x1xf32> to vector<2x16x8xf32>
    %277 = arith.divf %275, %276 : vector<2x16x8xf32>
    %278 = arith.mulf %277, %277 : vector<2x16x8xf32>
    %cst_98 = arith.constant dense<0.000000e+00> : vector<2x16xf32>
    %279 = vector.multi_reduction <add>, %278, %cst_98 [2] : vector<2x16x8xf32> to vector<2x16xf32>
    %280 = vector.shape_cast %279 : vector<2x16xf32> to vector<2x16x1xf32>
    %281 = math.sqrt %280 : vector<2x16x1xf32>
    %cst_99 = arith.constant 1.000000e-15 : f32
    %282 = vector.broadcast %cst_99 : f32 to vector<2x16x1xf32>
    %283 = arith.maximumf %281, %282 : vector<2x16x1xf32>
    %cst_100 = arith.constant 0.995999991 : f32
    %284 = vector.broadcast %cst_100 : f32 to vector<2x16x1xf32>
    %285 = arith.cmpf ogt, %283, %284 : vector<2x16x1xf32>
    %cst_101 = arith.constant 0.995999991 : f32
    %286 = vector.broadcast %cst_101 : f32 to vector<2x16x1xf32>
    %287 = arith.divf %286, %283 : vector<2x16x1xf32>
    %288 = vector.broadcast %287 : vector<2x16x1xf32> to vector<2x16x8xf32>
    %289 = arith.mulf %277, %288 : vector<2x16x8xf32>
    %290 = vector.shape_cast %285 : vector<2x16x1xi1> to vector<2x16x1xi1>
    %291 = vector.broadcast %290 : vector<2x16x1xi1> to vector<2x16x8xi1>
    %292 = arith.select %291, %289, %277 : vector<2x16x8xi1>, vector<2x16x8xf32>
    %293 = arith.mulf %292, %292 : vector<2x16x8xf32>
    %cst_102 = arith.constant dense<0.000000e+00> : vector<2x16xf32>
    %294 = vector.multi_reduction <add>, %293, %cst_102 [2] : vector<2x16x8xf32> to vector<2x16xf32>
    %295 = vector.shape_cast %294 : vector<2x16xf32> to vector<2x16x1xf32>
    %296 = math.sqrt %295 : vector<2x16x1xf32>
    %cst_103 = arith.constant 1.000000e-15 : f32
    %297 = vector.broadcast %cst_103 : f32 to vector<2x16x1xf32>
    %298 = arith.maximumf %296, %297 : vector<2x16x1xf32>
    %cst_104 = arith.constant -0.99999988 : f32
    %cst_105 = arith.constant 0.99999988 : f32
    %299 = vector.broadcast %cst_104 : f32 to vector<2x16x1xf32>
    %300 = arith.maximumf %299, %298 : vector<2x16x1xf32>
    %301 = vector.broadcast %cst_105 : f32 to vector<2x16x1xf32>
    %302 = arith.minimumf %301, %300 : vector<2x16x1xf32>
    %cst_106 = arith.constant 1.000000e+00 : f32
    %303 = vector.broadcast %cst_106 : f32 to vector<2x16x1xf32>
    %304 = arith.addf %303, %302 : vector<2x16x1xf32>
    %305 = math.log %304 : vector<2x16x1xf32>
    %cst_107 = arith.constant 1.000000e+00 : f32
    %306 = vector.broadcast %cst_107 : f32 to vector<2x16x1xf32>
    %307 = arith.subf %306, %302 : vector<2x16x1xf32>
    %308 = math.log %307 : vector<2x16x1xf32>
    %309 = arith.subf %305, %308 : vector<2x16x1xf32>
    %cst_108 = arith.constant 5.000000e-01 : f32
    %310 = vector.broadcast %cst_108 : f32 to vector<2x16x1xf32>
    %311 = arith.mulf %310, %309 : vector<2x16x1xf32>
    %312 = vector.broadcast %311 : vector<2x16x1xf32> to vector<2x16x8xf32>
    %313 = arith.mulf %312, %292 : vector<2x16x8xf32>
    %314 = vector.broadcast %298 : vector<2x16x1xf32> to vector<2x16x8xf32>
    %315 = arith.divf %313, %314 : vector<2x16x8xf32>
    %316 = tpu.transpose %315, [0, 2, 1] : vector<2x16x8xf32> -> vector<2x8x16xf32>
    %317 = arith.mulf %144, %144 : vector<2x8x32xf32>
    %cst_109 = arith.constant dense<0.000000e+00> : vector<2x8xf32>
    %318 = vector.multi_reduction <add>, %317, %cst_109 [2] : vector<2x8x32xf32> to vector<2x8xf32>
    %319 = vector.shape_cast %318 : vector<2x8xf32> to vector<2x8x1xf32>
    %320 = math.sqrt %319 : vector<2x8x1xf32>
    %cst_110 = arith.constant 1.000000e-15 : f32
    %321 = vector.broadcast %cst_110 : f32 to vector<2x8x1xf32>
    %322 = arith.maximumf %320, %321 : vector<2x8x1xf32>
    %323 = vector.shape_cast %144 : vector<2x8x32xf32> to vector<16x32xf32>
    %cst_111 = arith.constant dense<0.000000e+00> : vector<16x128xf32>
    %324 = tpu.matmul %323, %3, %cst_111 {dimension_numbers = #tpu.dot_dimension_numbers<[1], [0], [0], [1], [0, 0, 1, 1], [], []>} : vector<16x32xf32>, vector<32x128xf32>, vector<16x128xf32> -> vector<16x128xf32>
    %325 = vector.shape_cast %324 : vector<16x128xf32> to vector<2x8x128xf32>
    %326 = arith.mulf %325, %325 : vector<2x8x128xf32>
    %cst_112 = arith.constant dense<0.000000e+00> : vector<2x8xf32>
    %327 = vector.multi_reduction <add>, %326, %cst_112 [2] : vector<2x8x128xf32> to vector<2x8xf32>
    %328 = vector.shape_cast %327 : vector<2x8xf32> to vector<2x8x1xf32>
    %329 = math.sqrt %328 : vector<2x8x1xf32>
    %cst_113 = arith.constant 1.000000e-15 : f32
    %330 = vector.broadcast %cst_113 : f32 to vector<2x8x1xf32>
    %331 = arith.maximumf %329, %330 : vector<2x8x1xf32>
    %332 = arith.divf %331, %322 : vector<2x8x1xf32>
    %cst_114 = arith.constant -0.99999988 : f32
    %cst_115 = arith.constant 0.99999988 : f32
    %333 = vector.broadcast %cst_114 : f32 to vector<2x8x1xf32>
    %334 = arith.maximumf %333, %322 : vector<2x8x1xf32>
    %335 = vector.broadcast %cst_115 : f32 to vector<2x8x1xf32>
    %336 = arith.minimumf %335, %334 : vector<2x8x1xf32>
    %cst_116 = arith.constant 1.000000e+00 : f32
    %337 = vector.broadcast %cst_116 : f32 to vector<2x8x1xf32>
    %338 = arith.addf %337, %336 : vector<2x8x1xf32>
    %339 = math.log %338 : vector<2x8x1xf32>
    %cst_117 = arith.constant 1.000000e+00 : f32
    %340 = vector.broadcast %cst_117 : f32 to vector<2x8x1xf32>
    %341 = arith.subf %340, %336 : vector<2x8x1xf32>
    %342 = math.log %341 : vector<2x8x1xf32>
    %343 = arith.subf %339, %342 : vector<2x8x1xf32>
    %cst_118 = arith.constant 5.000000e-01 : f32
    %344 = vector.broadcast %cst_118 : f32 to vector<2x8x1xf32>
    %345 = arith.mulf %344, %343 : vector<2x8x1xf32>
    %346 = arith.mulf %332, %345 : vector<2x8x1xf32>
    %347 = math.tanh %346 : vector<2x8x1xf32>
    %348 = vector.broadcast %347 : vector<2x8x1xf32> to vector<2x8x128xf32>
    %349 = arith.mulf %348, %325 : vector<2x8x128xf32>
    %350 = vector.broadcast %331 : vector<2x8x1xf32> to vector<2x8x128xf32>
    %351 = arith.divf %349, %350 : vector<2x8x128xf32>
    %352 = math.absf %325 : vector<2x8x128xf32>
    %cst_119 = arith.constant dense<0.000000e+00> : vector<2x8xf32>
    %353 = vector.multi_reduction <add>, %352, %cst_119 [2] : vector<2x8x128xf32> to vector<2x8xf32>
    %354 = vector.shape_cast %353 : vector<2x8xf32> to vector<2x8x1xf32>
    %cst_120 = arith.constant 0.000000e+00 : f32
    %355 = vector.broadcast %cst_120 : f32 to vector<2x8x1xf32>
    %356 = arith.cmpf oeq, %354, %355 : vector<2x8x1xf32>
    %cst_121 = arith.constant 0.000000e+00 : f32
    %357 = vector.broadcast %cst_121 : f32 to vector<2x8x128xf32>
    %358 = vector.shape_cast %356 : vector<2x8x1xi1> to vector<2x8x1xi1>
    %359 = vector.broadcast %358 : vector<2x8x1xi1> to vector<2x8x128xi1>
    %360 = arith.select %359, %357, %351 : vector<2x8x128xi1>, vector<2x8x128xf32>
    %361 = arith.mulf %360, %360 : vector<2x8x128xf32>
    %cst_122 = arith.constant dense<0.000000e+00> : vector<2x128xf32>
    %362 = vector.multi_reduction <add>, %361, %cst_122 [1] : vector<2x8x128xf32> to vector<2x128xf32>
    %363 = vector.shape_cast %362 : vector<2x128xf32> to vector<2x1x128xf32>
    %364 = math.sqrt %363 : vector<2x1x128xf32>
    %cst_123 = arith.constant 1.000000e-15 : f32
    %365 = vector.broadcast %cst_123 : f32 to vector<2x1x128xf32>
    %366 = arith.maximumf %364, %365 : vector<2x1x128xf32>
    %cst_124 = arith.constant 0.995999991 : f32
    %367 = vector.broadcast %cst_124 : f32 to vector<2x1x128xf32>
    %368 = arith.cmpf ogt, %366, %367 : vector<2x1x128xf32>
    %cst_125 = arith.constant 0.995999991 : f32
    %369 = vector.broadcast %cst_125 : f32 to vector<2x1x128xf32>
    %370 = arith.divf %369, %366 : vector<2x1x128xf32>
    %371 = vector.broadcast %370 : vector<2x1x128xf32> to vector<2x8x128xf32>
    %372 = arith.mulf %360, %371 : vector<2x8x128xf32>
    %373 = vector.shape_cast %368 : vector<2x1x128xi1> to vector<2x1x128xi1>
    %374 = vector.broadcast %373 : vector<2x1x128xi1> to vector<2x8x128xi1>
    %375 = arith.select %374, %372, %360 : vector<2x8x128xi1>, vector<2x8x128xf32>
    %376 = arith.mulf %159, %159 : vector<2x16x32xf32>
    %cst_126 = arith.constant dense<0.000000e+00> : vector<2x16xf32>
    %377 = vector.multi_reduction <add>, %376, %cst_126 [2] : vector<2x16x32xf32> to vector<2x16xf32>
    %378 = vector.shape_cast %377 : vector<2x16xf32> to vector<2x16x1xf32>
    %379 = math.sqrt %378 : vector<2x16x1xf32>
    %cst_127 = arith.constant 1.000000e-15 : f32
    %380 = vector.broadcast %cst_127 : f32 to vector<2x16x1xf32>
    %381 = arith.maximumf %379, %380 : vector<2x16x1xf32>
    %382 = vector.shape_cast %159 : vector<2x16x32xf32> to vector<32x32xf32>
    %cst_128 = arith.constant dense<0.000000e+00> : vector<32x128xf32>
    %383 = tpu.matmul %382, %4, %cst_128 {dimension_numbers = #tpu.dot_dimension_numbers<[1], [0], [0], [1], [0, 0, 1, 1], [], []>} : vector<32x32xf32>, vector<32x128xf32>, vector<32x128xf32> -> vector<32x128xf32>
    %384 = vector.shape_cast %383 : vector<32x128xf32> to vector<2x16x128xf32>
    %385 = arith.mulf %384, %384 : vector<2x16x128xf32>
    %cst_129 = arith.constant dense<0.000000e+00> : vector<2x16xf32>
    %386 = vector.multi_reduction <add>, %385, %cst_129 [2] : vector<2x16x128xf32> to vector<2x16xf32>
    %387 = vector.shape_cast %386 : vector<2x16xf32> to vector<2x16x1xf32>
    %388 = math.sqrt %387 : vector<2x16x1xf32>
    %cst_130 = arith.constant 1.000000e-15 : f32
    %389 = vector.broadcast %cst_130 : f32 to vector<2x16x1xf32>
    %390 = arith.maximumf %388, %389 : vector<2x16x1xf32>
    %391 = arith.divf %390, %381 : vector<2x16x1xf32>
    %cst_131 = arith.constant -0.99999988 : f32
    %cst_132 = arith.constant 0.99999988 : f32
    %392 = vector.broadcast %cst_131 : f32 to vector<2x16x1xf32>
    %393 = arith.maximumf %392, %381 : vector<2x16x1xf32>
    %394 = vector.broadcast %cst_132 : f32 to vector<2x16x1xf32>
    %395 = arith.minimumf %394, %393 : vector<2x16x1xf32>
    %cst_133 = arith.constant 1.000000e+00 : f32
    %396 = vector.broadcast %cst_133 : f32 to vector<2x16x1xf32>
    %397 = arith.addf %396, %395 : vector<2x16x1xf32>
    %398 = math.log %397 : vector<2x16x1xf32>
    %cst_134 = arith.constant 1.000000e+00 : f32
    %399 = vector.broadcast %cst_134 : f32 to vector<2x16x1xf32>
    %400 = arith.subf %399, %395 : vector<2x16x1xf32>
    %401 = math.log %400 : vector<2x16x1xf32>
    %402 = arith.subf %398, %401 : vector<2x16x1xf32>
    %cst_135 = arith.constant 5.000000e-01 : f32
    %403 = vector.broadcast %cst_135 : f32 to vector<2x16x1xf32>
    %404 = arith.mulf %403, %402 : vector<2x16x1xf32>
    %405 = arith.mulf %391, %404 : vector<2x16x1xf32>
    %406 = math.tanh %405 : vector<2x16x1xf32>
    %407 = vector.broadcast %406 : vector<2x16x1xf32> to vector<2x16x128xf32>
    %408 = arith.mulf %407, %384 : vector<2x16x128xf32>
    %409 = vector.broadcast %390 : vector<2x16x1xf32> to vector<2x16x128xf32>
    %410 = arith.divf %408, %409 : vector<2x16x128xf32>
    %411 = math.absf %384 : vector<2x16x128xf32>
    %cst_136 = arith.constant dense<0.000000e+00> : vector<2x16xf32>
    %412 = vector.multi_reduction <add>, %411, %cst_136 [2] : vector<2x16x128xf32> to vector<2x16xf32>
    %413 = vector.shape_cast %412 : vector<2x16xf32> to vector<2x16x1xf32>
    %cst_137 = arith.constant 0.000000e+00 : f32
    %414 = vector.broadcast %cst_137 : f32 to vector<2x16x1xf32>
    %415 = arith.cmpf oeq, %413, %414 : vector<2x16x1xf32>
    %cst_138 = arith.constant 0.000000e+00 : f32
    %416 = vector.broadcast %cst_138 : f32 to vector<2x16x128xf32>
    %417 = vector.shape_cast %415 : vector<2x16x1xi1> to vector<2x16x1xi1>
    %418 = vector.broadcast %417 : vector<2x16x1xi1> to vector<2x16x128xi1>
    %419 = arith.select %418, %416, %410 : vector<2x16x128xi1>, vector<2x16x128xf32>
    %420 = arith.mulf %419, %419 : vector<2x16x128xf32>
    %cst_139 = arith.constant dense<0.000000e+00> : vector<2x128xf32>
    %421 = vector.multi_reduction <add>, %420, %cst_139 [1] : vector<2x16x128xf32> to vector<2x128xf32>
    %422 = vector.shape_cast %421 : vector<2x128xf32> to vector<2x1x128xf32>
    %423 = math.sqrt %422 : vector<2x1x128xf32>
    %cst_140 = arith.constant 1.000000e-15 : f32
    %424 = vector.broadcast %cst_140 : f32 to vector<2x1x128xf32>
    %425 = arith.maximumf %423, %424 : vector<2x1x128xf32>
    %cst_141 = arith.constant 0.995999991 : f32
    %426 = vector.broadcast %cst_141 : f32 to vector<2x1x128xf32>
    %427 = arith.cmpf ogt, %425, %426 : vector<2x1x128xf32>
    %cst_142 = arith.constant 0.995999991 : f32
    %428 = vector.broadcast %cst_142 : f32 to vector<2x1x128xf32>
    %429 = arith.divf %428, %425 : vector<2x1x128xf32>
    %430 = vector.broadcast %429 : vector<2x1x128xf32> to vector<2x16x128xf32>
    %431 = arith.mulf %419, %430 : vector<2x16x128xf32>
    %432 = vector.shape_cast %427 : vector<2x1x128xi1> to vector<2x1x128xi1>
    %433 = vector.broadcast %432 : vector<2x1x128xi1> to vector<2x16x128xi1>
    %434 = arith.select %433, %431, %419 : vector<2x16x128xi1>, vector<2x16x128xf32>
    %435 = arith.mulf %375, %375 : vector<2x8x128xf32>
    %cst_143 = arith.constant dense<0.000000e+00> : vector<2x128xf32>
    %436 = vector.multi_reduction <add>, %435, %cst_143 [1] : vector<2x8x128xf32> to vector<2x128xf32>
    %437 = vector.shape_cast %436 : vector<2x128xf32> to vector<2x1x128xf32>
    %438 = math.sqrt %437 : vector<2x1x128xf32>
    %cst_144 = arith.constant 1.000000e-15 : f32
    %439 = vector.broadcast %cst_144 : f32 to vector<2x1x128xf32>
    %440 = arith.maximumf %438, %439 : vector<2x1x128xf32>
    %cst_145 = arith.constant -0.99999988 : f32
    %cst_146 = arith.constant 0.99999988 : f32
    %441 = vector.broadcast %cst_145 : f32 to vector<2x1x128xf32>
    %442 = arith.maximumf %441, %440 : vector<2x1x128xf32>
    %443 = vector.broadcast %cst_146 : f32 to vector<2x1x128xf32>
    %444 = arith.minimumf %443, %442 : vector<2x1x128xf32>
    %cst_147 = arith.constant 1.000000e+00 : f32
    %445 = vector.broadcast %cst_147 : f32 to vector<2x1x128xf32>
    %446 = arith.addf %445, %444 : vector<2x1x128xf32>
    %447 = math.log %446 : vector<2x1x128xf32>
    %cst_148 = arith.constant 1.000000e+00 : f32
    %448 = vector.broadcast %cst_148 : f32 to vector<2x1x128xf32>
    %449 = arith.subf %448, %444 : vector<2x1x128xf32>
    %450 = math.log %449 : vector<2x1x128xf32>
    %451 = arith.subf %447, %450 : vector<2x1x128xf32>
    %cst_149 = arith.constant 5.000000e-01 : f32
    %452 = vector.broadcast %cst_149 : f32 to vector<2x1x128xf32>
    %453 = arith.mulf %452, %451 : vector<2x1x128xf32>
    %454 = vector.broadcast %453 : vector<2x1x128xf32> to vector<2x8x128xf32>
    %455 = arith.mulf %454, %375 : vector<2x8x128xf32>
    %456 = vector.broadcast %440 : vector<2x1x128xf32> to vector<2x8x128xf32>
    %457 = arith.divf %455, %456 : vector<2x8x128xf32>
    %458 = arith.mulf %434, %434 : vector<2x16x128xf32>
    %cst_150 = arith.constant dense<0.000000e+00> : vector<2x128xf32>
    %459 = vector.multi_reduction <add>, %458, %cst_150 [1] : vector<2x16x128xf32> to vector<2x128xf32>
    %460 = vector.shape_cast %459 : vector<2x128xf32> to vector<2x1x128xf32>
    %461 = math.sqrt %460 : vector<2x1x128xf32>
    %cst_151 = arith.constant 1.000000e-15 : f32
    %462 = vector.broadcast %cst_151 : f32 to vector<2x1x128xf32>
    %463 = arith.maximumf %461, %462 : vector<2x1x128xf32>
    %cst_152 = arith.constant -0.99999988 : f32
    %cst_153 = arith.constant 0.99999988 : f32
    %464 = vector.broadcast %cst_152 : f32 to vector<2x1x128xf32>
    %465 = arith.maximumf %464, %463 : vector<2x1x128xf32>
    %466 = vector.broadcast %cst_153 : f32 to vector<2x1x128xf32>
    %467 = arith.minimumf %466, %465 : vector<2x1x128xf32>
    %cst_154 = arith.constant 1.000000e+00 : f32
    %468 = vector.broadcast %cst_154 : f32 to vector<2x1x128xf32>
    %469 = arith.addf %468, %467 : vector<2x1x128xf32>
    %470 = math.log %469 : vector<2x1x128xf32>
    %cst_155 = arith.constant 1.000000e+00 : f32
    %471 = vector.broadcast %cst_155 : f32 to vector<2x1x128xf32>
    %472 = arith.subf %471, %467 : vector<2x1x128xf32>
    %473 = math.log %472 : vector<2x1x128xf32>
    %474 = arith.subf %470, %473 : vector<2x1x128xf32>
    %cst_156 = arith.constant 5.000000e-01 : f32
    %475 = vector.broadcast %cst_156 : f32 to vector<2x1x128xf32>
    %476 = arith.mulf %475, %474 : vector<2x1x128xf32>
    %477 = vector.broadcast %476 : vector<2x1x128xf32> to vector<2x16x128xf32>
    %478 = arith.mulf %477, %434 : vector<2x16x128xf32>
    %479 = vector.broadcast %463 : vector<2x1x128xf32> to vector<2x16x128xf32>
    %480 = arith.divf %478, %479 : vector<2x16x128xf32>
    "tpu.trace_start"() <{level = 10 : i32, message = "bnm,bmk->bnk"}> : () -> ()
    %cst_157 = arith.constant dense<0.000000e+00> : vector<2x8x128xf32>
    %481 = tpu.matmul %316, %480, %cst_157 {dimension_numbers = #tpu.dot_dimension_numbers<[2], [1], [1], [2], [0, 0, 0, 1, 1, 2], [0], [0]>} : vector<2x8x16xf32>, vector<2x16x128xf32>, vector<2x8x128xf32> -> vector<2x8x128xf32>
    "tpu.trace_stop"() : () -> ()
    %482 = arith.mulf %481, %481 : vector<2x8x128xf32>
    %cst_158 = arith.constant dense<0.000000e+00> : vector<2x128xf32>
    %483 = vector.multi_reduction <add>, %482, %cst_158 [1] : vector<2x8x128xf32> to vector<2x128xf32>
    %484 = vector.shape_cast %483 : vector<2x128xf32> to vector<2x1x128xf32>
    %485 = math.sqrt %484 : vector<2x1x128xf32>
    %cst_159 = arith.constant 1.000000e-15 : f32
    %486 = vector.broadcast %cst_159 : f32 to vector<2x1x128xf32>
    %487 = arith.maximumf %485, %486 : vector<2x1x128xf32>
    %488 = math.tanh %487 : vector<2x1x128xf32>
    %489 = vector.broadcast %488 : vector<2x1x128xf32> to vector<2x8x128xf32>
    %490 = arith.mulf %489, %481 : vector<2x8x128xf32>
    %491 = vector.broadcast %487 : vector<2x1x128xf32> to vector<2x8x128xf32>
    %492 = arith.divf %490, %491 : vector<2x8x128xf32>
    %493 = arith.mulf %492, %492 : vector<2x8x128xf32>
    %cst_160 = arith.constant dense<0.000000e+00> : vector<2x128xf32>
    %494 = vector.multi_reduction <add>, %493, %cst_160 [1] : vector<2x8x128xf32> to vector<2x128xf32>
    %495 = vector.shape_cast %494 : vector<2x128xf32> to vector<2x1x128xf32>
    %496 = math.sqrt %495 : vector<2x1x128xf32>
    %cst_161 = arith.constant 1.000000e-15 : f32
    %497 = vector.broadcast %cst_161 : f32 to vector<2x1x128xf32>
    %498 = arith.maximumf %496, %497 : vector<2x1x128xf32>
    %cst_162 = arith.constant 0.995999991 : f32
    %499 = vector.broadcast %cst_162 : f32 to vector<2x1x128xf32>
    %500 = arith.cmpf ogt, %498, %499 : vector<2x1x128xf32>
    %cst_163 = arith.constant 0.995999991 : f32
    %501 = vector.broadcast %cst_163 : f32 to vector<2x1x128xf32>
    %502 = arith.divf %501, %498 : vector<2x1x128xf32>
    %503 = vector.broadcast %502 : vector<2x1x128xf32> to vector<2x8x128xf32>
    %504 = arith.mulf %492, %503 : vector<2x8x128xf32>
    %505 = vector.shape_cast %500 : vector<2x1x128xi1> to vector<2x1x128xi1>
    %506 = vector.broadcast %505 : vector<2x1x128xi1> to vector<2x8x128xi1>
    %507 = arith.select %506, %504, %492 : vector<2x8x128xi1>, vector<2x8x128xf32>
    %508 = arith.mulf %375, %375 : vector<2x8x128xf32>
    %cst_164 = arith.constant dense<0.000000e+00> : vector<2x128xf32>
    %509 = vector.multi_reduction <add>, %508, %cst_164 [1] : vector<2x8x128xf32> to vector<2x128xf32>
    %510 = vector.shape_cast %509 : vector<2x128xf32> to vector<2x1x128xf32>
    %511 = arith.mulf %507, %507 : vector<2x8x128xf32>
    %cst_165 = arith.constant dense<0.000000e+00> : vector<2x128xf32>
    %512 = vector.multi_reduction <add>, %511, %cst_165 [1] : vector<2x8x128xf32> to vector<2x128xf32>
    %513 = vector.shape_cast %512 : vector<2x128xf32> to vector<2x1x128xf32>
    %514 = arith.mulf %375, %507 : vector<2x8x128xf32>
    %cst_166 = arith.constant dense<0.000000e+00> : vector<2x128xf32>
    %515 = vector.multi_reduction <add>, %514, %cst_166 [1] : vector<2x8x128xf32> to vector<2x128xf32>
    %516 = vector.shape_cast %515 : vector<2x128xf32> to vector<2x1x128xf32>
    %cst_167 = arith.constant 2.000000e+00 : f32
    %517 = vector.broadcast %cst_167 : f32 to vector<2x1x128xf32>
    %518 = arith.mulf %517, %516 : vector<2x1x128xf32>
    %cst_168 = arith.constant 1.000000e+00 : f32
    %519 = vector.broadcast %cst_168 : f32 to vector<2x1x128xf32>
    %520 = arith.addf %519, %518 : vector<2x1x128xf32>
    %521 = arith.addf %520, %513 : vector<2x1x128xf32>
    %522 = vector.broadcast %521 : vector<2x1x128xf32> to vector<2x8x128xf32>
    %523 = arith.mulf %522, %375 : vector<2x8x128xf32>
    %cst_169 = arith.constant 1.000000e+00 : f32
    %524 = vector.broadcast %cst_169 : f32 to vector<2x1x128xf32>
    %525 = arith.subf %524, %510 : vector<2x1x128xf32>
    %526 = vector.broadcast %525 : vector<2x1x128xf32> to vector<2x8x128xf32>
    %527 = arith.mulf %526, %507 : vector<2x8x128xf32>
    %528 = arith.addf %523, %527 : vector<2x8x128xf32>
    %cst_170 = arith.constant 2.000000e+00 : f32
    %529 = vector.broadcast %cst_170 : f32 to vector<2x1x128xf32>
    %530 = arith.mulf %529, %516 : vector<2x1x128xf32>
    %cst_171 = arith.constant 1.000000e+00 : f32
    %531 = vector.broadcast %cst_171 : f32 to vector<2x1x128xf32>
    %532 = arith.addf %531, %530 : vector<2x1x128xf32>
    %533 = arith.mulf %510, %513 : vector<2x1x128xf32>
    %534 = arith.addf %532, %533 : vector<2x1x128xf32>
    %cst_172 = arith.constant 1.000000e-15 : f32
    %535 = vector.broadcast %cst_172 : f32 to vector<2x1x128xf32>
    %536 = arith.maximumf %534, %535 : vector<2x1x128xf32>
    %537 = vector.broadcast %536 : vector<2x1x128xf32> to vector<2x8x128xf32>
    %538 = arith.divf %528, %537 : vector<2x8x128xf32>
    %539 = arith.mulf %538, %538 : vector<2x8x128xf32>
    %cst_173 = arith.constant dense<0.000000e+00> : vector<2x128xf32>
    %540 = vector.multi_reduction <add>, %539, %cst_173 [1] : vector<2x8x128xf32> to vector<2x128xf32>
    %541 = vector.shape_cast %540 : vector<2x128xf32> to vector<2x1x128xf32>
    %542 = math.sqrt %541 : vector<2x1x128xf32>
    %cst_174 = arith.constant 1.000000e-15 : f32
    %543 = vector.broadcast %cst_174 : f32 to vector<2x1x128xf32>
    %544 = arith.maximumf %542, %543 : vector<2x1x128xf32>
    %cst_175 = arith.constant 0.995999991 : f32
    %545 = vector.broadcast %cst_175 : f32 to vector<2x1x128xf32>
    %546 = arith.cmpf ogt, %544, %545 : vector<2x1x128xf32>
    %cst_176 = arith.constant 0.995999991 : f32
    %547 = vector.broadcast %cst_176 : f32 to vector<2x1x128xf32>
    %548 = arith.divf %547, %544 : vector<2x1x128xf32>
    %549 = vector.broadcast %548 : vector<2x1x128xf32> to vector<2x8x128xf32>
    %550 = arith.mulf %538, %549 : vector<2x8x128xf32>
    %551 = vector.shape_cast %546 : vector<2x1x128xi1> to vector<2x1x128xi1>
    %552 = vector.broadcast %551 : vector<2x1x128xi1> to vector<2x8x128xi1>
    %553 = arith.select %552, %550, %538 : vector<2x8x128xi1>, vector<2x8x128xf32>
    %554 = arith.mulf %553, %553 : vector<2x8x128xf32>
    %cst_177 = arith.constant dense<0.000000e+00> : vector<2x128xf32>
    %555 = vector.multi_reduction <add>, %554, %cst_177 [1] : vector<2x8x128xf32> to vector<2x128xf32>
    %556 = vector.shape_cast %555 : vector<2x128xf32> to vector<2x1x128xf32>
    %557 = math.sqrt %556 : vector<2x1x128xf32>
    %cst_178 = arith.constant 1.000000e-15 : f32
    %558 = vector.broadcast %cst_178 : f32 to vector<2x1x128xf32>
    %559 = arith.maximumf %557, %558 : vector<2x1x128xf32>
    %cst_179 = arith.constant -0.99999988 : f32
    %cst_180 = arith.constant 0.99999988 : f32
    %560 = vector.broadcast %cst_179 : f32 to vector<2x1x128xf32>
    %561 = arith.maximumf %560, %559 : vector<2x1x128xf32>
    %562 = vector.broadcast %cst_180 : f32 to vector<2x1x128xf32>
    %563 = arith.minimumf %562, %561 : vector<2x1x128xf32>
    %cst_181 = arith.constant 1.000000e+00 : f32
    %564 = vector.broadcast %cst_181 : f32 to vector<2x1x128xf32>
    %565 = arith.addf %564, %563 : vector<2x1x128xf32>
    %566 = math.log %565 : vector<2x1x128xf32>
    %cst_182 = arith.constant 1.000000e+00 : f32
    %567 = vector.broadcast %cst_182 : f32 to vector<2x1x128xf32>
    %568 = arith.subf %567, %563 : vector<2x1x128xf32>
    %569 = math.log %568 : vector<2x1x128xf32>
    %570 = arith.subf %566, %569 : vector<2x1x128xf32>
    %cst_183 = arith.constant 5.000000e-01 : f32
    %571 = vector.broadcast %cst_183 : f32 to vector<2x1x128xf32>
    %572 = arith.mulf %571, %570 : vector<2x1x128xf32>
    %573 = vector.broadcast %572 : vector<2x1x128xf32> to vector<2x8x128xf32>
    %574 = arith.mulf %573, %553 : vector<2x8x128xf32>
    %575 = vector.broadcast %559 : vector<2x1x128xf32> to vector<2x8x128xf32>
    %576 = arith.divf %574, %575 : vector<2x8x128xf32>
    %577 = math.tanh %576 : vector<2x8x128xf32>
    %578 = arith.mulf %577, %577 : vector<2x8x128xf32>
    %cst_184 = arith.constant dense<0.000000e+00> : vector<2x128xf32>
    %579 = vector.multi_reduction <add>, %578, %cst_184 [1] : vector<2x8x128xf32> to vector<2x128xf32>
    %580 = vector.shape_cast %579 : vector<2x128xf32> to vector<2x1x128xf32>
    %581 = math.sqrt %580 : vector<2x1x128xf32>
    %cst_185 = arith.constant 1.000000e-15 : f32
    %582 = vector.broadcast %cst_185 : f32 to vector<2x1x128xf32>
    %583 = arith.maximumf %581, %582 : vector<2x1x128xf32>
    %584 = math.tanh %583 : vector<2x1x128xf32>
    %585 = vector.broadcast %584 : vector<2x1x128xf32> to vector<2x8x128xf32>
    %586 = arith.mulf %585, %577 : vector<2x8x128xf32>
    %587 = vector.broadcast %583 : vector<2x1x128xf32> to vector<2x8x128xf32>
    %588 = arith.divf %586, %587 : vector<2x8x128xf32>
    %589 = arith.mulf %588, %588 : vector<2x8x128xf32>
    %cst_186 = arith.constant dense<0.000000e+00> : vector<2x128xf32>
    %590 = vector.multi_reduction <add>, %589, %cst_186 [1] : vector<2x8x128xf32> to vector<2x128xf32>
    %591 = vector.shape_cast %590 : vector<2x128xf32> to vector<2x1x128xf32>
    %592 = math.sqrt %591 : vector<2x1x128xf32>
    %cst_187 = arith.constant 1.000000e-15 : f32
    %593 = vector.broadcast %cst_187 : f32 to vector<2x1x128xf32>
    %594 = arith.maximumf %592, %593 : vector<2x1x128xf32>
    %cst_188 = arith.constant 0.995999991 : f32
    %595 = vector.broadcast %cst_188 : f32 to vector<2x1x128xf32>
    %596 = arith.cmpf ogt, %594, %595 : vector<2x1x128xf32>
    %cst_189 = arith.constant 0.995999991 : f32
    %597 = vector.broadcast %cst_189 : f32 to vector<2x1x128xf32>
    %598 = arith.divf %597, %594 : vector<2x1x128xf32>
    %599 = vector.broadcast %598 : vector<2x1x128xf32> to vector<2x8x128xf32>
    %600 = arith.mulf %588, %599 : vector<2x8x128xf32>
    %601 = vector.shape_cast %596 : vector<2x1x128xi1> to vector<2x1x128xi1>
    %602 = vector.broadcast %601 : vector<2x1x128xi1> to vector<2x8x128xi1>
    %603 = arith.select %602, %600, %588 : vector<2x8x128xi1>, vector<2x8x128xf32>
    "tpu.trace_start"() <{level = 10 : i32, message = "bnm,bmk->bnk"}> : () -> ()
    %cst_190 = arith.constant dense<0.000000e+00> : vector<2x16x128xf32>
    %604 = tpu.matmul %315, %457, %cst_190 {dimension_numbers = #tpu.dot_dimension_numbers<[2], [1], [1], [2], [0, 0, 0, 1, 1, 2], [0], [0]>} : vector<2x16x8xf32>, vector<2x8x128xf32>, vector<2x16x128xf32> -> vector<2x16x128xf32>
    "tpu.trace_stop"() : () -> ()
    %605 = arith.mulf %604, %604 : vector<2x16x128xf32>
    %cst_191 = arith.constant dense<0.000000e+00> : vector<2x128xf32>
    %606 = vector.multi_reduction <add>, %605, %cst_191 [1] : vector<2x16x128xf32> to vector<2x128xf32>
    %607 = vector.shape_cast %606 : vector<2x128xf32> to vector<2x1x128xf32>
    %608 = math.sqrt %607 : vector<2x1x128xf32>
    %cst_192 = arith.constant 1.000000e-15 : f32
    %609 = vector.broadcast %cst_192 : f32 to vector<2x1x128xf32>
    %610 = arith.maximumf %608, %609 : vector<2x1x128xf32>
    %611 = math.tanh %610 : vector<2x1x128xf32>
    %612 = vector.broadcast %611 : vector<2x1x128xf32> to vector<2x16x128xf32>
    %613 = arith.mulf %612, %604 : vector<2x16x128xf32>
    %614 = vector.broadcast %610 : vector<2x1x128xf32> to vector<2x16x128xf32>
    %615 = arith.divf %613, %614 : vector<2x16x128xf32>
    %616 = arith.mulf %615, %615 : vector<2x16x128xf32>
    %cst_193 = arith.constant dense<0.000000e+00> : vector<2x128xf32>
    %617 = vector.multi_reduction <add>, %616, %cst_193 [1] : vector<2x16x128xf32> to vector<2x128xf32>
    %618 = vector.shape_cast %617 : vector<2x128xf32> to vector<2x1x128xf32>
    %619 = math.sqrt %618 : vector<2x1x128xf32>
    %cst_194 = arith.constant 1.000000e-15 : f32
    %620 = vector.broadcast %cst_194 : f32 to vector<2x1x128xf32>
    %621 = arith.maximumf %619, %620 : vector<2x1x128xf32>
    %cst_195 = arith.constant 0.995999991 : f32
    %622 = vector.broadcast %cst_195 : f32 to vector<2x1x128xf32>
    %623 = arith.cmpf ogt, %621, %622 : vector<2x1x128xf32>
    %cst_196 = arith.constant 0.995999991 : f32
    %624 = vector.broadcast %cst_196 : f32 to vector<2x1x128xf32>
    %625 = arith.divf %624, %621 : vector<2x1x128xf32>
    %626 = vector.broadcast %625 : vector<2x1x128xf32> to vector<2x16x128xf32>
    %627 = arith.mulf %615, %626 : vector<2x16x128xf32>
    %628 = vector.shape_cast %623 : vector<2x1x128xi1> to vector<2x1x128xi1>
    %629 = vector.broadcast %628 : vector<2x1x128xi1> to vector<2x16x128xi1>
    %630 = arith.select %629, %627, %615 : vector<2x16x128xi1>, vector<2x16x128xf32>
    %631 = arith.mulf %434, %434 : vector<2x16x128xf32>
    %cst_197 = arith.constant dense<0.000000e+00> : vector<2x128xf32>
    %632 = vector.multi_reduction <add>, %631, %cst_197 [1] : vector<2x16x128xf32> to vector<2x128xf32>
    %633 = vector.shape_cast %632 : vector<2x128xf32> to vector<2x1x128xf32>
    %634 = arith.mulf %630, %630 : vector<2x16x128xf32>
    %cst_198 = arith.constant dense<0.000000e+00> : vector<2x128xf32>
    %635 = vector.multi_reduction <add>, %634, %cst_198 [1] : vector<2x16x128xf32> to vector<2x128xf32>
    %636 = vector.shape_cast %635 : vector<2x128xf32> to vector<2x1x128xf32>
    %637 = arith.mulf %434, %630 : vector<2x16x128xf32>
    %cst_199 = arith.constant dense<0.000000e+00> : vector<2x128xf32>
    %638 = vector.multi_reduction <add>, %637, %cst_199 [1] : vector<2x16x128xf32> to vector<2x128xf32>
    %639 = vector.shape_cast %638 : vector<2x128xf32> to vector<2x1x128xf32>
    %cst_200 = arith.constant 2.000000e+00 : f32
    %640 = vector.broadcast %cst_200 : f32 to vector<2x1x128xf32>
    %641 = arith.mulf %640, %639 : vector<2x1x128xf32>
    %cst_201 = arith.constant 1.000000e+00 : f32
    %642 = vector.broadcast %cst_201 : f32 to vector<2x1x128xf32>
    %643 = arith.addf %642, %641 : vector<2x1x128xf32>
    %644 = arith.addf %643, %636 : vector<2x1x128xf32>
    %645 = vector.broadcast %644 : vector<2x1x128xf32> to vector<2x16x128xf32>
    %646 = arith.mulf %645, %434 : vector<2x16x128xf32>
    %cst_202 = arith.constant 1.000000e+00 : f32
    %647 = vector.broadcast %cst_202 : f32 to vector<2x1x128xf32>
    %648 = arith.subf %647, %633 : vector<2x1x128xf32>
    %649 = vector.broadcast %648 : vector<2x1x128xf32> to vector<2x16x128xf32>
    %650 = arith.mulf %649, %630 : vector<2x16x128xf32>
    %651 = arith.addf %646, %650 : vector<2x16x128xf32>
    %cst_203 = arith.constant 2.000000e+00 : f32
    %652 = vector.broadcast %cst_203 : f32 to vector<2x1x128xf32>
    %653 = arith.mulf %652, %639 : vector<2x1x128xf32>
    %cst_204 = arith.constant 1.000000e+00 : f32
    %654 = vector.broadcast %cst_204 : f32 to vector<2x1x128xf32>
    %655 = arith.addf %654, %653 : vector<2x1x128xf32>
    %656 = arith.mulf %633, %636 : vector<2x1x128xf32>
    %657 = arith.addf %655, %656 : vector<2x1x128xf32>
    %cst_205 = arith.constant 1.000000e-15 : f32
    %658 = vector.broadcast %cst_205 : f32 to vector<2x1x128xf32>
    %659 = arith.maximumf %657, %658 : vector<2x1x128xf32>
    %660 = vector.broadcast %659 : vector<2x1x128xf32> to vector<2x16x128xf32>
    %661 = arith.divf %651, %660 : vector<2x16x128xf32>
    %662 = arith.mulf %661, %661 : vector<2x16x128xf32>
    %cst_206 = arith.constant dense<0.000000e+00> : vector<2x128xf32>
    %663 = vector.multi_reduction <add>, %662, %cst_206 [1] : vector<2x16x128xf32> to vector<2x128xf32>
    %664 = vector.shape_cast %663 : vector<2x128xf32> to vector<2x1x128xf32>
    %665 = math.sqrt %664 : vector<2x1x128xf32>
    %cst_207 = arith.constant 1.000000e-15 : f32
    %666 = vector.broadcast %cst_207 : f32 to vector<2x1x128xf32>
    %667 = arith.maximumf %665, %666 : vector<2x1x128xf32>
    %cst_208 = arith.constant 0.995999991 : f32
    %668 = vector.broadcast %cst_208 : f32 to vector<2x1x128xf32>
    %669 = arith.cmpf ogt, %667, %668 : vector<2x1x128xf32>
    %cst_209 = arith.constant 0.995999991 : f32
    %670 = vector.broadcast %cst_209 : f32 to vector<2x1x128xf32>
    %671 = arith.divf %670, %667 : vector<2x1x128xf32>
    %672 = vector.broadcast %671 : vector<2x1x128xf32> to vector<2x16x128xf32>
    %673 = arith.mulf %661, %672 : vector<2x16x128xf32>
    %674 = vector.shape_cast %669 : vector<2x1x128xi1> to vector<2x1x128xi1>
    %675 = vector.broadcast %674 : vector<2x1x128xi1> to vector<2x16x128xi1>
    %676 = arith.select %675, %673, %661 : vector<2x16x128xi1>, vector<2x16x128xf32>
    %677 = arith.mulf %676, %676 : vector<2x16x128xf32>
    %cst_210 = arith.constant dense<0.000000e+00> : vector<2x128xf32>
    %678 = vector.multi_reduction <add>, %677, %cst_210 [1] : vector<2x16x128xf32> to vector<2x128xf32>
    %679 = vector.shape_cast %678 : vector<2x128xf32> to vector<2x1x128xf32>
    %680 = math.sqrt %679 : vector<2x1x128xf32>
    %cst_211 = arith.constant 1.000000e-15 : f32
    %681 = vector.broadcast %cst_211 : f32 to vector<2x1x128xf32>
    %682 = arith.maximumf %680, %681 : vector<2x1x128xf32>
    %cst_212 = arith.constant -0.99999988 : f32
    %cst_213 = arith.constant 0.99999988 : f32
    %683 = vector.broadcast %cst_212 : f32 to vector<2x1x128xf32>
    %684 = arith.maximumf %683, %682 : vector<2x1x128xf32>
    %685 = vector.broadcast %cst_213 : f32 to vector<2x1x128xf32>
    %686 = arith.minimumf %685, %684 : vector<2x1x128xf32>
    %cst_214 = arith.constant 1.000000e+00 : f32
    %687 = vector.broadcast %cst_214 : f32 to vector<2x1x128xf32>
    %688 = arith.addf %687, %686 : vector<2x1x128xf32>
    %689 = math.log %688 : vector<2x1x128xf32>
    %cst_215 = arith.constant 1.000000e+00 : f32
    %690 = vector.broadcast %cst_215 : f32 to vector<2x1x128xf32>
    %691 = arith.subf %690, %686 : vector<2x1x128xf32>
    %692 = math.log %691 : vector<2x1x128xf32>
    %693 = arith.subf %689, %692 : vector<2x1x128xf32>
    %cst_216 = arith.constant 5.000000e-01 : f32
    %694 = vector.broadcast %cst_216 : f32 to vector<2x1x128xf32>
    %695 = arith.mulf %694, %693 : vector<2x1x128xf32>
    %696 = vector.broadcast %695 : vector<2x1x128xf32> to vector<2x16x128xf32>
    %697 = arith.mulf %696, %676 : vector<2x16x128xf32>
    %698 = vector.broadcast %682 : vector<2x1x128xf32> to vector<2x16x128xf32>
    %699 = arith.divf %697, %698 : vector<2x16x128xf32>
    %700 = math.tanh %699 : vector<2x16x128xf32>
    %701 = arith.mulf %700, %700 : vector<2x16x128xf32>
    %cst_217 = arith.constant dense<0.000000e+00> : vector<2x128xf32>
    %702 = vector.multi_reduction <add>, %701, %cst_217 [1] : vector<2x16x128xf32> to vector<2x128xf32>
    %703 = vector.shape_cast %702 : vector<2x128xf32> to vector<2x1x128xf32>
    %704 = math.sqrt %703 : vector<2x1x128xf32>
    %cst_218 = arith.constant 1.000000e-15 : f32
    %705 = vector.broadcast %cst_218 : f32 to vector<2x1x128xf32>
    %706 = arith.maximumf %704, %705 : vector<2x1x128xf32>
    %707 = math.tanh %706 : vector<2x1x128xf32>
    %708 = vector.broadcast %707 : vector<2x1x128xf32> to vector<2x16x128xf32>
    %709 = arith.mulf %708, %700 : vector<2x16x128xf32>
    %710 = vector.broadcast %706 : vector<2x1x128xf32> to vector<2x16x128xf32>
    %711 = arith.divf %709, %710 : vector<2x16x128xf32>
    %712 = arith.mulf %711, %711 : vector<2x16x128xf32>
    %cst_219 = arith.constant dense<0.000000e+00> : vector<2x128xf32>
    %713 = vector.multi_reduction <add>, %712, %cst_219 [1] : vector<2x16x128xf32> to vector<2x128xf32>
    %714 = vector.shape_cast %713 : vector<2x128xf32> to vector<2x1x128xf32>
    %715 = math.sqrt %714 : vector<2x1x128xf32>
    %cst_220 = arith.constant 1.000000e-15 : f32
    %716 = vector.broadcast %cst_220 : f32 to vector<2x1x128xf32>
    %717 = arith.maximumf %715, %716 : vector<2x1x128xf32>
    %cst_221 = arith.constant 0.995999991 : f32
    %718 = vector.broadcast %cst_221 : f32 to vector<2x1x128xf32>
    %719 = arith.cmpf ogt, %717, %718 : vector<2x1x128xf32>
    %cst_222 = arith.constant 0.995999991 : f32
    %720 = vector.broadcast %cst_222 : f32 to vector<2x1x128xf32>
    %721 = arith.divf %720, %717 : vector<2x1x128xf32>
    %722 = vector.broadcast %721 : vector<2x1x128xf32> to vector<2x16x128xf32>
    %723 = arith.mulf %711, %722 : vector<2x16x128xf32>
    %724 = vector.shape_cast %719 : vector<2x1x128xi1> to vector<2x1x128xi1>
    %725 = vector.broadcast %724 : vector<2x1x128xi1> to vector<2x16x128xi1>
    %726 = arith.select %725, %723, %711 : vector<2x16x128xi1>, vector<2x16x128xf32>
    %727 = arith.mulf %603, %603 : vector<2x8x128xf32>
    %cst_223 = arith.constant dense<0.000000e+00> : vector<2x8xf32>
    %728 = vector.multi_reduction <add>, %727, %cst_223 [2] : vector<2x8x128xf32> to vector<2x8xf32>
    %729 = vector.shape_cast %728 : vector<2x8xf32> to vector<2x8x1xf32>
    %730 = math.sqrt %729 : vector<2x8x1xf32>
    %cst_224 = arith.constant 1.000000e-15 : f32
    %731 = vector.broadcast %cst_224 : f32 to vector<2x8x1xf32>
    %732 = arith.maximumf %730, %731 : vector<2x8x1xf32>
    %733 = vector.shape_cast %5 : vector<1x128xf32> to vector<1x1x128xf32>
    %734 = vector.broadcast %733 : vector<1x1x128xf32> to vector<2x8x128xf32>
    %735 = arith.mulf %603, %734 : vector<2x8x128xf32>
    %cst_225 = arith.constant dense<0.000000e+00> : vector<2x8xf32>
    %736 = vector.multi_reduction <add>, %735, %cst_225 [2] : vector<2x8x128xf32> to vector<2x8xf32>
    %737 = vector.shape_cast %736 : vector<2x8xf32> to vector<2x8x1xf32>
    %738 = math.absf %737 : vector<2x8x1xf32>
    %cst_226 = arith.constant 1.000000e-15 : f32
    %739 = vector.broadcast %cst_226 : f32 to vector<2x8x1xf32>
    %740 = arith.maximumf %738, %739 : vector<2x8x1xf32>
    %741 = arith.divf %740, %732 : vector<2x8x1xf32>
    %cst_227 = arith.constant -0.99999988 : f32
    %cst_228 = arith.constant 0.99999988 : f32
    %742 = vector.broadcast %cst_227 : f32 to vector<2x8x1xf32>
    %743 = arith.maximumf %742, %732 : vector<2x8x1xf32>
    %744 = vector.broadcast %cst_228 : f32 to vector<2x8x1xf32>
    %745 = arith.minimumf %744, %743 : vector<2x8x1xf32>
    %cst_229 = arith.constant 1.000000e+00 : f32
    %746 = vector.broadcast %cst_229 : f32 to vector<2x8x1xf32>
    %747 = arith.addf %746, %745 : vector<2x8x1xf32>
    %748 = math.log %747 : vector<2x8x1xf32>
    %cst_230 = arith.constant 1.000000e+00 : f32
    %749 = vector.broadcast %cst_230 : f32 to vector<2x8x1xf32>
    %750 = arith.subf %749, %745 : vector<2x8x1xf32>
    %751 = math.log %750 : vector<2x8x1xf32>
    %752 = arith.subf %748, %751 : vector<2x8x1xf32>
    %cst_231 = arith.constant 5.000000e-01 : f32
    %753 = vector.broadcast %cst_231 : f32 to vector<2x8x1xf32>
    %754 = arith.mulf %753, %752 : vector<2x8x1xf32>
    %755 = arith.mulf %741, %754 : vector<2x8x1xf32>
    %756 = math.tanh %755 : vector<2x8x1xf32>
    %757 = arith.mulf %756, %737 : vector<2x8x1xf32>
    %758 = arith.divf %757, %740 : vector<2x8x1xf32>
    %cst_232 = arith.constant 0.000000e+00 : f32
    %759 = vector.broadcast %cst_232 : f32 to vector<2x8x1xf32>
    %760 = arith.cmpf oeq, %737, %759 : vector<2x8x1xf32>
    %cst_233 = arith.constant 0.000000e+00 : f32
    %761 = vector.broadcast %cst_233 : f32 to vector<2x8x1xf32>
    %762 = arith.select %760, %761, %758 : vector<2x8x1xi1>, vector<2x8x1xf32>
    %763 = arith.mulf %762, %762 : vector<2x8x1xf32>
    %cst_234 = arith.constant dense<0.000000e+00> : vector<2x1xf32>
    %764 = vector.multi_reduction <add>, %763, %cst_234 [1] : vector<2x8x1xf32> to vector<2x1xf32>
    %765 = vector.shape_cast %764 : vector<2x1xf32> to vector<2x1x1xf32>
    %766 = math.sqrt %765 : vector<2x1x1xf32>
    %cst_235 = arith.constant 1.000000e-15 : f32
    %767 = vector.broadcast %cst_235 : f32 to vector<2x1x1xf32>
    %768 = arith.maximumf %766, %767 : vector<2x1x1xf32>
    %cst_236 = arith.constant 0.995999991 : f32
    %769 = vector.broadcast %cst_236 : f32 to vector<2x1x1xf32>
    %770 = arith.cmpf ogt, %768, %769 : vector<2x1x1xf32>
    %cst_237 = arith.constant 0.995999991 : f32
    %771 = vector.broadcast %cst_237 : f32 to vector<2x1x1xf32>
    %772 = arith.divf %771, %768 : vector<2x1x1xf32>
    %773 = vector.broadcast %772 : vector<2x1x1xf32> to vector<2x8x1xf32>
    %774 = arith.mulf %762, %773 : vector<2x8x1xf32>
    %775 = vector.shape_cast %770 : vector<2x1x1xi1> to vector<2x1x1xi1>
    %776 = vector.broadcast %775 : vector<2x1x1xi1> to vector<2x8x1xi1>
    %777 = arith.select %776, %774, %762 : vector<2x8x1xi1>, vector<2x8x1xf32>
    %778 = arith.mulf %777, %777 : vector<2x8x1xf32>
    %cst_238 = arith.constant dense<0.000000e+00> : vector<2x1xf32>
    %779 = vector.multi_reduction <add>, %778, %cst_238 [1] : vector<2x8x1xf32> to vector<2x1xf32>
    %780 = vector.shape_cast %779 : vector<2x1xf32> to vector<2x1x1xf32>
    %781 = math.sqrt %780 : vector<2x1x1xf32>
    %cst_239 = arith.constant 1.000000e-15 : f32
    %782 = vector.broadcast %cst_239 : f32 to vector<2x1x1xf32>
    %783 = arith.maximumf %781, %782 : vector<2x1x1xf32>
    %cst_240 = arith.constant -0.99999988 : f32
    %cst_241 = arith.constant 0.99999988 : f32
    %784 = vector.broadcast %cst_240 : f32 to vector<2x1x1xf32>
    %785 = arith.maximumf %784, %783 : vector<2x1x1xf32>
    %786 = vector.broadcast %cst_241 : f32 to vector<2x1x1xf32>
    %787 = arith.minimumf %786, %785 : vector<2x1x1xf32>
    %cst_242 = arith.constant 1.000000e+00 : f32
    %788 = vector.broadcast %cst_242 : f32 to vector<2x1x1xf32>
    %789 = arith.addf %788, %787 : vector<2x1x1xf32>
    %790 = math.log %789 : vector<2x1x1xf32>
    %cst_243 = arith.constant 1.000000e+00 : f32
    %791 = vector.broadcast %cst_243 : f32 to vector<2x1x1xf32>
    %792 = arith.subf %791, %787 : vector<2x1x1xf32>
    %793 = math.log %792 : vector<2x1x1xf32>
    %794 = arith.subf %790, %793 : vector<2x1x1xf32>
    %cst_244 = arith.constant 5.000000e-01 : f32
    %795 = vector.broadcast %cst_244 : f32 to vector<2x1x1xf32>
    %796 = arith.mulf %795, %794 : vector<2x1x1xf32>
    %797 = vector.broadcast %796 : vector<2x1x1xf32> to vector<2x8x1xf32>
    %798 = arith.mulf %797, %777 : vector<2x8x1xf32>
    %799 = vector.broadcast %783 : vector<2x1x1xf32> to vector<2x8x1xf32>
    %800 = arith.divf %798, %799 : vector<2x8x1xf32>
    %cst_245 = arith.constant dense<0xFF800000> : vector<2x1xf32>
    %801 = vector.multi_reduction <maximumf>, %800, %cst_245 [1] : vector<2x8x1xf32> to vector<2x1xf32>
    %802 = vector.shape_cast %801 : vector<2x1xf32> to vector<2x1x1xf32>
    %803 = vector.broadcast %802 : vector<2x1x1xf32> to vector<2x8x1xf32>
    %804 = arith.subf %800, %803 : vector<2x8x1xf32>
    %805 = math.exp %804 : vector<2x8x1xf32>
    %cst_246 = arith.constant dense<0.000000e+00> : vector<2x1xf32>
    %806 = vector.multi_reduction <add>, %805, %cst_246 [1] : vector<2x8x1xf32> to vector<2x1xf32>
    %807 = vector.shape_cast %806 : vector<2x1xf32> to vector<2x1x1xf32>
    %808 = vector.broadcast %807 : vector<2x1x1xf32> to vector<2x8x1xf32>
    %809 = arith.divf %805, %808 : vector<2x8x1xf32>
    %810 = arith.mulf %809, %809 : vector<2x8x1xf32>
    %cst_247 = arith.constant dense<0.000000e+00> : vector<2x1xf32>
    %811 = vector.multi_reduction <add>, %810, %cst_247 [1] : vector<2x8x1xf32> to vector<2x1xf32>
    %812 = vector.shape_cast %811 : vector<2x1xf32> to vector<2x1x1xf32>
    %813 = math.sqrt %812 : vector<2x1x1xf32>
    %cst_248 = arith.constant 1.000000e-15 : f32
    %814 = vector.broadcast %cst_248 : f32 to vector<2x1x1xf32>
    %815 = arith.maximumf %813, %814 : vector<2x1x1xf32>
    %816 = math.tanh %815 : vector<2x1x1xf32>
    %817 = vector.broadcast %816 : vector<2x1x1xf32> to vector<2x8x1xf32>
    %818 = arith.mulf %817, %809 : vector<2x8x1xf32>
    %819 = vector.broadcast %815 : vector<2x1x1xf32> to vector<2x8x1xf32>
    %820 = arith.divf %818, %819 : vector<2x8x1xf32>
    %821 = arith.mulf %820, %820 : vector<2x8x1xf32>
    %cst_249 = arith.constant dense<0.000000e+00> : vector<2x1xf32>
    %822 = vector.multi_reduction <add>, %821, %cst_249 [1] : vector<2x8x1xf32> to vector<2x1xf32>
    %823 = vector.shape_cast %822 : vector<2x1xf32> to vector<2x1x1xf32>
    %824 = math.sqrt %823 : vector<2x1x1xf32>
    %cst_250 = arith.constant 1.000000e-15 : f32
    %825 = vector.broadcast %cst_250 : f32 to vector<2x1x1xf32>
    %826 = arith.maximumf %824, %825 : vector<2x1x1xf32>
    %cst_251 = arith.constant 0.995999991 : f32
    %827 = vector.broadcast %cst_251 : f32 to vector<2x1x1xf32>
    %828 = arith.cmpf ogt, %826, %827 : vector<2x1x1xf32>
    %cst_252 = arith.constant 0.995999991 : f32
    %829 = vector.broadcast %cst_252 : f32 to vector<2x1x1xf32>
    %830 = arith.divf %829, %826 : vector<2x1x1xf32>
    %831 = vector.broadcast %830 : vector<2x1x1xf32> to vector<2x8x1xf32>
    %832 = arith.mulf %820, %831 : vector<2x8x1xf32>
    %833 = vector.shape_cast %828 : vector<2x1x1xi1> to vector<2x1x1xi1>
    %834 = vector.broadcast %833 : vector<2x1x1xi1> to vector<2x8x1xi1>
    %835 = arith.select %834, %832, %820 : vector<2x8x1xi1>, vector<2x8x1xf32>
    %836 = arith.mulf %726, %726 : vector<2x16x128xf32>
    %cst_253 = arith.constant dense<0.000000e+00> : vector<2x16xf32>
    %837 = vector.multi_reduction <add>, %836, %cst_253 [2] : vector<2x16x128xf32> to vector<2x16xf32>
    %838 = vector.shape_cast %837 : vector<2x16xf32> to vector<2x16x1xf32>
    %839 = math.sqrt %838 : vector<2x16x1xf32>
    %cst_254 = arith.constant 1.000000e-15 : f32
    %840 = vector.broadcast %cst_254 : f32 to vector<2x16x1xf32>
    %841 = arith.maximumf %839, %840 : vector<2x16x1xf32>
    %842 = vector.shape_cast %6 : vector<1x128xf32> to vector<1x1x128xf32>
    %843 = vector.broadcast %842 : vector<1x1x128xf32> to vector<2x16x128xf32>
    %844 = arith.mulf %726, %843 : vector<2x16x128xf32>
    %cst_255 = arith.constant dense<0.000000e+00> : vector<2x16xf32>
    %845 = vector.multi_reduction <add>, %844, %cst_255 [2] : vector<2x16x128xf32> to vector<2x16xf32>
    %846 = vector.shape_cast %845 : vector<2x16xf32> to vector<2x16x1xf32>
    %847 = math.absf %846 : vector<2x16x1xf32>
    %cst_256 = arith.constant 1.000000e-15 : f32
    %848 = vector.broadcast %cst_256 : f32 to vector<2x16x1xf32>
    %849 = arith.maximumf %847, %848 : vector<2x16x1xf32>
    %850 = arith.divf %849, %841 : vector<2x16x1xf32>
    %cst_257 = arith.constant -0.99999988 : f32
    %cst_258 = arith.constant 0.99999988 : f32
    %851 = vector.broadcast %cst_257 : f32 to vector<2x16x1xf32>
    %852 = arith.maximumf %851, %841 : vector<2x16x1xf32>
    %853 = vector.broadcast %cst_258 : f32 to vector<2x16x1xf32>
    %854 = arith.minimumf %853, %852 : vector<2x16x1xf32>
    %cst_259 = arith.constant 1.000000e+00 : f32
    %855 = vector.broadcast %cst_259 : f32 to vector<2x16x1xf32>
    %856 = arith.addf %855, %854 : vector<2x16x1xf32>
    %857 = math.log %856 : vector<2x16x1xf32>
    %cst_260 = arith.constant 1.000000e+00 : f32
    %858 = vector.broadcast %cst_260 : f32 to vector<2x16x1xf32>
    %859 = arith.subf %858, %854 : vector<2x16x1xf32>
    %860 = math.log %859 : vector<2x16x1xf32>
    %861 = arith.subf %857, %860 : vector<2x16x1xf32>
    %cst_261 = arith.constant 5.000000e-01 : f32
    %862 = vector.broadcast %cst_261 : f32 to vector<2x16x1xf32>
    %863 = arith.mulf %862, %861 : vector<2x16x1xf32>
    %864 = arith.mulf %850, %863 : vector<2x16x1xf32>
    %865 = math.tanh %864 : vector<2x16x1xf32>
    %866 = arith.mulf %865, %846 : vector<2x16x1xf32>
    %867 = arith.divf %866, %849 : vector<2x16x1xf32>
    %cst_262 = arith.constant 0.000000e+00 : f32
    %868 = vector.broadcast %cst_262 : f32 to vector<2x16x1xf32>
    %869 = arith.cmpf oeq, %846, %868 : vector<2x16x1xf32>
    %cst_263 = arith.constant 0.000000e+00 : f32
    %870 = vector.broadcast %cst_263 : f32 to vector<2x16x1xf32>
    %871 = arith.select %869, %870, %867 : vector<2x16x1xi1>, vector<2x16x1xf32>
    %872 = arith.mulf %871, %871 : vector<2x16x1xf32>
    %cst_264 = arith.constant dense<0.000000e+00> : vector<2x1xf32>
    %873 = vector.multi_reduction <add>, %872, %cst_264 [1] : vector<2x16x1xf32> to vector<2x1xf32>
    %874 = vector.shape_cast %873 : vector<2x1xf32> to vector<2x1x1xf32>
    %875 = math.sqrt %874 : vector<2x1x1xf32>
    %cst_265 = arith.constant 1.000000e-15 : f32
    %876 = vector.broadcast %cst_265 : f32 to vector<2x1x1xf32>
    %877 = arith.maximumf %875, %876 : vector<2x1x1xf32>
    %cst_266 = arith.constant 0.995999991 : f32
    %878 = vector.broadcast %cst_266 : f32 to vector<2x1x1xf32>
    %879 = arith.cmpf ogt, %877, %878 : vector<2x1x1xf32>
    %cst_267 = arith.constant 0.995999991 : f32
    %880 = vector.broadcast %cst_267 : f32 to vector<2x1x1xf32>
    %881 = arith.divf %880, %877 : vector<2x1x1xf32>
    %882 = vector.broadcast %881 : vector<2x1x1xf32> to vector<2x16x1xf32>
    %883 = arith.mulf %871, %882 : vector<2x16x1xf32>
    %884 = vector.shape_cast %879 : vector<2x1x1xi1> to vector<2x1x1xi1>
    %885 = vector.broadcast %884 : vector<2x1x1xi1> to vector<2x16x1xi1>
    %886 = arith.select %885, %883, %871 : vector<2x16x1xi1>, vector<2x16x1xf32>
    %887 = arith.mulf %886, %886 : vector<2x16x1xf32>
    %cst_268 = arith.constant dense<0.000000e+00> : vector<2x1xf32>
    %888 = vector.multi_reduction <add>, %887, %cst_268 [1] : vector<2x16x1xf32> to vector<2x1xf32>
    %889 = vector.shape_cast %888 : vector<2x1xf32> to vector<2x1x1xf32>
    %890 = math.sqrt %889 : vector<2x1x1xf32>
    %cst_269 = arith.constant 1.000000e-15 : f32
    %891 = vector.broadcast %cst_269 : f32 to vector<2x1x1xf32>
    %892 = arith.maximumf %890, %891 : vector<2x1x1xf32>
    %cst_270 = arith.constant -0.99999988 : f32
    %cst_271 = arith.constant 0.99999988 : f32
    %893 = vector.broadcast %cst_270 : f32 to vector<2x1x1xf32>
    %894 = arith.maximumf %893, %892 : vector<2x1x1xf32>
    %895 = vector.broadcast %cst_271 : f32 to vector<2x1x1xf32>
    %896 = arith.minimumf %895, %894 : vector<2x1x1xf32>
    %cst_272 = arith.constant 1.000000e+00 : f32
    %897 = vector.broadcast %cst_272 : f32 to vector<2x1x1xf32>
    %898 = arith.addf %897, %896 : vector<2x1x1xf32>
    %899 = math.log %898 : vector<2x1x1xf32>
    %cst_273 = arith.constant 1.000000e+00 : f32
    %900 = vector.broadcast %cst_273 : f32 to vector<2x1x1xf32>
    %901 = arith.subf %900, %896 : vector<2x1x1xf32>
    %902 = math.log %901 : vector<2x1x1xf32>
    %903 = arith.subf %899, %902 : vector<2x1x1xf32>
    %cst_274 = arith.constant 5.000000e-01 : f32
    %904 = vector.broadcast %cst_274 : f32 to vector<2x1x1xf32>
    %905 = arith.mulf %904, %903 : vector<2x1x1xf32>
    %906 = vector.broadcast %905 : vector<2x1x1xf32> to vector<2x16x1xf32>
    %907 = arith.mulf %906, %886 : vector<2x16x1xf32>
    %908 = vector.broadcast %892 : vector<2x1x1xf32> to vector<2x16x1xf32>
    %909 = arith.divf %907, %908 : vector<2x16x1xf32>
    %cst_275 = arith.constant dense<0xFF800000> : vector<2x1xf32>
    %910 = vector.multi_reduction <maximumf>, %909, %cst_275 [1] : vector<2x16x1xf32> to vector<2x1xf32>
    %911 = vector.shape_cast %910 : vector<2x1xf32> to vector<2x1x1xf32>
    %912 = vector.broadcast %911 : vector<2x1x1xf32> to vector<2x16x1xf32>
    %913 = arith.subf %909, %912 : vector<2x16x1xf32>
    %914 = math.exp %913 : vector<2x16x1xf32>
    %cst_276 = arith.constant dense<0.000000e+00> : vector<2x1xf32>
    %915 = vector.multi_reduction <add>, %914, %cst_276 [1] : vector<2x16x1xf32> to vector<2x1xf32>
    %916 = vector.shape_cast %915 : vector<2x1xf32> to vector<2x1x1xf32>
    %917 = vector.broadcast %916 : vector<2x1x1xf32> to vector<2x16x1xf32>
    %918 = arith.divf %914, %917 : vector<2x16x1xf32>
    %919 = arith.mulf %918, %918 : vector<2x16x1xf32>
    %cst_277 = arith.constant dense<0.000000e+00> : vector<2x1xf32>
    %920 = vector.multi_reduction <add>, %919, %cst_277 [1] : vector<2x16x1xf32> to vector<2x1xf32>
    %921 = vector.shape_cast %920 : vector<2x1xf32> to vector<2x1x1xf32>
    %922 = math.sqrt %921 : vector<2x1x1xf32>
    %cst_278 = arith.constant 1.000000e-15 : f32
    %923 = vector.broadcast %cst_278 : f32 to vector<2x1x1xf32>
    %924 = arith.maximumf %922, %923 : vector<2x1x1xf32>
    %925 = math.tanh %924 : vector<2x1x1xf32>
    %926 = vector.broadcast %925 : vector<2x1x1xf32> to vector<2x16x1xf32>
    %927 = arith.mulf %926, %918 : vector<2x16x1xf32>
    %928 = vector.broadcast %924 : vector<2x1x1xf32> to vector<2x16x1xf32>
    %929 = arith.divf %927, %928 : vector<2x16x1xf32>
    %930 = arith.mulf %929, %929 : vector<2x16x1xf32>
    %cst_279 = arith.constant dense<0.000000e+00> : vector<2x1xf32>
    %931 = vector.multi_reduction <add>, %930, %cst_279 [1] : vector<2x16x1xf32> to vector<2x1xf32>
    %932 = vector.shape_cast %931 : vector<2x1xf32> to vector<2x1x1xf32>
    %933 = math.sqrt %932 : vector<2x1x1xf32>
    %cst_280 = arith.constant 1.000000e-15 : f32
    %934 = vector.broadcast %cst_280 : f32 to vector<2x1x1xf32>
    %935 = arith.maximumf %933, %934 : vector<2x1x1xf32>
    %cst_281 = arith.constant 0.995999991 : f32
    %936 = vector.broadcast %cst_281 : f32 to vector<2x1x1xf32>
    %937 = arith.cmpf ogt, %935, %936 : vector<2x1x1xf32>
    %cst_282 = arith.constant 0.995999991 : f32
    %938 = vector.broadcast %cst_282 : f32 to vector<2x1x1xf32>
    %939 = arith.divf %938, %935 : vector<2x1x1xf32>
    %940 = vector.broadcast %939 : vector<2x1x1xf32> to vector<2x16x1xf32>
    %941 = arith.mulf %929, %940 : vector<2x16x1xf32>
    %942 = vector.shape_cast %937 : vector<2x1x1xi1> to vector<2x1x1xi1>
    %943 = vector.broadcast %942 : vector<2x1x1xi1> to vector<2x16x1xi1>
    %944 = arith.select %943, %941, %929 : vector<2x16x1xi1>, vector<2x16x1xf32>
    %945 = arith.mulf %74, %74 : vector<2x8x32xf32>
    %cst_283 = arith.constant dense<0.000000e+00> : vector<2x8xf32>
    %946 = vector.multi_reduction <add>, %945, %cst_283 [2] : vector<2x8x32xf32> to vector<2x8xf32>
    %947 = vector.shape_cast %946 : vector<2x8xf32> to vector<2x8x1xf32>
    %948 = math.sqrt %947 : vector<2x8x1xf32>
    %cst_284 = arith.constant 1.000000e-15 : f32
    %949 = vector.broadcast %cst_284 : f32 to vector<2x8x1xf32>
    %950 = arith.maximumf %948, %949 : vector<2x8x1xf32>
    %cst_285 = arith.constant -0.99999988 : f32
    %cst_286 = arith.constant 0.99999988 : f32
    %951 = vector.broadcast %cst_285 : f32 to vector<2x8x1xf32>
    %952 = arith.maximumf %951, %950 : vector<2x8x1xf32>
    %953 = vector.broadcast %cst_286 : f32 to vector<2x8x1xf32>
    %954 = arith.minimumf %953, %952 : vector<2x8x1xf32>
    %cst_287 = arith.constant 1.000000e+00 : f32
    %955 = vector.broadcast %cst_287 : f32 to vector<2x8x1xf32>
    %956 = arith.addf %955, %954 : vector<2x8x1xf32>
    %957 = math.log %956 : vector<2x8x1xf32>
    %cst_288 = arith.constant 1.000000e+00 : f32
    %958 = vector.broadcast %cst_288 : f32 to vector<2x8x1xf32>
    %959 = arith.subf %958, %954 : vector<2x8x1xf32>
    %960 = math.log %959 : vector<2x8x1xf32>
    %961 = arith.subf %957, %960 : vector<2x8x1xf32>
    %cst_289 = arith.constant 5.000000e-01 : f32
    %962 = vector.broadcast %cst_289 : f32 to vector<2x8x1xf32>
    %963 = arith.mulf %962, %961 : vector<2x8x1xf32>
    %964 = vector.broadcast %963 : vector<2x8x1xf32> to vector<2x8x32xf32>
    %965 = arith.mulf %964, %74 : vector<2x8x32xf32>
    %966 = vector.broadcast %950 : vector<2x8x1xf32> to vector<2x8x32xf32>
    %967 = arith.divf %965, %966 : vector<2x8x32xf32>
    %968 = arith.mulf %129, %129 : vector<2x16x32xf32>
    %cst_290 = arith.constant dense<0.000000e+00> : vector<2x16xf32>
    %969 = vector.multi_reduction <add>, %968, %cst_290 [2] : vector<2x16x32xf32> to vector<2x16xf32>
    %970 = vector.shape_cast %969 : vector<2x16xf32> to vector<2x16x1xf32>
    %971 = math.sqrt %970 : vector<2x16x1xf32>
    %cst_291 = arith.constant 1.000000e-15 : f32
    %972 = vector.broadcast %cst_291 : f32 to vector<2x16x1xf32>
    %973 = arith.maximumf %971, %972 : vector<2x16x1xf32>
    %cst_292 = arith.constant -0.99999988 : f32
    %cst_293 = arith.constant 0.99999988 : f32
    %974 = vector.broadcast %cst_292 : f32 to vector<2x16x1xf32>
    %975 = arith.maximumf %974, %973 : vector<2x16x1xf32>
    %976 = vector.broadcast %cst_293 : f32 to vector<2x16x1xf32>
    %977 = arith.minimumf %976, %975 : vector<2x16x1xf32>
    %cst_294 = arith.constant 1.000000e+00 : f32
    %978 = vector.broadcast %cst_294 : f32 to vector<2x16x1xf32>
    %979 = arith.addf %978, %977 : vector<2x16x1xf32>
    %980 = math.log %979 : vector<2x16x1xf32>
    %cst_295 = arith.constant 1.000000e+00 : f32
    %981 = vector.broadcast %cst_295 : f32 to vector<2x16x1xf32>
    %982 = arith.subf %981, %977 : vector<2x16x1xf32>
    %983 = math.log %982 : vector<2x16x1xf32>
    %984 = arith.subf %980, %983 : vector<2x16x1xf32>
    %cst_296 = arith.constant 5.000000e-01 : f32
    %985 = vector.broadcast %cst_296 : f32 to vector<2x16x1xf32>
    %986 = arith.mulf %985, %984 : vector<2x16x1xf32>
    %987 = vector.broadcast %986 : vector<2x16x1xf32> to vector<2x16x32xf32>
    %988 = arith.mulf %987, %129 : vector<2x16x32xf32>
    %989 = vector.broadcast %973 : vector<2x16x1xf32> to vector<2x16x32xf32>
    %990 = arith.divf %988, %989 : vector<2x16x32xf32>
    %991 = arith.mulf %835, %835 : vector<2x8x1xf32>
    %cst_297 = arith.constant dense<0.000000e+00> : vector<2x1xf32>
    %992 = vector.multi_reduction <add>, %991, %cst_297 [1] : vector<2x8x1xf32> to vector<2x1xf32>
    %993 = vector.shape_cast %992 : vector<2x1xf32> to vector<2x1x1xf32>
    %994 = math.sqrt %993 : vector<2x1x1xf32>
    %cst_298 = arith.constant 1.000000e-15 : f32
    %995 = vector.broadcast %cst_298 : f32 to vector<2x1x1xf32>
    %996 = arith.maximumf %994, %995 : vector<2x1x1xf32>
    %cst_299 = arith.constant -0.99999988 : f32
    %cst_300 = arith.constant 0.99999988 : f32
    %997 = vector.broadcast %cst_299 : f32 to vector<2x1x1xf32>
    %998 = arith.maximumf %997, %996 : vector<2x1x1xf32>
    %999 = vector.broadcast %cst_300 : f32 to vector<2x1x1xf32>
    %1000 = arith.minimumf %999, %998 : vector<2x1x1xf32>
    %cst_301 = arith.constant 1.000000e+00 : f32
    %1001 = vector.broadcast %cst_301 : f32 to vector<2x1x1xf32>
    %1002 = arith.addf %1001, %1000 : vector<2x1x1xf32>
    %1003 = math.log %1002 : vector<2x1x1xf32>
    %cst_302 = arith.constant 1.000000e+00 : f32
    %1004 = vector.broadcast %cst_302 : f32 to vector<2x1x1xf32>
    %1005 = arith.subf %1004, %1000 : vector<2x1x1xf32>
    %1006 = math.log %1005 : vector<2x1x1xf32>
    %1007 = arith.subf %1003, %1006 : vector<2x1x1xf32>
    %cst_303 = arith.constant 5.000000e-01 : f32
    %1008 = vector.broadcast %cst_303 : f32 to vector<2x1x1xf32>
    %1009 = arith.mulf %1008, %1007 : vector<2x1x1xf32>
    %1010 = vector.broadcast %1009 : vector<2x1x1xf32> to vector<2x8x1xf32>
    %1011 = arith.mulf %1010, %835 : vector<2x8x1xf32>
    %1012 = vector.broadcast %996 : vector<2x1x1xf32> to vector<2x8x1xf32>
    %1013 = arith.divf %1011, %1012 : vector<2x8x1xf32>
    %1014 = vector.broadcast %1013 : vector<2x8x1xf32> to vector<2x8x32xf32>
    %1015 = arith.mulf %1014, %967 : vector<2x8x32xf32>
    %cst_304 = arith.constant dense<0.000000e+00> : vector<2x32xf32>
    %1016 = vector.multi_reduction <add>, %1015, %cst_304 [1] : vector<2x8x32xf32> to vector<2x32xf32>
    %1017 = vector.shape_cast %1016 : vector<2x32xf32> to vector<2x1x32xf32>
    %1018 = arith.mulf %944, %944 : vector<2x16x1xf32>
    %cst_305 = arith.constant dense<0.000000e+00> : vector<2x1xf32>
    %1019 = vector.multi_reduction <add>, %1018, %cst_305 [1] : vector<2x16x1xf32> to vector<2x1xf32>
    %1020 = vector.shape_cast %1019 : vector<2x1xf32> to vector<2x1x1xf32>
    %1021 = math.sqrt %1020 : vector<2x1x1xf32>
    %cst_306 = arith.constant 1.000000e-15 : f32
    %1022 = vector.broadcast %cst_306 : f32 to vector<2x1x1xf32>
    %1023 = arith.maximumf %1021, %1022 : vector<2x1x1xf32>
    %cst_307 = arith.constant -0.99999988 : f32
    %cst_308 = arith.constant 0.99999988 : f32
    %1024 = vector.broadcast %cst_307 : f32 to vector<2x1x1xf32>
    %1025 = arith.maximumf %1024, %1023 : vector<2x1x1xf32>
    %1026 = vector.broadcast %cst_308 : f32 to vector<2x1x1xf32>
    %1027 = arith.minimumf %1026, %1025 : vector<2x1x1xf32>
    %cst_309 = arith.constant 1.000000e+00 : f32
    %1028 = vector.broadcast %cst_309 : f32 to vector<2x1x1xf32>
    %1029 = arith.addf %1028, %1027 : vector<2x1x1xf32>
    %1030 = math.log %1029 : vector<2x1x1xf32>
    %cst_310 = arith.constant 1.000000e+00 : f32
    %1031 = vector.broadcast %cst_310 : f32 to vector<2x1x1xf32>
    %1032 = arith.subf %1031, %1027 : vector<2x1x1xf32>
    %1033 = math.log %1032 : vector<2x1x1xf32>
    %1034 = arith.subf %1030, %1033 : vector<2x1x1xf32>
    %cst_311 = arith.constant 5.000000e-01 : f32
    %1035 = vector.broadcast %cst_311 : f32 to vector<2x1x1xf32>
    %1036 = arith.mulf %1035, %1034 : vector<2x1x1xf32>
    %1037 = vector.broadcast %1036 : vector<2x1x1xf32> to vector<2x16x1xf32>
    %1038 = arith.mulf %1037, %944 : vector<2x16x1xf32>
    %1039 = vector.broadcast %1023 : vector<2x1x1xf32> to vector<2x16x1xf32>
    %1040 = arith.divf %1038, %1039 : vector<2x16x1xf32>
    %1041 = vector.broadcast %1040 : vector<2x16x1xf32> to vector<2x16x32xf32>
    %1042 = arith.mulf %1041, %990 : vector<2x16x32xf32>
    %cst_312 = arith.constant dense<0.000000e+00> : vector<2x32xf32>
    %1043 = vector.multi_reduction <add>, %1042, %cst_312 [1] : vector<2x16x32xf32> to vector<2x32xf32>
    %1044 = vector.shape_cast %1043 : vector<2x32xf32> to vector<2x1x32xf32>
    %1045 = tpu.iota {dimensions = array<i32: 0>} : vector<8x8xi32>
    %1046 = tpu.iota {dimensions = array<i32: 1>} : vector<8x8xi32>
    %1047 = arith.cmpi eq, %1045, %1046 : vector<8x8xi32>
    %1048 = arith.extui %1047 : vector<8x8xi1> to vector<8x8xi32>
    %1049 = arith.sitofp %1048 : vector<8x8xi32> to vector<8x8xf32>
    %1050 = vector.shape_cast %1049 : vector<8x8xf32> to vector<1x8x8xf32>
    %1051 = vector.broadcast %835 : vector<2x8x1xf32> to vector<2x8x8xf32>
    %1052 = vector.broadcast %1050 : vector<1x8x8xf32> to vector<2x8x8xf32>
    %1053 = arith.mulf %1051, %1052 : vector<2x8x8xf32>
    %cst_313 = arith.constant dense<0.000000e+00> : vector<2x8xf32>
    %1054 = vector.multi_reduction <add>, %1053, %cst_313 [1] : vector<2x8x8xf32> to vector<2x8xf32>
    %1055 = vector.shape_cast %1054 : vector<2x8xf32> to vector<2x1x8xf32>
    %1056 = tpu.iota {dimensions = array<i32: 0>} : vector<16x16xi32>
    %1057 = tpu.iota {dimensions = array<i32: 1>} : vector<16x16xi32>
    %1058 = arith.cmpi eq, %1056, %1057 : vector<16x16xi32>
    %1059 = arith.extui %1058 : vector<16x16xi1> to vector<16x16xi32>
    %1060 = arith.sitofp %1059 : vector<16x16xi32> to vector<16x16xf32>
    %1061 = vector.shape_cast %1060 : vector<16x16xf32> to vector<1x16x16xf32>
    %1062 = vector.broadcast %944 : vector<2x16x1xf32> to vector<2x16x16xf32>
    %1063 = vector.broadcast %1061 : vector<1x16x16xf32> to vector<2x16x16xf32>
    %1064 = arith.mulf %1062, %1063 : vector<2x16x16xf32>
    %cst_314 = arith.constant dense<0.000000e+00> : vector<2x16xf32>
    %1065 = vector.multi_reduction <add>, %1064, %cst_314 [1] : vector<2x16x16xf32> to vector<2x16xf32>
    %1066 = vector.shape_cast %1065 : vector<2x16xf32> to vector<2x1x16xf32>
    %cst_315 = arith.constant 0.000000e+00 : f32
    %1067 = vector.broadcast %cst_315 : f32 to vector<2x1x40xf32>
    %1068 = tpu.concatenate %1017, %1044, %1055, %1066, %1067 in 2 : vector<2x1x32xf32>, vector<2x1x32xf32>, vector<2x1x8xf32>, vector<2x1x16xf32>, vector<2x1x40xf32> -> vector<2x1x128xf32>
    %c0_316 = arith.constant 0 : index
    %c0_317 = arith.constant 0 : index
    %c0_318 = arith.constant 0 : index
    %1069 = vector.load %arg13[%c0_316, %c0_317, %c0_318] : memref<2x1x128xf32, #tpu.memory_space<vmem>>, vector<2x1x128xf32>
    tpu.vector_store %arg13[%c0_316, %c0_317, %c0_318], %1068 {strides = array<i32>} : memref<2x1x128xf32, #tpu.memory_space<vmem>>, vector<2x1x128xf32>,
    return
  }
  func.func @transform_0(%arg0: i32) -> (i32, i32, i32) {
    %c0_i32 = arith.constant 0 : i32
    %c0_i32_0 = arith.constant 0 : i32
    %c0_i32_1 = arith.constant 0 : i32
    return %arg0, %c0_i32, %c0_i32_0 : i32, i32, i32
  }
  func.func @transform_1(%arg0: i32) -> (i32, i32, i32) {
    %c0_i32 = arith.constant 0 : i32
    %c0_i32_0 = arith.constant 0 : i32
    %c0_i32_1 = arith.constant 0 : i32
    return %arg0, %c0_i32, %c0_i32_0 : i32, i32, i32
  }
  func.func @transform_2(%arg0: i32) -> (i32, i32) {
    %c0_i32 = arith.constant 0 : i32
    %c0_i32_0 = arith.constant 0 : i32
    %c0_i32_1 = arith.constant 0 : i32
    return %c0_i32, %c0_i32_0 : i32, i32
  }
  func.func @transform_3(%arg0: i32) -> (i32, i32) {
    %c0_i32 = arith.constant 0 : i32
    %c0_i32_0 = arith.constant 0 : i32
    %c0_i32_1 = arith.constant 0 : i32
    return %c0_i32, %c0_i32_0 : i32, i32
  }
  func.func @transform_4(%arg0: i32) -> (i32, i32) {
    %c0_i32 = arith.constant 0 : i32
    %c0_i32_0 = arith.constant 0 : i32
    %c0_i32_1 = arith.constant 0 : i32
    return %c0_i32, %c0_i32_0 : i32, i32
  }
  func.func @transform_5(%arg0: i32) -> (i32, i32) {
    %c0_i32 = arith.constant 0 : i32
    %c0_i32_0 = arith.constant 0 : i32
    %c0_i32_1 = arith.constant 0 : i32
    return %c0_i32, %c0_i32_0 : i32, i32
  }
  func.func @transform_6(%arg0: i32) -> (i32, i32) {
    %c0_i32 = arith.constant 0 : i32
    %c0_i32_0 = arith.constant 0 : i32
    %c0_i32_1 = arith.constant 0 : i32
    return %c0_i32, %c0_i32_0 : i32, i32
  }
  func.func @transform_7(%arg0: i32) -> (i32, i32) {
    %c0_i32 = arith.constant 0 : i32
    %c0_i32_0 = arith.constant 0 : i32
    %c0_i32_1 = arith.constant 0 : i32
    return %c0_i32, %c0_i32_0 : i32, i32
  }
  func.func @transform_8(%arg0: i32) -> (i32, i32) {
    %c0_i32 = arith.constant 0 : i32
    %c0_i32_0 = arith.constant 0 : i32
    %c0_i32_1 = arith.constant 0 : i32
    return %c0_i32, %c0_i32_0 : i32, i32
  }
  func.func @transform_9(%arg0: i32) -> (i32, i32) {
    %c0_i32 = arith.constant 0 : i32
    %c0_i32_0 = arith.constant 0 : i32
    %c0_i32_1 = arith.constant 0 : i32
    return %c0_i32, %c0_i32_0 : i32, i32
  }
  func.func @transform_10(%arg0: i32) -> (i32, i32) {
    %c0_i32 = arith.constant 0 : i32
    %c0_i32_0 = arith.constant 0 : i32
    %c0_i32_1 = arith.constant 0 : i32
    return %c0_i32, %c0_i32_0 : i32, i32
  }
  func.func @transform_11(%arg0: i32) -> (i32, i32) {
    %c0_i32 = arith.constant 0 : i32
    %c0_i32_0 = arith.constant 0 : i32
    %c0_i32_1 = arith.constant 0 : i32
    return %c0_i32, %c0_i32_0 : i32, i32
  }
  func.func @transform_12(%arg0: i32) -> (i32, i32, i32) {
    %c0_i32 = arith.constant 0 : i32
    %c0_i32_0 = arith.constant 0 : i32
    %c0_i32_1 = arith.constant 0 : i32
    return %arg0, %c0_i32, %c0_i32_0 : i32, i32, i32
  }
}

</mosaic_0001>

<bundles_post_ra>
// kernel: coattention_forward.1
= control target key start
LH: loop header
LB: loop body
LE: loop exit
PB: predicated region body
PF: predicated region fallthrough
CT: control target
= control target key end

     0   :  { %s7929_s21 = smov 0   ;;  %s11309_s0 = inlined_call_operand.vmem [shape: f32[4,8,32], index: 0, kind: input, shape index: {}]   ;;  %s11310_s1 = inlined_call_operand.vmem [shape: f32[4,16,32], index: 1, kind: input, shape index: {}]   ;;  %s11311_s2 = inlined_call_operand.vmem [shape: f32[32,32], index: 2, kind: input, shape index: {}]   ;;  %s11312_s3 = inlined_call_operand.vmem [shape: f32[32,128], index: 3, kind: input, shape index: {}]   ;;  %s11313_s4 = inlined_call_operand.vmem [shape: f32[32,128], index: 4, kind: input, shape index: {}]   ;;  %s11314_s5 = inlined_call_operand.vmem [shape: f32[1,128], index: 5, kind: input, shape index: {}]   ;;  %s11315_s6 = inlined_call_operand.vmem [shape: f32[1,128], index: 6, kind: input, shape index: {}]   ;;  %s11316_s7 = inlined_call_operand.vmem [shape: f32[8,8], index: 7, kind: input, shape index: {}]   ;;  %s11317_s8 = inlined_call_operand.vmem [shape: f32[8,8], index: 8, kind: input, shape index: {}]   ;;  %s11318_s9 = inlined_call_operand.vmem [shape: f32[16,16], index: 9, kind: input, shape index: {}]   ;;  %s11319_s10 = inlined_call_operand.vmem [shape: f32[16,16], index: 10, kind: input, shape index: {}]   ;;  %s11320_s11 = inlined_call_operand.vmem [shape: f32[64,32], index: 11, kind: input, shape index: {}]   ;;  %s11321_s12 = inlined_call_operand.vmem [shape: f32[4,1,128], index: 12, kind: output, shape index: {}]  }
   0x1 LB: > { %s6900_s22 = sadd.s32 4294967295, %s7858_s21   ;;  %p6904_p0 = scmp.ge.s32.totalorder %s7858_s21, 1  ;;  %s7858_s21 = sphi %s7929_s21, %s22_s21  }
   0x2   : > { %p375_p1 = scmp.lt.s32.totalorder %s7858_s21, 3 }
   0x4   : > { %p376_p2 = pnand %p6904_p0, %p375_p1 }
   0x5   : > { %s6905_s23 = sshll.u32 (!%p376_p2), %s6900_s22, 1  ;;  %s7860_s26 = smov (!%p376_p2), 32  }
   0x6   : > { %379 = sbr.rel (%p376_p2) target bundleno = 3598 (0xe0e), region = 68  ;;  %p423_p3 = scmp.lt.s32.totalorder (!%p376_p2), %s6905_s23, 3 }
   0x7   : > { %s7862_s27 = smov (!%p376_p2), 72  }
   0xb   : > { %s11417_s23 = smov (!%p423_p3, %s6905_s23), 3  ;;  %vm476_vm0 = vcmask 261120  }
   0xc   : > { %s7005_s24 = sshll.u32 %s11417_s23, 4  ;;  %s6906_s25 = sshll.u32 %s11417_s23, 3 }
   0xd   : > { %s433_s28 = scalar_lea.vmem %s11310_s1, %s7005_s24  ;;  %s426_s13 = scalar_lea.vmem %s11309_s0, %s6906_s25 }
   0xe   : > { %v7947_v0 = vld [vmem:[%s433_s28] sm:$0xff]  ;;  %v7949_v1 = vld [vmem:[%s426_s13 + $0x8] sm:$0xff]  ;;  %v7955_v4 = vld [vmem:[%s433_s28 + $0x10] sm:$0xff]  ;;  %s11287_s30 = scalar_lea.vmem %s11321_s12, %s11417_s23 }
   0xf   : > { %v830_v2 = vmul.f32 %v7947_v0, %v7947_v0  ;;  %v475_v3 = vmul.f32 %v7949_v1, %v7949_v1  ;;  %v7957_v5 = vld [vmem:[%s433_s28 + $0x8] sm:$0xff]  ;;  %v832_v6 = vmul.f32 %v7955_v4, %v7955_v4  ;;  %v7961_v7 = vld [vmem:[%s433_s28 + $0x18] sm:$0xff]  ;;  %v7965_v10 = vld [vmem:[%s426_s13] sm:$0xff]  ;;  %s7863_s28 = smov 64  }
  0x10   : > { %v831_v12 = vmul.f32 %v7957_v5, %v7957_v5  ;;  %v833_v13 = vmul.f32 %v7961_v7, %v7961_v7  ;;  %v474_v14 = vmul.f32 %v7965_v10, %v7965_v10 }
  0x11   : > { %v834_v8 = vsel %vm476_vm0, %v830_v2, 0.0  ;;  %v480_v9 = vsel %vm476_vm0, %v475_v3, 0.0  ;;  %v840_v11 = vsel %vm476_vm0, %v832_v6, 0.0 }
  0x12   : > { %835 = vadd.xlane.f32.xlu1 %v834_v8  ;;  %481 = vadd.xlane.f32.xlu0 %v480_v9  ;;  %v837_v15 = vsel %vm476_vm0, %v831_v12, 0.0  ;;  %v843_v16 = vsel %vm476_vm0, %v833_v13, 0.0  ;;  %v477_v17 = vsel %vm476_vm0, %v474_v14, 0.0 }
  0x13   : > { %841 = vadd.xlane.f32.xlu2 %v840_v11 }
  0x1a   : > { %838 = vadd.xlane.f32.xlu0 %v837_v15  ;;  %844 = vadd.xlane.f32.xlu1 %v843_v16 }
  0x1b   : > { %478 = vadd.xlane.f32.xlu2 %v477_v17 }
  0x85   : > { %v836_v18 = vpop.xlane.xlu1 %835  ;;  %v482_v19 = vpop.xlane.xlu0 %481 }
  0x86   : > { %7020 = vrsqrt.f32 %v836_v18  ;;  %v7977_v20 = vpop.xlane.xlu2 %841  ;;  %vm853_vm1 = vcmp.eq.f32.partialorder %v836_v18, inf  ;;  %vm855_vm2 = vcmp.eq.f32.partialorder %v836_v18, 0.0  ;;  %v856_v38 = vand.u32 2147483648, %v836_v18 }
  0x87   : > { %7022 = vrsqrt.f32 %v482_v19  ;;  %vm502_vm3 = vcmp.eq.f32.partialorder %v482_v19, inf  ;;  %vm504_vm4 = vcmp.eq.f32.partialorder %v482_v19, 0.0  ;;  %v505_v42 = vand.u32 2147483648, %v482_v19 }
  0x88   : > { %7024 = vrsqrt.f32 %v7977_v20  ;;  %vm877_vm5 = vcmp.eq.f32.partialorder %v7977_v20, inf  ;;  %vm879_vm6 = vcmp.eq.f32.partialorder %v7977_v20, 0.0  ;;  %v880_v51 = vand.u32 2147483648, %v7977_v20 }
  0x8c   : > { %v7021_v21 = vpop.eup %7020 }
  0x8d   : > { %v7023_v22 = vpop.eup %7022  ;;  %v847_v23 = vmul.f32 %v7021_v21, %v836_v18  ;;  %v7980_v24 = vpop.xlane.xlu0 %838 }
  0x8e   : > { %v7025_v25 = vpop.eup %7024  ;;  %v496_v26 = vmul.f32 %v7023_v22, %v482_v19  ;;  %7026 = vrsqrt.f32 %v7980_v24  ;;  %v7983_v27 = vpop.xlane.xlu2 %478  ;;  %vm865_vm7 = vcmp.eq.f32.partialorder %v7980_v24, inf  ;;  %vm867_vm8 = vcmp.eq.f32.partialorder %v7980_v24, 0.0 }
  0x8f   : > { %v7985_v28 = vpop.xlane.xlu1 %844  ;;  %v848_v29 = vmul.f32 %v7021_v21, %v847_v23  ;;  %v871_v30 = vmul.f32 %v7025_v25, %v7977_v20  ;;  %7028 = vrsqrt.f32 %v7983_v27  ;;  %v868_v57 = vand.u32 2147483648, %v7980_v24 }
  0x90   : > { %v497_v31 = vmul.f32 %v7023_v22, %v496_v26  ;;  %7030 = vrsqrt.f32 %v7985_v28  ;;  %vm490_vm9 = vcmp.eq.f32.partialorder %v7983_v27, inf  ;;  %vm492_vm10 = vcmp.eq.f32.partialorder %v7983_v27, 0.0 }
  0x91   : > { %v849_v32 = vmul.f32 0.5, %v848_v29  ;;  %v872_v33 = vmul.f32 %v7025_v25, %v871_v30  ;;  %vm889_vm11 = vcmp.eq.f32.partialorder %v7985_v28, inf  ;;  %vm891_vm12 = vcmp.eq.f32.partialorder %v7985_v28, 0.0 }
  0x92   : > { %v498_v34 = vmul.f32 0.5, %v497_v31 }
  0x93   : > { %v850_v35 = vsub.f32 1.5, %v849_v32  ;;  %v873_v36 = vmul.f32 0.5, %v872_v33 }
  0x94   : > { %v7027_v37 = vpop.eup %7026  ;;  %v499_v39 = vsub.f32 1.5, %v498_v34 }
  0x95   : > { %v7029_v40 = vpop.eup %7028  ;;  %v851_v41 = vmul.f32 %v7021_v21, %v850_v35  ;;  %v859_v43 = vmul.f32 %v7027_v37, %v7980_v24  ;;  %v874_v44 = vsub.f32 1.5, %v873_v36 }
  0x96   : > { %v500_v45 = vmul.f32 %v7023_v22, %v499_v39  ;;  %v484_v46 = vmul.f32 %v7029_v40, %v7983_v27  ;;  %v7031_v47 = vpop.eup %7030 }
  0x97   : > { %v852_v48 = vmul.f32 %v851_v41, %v836_v18  ;;  %v860_v49 = vmul.f32 %v7027_v37, %v859_v43  ;;  %v875_v50 = vmul.f32 %v7025_v25, %v874_v44  ;;  %v883_v54 = vmul.f32 %v7031_v47, %v7985_v28 }
  0x98   : > { %v501_v52 = vmul.f32 %v500_v45, %v482_v19  ;;  %v485_v53 = vmul.f32 %v7029_v40, %v484_v46 }
  0x99   : > { %v854_v55 = vsel %vm853_vm1, %v836_v18, %v852_v48  ;;  %v861_v56 = vmul.f32 0.5, %v860_v49  ;;  %v876_v58 = vmul.f32 %v875_v50, %v7977_v20  ;;  %v884_v62 = vmul.f32 %v7031_v47, %v883_v54 }
  0x9a   : > { %v857_v59 = vsel %vm855_vm2, %v856_v38, %v854_v55  ;;  %v503_v60 = vsel %vm502_vm3, %v482_v19, %v501_v52  ;;  %v486_v61 = vmul.f32 0.5, %v485_v53  ;;  %vm561_vm1 = vcmask 64512  }
  0x9b   : > { %v8003_v63 = vmax.f32 %v857_v59, 1e-15  ;;  %v506_v2 = vsel %vm504_vm4, %v505_v42, %v503_v60  ;;  %v862_v3 = vsub.f32 1.5, %v861_v56  ;;  %v878_v6 = vsel %vm877_vm5, %v7977_v20, %v876_v58 }
  0x9c   : > { %v8009_v8 = vmax.f32 %v506_v2, 1e-15  ;;  %v881_v9 = vsel %vm879_vm6, %v880_v51, %v878_v6  ;;  %v487_v11 = vsub.f32 1.5, %v486_v61  ;;  %v885_v12 = vmul.f32 0.5, %v884_v62 }
  0x9d   : > { %v863_v13 = vmul.f32 %v7027_v37, %v862_v3  ;;  %v6919_v14 = vclamps-f32 %v8003_v63, 0.9999999  ;;  %v8020_v19 = vmax.f32 %v881_v9, 1e-15  ;;  %v493_v20 = vand.u32 2147483648, %v7983_v27 }
  0x9e   : > { %7032 = vrcp.f32 %v8009_v8  ;;  %v488_v15 = vmul.f32 %v7029_v40, %v487_v11  ;;  %v886_v16 = vsub.f32 1.5, %v885_v12  ;;  %v6912_v17 = vclamps-f32 %v8009_v8, 0.9999999 }
  0x9f   : > { %7034 = vrcp.f32 %v8003_v63  ;;  %v864_v18 = vmul.f32 %v863_v13, %v7980_v24  ;;  %v906_v29 = vadd.f32 1.0, %v6919_v14  ;;  %v918_v37 = vsub.f32 1.0, %v6919_v14 }
  0xa0   : > { %v489_v21 = vmul.f32 %v488_v15, %v7983_v27  ;;  %v887_v22 = vmul.f32 %v7031_v47, %v886_v16  ;;  %v514_v23 = vadd.f32 1.0, %v6912_v17  ;;  %v520_v25 = vsub.f32 1.0, %v6912_v17 }
  0xa1   : > { %v866_v26 = vsel %vm865_vm7, %v7980_v24, %v864_v18  ;;  %7036 = vrcp.f32 %v8020_v19  ;;  %v892_v24 = vand.u32 2147483648, %v7985_v28  ;;  %v555_v40 = vand.u32 2147483647, %v8009_v8 }
  0xa2   : > { %v869_v30 = vsel %vm867_vm8, %v868_v57, %v866_v26  ;;  %v491_v31 = vsel %vm490_vm9, %v7983_v27, %v489_v21  ;;  %v888_v32 = vmul.f32 %v887_v22, %v7985_v28  ;;  %7038 = vlog2.f32 %v514_v23 }
  0xa3   : > { %v8035_v33 = vmax.f32 %v869_v30, 1e-15  ;;  %v494_v34 = vsel %vm492_vm10, %v493_v20, %v491_v31  ;;  %7040 = vlog2.f32 %v520_v25  ;;  %v557_v44 = vand.u32 2147483648, %v8009_v8 }
  0xa4   : > { %v8040_v35 = vpop.eup %7032  ;;  %v8042_v36 = vmax.f32 %v494_v34, 1e-15  ;;  %7042 = vlog2.f32 %v906_v29  ;;  %v890_v27 = vsel %vm889_vm11, %v7985_v28, %v888_v32  ;;  %vm551_vm13 = vweird.f32 %v8009_v8 }
  0xa5   : > { %v8045_v38 = vpop.eup %7034  ;;  %7044 = vrcp.f32 %v8035_v33  ;;  %v547_v39 = vmul.f32 %v8040_v35, %v8009_v8  ;;  %v6920_v41 = vclamps-f32 %v8035_v33, 0.9999999  ;;  %v893_v46 = vsel %vm891_vm12, %v892_v24, %v890_v27 }
  0xa6   : > { %7046 = vrcp.f32 %v8042_v36  ;;  %v943_v49 = vmul.f32 %v8045_v38, %v8003_v63  ;;  %vm8065_vm14 = vcmp.eq.f32.partialorder %v555_v40, 8.507059e+37  ;;  %vm552_vm15 = vweird.f32 %v8040_v35 }
  0xa7   : > { %v8056_v42 = vpop.eup %7036  ;;  %v548_v43 = vsub.f32 1.0, %v547_v39  ;;  %7048 = vlog2.f32 %v918_v37  ;;  %v907_v47 = vadd.f32 1.0, %v6920_v41  ;;  %v919_v48 = vsub.f32 1.0, %v6920_v41  ;;  %vm8085_vm2 = vmor %vm551_vm13, %vm552_vm15 }
  0xa8   : > { %v7039_v45 = vpop.eup %7038  ;;  %v944_v28 = vsub.f32 1.0, %v943_v49  ;;  %v8072_v57 = vmax.f32 %v893_v46, 1e-15  ;;  %v558_v59 = vor.u32 1.1754944e-38, %v557_v44  ;;  %v966_v2 = vand.u32 2147483647, %v8035_v33 }
  0xa9   : > { %v7041_v50 = vpop.eup %7040  ;;  %v518_v51 = vmul.f32 0.6931472, %v7039_v45  ;;  %v549_v52 = vmul.f32 %v8040_v35, %v548_v43  ;;  %7050 = vlog2.f32 %v907_v47  ;;  %v968_v11 = vand.u32 2147483648, %v8035_v33 }
  0xaa   : > { %v7043_v54 = vpop.eup %7042  ;;  %v524_v55 = vmul.f32 0.6931472, %v7041_v50  ;;  %7052 = vlog2.f32 %v919_v48  ;;  %v945_v12 = vmul.f32 %v8045_v38, %v944_v28  ;;  %vm948_vm3 = vweird.f32 %v8045_v38 }
  0xab   : > { %v8070_v56 = vpop.eup %7044  ;;  %v550_v58 = vadd.f32 %v8040_v35, %v549_v52  ;;  %v911_v3 = vmul.f32 0.6931472, %v7043_v54  ;;  %7054 = vrcp.f32 %v8072_v57  ;;  %v951_v8 = vand.u32 2147483647, %v8003_v63  ;;  %v8154_v54 = vld [vmem:[%s11316_s7] sm:$0xff] }
  0xac   : > { %v8075_v60 = vpop.eup %7046  ;;  %v526_v61 = vsub.f32 %v518_v51, %v524_v55  ;;  %v958_v62 = vmul.f32 %v8070_v56, %v8035_v33  ;;  %vm963_vm4 = vweird.f32 %v8070_v56  ;;  %v953_v17 = vand.u32 2147483648, %v8003_v63 }
  0xad   : > { %v7049_v6 = vpop.eup %7048  ;;  %v554_v14 = vsel %vm8085_vm2, %v8040_v35, %v550_v58  ;;  %v6911_v18 = vclamps-f32 %v8042_v36, 0.9999999  ;;  %v532_v25 = vmul.f32 %v8075_v60, %v8042_v36  ;;  %v8108_v35 = vld [vmem:[%s11317_s8] sm:$0xff]  ;;  %v946_v37 = vadd.f32 %v8045_v38, %v945_v12 }
  0xae   : > { %v528_v13 = vmul.f32 0.5, %v526_v61  ;;  %v959_v15 = vsub.f32 1.0, %v958_v62  ;;  %v923_v16 = vmul.f32 0.6931472, %v7049_v6  ;;  %v559_v29 = vsel %vm8065_vm14, %v558_v59, %v554_v14 }
  0xaf   : > { %v7051_v20 = vpop.eup %7050  ;;  %v513_v31 = vadd.f32 1.0, %v6911_v18  ;;  %v519_v32 = vsub.f32 1.0, %v6911_v18  ;;  %vm947_vm5 = vweird.f32 %v8003_v63  ;;  %v533_v40 = vsub.f32 1.0, %v532_v25 }
  0xb0   : > { %v530_v21 = vmul.f32 %v528_v13, %v7949_v1  ;;  %v960_v22 = vmul.f32 %v8070_v56, %v959_v15  ;;  %v930_v23 = vsub.f32 %v911_v3, %v923_v16  ;;  %v7053_v26 = vpop.eup %7052  ;;  %v913_v30 = vmul.f32 0.6931472, %v7051_v20  ;;  %vm8122_vm8 = vmor %vm947_vm5, %vm948_vm3  ;;  %v8177_v13 = vld [vmem:[%s11318_s9] sm:$0xff] }
  0xb1   : > { %v925_v1 = vmul.f32 0.6931472, %v7053_v26  ;;  %v8112_v27 = vpop.eup %7054  ;;  %7056 = vlog2.f32 %v513_v31  ;;  %vm962_vm6 = vweird.f32 %v8035_v33  ;;  %vm8116_vm7 = vcmp.eq.f32.partialorder %v966_v2, 8.507059e+37 }
  0xb2   : > { %v560_v34 = vmul.f32 %v559_v29, %v530_v21  ;;  %v961_v24 = vadd.f32 %v8070_v56, %v960_v22  ;;  %v934_v39 = vmul.f32 0.5, %v930_v23  ;;  %7058 = vlog2.f32 %v519_v32  ;;  %vm8130_vm9 = vmor %vm962_vm6, %vm963_vm4 }
  0xb3   : > { %v931_v41 = vsub.f32 %v913_v30, %v925_v1  ;;  %v969_v33 = vor.u32 1.1754944e-38, %v968_v11  ;;  %vm8134_vm10 = vcmp.eq.f32.partialorder %v951_v8, 8.507059e+37  ;;  %v954_v46 = vor.u32 1.1754944e-38, %v953_v17 }
  0xb4   : > { %600 = vmatpush.msra.mxu1 %v560_v34  ;;  %643 = vmatpush.msra.mxu3 %v560_v34  ;;  %v534_v47 = vmul.f32 %v8075_v60, %v533_v40  ;;  %v965_v49 = vsel %vm8130_vm9, %v8070_v56, %v961_v24  ;;  %v950_v50 = vsel %vm8122_vm8, %v8045_v38, %v946_v37  ;;  %v6922_v51 = vclamps-f32 %v8072_v57, 0.9999999  ;;  %v471_v40 = vld [vmem:[%s11318_s9 + $0x8] sm:$0xff] }
  0xb5   : > { %6916 = vmatmul.msk.f32.vlgmr.msra.gmra.mxu3 %vm561_vm1, %v8108_v35  ;;  %v935_v48 = vmul.f32 0.5, %v931_v41  ;;  %v938_v52 = vmul.f32 %v934_v39, %v7947_v0  ;;  %vm536_vm11 = vweird.f32 %v8042_v36  ;;  %vm537_vm12 = vweird.f32 %v8075_v60  ;;  %6914 = vmatmul.msk.f32.vlgmr.msra.gmra.mxu1 %vm561_vm1, %v8154_v54 }
  0xb6   : > { %v988_v53 = vmul.f32 %v8112_v27, %v8072_v57  ;;  %v542_v38 = vand.u32 2147483648, %v8042_v36  ;;  %v909_v28 = vadd.f32 1.0, %v6922_v51  ;;  %v921_v56 = vsub.f32 1.0, %v6922_v51  ;;  %vm8170_vm13 = vmor %vm536_vm11, %vm537_vm12 }
  0xb7   : > { %v939_v55 = vmul.f32 %v935_v48, %v7957_v5  ;;  %v7057_v0 = vpop.eup %7056  ;;  %v970_v58 = vsel %vm8116_vm7, %v969_v33, %v965_v49  ;;  %v535_v59 = vadd.f32 %v8075_v60, %v534_v47  ;;  %v540_v61 = vand.u32 2147483647, %v8042_v36 }
  0xb8   : > { %v989_v62 = vsub.f32 1.0, %v988_v53  ;;  %v7059_v2 = vpop.eup %7058  ;;  %v955_v5 = vsel %vm8134_vm10, %v954_v46, %v950_v50  ;;  %v516_v6 = vmul.f32 0.6931472, %v7057_v0  ;;  %7060 = vlog2.f32 %v909_v28  ;;  %v472_v53 = vld [vmem:[%s11319_s10] sm:$0xff]  ;;  %v466_v28 = vld [vmem:[%s11320_s11 + $0x30] sm:$0xff] }
  0xb9   : > { %v971_v3 = vmul.f32 %v970_v58, %v939_v55  ;;  %v956_v11 = vmul.f32 %v955_v5, %v938_v52  ;;  %vm1002_vm14 = vcmask 130048   ;;  %v522_v12 = vmul.f32 0.6931472, %v7059_v2  ;;  %v464_v0 = vld [vmem:[%s11320_s11 + $0x20] sm:$0xff]  ;;  %v463_v58 = vld [vmem:[%s11320_s11 + $0x18] sm:$0xff] }
  0xba   : > { %7062 = vlog2.f32 %v921_v56  ;;  %v543_v14 = vor.u32 1.1754944e-38, %v542_v38  ;;  %v990_v15 = vmul.f32 %v8112_v27, %v989_v62  ;;  %v6921_v36 = vclamps-f32 %v8020_v19, 0.9999999  ;;  %v467_v38 = vld [vmem:[%s11320_s11 + $0x38] sm:$0xff]  ;;  %v465_v56 = vld [vmem:[%s11320_s11 + $0x28] sm:$0xff] }
  0xbb   : > { %1023 = vmatpush.msrb.mxu3 %v971_v3  ;;  %v973_v16 = vmul.f32 %v8056_v42, %v8020_v19  ;;  %v525_v8 = vsub.f32 %v516_v6, %v522_v12  ;;  %v539_v17 = vsel %vm8170_vm13, %v8075_v60, %v535_v59  ;;  %vm541_vm15 = vcmp.eq.f32.partialorder %v540_v61, 8.507059e+37  ;;  %v462_v61 = vld [vmem:[%s11320_s11 + $0x10] sm:$0xff]  ;;  %v461_v62 = vld [vmem:[%s11320_s11 + $0x8] sm:$0xff]  ;;  %v460_v12 = vld [vmem:[%s11320_s11] sm:$0xff] }
  0xbc   : > { %vm992_vm2 = vweird.f32 %v8072_v57  ;;  %vm993_vm3 = vweird.f32 %v8112_v27  ;;  %v908_v18 = vadd.f32 1.0, %v6921_v36  ;;  %v920_v20 = vsub.f32 1.0, %v6921_v36 }
  0xbd   : > { %1024 = vmatpush.msrb.mxu3 %v956_v11  ;;  %v974_v21 = vsub.f32 1.0, %v973_v16  ;;  %v527_v22 = vmul.f32 0.5, %v525_v8  ;;  %v996_v23 = vand.u32 2147483647, %v8072_v57  ;;  %v998_v25 = vand.u32 2147483648, %v8072_v57  ;;  %vm8198_vm4 = vmor %vm992_vm2, %vm993_vm3 }
  0xbe   : > { %6923 = vmatmul.msk.f32.vlgmr.msrb.gmra.mxu3 %vm1002_vm14, %v8177_v13  ;;  %v7061_v26 = vpop.eup %7060  ;;  %v544_v60 = vsel %vm541_vm15, %v543_v14, %v539_v17  ;;  %v991_v29 = vadd.f32 %v8112_v27, %v990_v15  ;;  %7064 = vlog2.f32 %v908_v18  ;;  %vm977_vm6 = vweird.f32 %v8020_v19 }
  0xbf   : > { %1075 = vmatpush.msra.mxu3 %v971_v3  ;;  %v529_v31 = vmul.f32 %v527_v22, %v7965_v10  ;;  %v917_v32 = vmul.f32 0.6931472, %v7061_v26  ;;  %7066 = vlog2.f32 %v920_v20  ;;  %v975_v24 = vmul.f32 %v8056_v42, %v974_v21 }
  0xc0   : > { %v7063_v30 = vpop.eup %7062  ;;  %vm8203_vm5 = vcmp.eq.f32.partialorder %v996_v23, 8.507059e+37  ;;  %v999_v10 = vor.u32 1.1754944e-38, %v998_v25  ;;  %v995_v41 = vsel %vm8198_vm4, %v8112_v27, %v991_v29  ;;  %vm978_vm7 = vweird.f32 %v8056_v42 }
  0xc1   : > { %1076 = vmatpush.msra.mxu3 %v956_v11  ;;  %v929_v1 = vmul.f32 0.6931472, %v7063_v30  ;;  %v545_v37 = vmul.f32 %v544_v60, %v529_v31  ;;  %v983_v43 = vand.u32 2147483648, %v8020_v19  ;;  %v976_v33 = vadd.f32 %v8056_v42, %v975_v24  ;;  %vm979_vm8 = vmor %vm977_vm6, %vm978_vm7 }
  0xc2   : > { %v981_v45 = vand.u32 2147483647, %v8020_v19  ;;  %v1000_v46 = vsel %vm8203_vm5, %v999_v10, %v995_v41  ;;  %vm658_vm10 = vcmask 523264  }
  0xc3   : > { %v933_v57 = vsub.f32 %v917_v32, %v929_v1  ;;  %623 = vmatpush.msra.mxu2 %v545_v37  ;;  %580 = vmatpush.msra.mxu0 %v545_v37  ;;  %v984_v50 = vor.u32 1.1754944e-38, %v983_v43 }
  0xc4   : > { %v7065_v44 = vpop.eup %7064  ;;  %6915 = vmatmul.msk.f32.vlgmr.msra.gmra.mxu2 %vm561_vm1, %v8108_v35  ;;  %6913 = vmatmul.msk.f32.vlgmr.msra.gmra.mxu0 %vm561_vm1, %v8154_v54  ;;  %v980_v35 = vsel %vm979_vm8, %v8056_v42, %v976_v33  ;;  %vm982_vm9 = vcmp.eq.f32.partialorder %v981_v45, 8.507059e+37  ;;  %v473_v42 = vld [vmem:[%s11319_s10 + $0x8] sm:$0xff] }
  0xc5   : > { %v937_v63 = vmul.f32 0.5, %v933_v57  ;;  %v7067_v27 = vpop.eup %7066  ;;  %v915_v47 = vmul.f32 0.6931472, %v7065_v44  ;;  %v985_v55 = vsel %vm982_vm9, %v984_v50, %v980_v35  ;;  %673 = vmatpush.msrb.mxu0 %v467_v38 }
  0xc6   : > { %6924 = vmatmul.msk.f32.gmra.mxu3 %vm1002_vm14, %v471_v40  ;;  %v927_v49 = vmul.f32 0.6931472, %v7067_v27 }
  0xc7   : > { %v941_v48 = vmul.f32 %v937_v63, %v7961_v7  ;;  %674 = vmatpush.msrb.mxu0 %v466_v28 }
  0xc8   : > { %v932_v52 = vsub.f32 %v915_v47, %v927_v49 }
  0xc9   : > { %v1001_v51 = vmul.f32 %v1000_v46, %v941_v48  ;;  %675 = vmatpush.msrb.mxu0 %v465_v56 }
  0xca   : > { %v936_v54 = vmul.f32 0.5, %v932_v52 }
  0xcb   : > { %1046 = vmatpush.msrb.mxu2 %v1001_v51  ;;  %1098 = vmatpush.msrb.mxu1 %v1001_v51 }
  0xcc   : > { %v940_v19 = vmul.f32 %v936_v54, %v7955_v4  ;;  %676 = vmatpush.msrb.mxu0 %v464_v0 }
  0xce   : > { %6927 = vmatmul.msk.f32.vlgmr.msra.gmra.mxu3 %vm1002_vm14, %v472_v53  ;;  %v986_v7 = vmul.f32 %v985_v55, %v940_v19  ;;  %677 = vmatpush.msrb.mxu0 %v463_v58 }
  0xd0   : > { %1047 = vmatpush.msrb.mxu2 %v986_v7  ;;  %1099 = vmatpush.msrb.mxu1 %v986_v7 }
  0xd1   : > { %6929 = vmatmul.msk.f32.vlgmr.msrb.gmra.mxu1 %vm1002_vm14, %v472_v53  ;;  %6925 = vmatmul.msk.f32.vlgmr.msrb.gmra.mxu2 %vm1002_vm14, %v8177_v13 }
  0xd2   : > { %1147 = vmatpush.msra.mxu2 %v467_v38  ;;  %678 = vmatpush.msrb.mxu0 %v462_v61 }
  0xd4   : > { %1148 = vmatpush.msra.mxu2 %v466_v28  ;;  %679 = vmatpush.msrb.mxu0 %v461_v62 }
  0xd6   : > { %6928 = vmatmul.msk.f32.gmra.mxu3 %vm1002_vm14, %v473_v42  ;;  %1149 = vmatpush.msra.mxu2 %v465_v56 }
  0xd7   : > { %680 = vmatpush.msrb.mxu0 %v460_v12 }
  0xd8   : > { %1150 = vmatpush.msra.mxu2 %v464_v0 }
  0xd9   : > { %6930 = vmatmul.msk.f32.gmra.mxu1 %vm1002_vm14, %v473_v42  ;;  %6926 = vmatmul.msk.f32.gmra.mxu2 %vm1002_vm14, %v471_v40 }
  0xda   : > { %1151 = vmatpush.msra.mxu2 %v463_v58 }
  0xdc   : > { %1152 = vmatpush.msra.mxu2 %v462_v61 }
  0xde   : > { %1153 = vmatpush.msra.mxu2 %v461_v62 }
  0xe0   : > { %1154 = vmatpush.msra.mxu2 %v460_v12 }
 0x132   : > { %v8266_v2 = vpop.f32.mrf.mxu1 }
 0x138   : > { %v8243_v4 = vpop.f32.mrf.mxu3 }
 0x141   : > { %v1026_v59 = vpop.f32.mrf.mxu3  ;;  %v582_v62 = vpop.f32.mrf.mxu0 }
 0x147   : > { %v625_v15 = vpop.f32.mrf.mxu2 }
 0x149   : > { %v1029_v3 = vpop.f32.mrf.mxu3 }
 0x14e   : > { %v1101_v5 = vpop.f32.mrf.mxu1 }
 0x14f   : > { %1115 = vrot.lane.b32.xlu2 %v1101_v5, %s7860_s26 }
 0x151   : > { %v1078_v6 = vpop.f32.mrf.mxu3 }
 0x152   : > { %1111 = vrot.lane.b32.xlu0 %v1078_v6, %s7860_s26 }
 0x154   : > { %v1049_v8 = vpop.f32.mrf.mxu2 }
 0x156   : > { %v1104_v9 = vpop.f32.mrf.mxu1 }
 0x159   : > { %v1081_v11 = vpop.f32.mrf.mxu3 }
 0x15a   : > { %1113 = vrot.lane.b32.xlu1 %v1081_v11, %s7860_s26  ;;  %1117 = vrot.lane.b32.xlu0 %v1104_v9, %s7860_s26 }
 0x15c   : > { %v1052_v21 = vpop.f32.mrf.mxu2 }
 0x1a9   : > { %v1116_v17 = vpop.permute.xlu2 %1115 }
 0x1aa   : > { %v1125_v18 = vsel %vm476_vm0, %v1049_v8, %v1116_v17 }
 0x1c4   : > { %v1112_v13 = vpop.permute.xlu0 %1111 }
 0x1c5   : > { %v1123_v14 = vsel %vm476_vm0, %v1026_v59, %v1112_v13 }
 0x1c6   : > { %6931 = vmatmul.msk.f32.vlgmr.msra.gmra.mxu2 %vm658_vm10, %v1123_v14 }
 0x1cc   : > { %v1114_v36 = vpop.permute.xlu1 %1113  ;;  %v1118_v20 = vpop.permute.xlu0 %1117 }
 0x1cd   : > { %v1124_v16 = vsel %vm476_vm0, %v1029_v3, %v1114_v36  ;;  %v1126_v22 = vsel %vm476_vm0, %v1052_v21, %v1118_v20 }
 0x1ce   : > { %6932 = vmatmul.msk.f32.gmra.mxu2 %vm658_vm10, %v1124_v16 }
 0x1d6   : > { %6933 = vmatmul.msk.f32.gmra.mxu2 %vm658_vm10, %v1125_v18 }
 0x1de   : > { %6934 = vmatmul.msk.f32.gmra.mxu2 %vm658_vm10, %v1126_v22 }
 0x249   : > { %v8283_v23 = vpop.f32.mrf.mxu2 }
 0x24a   : > { %v1168_v25 = vmul.f32 %v8283_v23, %v8283_v23 }
 0x24c   : > { %v1172_v26 = vsel %vm476_vm0, %v1168_v25, 0.0 }
 0x24d   : > { %1173 = vadd.xlane.f32.xlu2 %v1172_v26 }
 0x251   : > { %v8288_v60 = vpop.f32.mrf.mxu2 }
 0x252   : > { %v1169_v29 = vmul.f32 %v8288_v60, %v8288_v60 }
 0x254   : > { %v1175_v30 = vsel %vm476_vm0, %v1169_v29, 0.0 }
 0x255   : > { %1176 = vadd.xlane.f32.xlu1 %v1175_v30 }
 0x259   : > { %v8293_v31 = vpop.f32.mrf.mxu2 }
 0x25a   : > { %v1170_v32 = vmul.f32 %v8293_v31, %v8293_v31 }
 0x25c   : > { %v1178_v34 = vsel %vm476_vm0, %v1170_v32, 0.0 }
 0x25d   : > { %1179 = vadd.xlane.f32.xlu0 %v1178_v34 }
 0x261   : > { %v8298_v1 = vpop.f32.mrf.mxu2 }
 0x262   : > { %v1171_v24 = vmul.f32 %v8298_v1, %v8298_v1 }
 0x264   : > { %v1181_v37 = vsel %vm476_vm0, %v1171_v24, 0.0 }
 0x265   : > { %1182 = vadd.xlane.f32.xlu2 %v1181_v37 }
 0x27d   : > { %650 = vrot.lane.b32.xlu2 %v625_v15, %s7860_s26 }
 0x2c0   : > { %v1174_v39 = vpop.xlane.xlu2 %1173 }
 0x2c1   : > { %7068 = vrsqrt.f32 %v1174_v39  ;;  %vm1191_vm11 = vcmp.eq.f32.partialorder %v1174_v39, inf  ;;  %v1194_v48 = vand.u32 2147483648, %v1174_v39  ;;  %vm1193_vm12 = vcmp.eq.f32.partialorder %v1174_v39, 0.0 }
 0x2c7   : > { %v7069_v10 = vpop.eup %7068 }
 0x2c8   : > { %v1185_v40 = vmul.f32 %v7069_v10, %v1174_v39  ;;  %v1177_v57 = vpop.xlane.xlu1 %1176 }
 0x2c9   : > { %7070 = vrsqrt.f32 %v1177_v57  ;;  %vm1203_vm13 = vcmp.eq.f32.partialorder %v1177_v57, inf  ;;  %v1206_v38 = vand.u32 2147483648, %v1177_v57  ;;  %vm1205_vm15 = vcmp.eq.f32.partialorder %v1177_v57, 0.0 }
 0x2ca   : > { %v1186_v41 = vmul.f32 %v7069_v10, %v1185_v40 }
 0x2cc   : > { %v1187_v43 = vmul.f32 0.5, %v1186_v41 }
 0x2ce   : > { %v1188_v44 = vsub.f32 1.5, %v1187_v43 }
 0x2cf   : > { %v7071_v63 = vpop.eup %7070 }
 0x2d0   : > { %v1189_v33 = vmul.f32 %v7069_v10, %v1188_v44  ;;  %v1197_v45 = vmul.f32 %v7071_v63, %v1177_v57  ;;  %v1180_v27 = vpop.xlane.xlu0 %1179 }
 0x2d1   : > { %7072 = vrsqrt.f32 %v1180_v27  ;;  %vm1215_vm2 = vcmp.eq.f32.partialorder %v1180_v27, inf  ;;  %v1218_v16 = vand.u32 2147483648, %v1180_v27  ;;  %vm1217_vm4 = vcmp.eq.f32.partialorder %v1180_v27, 0.0 }
 0x2d2   : > { %v1190_v46 = vmul.f32 %v1189_v33, %v1174_v39  ;;  %v1198_v47 = vmul.f32 %v7071_v63, %v1197_v45 }
 0x2d4   : > { %v1192_v49 = vsel %vm1191_vm11, %v1174_v39, %v1190_v46  ;;  %v1199_v50 = vmul.f32 0.5, %v1198_v47 }
 0x2d5   : > { %v1195_v51 = vsel %vm1193_vm12, %v1194_v48, %v1192_v49 }
 0x2d6   : > { %v1232_v52 = vmax.f32 %v1195_v51, 1e-15  ;;  %v1200_v35 = vsub.f32 1.5, %v1199_v50 }
 0x2d7   : > { %v7073_v53 = vpop.eup %7072 }
 0x2d8   : > { %7074 = vrcp.f32 %v1232_v52  ;;  %v1201_v54 = vmul.f32 %v7071_v63, %v1200_v35  ;;  %v1209_v55 = vmul.f32 %v7073_v53, %v1180_v27  ;;  %v8304_v19 = vpop.xlane.xlu2 %1182  ;;  %v1255_v36 = vand.u32 2147483648, %v1232_v52 }
 0x2d9   : > { %7076 = vrsqrt.f32 %v8304_v19  ;;  %v1253_v17 = vand.u32 2147483647, %v1232_v52  ;;  %vm1249_vm5 = vweird.f32 %v1232_v52  ;;  %vm1227_vm8 = vcmp.eq.f32.partialorder %v8304_v19, inf }
 0x2da   : > { %v1202_v7 = vmul.f32 %v1201_v54, %v1177_v57  ;;  %v1210_v42 = vmul.f32 %v7073_v53, %v1209_v55  ;;  %7078 = vtanh.f32 %v1232_v52  ;;  %v1256_v32 = vor.u32 1.1754944e-38, %v1255_v36 }
 0x2db   : > { %vm1254_vm7 = vcmp.eq.f32.partialorder %v1253_v17, 8.507059e+37  ;;  %v1230_v40 = vand.u32 2147483648, %v8304_v19  ;;  %vm1229_vm11 = vcmp.eq.f32.partialorder %v8304_v19, 0.0 }
 0x2dc   : > { %v1204_v28 = vsel %vm1203_vm13, %v1177_v57, %v1202_v7  ;;  %v1211_v56 = vmul.f32 0.5, %v1210_v42 }
 0x2dd   : > { %v1207_v0 = vsel %vm1205_vm15, %v1206_v38, %v1204_v28 }
 0x2de   : > { %v7075_v58 = vpop.eup %7074  ;;  %v8307_v59 = vmax.f32 %v1207_v0, 1e-15  ;;  %v1212_v61 = vsub.f32 1.5, %v1211_v56 }
 0x2df   : > { %v7077_v3 = vpop.eup %7076  ;;  %v1245_v5 = vmul.f32 %v7075_v58, %v1232_v52  ;;  %vm1250_vm3 = vweird.f32 %v7075_v58 }
 0x2e0   : > { %7080 = vrcp.f32 %v8307_v59  ;;  %v1213_v6 = vmul.f32 %v7073_v53, %v1212_v61  ;;  %v1221_v9 = vmul.f32 %v7077_v3, %v8304_v19  ;;  %v651_v11 = vpop.permute.xlu2 %650  ;;  %v7079_v18 = vpop.eup %7078  ;;  %vm1251_vm6 = vmor %vm1249_vm5, %vm1250_vm3  ;;  %v1270_v44 = vand.u32 2147483648, %v8307_v59 }
 0x2e1   : > { %v656_v12 = vsel %vm476_vm0, %v582_v62, %v651_v11  ;;  %v1246_v13 = vsub.f32 1.0, %v1245_v5  ;;  %7082 = vtanh.f32 %v8307_v59  ;;  %v1240_v34 = vmul.f32 %v7079_v18, %v8283_v23 }
 0x2e2   : > { %v1214_v14 = vmul.f32 %v1213_v6, %v1180_v27  ;;  %v1222_v15 = vmul.f32 %v7077_v3, %v1221_v9  ;;  %6917 = vmatmul.msk.f32.vlgmr.msrb.gmra.mxu0 %vm658_vm10, %v656_v12  ;;  %v1268_v33 = vand.u32 2147483647, %v8307_v59  ;;  %vm1264_vm12 = vweird.f32 %v8307_v59 }
 0x2e3   : > { %v1247_v8 = vmul.f32 %v7075_v58, %v1246_v13  ;;  %v1271_v51 = vor.u32 1.1754944e-38, %v1270_v44  ;;  %v448_v44 = vld [vmem:[%s11311_s2 + $0x10] sm:$0xff] }
 0x2e4   : > { %v1216_v20 = vsel %vm1215_vm2, %v1180_v27, %v1214_v14  ;;  %v1223_v21 = vmul.f32 0.5, %v1222_v15  ;;  %vm1269_vm15 = vcmp.eq.f32.partialorder %v1268_v33, 8.507059e+37  ;;  %v447_v33 = vld [vmem:[%s11311_s2 + $0x8] sm:$0xff] }
 0x2e5   : > { %v1219_v22 = vsel %vm1217_vm4, %v1218_v16, %v1216_v20  ;;  %v1248_v25 = vadd.f32 %v7075_v58, %v1247_v8 }
 0x2e6   : > { %v7081_v26 = vpop.eup %7080  ;;  %v1234_v29 = vmax.f32 %v1219_v22, 1e-15  ;;  %v1224_v30 = vsub.f32 1.5, %v1223_v21 }
 0x2e7   : > { %v1252_v24 = vsel %vm1251_vm6, %v7075_v58, %v1248_v25  ;;  %v1260_v37 = vmul.f32 %v7081_v26, %v8307_v59  ;;  %vm1265_vm9 = vweird.f32 %v7081_v26  ;;  %v7083_v45 = vpop.eup %7082 }
 0x2e8   : > { %7084 = vrcp.f32 %v1234_v29  ;;  %v1225_v39 = vmul.f32 %v7077_v3, %v1224_v30  ;;  %v1257_v10 = vsel %vm1254_vm7, %v1256_v32, %v1252_v24  ;;  %vm1266_vm13 = vmor %vm1264_vm12, %vm1265_vm9  ;;  %v1241_v52 = vmul.f32 %v7083_v45, %v8288_v60 }
 0x2e9   : > { %v8318_v57 = vmul.f32 %v1257_v10, %v1240_v34  ;;  %v1261_v41 = vsub.f32 1.0, %v1260_v37  ;;  %7086 = vtanh.f32 %v1234_v29  ;;  %v1285_v7 = vand.u32 2147483648, %v1234_v29 }
 0x2ea   : > { %v1226_v43 = vmul.f32 %v1225_v39, %v8304_v19  ;;  %v1283_v28 = vand.u32 2147483647, %v1234_v29  ;;  %vm1279_vm3 = vweird.f32 %v1234_v29 }
 0x2eb   : > { %v1304_v23 = vmul.f32 %v8318_v57, %v8318_v57  ;;  %v1262_v63 = vmul.f32 %v7081_v26, %v1261_v41  ;;  %v1286_v59 = vor.u32 1.1754944e-38, %v1285_v7 }
 0x2ec   : > { %v1228_v27 = vsel %vm1227_vm8, %v8304_v19, %v1226_v43  ;;  %vm1284_vm5 = vcmp.eq.f32.partialorder %v1283_v28, 8.507059e+37  ;;  %v449_v43 = vld [vmem:[%s11311_s2 + $0x18] sm:$0xff] }
 0x2ed   : > { %v1231_v46 = vsel %vm1229_vm11, %v1230_v40, %v1228_v27  ;;  %v1308_v47 = vsel %vm476_vm0, %v1304_v23, 0.0  ;;  %v1263_v48 = vadd.f32 %v7081_v26, %v1262_v63  ;;  %1710 = vmatpush.msrb.mxu3 %v449_v43 }
 0x2ee   : > { %v7085_v49 = vpop.eup %7084  ;;  %v1235_v50 = vmax.f32 %v1231_v46, 1e-15  ;;  %1309 = vadd.xlane.f32.xlu1 %v1308_v47  ;;  %v446_v47 = vld [vmem:[%s11311_s2] sm:$0xff] }
 0x2ef   : > { %v1267_v35 = vsel %vm1266_vm13, %v7081_v26, %v1263_v48  ;;  %v1275_v53 = vmul.f32 %v7085_v49, %v1234_v29  ;;  %vm1280_vm2 = vweird.f32 %v7085_v49  ;;  %v7087_v56 = vpop.eup %7086  ;;  %1711 = vmatpush.msrb.mxu3 %v448_v44 }
 0x2f0   : > { %7088 = vrcp.f32 %v1235_v50  ;;  %v1272_v54 = vsel %vm1269_vm15, %v1271_v51, %v1267_v35  ;;  %vm1281_vm4 = vmor %vm1279_vm3, %vm1280_vm2  ;;  %v1242_v61 = vmul.f32 %v7087_v56, %v8293_v31  ;;  %v1300_v11 = vand.u32 2147483648, %v1235_v50 }
 0x2f1   : > { %v8330_v55 = vmul.f32 %v1272_v54, %v1241_v52  ;;  %v1276_v19 = vsub.f32 1.0, %v1275_v53  ;;  %7090 = vtanh.f32 %v1235_v50  ;;  %v1298_v14 = vand.u32 2147483647, %v1235_v50  ;;  %1712 = vmatpush.msrb.mxu3 %v447_v33 }
 0x2f2   : > { %vm1294_vm7 = vweird.f32 %v1235_v50  ;;  %v1301_v31 = vor.u32 1.1754944e-38, %v1300_v11 }
 0x2f3   : > { %v1305_v42 = vmul.f32 %v8330_v55, %v8330_v55  ;;  %v1277_v38 = vmul.f32 %v7085_v49, %v1276_v19  ;;  %vm1299_vm9 = vcmp.eq.f32.partialorder %v1298_v14, 8.507059e+37  ;;  %1713 = vmatpush.msrb.mxu3 %v446_v47 }
 0x2f5   : > { %v1311_v0 = vsel %vm476_vm0, %v1305_v42, 0.0  ;;  %v1278_v58 = vadd.f32 %v7085_v49, %v1277_v38 }
 0x2f6   : > { %v7089_v60 = vpop.eup %7088  ;;  %1312 = vadd.xlane.f32.xlu0 %v1311_v0 }
 0x2f7   : > { %v1282_v62 = vsel %vm1281_vm4, %v7085_v49, %v1278_v58  ;;  %v1290_v3 = vmul.f32 %v7089_v60, %v1235_v50  ;;  %vm1295_vm6 = vweird.f32 %v7089_v60  ;;  %v7091_v15 = vpop.eup %7090 }
 0x2f8   : > { %v1287_v5 = vsel %vm1284_vm5, %v1286_v59, %v1282_v62  ;;  %vm1296_vm8 = vmor %vm1294_vm7, %vm1295_vm6  ;;  %v1243_v8 = vmul.f32 %v7091_v15, %v8298_v1 }
 0x2f9   : > { %v8336_v6 = vmul.f32 %v1287_v5, %v1242_v61  ;;  %v1291_v9 = vsub.f32 1.0, %v1290_v3 }
 0x2fb   : > { %v1306_v12 = vmul.f32 %v8336_v6, %v8336_v6  ;;  %v1292_v13 = vmul.f32 %v7089_v60, %v1291_v9 }
 0x2fd   : > { %v1314_v36 = vsel %vm476_vm0, %v1306_v12, 0.0  ;;  %v1293_v16 = vadd.f32 %v7089_v60, %v1292_v13 }
 0x2fe   : > { %1315 = vadd.xlane.f32.xlu1 %v1314_v36 }
 0x2ff   : > { %v1297_v17 = vsel %vm1296_vm8, %v7089_v60, %v1293_v16 }
 0x300   : > { %v1302_v18 = vsel %vm1299_vm9, %v1301_v31, %v1297_v17 }
 0x301   : > { %v8342_v20 = vmul.f32 %v1302_v18, %v1243_v8 }
 0x303   : > { %v1307_v21 = vmul.f32 %v8342_v20, %v8342_v20 }
 0x305   : > { %v1317_v22 = vsel %vm476_vm0, %v1307_v21, 0.0 }
 0x306   : > { %1318 = vadd.xlane.f32.xlu0 %v1317_v22 }
 0x317   : > { %652 = vrot.lane.b32.xlu1 %v8243_v4, %s7860_s26 }
 0x35f   : > { %v8349_v25 = vpop.f32.mrf.mxu0 }
 0x360   : > { %v688_v26 = vmul.f32 %v8349_v25, %v8349_v25 }
 0x361   : > { %v1310_v1 = vpop.xlane.xlu1 %1309 }
 0x362   : > { %7092 = vrsqrt.f32 %v1310_v1  ;;  %v690_v29 = vsel %vm476_vm0, %v688_v26, 0.0  ;;  %vm1327_vm11 = vcmp.eq.f32.partialorder %v1310_v1, inf  ;;  %v1330_v45 = vand.u32 2147483648, %v1310_v1 }
 0x363   : > { %691 = vadd.xlane.f32.xlu0 %v690_v29  ;;  %vm1329_vm12 = vcmp.eq.f32.partialorder %v1310_v1, 0.0 }
 0x368   : > { %v7093_v30 = vpop.eup %7092 }
 0x369   : > { %v1321_v32 = vmul.f32 %v7093_v30, %v1310_v1  ;;  %v1313_v34 = vpop.xlane.xlu0 %1312 }
 0x36a   : > { %7094 = vrsqrt.f32 %v1313_v34  ;;  %vm1339_vm13 = vcmp.eq.f32.partialorder %v1313_v34, inf  ;;  %v1342_v7 = vand.u32 2147483648, %v1313_v34  ;;  %vm1341_vm15 = vcmp.eq.f32.partialorder %v1313_v34, 0.0 }
 0x36b   : > { %v1322_v24 = vmul.f32 %v7093_v30, %v1321_v32 }
 0x36d   : > { %v1323_v37 = vmul.f32 0.5, %v1322_v24 }
 0x36f   : > { %v1324_v39 = vsub.f32 1.5, %v1323_v37 }
 0x370   : > { %v7095_v10 = vpop.eup %7094 }
 0x371   : > { %v1325_v40 = vmul.f32 %v7093_v30, %v1324_v39  ;;  %v1333_v4 = vmul.f32 %v7095_v10, %v1313_v34  ;;  %v1316_v41 = vpop.xlane.xlu1 %1315 }
 0x372   : > { %7096 = vrsqrt.f32 %v1316_v41  ;;  %vm1351_vm2 = vcmp.eq.f32.partialorder %v1316_v41, inf  ;;  %v1354_v12 = vand.u32 2147483648, %v1316_v41  ;;  %vm1353_vm4 = vcmp.eq.f32.partialorder %v1316_v41, 0.0 }
 0x373   : > { %v1326_v23 = vmul.f32 %v1325_v40, %v1310_v1  ;;  %v1334_v63 = vmul.f32 %v7095_v10, %v1333_v4 }
 0x375   : > { %v1328_v27 = vsel %vm1327_vm11, %v1310_v1, %v1326_v23  ;;  %v1335_v46 = vmul.f32 0.5, %v1334_v63 }
 0x376   : > { %v1331_v48 = vsel %vm1329_vm12, %v1330_v45, %v1328_v27 }
 0x377   : > { %v8366_v49 = vmax.f32 %v1331_v48, 1e-15  ;;  %v1336_v50 = vsub.f32 1.5, %v1335_v46 }
 0x378   : > { %v7097_v51 = vpop.eup %7096 }
 0x379   : > { %7098 = vrcp.f32 %v8366_v49  ;;  %v1337_v52 = vmul.f32 %v7095_v10, %v1336_v50  ;;  %v1345_v35 = vmul.f32 %v7097_v51, %v1316_v41  ;;  %v1319_v53 = vpop.xlane.xlu0 %1318  ;;  %v1387_v11 = vand.u32 2147483648, %v8366_v49 }
 0x37a   : > { %7100 = vrsqrt.f32 %v1319_v53  ;;  %v1385_v14 = vand.u32 2147483647, %v8366_v49  ;;  %vm1381_vm5 = vweird.f32 %v8366_v49  ;;  %vm1363_vm8 = vcmp.eq.f32.partialorder %v1319_v53, inf }
 0x37b   : > { %v1338_v54 = vmul.f32 %v1337_v52, %v1313_v34  ;;  %v1346_v19 = vmul.f32 %v7097_v51, %v1345_v35  ;;  %v1388_v21 = vor.u32 1.1754944e-38, %v1387_v11  ;;  %v1366_v39 = vand.u32 2147483648, %v1319_v53 }
 0x37c   : > { %vm1386_vm7 = vcmp.eq.f32.partialorder %v1385_v14, 8.507059e+37  ;;  %vm1365_vm11 = vcmp.eq.f32.partialorder %v1319_v53, 0.0  ;;  %vm1372_vm12 = vcmp.gt.f32.partialorder %v8366_v49, 0.996 }
 0x37d   : > { %v1340_v42 = vsel %vm1339_vm13, %v1313_v34, %v1338_v54  ;;  %v1347_v38 = vmul.f32 0.5, %v1346_v19 }
 0x37e   : > { %v1343_v28 = vsel %vm1341_vm15, %v1342_v7, %v1340_v42 }
 0x37f   : > { %v7099_v56 = vpop.eup %7098  ;;  %v8369_v0 = vmax.f32 %v1343_v28, 1e-15  ;;  %v1348_v58 = vsub.f32 1.5, %v1347_v38 }
 0x380   : > { %v7101_v60 = vpop.eup %7100  ;;  %v1377_v59 = vmul.f32 %v7099_v56, %v8366_v49  ;;  %vm1382_vm3 = vweird.f32 %v7099_v56 }
 0x381   : > { %7102 = vrcp.f32 %v8369_v0  ;;  %v1349_v61 = vmul.f32 %v7097_v51, %v1348_v58  ;;  %v1357_v62 = vmul.f32 %v7101_v60, %v1319_v53  ;;  %vm1383_vm6 = vmor %vm1381_vm5, %vm1382_vm3  ;;  %v1402_v10 = vand.u32 2147483648, %v8369_v0 }
 0x382   : > { %v1378_v3 = vsub.f32 1.0, %v1377_v59  ;;  %vm1396_vm13 = vweird.f32 %v8369_v0 }
 0x383   : > { %v1350_v5 = vmul.f32 %v1349_v61, %v1316_v41  ;;  %v1358_v9 = vmul.f32 %v7101_v60, %v1357_v62  ;;  %v1403_v27 = vor.u32 1.1754944e-38, %v1402_v10 }
 0x384   : > { %v1379_v13 = vmul.f32 %v7099_v56, %v1378_v3 }
 0x385   : > { %v1352_v15 = vsel %vm1351_vm2, %v1316_v41, %v1350_v5  ;;  %v1359_v36 = vmul.f32 0.5, %v1358_v9  ;;  %v1400_v41 = vand.u32 2147483647, %v8369_v0 }
 0x386   : > { %v1355_v16 = vsel %vm1353_vm4, %v1354_v12, %v1352_v15  ;;  %v1380_v31 = vadd.f32 %v7099_v56, %v1379_v13  ;;  %vm1373_vm4 = vcmp.gt.f32.partialorder %v8369_v0, 0.996 }
 0x387   : > { %v7103_v8 = vpop.eup %7102  ;;  %v8376_v17 = vmax.f32 %v1355_v16, 1e-15  ;;  %v1360_v18 = vsub.f32 1.5, %v1359_v36  ;;  %vm1401_vm2 = vcmp.eq.f32.partialorder %v1400_v41, 8.507059e+37 }
 0x388   : > { %v1384_v22 = vsel %vm1383_vm6, %v7099_v56, %v1380_v31  ;;  %v1392_v26 = vmul.f32 %v7103_v8, %v8369_v0  ;;  %vm1397_vm9 = vweird.f32 %v7103_v8 }
 0x389   : > { %7104 = vrcp.f32 %v8376_v17  ;;  %v1361_v1 = vmul.f32 %v7101_v60, %v1360_v18  ;;  %v653_v29 = vpop.permute.xlu1 %652  ;;  %v1389_v30 = vsel %vm1386_vm7, %v1388_v21, %v1384_v22  ;;  %vm1398_vm15 = vmor %vm1396_vm13, %vm1397_vm9  ;;  %v1417_v51 = vand.u32 2147483648, %v8376_v17 }
 0x38a   : > { %v657_v32 = vsel %vm476_vm0, %v8266_v2, %v653_v29  ;;  %v1390_v34 = vmul.f32 0.996, %v1389_v30  ;;  %v1393_v24 = vsub.f32 1.0, %v1392_v26  ;;  %vm1411_vm5 = vweird.f32 %v8376_v17 }
 0x38b   : > { %v1362_v37 = vmul.f32 %v1361_v1, %v1319_v53  ;;  %6918 = vmatmul.msk.f32.gmra.mxu0 %vm658_vm10, %v657_v32  ;;  %v1418_v38 = vor.u32 1.1754944e-38, %v1417_v51  ;;  %vm1374_vm9 = vcmp.gt.f32.partialorder %v8376_v17, 0.996 }
 0x38c   : > { %v1436_v40 = vmul.f32 %v1390_v34, %v8318_v57  ;;  %v1394_v4 = vmul.f32 %v7103_v8, %v1393_v24 }
 0x38d   : > { %v1364_v43 = vsel %vm1363_vm8, %v1319_v53, %v1362_v37  ;;  %v1415_v53 = vand.u32 2147483647, %v8376_v17 }
 0x38e   : > { %v1367_v2 = vsel %vm1365_vm11, %v1366_v39, %v1364_v43  ;;  %v8388_v44 = vsel %vm1372_vm12, %v1436_v40, %v8318_v57  ;;  %v1395_v23 = vadd.f32 %v7103_v8, %v1394_v4 }
 0x38f   : > { %v7105_v63 = vpop.eup %7104  ;;  %v1371_v33 = vmax.f32 %v1367_v2, 1e-15  ;;  %6935 = vmatmul.msk.f32.vlgmr.msrb.gmra.mxu3 %vm476_vm0, %v8388_v44  ;;  %v1534_v45 = vmul.f32 %v8388_v44, %v8388_v44  ;;  %vm1416_vm7 = vcmp.eq.f32.partialorder %v1415_v53, 8.507059e+37 }
 0x390   : > { %v1399_v46 = vsel %vm1398_vm15, %v7103_v8, %v1395_v23  ;;  %v1407_v47 = vmul.f32 %v7105_v63, %v8376_v17  ;;  %vm1412_vm3 = vweird.f32 %v7105_v63 }
 0x391   : > { %7106 = vrcp.f32 %v1371_v33  ;;  %v1538_v57 = vsel %vm476_vm0, %v1534_v45, 0.0  ;;  %v1404_v48 = vsel %vm1401_vm2, %v1403_v27, %v1399_v46  ;;  %vm1413_vm6 = vmor %vm1411_vm5, %vm1412_vm3  ;;  %v1432_v61 = vand.u32 2147483648, %v1371_v33 }
 0x392   : > { %1626 = vadd.xlane.f32.xlu0 %v1538_v57  ;;  %v1405_v49 = vmul.f32 0.996, %v1404_v48  ;;  %v1408_v50 = vsub.f32 1.0, %v1407_v47  ;;  %v1430_v5 = vand.u32 2147483647, %v1371_v33  ;;  %vm1426_vm11 = vweird.f32 %v1371_v33 }
 0x393   : > { %v1433_v12 = vor.u32 1.1754944e-38, %v1432_v61  ;;  %vm1375_vm15 = vcmp.gt.f32.partialorder %v1371_v33, 0.996 }
 0x394   : > { %v1437_v52 = vmul.f32 %v1405_v49, %v8330_v55  ;;  %v1409_v35 = vmul.f32 %v7105_v63, %v1408_v50  ;;  %vm1431_vm13 = vcmp.eq.f32.partialorder %v1430_v5, 8.507059e+37 }
 0x396   : > { %v8402_v54 = vsel %vm1373_vm4, %v1437_v52, %v8330_v55  ;;  %v1410_v19 = vadd.f32 %v7105_v63, %v1409_v35 }
 0x397   : > { %v7107_v7 = vpop.eup %7106  ;;  %6936 = vmatmul.msk.f32.gmra.mxu3 %vm476_vm0, %v8402_v54  ;;  %v1535_v42 = vmul.f32 %v8402_v54, %v8402_v54 }
 0x398   : > { %v1414_v28 = vsel %vm1413_vm6, %v7105_v63, %v1410_v19  ;;  %v1422_v56 = vmul.f32 %v7107_v7, %v1371_v33  ;;  %vm1427_vm8 = vweird.f32 %v7107_v7 }
 0x399   : > { %v1539_v0 = vsel %vm476_vm0, %v1535_v42, 0.0  ;;  %v1419_v58 = vsel %vm1416_vm7, %v1418_v38, %v1414_v28  ;;  %vm1428_vm12 = vmor %vm1426_vm11, %vm1427_vm8 }
 0x39a   : > { %1628 = vadd.xlane.f32.xlu2 %v1539_v0  ;;  %v8410_v55 = vadd.f32 %v1539_v0, %v1538_v57  ;;  %v1420_v60 = vmul.f32 0.996, %v1419_v58  ;;  %v1423_v59 = vsub.f32 1.0, %v1422_v56 }
 0x39c   : > { %v1438_v62 = vmul.f32 %v1420_v60, %v8336_v6  ;;  %v1424_v3 = vmul.f32 %v7107_v7, %v1423_v59 }
 0x39e   : > { %v8415_v9 = vsel %vm1374_vm9, %v1438_v62, %v8336_v6  ;;  %v1425_v11 = vadd.f32 %v7107_v7, %v1424_v3 }
 0x39f   : > { %6937 = vmatmul.msk.f32.gmra.mxu3 %vm476_vm0, %v8415_v9  ;;  %v1536_v43 = vmul.f32 %v8415_v9, %v8415_v9 }
 0x3a0   : > { %v1429_v13 = vsel %vm1428_vm12, %v7107_v7, %v1425_v11 }
 0x3a1   : > { %v1434_v14 = vsel %vm1431_vm13, %v1433_v12, %v1429_v13  ;;  %v8447_v45 = vsel %vm476_vm0, %v1536_v43, 0.0 }
 0x3a2   : > { %v1435_v15 = vmul.f32 0.996, %v1434_v14 }
 0x3a4   : > { %v1439_v36 = vmul.f32 %v1435_v15, %v8342_v20 }
 0x3a6   : > { %v8421_v16 = vsel %vm1375_vm15, %v1439_v36, %v8342_v20 }
 0x3a7   : > { %6938 = vmatmul.msk.f32.gmra.mxu3 %vm476_vm0, %v8421_v16  ;;  %v1537_v46 = vmul.f32 %v8421_v16, %v8421_v16 }
 0x3a9   : > { %v8458_v50 = vsel %vm476_vm0, %v1537_v46, 0.0 }
 0x3d6   : > { %v692_v6 = vpop.xlane.xlu0 %691 }
 0x3d7   : > { %7108 = vrsqrt.f32 %v692_v6  ;;  %vm703_vm2 = vcmp.eq.f32.partialorder %v692_v6, inf  ;;  %v706_v24 = vand.u32 2147483648, %v692_v6  ;;  %vm705_vm3 = vcmp.eq.f32.partialorder %v692_v6, 0.0 }
 0x3dd   : > { %v7109_v31 = vpop.eup %7108 }
 0x3de   : > { %v697_v8 = vmul.f32 %v7109_v31, %v692_v6 }
 0x3e0   : > { %v698_v17 = vmul.f32 %v7109_v31, %v697_v8 }
 0x3e2   : > { %v699_v18 = vmul.f32 0.5, %v698_v17 }
 0x3e4   : > { %v700_v21 = vsub.f32 1.5, %v699_v18 }
 0x3e6   : > { %v701_v29 = vmul.f32 %v7109_v31, %v700_v21 }
 0x3e8   : > { %v702_v20 = vmul.f32 %v701_v29, %v692_v6 }
 0x3ea   : > { %v704_v34 = vsel %vm703_vm2, %v692_v6, %v702_v20 }
 0x3eb   : > { %v707_v39 = vsel %vm705_vm3, %v706_v24, %v704_v34 }
 0x3ec   : > { %v720_v10 = vmax.f32 %v707_v39, 1e-15 }
 0x3ee   : > { %7110 = vrcp.f32 %v720_v10  ;;  %v737_v7 = vand.u32 2147483648, %v720_v10  ;;  %vm731_vm5 = vweird.f32 %v720_v10  ;;  %v735_v28 = vand.u32 2147483647, %v720_v10 }
 0x3ef   : > { %7112 = vtanh.f32 %v720_v10 }
 0x3f0   : > { %v738_v58 = vor.u32 1.1754944e-38, %v737_v7  ;;  %vm736_vm7 = vcmp.eq.f32.partialorder %v735_v28, 8.507059e+37 }
 0x3f4   : > { %v7111_v63 = vpop.eup %7110 }
 0x3f5   : > { %v727_v27 = vmul.f32 %v7111_v63, %v720_v10  ;;  %vm732_vm4 = vweird.f32 %v7111_v63  ;;  %v7113_v0 = vpop.eup %7112 }
 0x3f6   : > { %vm733_vm6 = vmor %vm731_vm5, %vm732_vm4  ;;  %v724_v5 = vmul.f32 %v7113_v0, %v8349_v25 }
 0x3f7   : > { %v728_v48 = vsub.f32 1.0, %v727_v27 }
 0x3f9   : > { %v729_v51 = vmul.f32 %v7111_v63, %v728_v48 }
 0x3fb   : > { %v730_v19 = vadd.f32 %v7111_v63, %v729_v51 }
 0x3fd   : > { %v734_v56 = vsel %vm733_vm6, %v7111_v63, %v730_v19 }
 0x3fe   : > { %v739_v3 = vsel %vm736_vm7, %v738_v58, %v734_v56 }
 0x3ff   : > { %v8471_v14 = vmul.f32 %v739_v3, %v724_v5 }
 0x401   : > { %v756_v36 = vmul.f32 %v8471_v14, %v8471_v14 }
 0x403   : > { %v758_v17 = vsel %vm476_vm0, %v756_v36, 0.0 }
 0x405   : > { %v1627_v52 = vpop.xlane.xlu0 %1626 }
 0x406   : > { %7114 = vrsqrt.f32 %v1627_v52  ;;  %vm1641_vm8 = vcmp.eq.f32.partialorder %v1627_v52, inf  ;;  %v1644_v34 = vand.u32 2147483648, %v1627_v52  ;;  %vm1643_vm9 = vcmp.eq.f32.partialorder %v1627_v52, 0.0 }
 0x408   : > { %v8425_v22 = vpop.f32.mrf.mxu0 }
 0x409   : > { %v689_v26 = vmul.f32 %v8425_v22, %v8425_v22 }
 0x40b   : > { %v693_v1 = vsel %vm476_vm0, %v689_v26, 0.0 }
 0x40c   : > { %694 = vadd.xlane.f32.xlu0 %v693_v1  ;;  %v7115_v62 = vpop.eup %7114 }
 0x40d   : > { %v1629_v60 = vpop.xlane.xlu2 %1628  ;;  %v1635_v11 = vmul.f32 %v7115_v62, %v1627_v52 }
 0x40e   : > { %7116 = vrsqrt.f32 %v1629_v60  ;;  %vm1653_vm11 = vcmp.eq.f32.partialorder %v1629_v60, inf  ;;  %vm1655_vm12 = vcmp.eq.f32.partialorder %v1629_v60, 0.0 }
 0x40f   : > { %v1636_v15 = vmul.f32 %v7115_v62, %v1635_v11 }
 0x411   : > { %v1637_v31 = vmul.f32 0.5, %v1636_v15 }
 0x412   : > { %v8430_v30 = vpop.f32.mrf.mxu3 }
 0x413   : > { %v1727_v32 = vmul.f32 %v8430_v30, %v8430_v30  ;;  %v1967_v61 = vand.u32 2147483647, %v8430_v30  ;;  %v1638_v25 = vsub.f32 1.5, %v1637_v31 }
 0x414   : > { %v7117_v6 = vpop.eup %7116 }
 0x415   : > { %v1731_v37 = vsel %vm476_vm0, %v1727_v32, 0.0  ;;  %v1971_v13 = vsel %vm476_vm0, %v1967_v61, 0.0  ;;  %v1647_v8 = vmul.f32 %v7117_v6, %v1629_v60  ;;  %v1639_v21 = vmul.f32 %v7115_v62, %v1638_v25 }
 0x416   : > { %1732 = vadd.xlane.f32.xlu1 %v1731_v37 }
 0x417   : > { %v1648_v18 = vmul.f32 %v7117_v6, %v1647_v8  ;;  %v1640_v1 = vmul.f32 %v1639_v21, %v1627_v52 }
 0x419   : > { %v1649_v26 = vmul.f32 0.5, %v1648_v18  ;;  %v1642_v20 = vsel %vm1641_vm8, %v1627_v52, %v1640_v1 }
 0x41a   : > { %v8435_v40 = vpop.f32.mrf.mxu3  ;;  %v1645_v24 = vsel %vm1643_vm9, %v1644_v34, %v1642_v20 }
 0x41b   : > { %v1728_v4 = vmul.f32 %v8435_v40, %v8435_v40  ;;  %v1968_v35 = vand.u32 2147483647, %v8435_v40  ;;  %v1650_v29 = vsub.f32 1.5, %v1649_v26  ;;  %v1682_v39 = vmax.f32 %v1645_v24, 1e-15 }
 0x41d   : > { %v1734_v41 = vsel %vm476_vm0, %v1728_v4, 0.0  ;;  %v1974_v42 = vsel %vm476_vm0, %v1968_v35, 0.0  ;;  %v1651_v32 = vmul.f32 %v7117_v6, %v1650_v29  ;;  %v1656_v4 = vand.u32 2147483648, %v1629_v60 }
 0x41e   : > { %1735 = vadd.xlane.f32.xlu0 %v1734_v41  ;;  %v6939_v41 = vclamps-f32 %v1682_v39, 0.9999999  ;;  %7118 = vrcp.f32 %v1682_v39  ;;  %v1806_v61 = vand.u32 2147483648, %v1682_v39  ;;  %vm1800_vm15 = vweird.f32 %v1682_v39 }
 0x41f   : > { %v1652_v37 = vmul.f32 %v1651_v32, %v1629_v60 }
 0x420   : > { %v1863_v63 = vadd.f32 1.0, %v6939_v41 }
 0x421   : > { %v1654_v10 = vsel %vm1653_vm11, %v1629_v60, %v1652_v37 }
 0x422   : > { %v8442_v2 = vpop.f32.mrf.mxu3  ;;  %v1657_v43 = vsel %vm1655_vm12, %v1656_v4, %v1654_v10  ;;  %7120 = vlog2.f32 %v1863_v63 }
 0x423   : > { %v1969_v23 = vand.u32 2147483647, %v8442_v2  ;;  %v1729_v53 = vmul.f32 %v8442_v2, %v8442_v2 }
 0x424   : > { %v7119_v46 = vpop.eup %7118 }
 0x425   : > { %v1977_v33 = vsel %vm476_vm0, %v1969_v23, 0.0  ;;  %v1737_v38 = vsel %vm476_vm0, %v1729_v53, 0.0  ;;  %v1683_v23 = vmax.f32 %v1657_v43, 1e-15  ;;  %v1796_v48 = vmul.f32 %v7119_v46, %v1682_v39 }
 0x426   : > { %1978 = vadd.xlane.f32.xlu1 %v1977_v33  ;;  %1630 = vadd.xlane.f32.xlu0 %v8447_v45  ;;  %v1875_v33 = vsub.f32 1.0, %v6939_v41  ;;  %vm1801_vm13 = vweird.f32 %v7119_v46 }
 0x427   : > { %v6940_v27 = vclamps-f32 %v1683_v23, 0.9999999  ;;  %v1797_v35 = vsub.f32 1.0, %v1796_v48  ;;  %vm1802_vm2 = vmor %vm1800_vm15, %vm1801_vm13  ;;  %v1821_v25 = vand.u32 2147483648, %v1683_v23  ;;  %vm1815_vm5 = vweird.f32 %v1683_v23 }
 0x428   : > { %7122 = vlog2.f32 %v1875_v33  ;;  %v7121_v51 = vpop.eup %7120  ;;  %v1819_v18 = vand.u32 2147483647, %v1683_v23 }
 0x429   : > { %7124 = vrcp.f32 %v1683_v23  ;;  %v1868_v19 = vmul.f32 0.6931472, %v7121_v51  ;;  %v1822_v1 = vor.u32 1.1754944e-38, %v1821_v25 }
 0x42a   : > { %v8452_v47 = vpop.f32.mrf.mxu3  ;;  %vm1820_vm7 = vcmp.eq.f32.partialorder %v1819_v18, 8.507059e+37 }
 0x42b   : > { %v1730_v57 = vmul.f32 %v8452_v47, %v8452_v47  ;;  %v1970_v59 = vand.u32 2147483647, %v8452_v47 }
 0x42d   : > { %v1740_v49 = vsel %vm476_vm0, %v1730_v57, 0.0  ;;  %v1980_v12 = vsel %vm476_vm0, %v1970_v59, 0.0  ;;  %v1864_v57 = vadd.f32 1.0, %v6940_v27  ;;  %v1804_v59 = vand.u32 2147483647, %v1682_v39 }
 0x42e   : > { %1741 = vadd.xlane.f32.xlu2 %v1740_v49  ;;  %1632 = vadd.xlane.f32.xlu0 %v8458_v50  ;;  %v1876_v49 = vsub.f32 1.0, %v6940_v27  ;;  %v7123_v52 = vpop.eup %7122 }
 0x42f   : > { %7126 = vlog2.f32 %v1864_v57  ;;  %v7125_v53 = vpop.eup %7124  ;;  %v1880_v7 = vmul.f32 0.6931472, %v7123_v52  ;;  %vm1805_vm3 = vcmp.eq.f32.partialorder %v1804_v59, 8.507059e+37 }
 0x430   : > { %7128 = vlog2.f32 %v1876_v49  ;;  %vm1816_vm4 = vweird.f32 %v7125_v53 }
 0x431   : > { %v1887_v56 = vsub.f32 %v1868_v19, %v1880_v7  ;;  %vm1817_vm6 = vmor %vm1815_vm5, %vm1816_vm4 }
 0x433   : > { %v8476_v5 = vmul.f32 0.5, %v1887_v56 }
 0x435   : > { %v7127_v28 = vpop.eup %7126  ;;  %v6515_v36 = vmul.f32 %v8476_v5, %v8388_v44 }
 0x436   : > { %1975 = vadd.xlane.f32.xlu2 %v1974_v42  ;;  %1738 = vadd.xlane.f32.xlu0 %v1737_v38  ;;  %v1811_v42 = vmul.f32 %v7125_v53, %v1683_v23  ;;  %v1798_v38 = vmul.f32 %v7119_v46, %v1797_v35  ;;  %v7129_v0 = vpop.eup %7128  ;;  %v1870_v62 = vmul.f32 0.6931472, %v7127_v28 }
 0x437   : > { %v1882_v3 = vmul.f32 0.6931472, %v7129_v0 }
 0x438   : > { %v1812_v58 = vsub.f32 1.0, %v1811_v42  ;;  %v1799_v60 = vadd.f32 %v7119_v46, %v1798_v38 }
 0x439   : > { %v1888_v15 = vsub.f32 %v1870_v62, %v1882_v3 }
 0x43a   : > { %v1813_v11 = vmul.f32 %v7125_v53, %v1812_v58 }
 0x43b   : > { %v8485_v21 = vmul.f32 0.5, %v1888_v15 }
 0x43c   : > { %v1814_v8 = vadd.f32 %v7125_v53, %v1813_v11 }
 0x43d   : > { %v6516_v29 = vmul.f32 %v8485_v21, %v8402_v54 }
 0x43e   : > { %1981 = vadd.xlane.f32.xlu2 %v1980_v12  ;;  %1972 = vadd.xlane.f32.xlu0 %v1971_v13  ;;  %v1803_v12 = vsel %vm1802_vm2, %v7119_v46, %v1799_v60  ;;  %v1807_v13 = vor.u32 1.1754944e-38, %v1806_v61  ;;  %v1818_v26 = vsel %vm1817_vm6, %v7125_v53, %v1814_v8 }
 0x43f   : > { %v8489_v32 = vsel %vm1820_vm7, %v1822_v1, %v1818_v26 }
 0x440   : > { %v8480_v6 = vsel %vm1805_vm3, %v1807_v13, %v1803_v12  ;;  %v8492_v24 = vmul.f32 %v6516_v29, %v8489_v32 }
 0x446   : > { %759 = vadd.xlane.f32.xlu0 %v758_v17  ;;  %v8483_v17 = vmul.f32 %v6515_v36, %v8480_v6 }
 0x47f   : > { %v695_v31 = vpop.xlane.xlu0 %694 }
 0x480   : > { %7130 = vrsqrt.f32 %v695_v31  ;;  %vm715_vm8 = vcmp.eq.f32.partialorder %v695_v31, inf  ;;  %v718_v27 = vand.u32 2147483648, %v695_v31  ;;  %vm717_vm9 = vcmp.eq.f32.partialorder %v695_v31, 0.0 }
 0x486   : > { %v7131_v20 = vpop.eup %7130 }
 0x487   : > { %v709_v34 = vmul.f32 %v7131_v20, %v695_v31 }
 0x489   : > { %v710_v37 = vmul.f32 %v7131_v20, %v709_v34  ;;  %v1733_v39 = vpop.xlane.xlu1 %1732 }
 0x48a   : > { %7132 = vrsqrt.f32 %v1733_v39  ;;  %vm1750_vm11 = vcmp.eq.f32.partialorder %v1733_v39, inf  ;;  %v1753_v28 = vand.u32 2147483648, %v1733_v39  ;;  %vm1752_vm12 = vcmp.eq.f32.partialorder %v1733_v39, 0.0 }
 0x48b   : > { %v711_v10 = vmul.f32 0.5, %v710_v37 }
 0x48d   : > { %v712_v4 = vsub.f32 1.5, %v711_v10 }
 0x48f   : > { %v713_v41 = vmul.f32 %v7131_v20, %v712_v4 }
 0x490   : > { %v7133_v43 = vpop.eup %7132 }
 0x491   : > { %v714_v23 = vmul.f32 %v713_v41, %v695_v31  ;;  %v1744_v63 = vmul.f32 %v7133_v43, %v1733_v39  ;;  %v1736_v33 = vpop.xlane.xlu0 %1735 }
 0x492   : > { %7134 = vrsqrt.f32 %v1736_v33  ;;  %vm1762_vm13 = vcmp.eq.f32.partialorder %v1736_v33, inf  ;;  %v1765_v1 = vand.u32 2147483648, %v1736_v33  ;;  %vm1764_vm15 = vcmp.eq.f32.partialorder %v1736_v33, 0.0 }
 0x493   : > { %v716_v46 = vsel %vm715_vm8, %v695_v31, %v714_v23  ;;  %v1745_v57 = vmul.f32 %v7133_v43, %v1744_v63 }
 0x494   : > { %v719_v48 = vsel %vm717_vm9, %v718_v27, %v716_v46 }
 0x495   : > { %v8494_v49 = vmax.f32 %v719_v48, 1e-15  ;;  %v1746_v51 = vmul.f32 0.5, %v1745_v57 }
 0x497   : > { %7136 = vrcp.f32 %v8494_v49  ;;  %v1747_v52 = vsub.f32 1.5, %v1746_v51  ;;  %v750_v8 = vand.u32 2147483647, %v8494_v49  ;;  %v752_v26 = vand.u32 2147483648, %v8494_v49 }
 0x498   : > { %v7135_v35 = vpop.eup %7134  ;;  %vm746_vm2 = vweird.f32 %v8494_v49 }
 0x499   : > { %v1748_v53 = vmul.f32 %v7133_v43, %v1747_v52  ;;  %v1756_v19 = vmul.f32 %v7135_v35, %v1736_v33  ;;  %v8497_v7 = vpop.xlane.xlu0 %1630  ;;  %vm8524_vm5 = vcmp.eq.f32.partialorder %v750_v8, 8.507059e+37  ;;  %v753_v43 = vor.u32 1.1754944e-38, %v752_v26 }
 0x49a   : > { %7138 = vrsqrt.f32 %v8497_v7  ;;  %vm1665_vm3 = vcmp.eq.f32.partialorder %v8497_v7, inf  ;;  %vm1667_vm4 = vcmp.eq.f32.partialorder %v8497_v7, 0.0 }
 0x49b   : > { %v1749_v42 = vmul.f32 %v1748_v53, %v1733_v39  ;;  %v1757_v38 = vmul.f32 %v7135_v35, %v1756_v19  ;;  %7140 = vtanh.f32 %v8494_v49 }
 0x49d   : > { %v8500_v56 = vpop.eup %7136  ;;  %v1751_v0 = vsel %vm1750_vm11, %v1733_v39, %v1749_v42  ;;  %v1758_v58 = vmul.f32 0.5, %v1757_v38 }
 0x49e   : > { %v1754_v60 = vsel %vm1752_vm12, %v1753_v28, %v1751_v0  ;;  %v742_v59 = vmul.f32 %v8500_v56, %v8494_v49  ;;  %vm747_vm6 = vweird.f32 %v8500_v56 }
 0x49f   : > { %v8504_v61 = vmax.f32 %v1754_v60, 1e-15  ;;  %v1759_v62 = vsub.f32 1.5, %v1758_v58  ;;  %vm8552_vm7 = vmor %vm746_vm2, %vm747_vm6 }
 0x4a0   : > { %v7139_v3 = vpop.eup %7138  ;;  %v743_v11 = vsub.f32 1.0, %v742_v59 }
 0x4a1   : > { %v1760_v12 = vmul.f32 %v7135_v35, %v1759_v62  ;;  %v1659_v13 = vmul.f32 %v7139_v3, %v8497_v7  ;;  %v8508_v15 = vpop.xlane.xlu0 %1632  ;;  %v8510_v36 = vpop.xlane.xlu2 %1741  ;;  %v1809_v31 = vmul.f32 %v8480_v6, %v8504_v61  ;;  %v1918_v53 = vand.u32 2147483648, %v8504_v61 }
 0x4a2   : > { %7142 = vrsqrt.f32 %v8508_v15  ;;  %v744_v29 = vmul.f32 %v8500_v56, %v743_v11  ;;  %v7141_v34 = vpop.eup %7140  ;;  %v1916_v28 = vand.u32 2147483647, %v8504_v61  ;;  %vm1677_vm8 = vcmp.eq.f32.partialorder %v8508_v15, inf }
 0x4a3   : > { %v1761_v25 = vmul.f32 %v1760_v12, %v1736_v33  ;;  %v1660_v18 = vmul.f32 %v7139_v3, %v1659_v13  ;;  %7144 = vrsqrt.f32 %v8510_v36  ;;  %v1895_v20 = vmul.f32 %v8476_v5, %v1809_v31 }
 0x4a4   : > { %7146 = vrcp.f32 %v8504_v61  ;;  %v1668_v5 = vand.u32 2147483648, %v8497_v7  ;;  %v725_v63 = vmul.f32 %v7141_v34, %v8425_v22  ;;  %v1680_v22 = vand.u32 2147483648, %v8508_v15 }
 0x4a5   : > { %v1763_v6 = vsel %vm1762_vm13, %v1736_v33, %v1761_v25  ;;  %v1661_v37 = vmul.f32 0.5, %v1660_v18  ;;  %v745_v33 = vadd.f32 %v8500_v56, %v744_v29  ;;  %7148 = vtanh.f32 %v1895_v20 }
 0x4a6   : > { %v1766_v39 = vsel %vm1764_vm15, %v1765_v1, %v1763_v6  ;;  %v1789_v58 = vand.u32 2147483648, %v8510_v36  ;;  %vm1679_vm9 = vcmp.eq.f32.partialorder %v8508_v15, 0.0  ;;  %vm1786_vm11 = vcmp.eq.f32.partialorder %v8510_v36, inf }
 0x4a7   : > { %v8528_v4 = vmax.f32 %v1766_v39, 1e-15  ;;  %v1662_v41 = vsub.f32 1.5, %v1661_v37  ;;  %vm1912_vm12 = vweird.f32 %v8504_v61  ;;  %vm1788_vm15 = vcmp.eq.f32.partialorder %v8510_v36, 0.0 }
 0x4a8   : > { %v7143_v23 = vpop.eup %7142  ;;  %v1919_v13 = vor.u32 1.1754944e-38, %v1918_v53 }
 0x4a9   : > { %v7145_v27 = vpop.eup %7144  ;;  %7150 = vrcp.f32 %v8528_v4  ;;  %v1663_v46 = vmul.f32 %v7139_v3, %v1662_v41  ;;  %v1671_v57 = vmul.f32 %v7143_v23, %v8508_v15  ;;  %v8536_v48 = vpop.xlane.xlu0 %1738  ;;  %v1824_v51 = vmul.f32 %v8489_v32, %v8528_v4 }
 0x4aa   : > { %v8540_v52 = vpop.eup %7146  ;;  %v1780_v35 = vmul.f32 %v7145_v27, %v8510_v36  ;;  %7152 = vrsqrt.f32 %v8536_v48  ;;  %v1931_v60 = vand.u32 2147483647, %v8528_v4  ;;  %v1933_v12 = vand.u32 2147483648, %v8528_v4 }
 0x4ab   : > { %v1664_v19 = vmul.f32 %v1663_v46, %v8497_v7  ;;  %v1672_v42 = vmul.f32 %v7143_v23, %v1671_v57  ;;  %v1896_v38 = vmul.f32 %v8485_v21, %v1824_v51  ;;  %v749_v21 = vsel %vm8552_vm7, %v8500_v56, %v745_v33  ;;  %v7149_v3 = vpop.eup %7148 }
 0x4ac   : > { %v1781_v0 = vmul.f32 %v7145_v27, %v1780_v35  ;;  %v1908_v62 = vmul.f32 %v8540_v52, %v8504_v61  ;;  %vm1913_vm13 = vweird.f32 %v8540_v52  ;;  %vm1927_vm2 = vweird.f32 %v8528_v4 }
 0x4ad   : > { %v1666_v49 = vsel %vm1665_vm3, %v8497_v7, %v1664_v19  ;;  %v1673_v59 = vmul.f32 0.5, %v1672_v42  ;;  %7154 = vtanh.f32 %v1896_v38  ;;  %v754_v25 = vsel %vm8524_vm5, %v753_v43, %v749_v21  ;;  %vm1914_vm6 = vmor %vm1912_vm12, %vm1913_vm13 }
 0x4ae   : > { %v1669_v56 = vsel %vm1667_vm4, %v1668_v5, %v1666_v49  ;;  %v1782_v11 = vmul.f32 0.5, %v1781_v0  ;;  %vm8579_vm3 = vcmp.eq.f32.partialorder %v1916_v28, 8.507059e+37  ;;  %vm8584_vm4 = vcmp.eq.f32.partialorder %v1931_v60, 8.507059e+37 }
 0x4af   : > { %v7151_v31 = vpop.eup %7150  ;;  %v1674_v8 = vsub.f32 1.5, %v1673_v59  ;;  %v8588_v20 = vmul.f32 %v754_v25, %v725_v63  ;;  %v8590_v34 = vmax.f32 %v1669_v56, 1e-15  ;;  %v1909_v39 = vsub.f32 1.0, %v1908_v62  ;;  %v1976_v56 = vpop.xlane.xlu2 %1975 }
 0x4b0   : > { %v7153_v7 = vpop.eup %7152  ;;  %v1783_v26 = vsub.f32 1.5, %v1782_v11  ;;  %v1923_v1 = vmul.f32 %v7151_v31, %v8528_v4  ;;  %v1934_v5 = vor.u32 1.1754944e-38, %v1933_v12  ;;  %v1903_v57 = vmul.f32 %v7149_v3, %v8430_v30 }
 0x4b1   : > { %v1675_v6 = vmul.f32 %v7143_v23, %v1674_v8  ;;  %v1768_v37 = vmul.f32 %v7153_v7, %v8536_v48  ;;  %v757_v43 = vmul.f32 %v8588_v20, %v8588_v20  ;;  %v1910_v63 = vmul.f32 %v8540_v52, %v1909_v39  ;;  %v1973_v51 = vpop.xlane.xlu0 %1972 }
 0x4b2   : > { %v1784_v10 = vmul.f32 %v7145_v27, %v1783_v26  ;;  %v1924_v41 = vsub.f32 1.0, %v1923_v1  ;;  %vm1928_vm5 = vweird.f32 %v7151_v31  ;;  %7156 = vrcp.f32 %v8590_v34 }
 0x4b3   : > { %v1676_v33 = vmul.f32 %v1675_v6, %v8508_v15  ;;  %v1769_v46 = vmul.f32 %v7153_v7, %v1768_v37  ;;  %v761_v53 = vsel %vm476_vm0, %v757_v43, 0.0  ;;  %v7155_v27 = vpop.eup %7154  ;;  %v1911_v30 = vadd.f32 %v8540_v52, %v1910_v63 }
 0x4b4   : > { %v1785_v35 = vmul.f32 %v1784_v10, %v8510_v36  ;;  %v1925_v23 = vmul.f32 %v7151_v31, %v1924_v41  ;;  %762 = vadd.xlane.f32.xlu0 %v761_v53  ;;  %vm1983_vm7 = vcmp.eq.f32.partialorder %v1973_v51, 0.0  ;;  %v1904_v49 = vmul.f32 %v7155_v27, %v8435_v40 }
 0x4b5   : > { %v1678_v19 = vsel %vm1677_vm8, %v8508_v15, %v1676_v33  ;;  %v1770_v42 = vmul.f32 0.5, %v1769_v46  ;;  %vm1929_vm8 = vmor %vm1927_vm2, %vm1928_vm5  ;;  %v1915_v15 = vsel %vm1914_vm6, %v8540_v52, %v1911_v30  ;;  %v1777_v12 = vand.u32 2147483648, %v8536_v48 }
 0x4b6   : > { %v1681_v38 = vsel %vm1679_vm9, %v1680_v22, %v1678_v19  ;;  %v1787_v32 = vsel %vm1786_vm11, %v8510_v36, %v1785_v35  ;;  %v1926_v28 = vadd.f32 %v7151_v31, %v1925_v23  ;;  %v1920_v61 = vsel %vm8579_vm3, %v1919_v13, %v1915_v15 }
 0x4b7   : > { %v1685_v0 = vmax.f32 %v1681_v38, 1e-15  ;;  %v1790_v60 = vsel %vm1788_vm15, %v1789_v58, %v1787_v32  ;;  %v1771_v21 = vsub.f32 1.5, %v1770_v42  ;;  %v1921_v58 = vmul.f32 %v1920_v61, %v1903_v57 }
 0x4b8   : > { %v8620_v22 = vmax.f32 %v1790_v60, 1e-15  ;;  %v1930_v59 = vsel %vm1929_vm8, %v7151_v31, %v1926_v28  ;;  %v8628_v4 = vpop.eup %7156  ;;  %vm1774_vm9 = vcmp.eq.f32.partialorder %v8536_v48, inf  ;;  %vm1776_vm11 = vcmp.eq.f32.partialorder %v8536_v48, 0.0 }
 0x4b9   : > { %7158 = vrcp.f32 %v1685_v0  ;;  %v1772_v62 = vmul.f32 %v7153_v7, %v1771_v21  ;;  %v1935_v36 = vsel %vm8584_vm4, %v1934_v5, %v1930_v59  ;;  %v8632_v40 = vsel %vm1983_vm7, 0.0, %v1921_v58  ;;  %v8644_v29 = vpop.xlane.xlu0 %759 }
 0x4ba   : > { %7160 = vrcp.f32 %v8620_v22  ;;  %v1936_v3 = vmul.f32 %v1935_v36, %v1904_v49  ;;  %v6942_v11 = vclamps-f32 %v1685_v0, 0.9999999  ;;  %vm1984_vm12 = vcmp.eq.f32.partialorder %v1976_v56, 0.0 }
 0x4bb   : > { %v1773_v52 = vmul.f32 %v1772_v62, %v8536_v48  ;;  %v1999_v18 = vmul.f32 %v8632_v40, %v8632_v40  ;;  %v1826_v6 = vmul.f32 %v8628_v4, %v8590_v34  ;;  %v1849_v41 = vand.u32 2147483647, %v1685_v0 }
 0x4bc   : > { %v1866_v31 = vadd.f32 1.0, %v6942_v11  ;;  %v1878_v8 = vsub.f32 1.0, %v6942_v11  ;;  %v8642_v1 = vsel %vm1984_vm12, 0.0, %v1936_v3  ;;  %v1851_v43 = vand.u32 2147483648, %v1685_v0 }
 0x4bd   : > { %v1775_v13 = vsel %vm1774_vm9, %v8536_v48, %v1773_v52  ;;  %v2003_v39 = vsel %vm476_vm0, %v1999_v18, 0.0  ;;  %v2000_v5 = vmul.f32 %v8642_v1, %v8642_v1  ;;  %v1827_v33 = vsub.f32 1.0, %v1826_v6 }
 0x4be   : > { %v1778_v25 = vsel %vm1776_vm11, %v1777_v12, %v1775_v13  ;;  %7162 = vlog2.f32 %v1866_v31  ;;  %2004 = vadd.xlane.f32.xlu1 %v2003_v39  ;;  %v6941_v51 = vclamps-f32 %v8590_v34, 0.9999999  ;;  %vm1845_vm15 = vweird.f32 %v1685_v0 }
 0x4bf   : > { %v7159_v7 = vpop.eup %7158  ;;  %v8640_v26 = vmax.f32 %v1778_v25, 1e-15  ;;  %7164 = vlog2.f32 %v1878_v8  ;;  %v2006_v63 = vsel %vm476_vm0, %v2000_v5, 0.0  ;;  %v1828_v23 = vmul.f32 %v8628_v4, %v1827_v33 }
 0x4c0   : > { %v8648_v37 = vpop.eup %7160  ;;  %v1841_v48 = vmul.f32 %v7159_v7, %v1685_v0  ;;  %7166 = vrsqrt.f32 %v8644_v29  ;;  %vm1846_vm13 = vweird.f32 %v7159_v7  ;;  %2007 = vadd.xlane.f32.xlu2 %v2006_v63  ;;  %v1865_v42 = vadd.f32 1.0, %v6941_v51 }
 0x4c1   : > { %7168 = vrcp.f32 %v8640_v26  ;;  %v1953_v57 = vmul.f32 %v8648_v37, %v8620_v22  ;;  %vm1847_vm2 = vmor %vm1845_vm15, %vm1846_vm13  ;;  %vm1850_vm3 = vcmp.eq.f32.partialorder %v1849_v41, 8.507059e+37  ;;  %v1852_v30 = vor.u32 1.1754944e-38, %v1851_v43 }
 0x4c2   : > { %v1842_v10 = vsub.f32 1.0, %v1841_v48  ;;  %v1877_v32 = vsub.f32 1.0, %v6941_v51  ;;  %vm1831_vm4 = vweird.f32 %v8628_v4  ;;  %7170 = vlog2.f32 %v1865_v42  ;;  %v1982_v42 = vpop.xlane.xlu2 %1981 }
 0x4c3   : > { %v1954_v21 = vsub.f32 1.0, %v1953_v57  ;;  %v1829_v61 = vadd.f32 %v8628_v4, %v1828_v23  ;;  %v1836_v36 = vand.u32 2147483648, %v8590_v34  ;;  %vm1830_vm5 = vweird.f32 %v8590_v34 }
 0x4c4   : > { %v1843_v46 = vmul.f32 %v7159_v7, %v1842_v10  ;;  %v7163_v35 = vpop.eup %7162  ;;  %7172 = vlog2.f32 %v1877_v32  ;;  %v1834_v3 = vand.u32 2147483647, %v8590_v34  ;;  %vm1832_vm6 = vmor %vm1830_vm5, %vm1831_vm4  ;;  %vm1958_vm8 = vweird.f32 %v8648_v37 }
 0x4c5   : > { %v7165_v53 = vpop.eup %7164  ;;  %v1874_v19 = vmul.f32 0.6931472, %v7163_v35  ;;  %v1955_v56 = vmul.f32 %v8648_v37, %v1954_v21  ;;  %v1833_v13 = vsel %vm1832_vm6, %v8628_v4, %v1829_v61  ;;  %v1837_v25 = vor.u32 1.1754944e-38, %v1836_v36 }
 0x4c6   : > { %v1844_v27 = vadd.f32 %v7159_v7, %v1843_v46  ;;  %v1886_v38 = vmul.f32 0.6931472, %v7165_v53  ;;  %v7167_v28 = vpop.eup %7166  ;;  %vm1835_vm7 = vcmp.eq.f32.partialorder %v1834_v3, 8.507059e+37  ;;  %v1963_v39 = vand.u32 2147483648, %v8620_v22 }
 0x4c7   : > { %v8662_v15 = vpop.eup %7168  ;;  %v765_v0 = vmul.f32 %v7167_v28, %v8644_v29  ;;  %v1956_v6 = vadd.f32 %v8648_v37, %v1955_v56  ;;  %v8684_v48 = vsel %vm1835_vm7, %v1837_v25, %v1833_v13  ;;  %vm1957_vm9 = vweird.f32 %v8620_v22 }
 0x4c8   : > { %v1848_v60 = vsel %vm1847_vm2, %v7159_v7, %v1844_v27  ;;  %v1890_v59 = vsub.f32 %v1874_v19, %v1886_v38  ;;  %v1938_v31 = vmul.f32 %v8662_v15, %v8640_v26  ;;  %v7171_v8 = vpop.eup %7170  ;;  %v1961_v5 = vand.u32 2147483647, %v8620_v22  ;;  %vm8689_vm11 = vmor %vm1957_vm9, %vm1958_vm8 }
 0x4c9   : > { %v8664_v49 = vsel %vm1850_vm3, %v1852_v30, %v1848_v60  ;;  %v766_v52 = vmul.f32 %v7167_v28, %v765_v0  ;;  %v1872_v7 = vmul.f32 0.6931472, %v7171_v8  ;;  %v1839_v46 = vmul.f32 %v8684_v48, %v8640_v26 }
 0x4ca   : > { %v1854_v62 = vmul.f32 %v8664_v49, %v8620_v22  ;;  %v8671_v58 = vmul.f32 0.5, %v1890_v59  ;;  %v7173_v34 = vpop.eup %7172  ;;  %v1939_v41 = vsub.f32 1.0, %v1938_v31  ;;  %v1960_v63 = vsel %vm8689_vm11, %v8648_v37, %v1956_v6 }
 0x4cb   : > { %v767_v12 = vmul.f32 0.5, %v766_v52  ;;  %v1884_v4 = vmul.f32 0.6931472, %v7173_v34  ;;  %vm771_vm12 = vcmp.eq.f32.partialorder %v8644_v29, inf  ;;  %vm773_vm13 = vcmp.eq.f32.partialorder %v8644_v29, 0.0 }
 0x4cc   : > { %v1898_v11 = vmul.f32 %v8671_v58, %v1854_v62  ;;  %v774_v22 = vand.u32 2147483648, %v8644_v29  ;;  %v1964_v35 = vor.u32 1.1754944e-38, %v1963_v39  ;;  %v1940_v27 = vmul.f32 %v8662_v15, %v1939_v41 }
 0x4cd   : > { %v768_v18 = vsub.f32 1.5, %v767_v12  ;;  %v1889_v57 = vsub.f32 %v1872_v7, %v1884_v4  ;;  %vm1962_vm15 = vcmp.eq.f32.partialorder %v1961_v5, 8.507059e+37  ;;  %vm1986_vm2 = vcmp.eq.f32.partialorder %v1982_v42, 0.0 }
 0x4ce   : > { %7174 = vtanh.f32 %v1898_v11  ;;  %v1965_v37 = vsel %vm1962_vm15, %v1964_v35, %v1960_v63  ;;  %v1941_v60 = vadd.f32 %v8662_v15, %v1940_v27  ;;  %vm1943_vm3 = vweird.f32 %v8662_v15  ;;  %v1979_v11 = vpop.xlane.xlu1 %1978 }
 0x4cf   : > { %v769_v10 = vmul.f32 %v7167_v28, %v768_v18  ;;  %v8703_v53 = vmul.f32 0.5, %v1889_v57  ;;  %v1948_v21 = vand.u32 2147483648, %v8640_v26  ;;  %vm1942_vm4 = vweird.f32 %v8640_v26 }
 0x4d0   : > { %vm1944_vm5 = vmor %vm1942_vm4, %vm1943_vm3  ;;  %vm1985_vm7 = vcmp.eq.f32.partialorder %v1979_v11, 0.0 }
 0x4d1   : > { %v770_v33 = vmul.f32 %v769_v10, %v8644_v29  ;;  %v1897_v32 = vmul.f32 %v8703_v53, %v1839_v46  ;;  %v1945_v0 = vsel %vm1944_vm5, %v8662_v15, %v1941_v60  ;;  %v1949_v62 = vor.u32 1.1754944e-38, %v1948_v21 }
 0x4d3   : > { %v772_v23 = vsel %vm771_vm12, %v8644_v29, %v770_v33 }
 0x4d4   : > { %v7175_v51 = vpop.eup %7174  ;;  %v775_v30 = vsel %vm773_vm13, %v774_v22, %v772_v23 }
 0x4d5   : > { %v1906_v19 = vmul.f32 %v7175_v51, %v8452_v47  ;;  %v788_v38 = vmax.f32 %v775_v30, 1e-15  ;;  %v1946_v47 = vand.u32 2147483647, %v8640_v26 }
 0x4d7   : > { %v1966_v28 = vmul.f32 %v1965_v37, %v1906_v19  ;;  %7176 = vrcp.f32 %v788_v38  ;;  %vm1947_vm6 = vcmp.eq.f32.partialorder %v1946_v47, 8.507059e+37  ;;  %v803_v31 = vand.u32 2147483648, %v788_v38 }
 0x4d8   : > { %7178 = vtanh.f32 %v1897_v32  ;;  %v1950_v56 = vsel %vm1947_vm6, %v1949_v62, %v1945_v0  ;;  %v801_v25 = vand.u32 2147483647, %v788_v38  ;;  %vm797_vm9 = vweird.f32 %v788_v38 }
 0x4d9   : > { %v8710_v29 = vsel %vm1986_vm2, 0.0, %v1966_v28  ;;  %v804_v34 = vor.u32 1.1754944e-38, %v803_v31  ;;  %vm790_vm13 = vcmp.gt.f32.partialorder %v788_v38, 0.996 }
 0x4da   : > { %v2002_v59 = vmul.f32 %v8710_v29, %v8710_v29  ;;  %vm802_vm12 = vcmp.eq.f32.partialorder %v801_v25, 8.507059e+37 }
 0x4dc   : > { %v2012_v61 = vsel %vm476_vm0, %v2002_v59, 0.0 }
 0x4dd   : > { %2013 = vadd.xlane.f32.xlu1 %v2012_v61  ;;  %v7177_v36 = vpop.eup %7176 }
 0x4de   : > { %v7179_v52 = vpop.eup %7178  ;;  %v793_v3 = vmul.f32 %v7177_v36, %v788_v38  ;;  %vm798_vm8 = vweird.f32 %v7177_v36 }
 0x4df   : > { %v1905_v12 = vmul.f32 %v7179_v52, %v8442_v2  ;;  %vm799_vm11 = vmor %vm797_vm9, %vm798_vm8 }
 0x4e0   : > { %v794_v13 = vsub.f32 1.0, %v793_v3 }
 0x4e1   : > { %v1951_v26 = vmul.f32 %v1950_v56, %v1905_v12 }
 0x4e2   : > { %v795_v8 = vmul.f32 %v7177_v36, %v794_v13 }
 0x4e3   : > { %v8720_v15 = vsel %vm1985_vm7, 0.0, %v1951_v26 }
 0x4e4   : > { %v2001_v18 = vmul.f32 %v8720_v15, %v8720_v15  ;;  %v796_v7 = vadd.f32 %v7177_v36, %v795_v8 }
 0x4e6   : > { %v2009_v6 = vsel %vm476_vm0, %v2001_v18, 0.0  ;;  %v800_v39 = vsel %vm799_vm11, %v7177_v36, %v796_v7 }
 0x4e7   : > { %2010 = vadd.xlane.f32.xlu0 %v2009_v6  ;;  %v805_v2 = vsel %vm802_vm12, %v804_v34, %v800_v39 }
 0x4e8   : > { %v806_v10 = vmul.f32 0.996, %v805_v2 }
 0x4ea   : > { %v822_v4 = vmul.f32 %v806_v10, %v8471_v14 }
 0x4ec   : > { %v8727_v41 = vsel %vm790_vm13, %v822_v4, %v8471_v14 }
 0x4ed   : > { %v1452_v5 = vmul.f32 %v8727_v41, %v8727_v41 }
 0x4ef   : > { %v8732_v43 = vsel %vm476_vm0, %v1452_v5, 0.0 }
 0x4f0   : > { %v1455_v33 = vrot.slane %v8732_v43, 4 }
 0x4f2   : > { %v1456_v46 = vadd.f32 %v1455_v33, %v8732_v43 }
 0x4f4   : > { %v1457_v57 = vrot.slane %v1456_v46, 2 }
 0x4f6   : > { %v1458_v63 = vadd.f32 %v1457_v57, %v1456_v46 }
 0x4f8   : > { %v1459_v22 = vrot.slane %v1458_v63, 1 }
 0x4fa   : > { %v1460_v51 = vadd.f32 %v1459_v22, %v1458_v63 }
 0x4fc   : > { %7180 = vrsqrt.f32 %v1460_v51  ;;  %vm1475_vm15 = vcmp.eq.f32.partialorder %v1460_v51, inf  ;;  %v1478_v37 = vand.u32 2147483648, %v1460_v51  ;;  %vm1477_vm2 = vcmp.eq.f32.partialorder %v1460_v51, 0.0 }
 0x502   : > { %v7181_v35 = vpop.eup %7180 }
 0x503   : > { %v1469_v23 = vmul.f32 %v7181_v35, %v1460_v51 }
 0x505   : > { %v1470_v27 = vmul.f32 %v7181_v35, %v1469_v23 }
 0x507   : > { %v1471_v14 = vmul.f32 0.5, %v1470_v27 }
 0x509   : > { %v1472_v19 = vsub.f32 1.5, %v1471_v14 }
 0x50b   : > { %v1473_v42 = vmul.f32 %v7181_v35, %v1472_v19 }
 0x50d   : > { %v1474_v30 = vmul.f32 %v1473_v42, %v1460_v51 }
 0x50f   : > { %v1476_v38 = vsel %vm1475_vm15, %v1460_v51, %v1474_v30 }
 0x510   : > { %v1479_v32 = vsel %vm1477_vm2, %v1478_v37, %v1476_v38 }
 0x511   : > { %v1492_v28 = vmax.f32 %v1479_v32, 1e-15 }
 0x513   : > { %7182 = vrcp.f32 %v1492_v28  ;;  %v1507_v59 = vand.u32 2147483648, %v1492_v28  ;;  %v1505_v61 = vand.u32 2147483647, %v1492_v28  ;;  %vm1501_vm4 = vweird.f32 %v1492_v28 }
 0x514   : > { %vm1494_vm7 = vcmp.gt.f32.partialorder %v1492_v28, 0.996 }
 0x515   : > { %v1508_v36 = vor.u32 1.1754944e-38, %v1507_v59  ;;  %vm1506_vm6 = vcmp.eq.f32.partialorder %v1505_v61, 8.507059e+37 }
 0x519   : > { %v7183_v60 = vpop.eup %7182 }
 0x51a   : > { %v1497_v21 = vmul.f32 %v7183_v60, %v1492_v28  ;;  %vm1502_vm3 = vweird.f32 %v7183_v60 }
 0x51b   : > { %vm1503_vm5 = vmor %vm1501_vm4, %vm1502_vm3 }
 0x51c   : > { %v1498_v47 = vsub.f32 1.0, %v1497_v21 }
 0x51e   : > { %v1499_v0 = vmul.f32 %v7183_v60, %v1498_v47 }
 0x520   : > { %v1500_v62 = vadd.f32 %v7183_v60, %v1499_v0 }
 0x522   : > { %v1504_v52 = vsel %vm1503_vm5, %v7183_v60, %v1500_v62 }
 0x523   : > { %v1509_v3 = vsel %vm1506_vm6, %v1508_v36, %v1504_v52 }
 0x524   : > { %v1510_v56 = vmul.f32 0.996, %v1509_v3 }
 0x526   : > { %v1526_v12 = vmul.f32 %v1510_v56, %v8727_v41 }
 0x527   : > { %v763_v11 = vpop.xlane.xlu0 %762 }
 0x528   : > { %7184 = vrsqrt.f32 %v763_v11  ;;  %v8738_v13 = vsel %vm1494_vm7, %v1526_v12, %v8727_v41  ;;  %vm783_vm8 = vcmp.eq.f32.partialorder %v763_v11, inf  ;;  %v786_v22 = vand.u32 2147483648, %v763_v11 }
 0x529   : > { %v2319_v26 = vmul.f32 %v8738_v13, %v8738_v13  ;;  %vm785_vm9 = vcmp.eq.f32.partialorder %v763_v11, 0.0 }
 0x52b   : > { %v8743_v31 = vsel %vm476_vm0, %v2319_v26, 0.0 }
 0x52c   : > { %v2322_v8 = vrot.slane %v8743_v31, 4 }
 0x52e   : > { %v7185_v25 = vpop.eup %7184  ;;  %v2323_v7 = vadd.f32 %v2322_v8, %v8743_v31 }
 0x52f   : > { %v777_v18 = vmul.f32 %v7185_v25, %v763_v11 }
 0x530   : > { %v2324_v6 = vrot.slane %v2323_v7, 2 }
 0x531   : > { %v778_v34 = vmul.f32 %v7185_v25, %v777_v18  ;;  %v2005_v10 = vpop.xlane.xlu1 %2004 }
 0x532   : > { %v2325_v2 = vadd.f32 %v2324_v6, %v2323_v7  ;;  %7186 = vrsqrt.f32 %v2005_v10  ;;  %vm2022_vm11 = vcmp.eq.f32.partialorder %v2005_v10, inf  ;;  %v2025_v3 = vand.u32 2147483648, %v2005_v10 }
 0x533   : > { %v779_v39 = vmul.f32 0.5, %v778_v34  ;;  %v2008_v46 = vpop.xlane.xlu2 %2007  ;;  %vm2024_vm12 = vcmp.eq.f32.partialorder %v2005_v10, 0.0 }
 0x534   : > { %v2326_v5 = vrot.slane %v2325_v2, 1  ;;  %7188 = vrsqrt.f32 %v2008_v46  ;;  %vm2034_vm13 = vcmp.eq.f32.partialorder %v2008_v46, inf  ;;  %v2037_v7 = vand.u32 2147483648, %v2008_v46 }
 0x535   : > { %v780_v4 = vsub.f32 1.5, %v779_v39  ;;  %vm2036_vm15 = vcmp.eq.f32.partialorder %v2008_v46, 0.0 }
 0x536   : > { %v2327_v63 = vadd.f32 %v2326_v5, %v2325_v2 }
 0x537   : > { %v781_v33 = vmul.f32 %v7185_v25, %v780_v4 }
 0x538   : > { %v7187_v51 = vpop.eup %7186  ;;  %7190 = vrsqrt.f32 %v2327_v63  ;;  %vm2342_vm2 = vcmp.eq.f32.partialorder %v2327_v63, inf  ;;  %vm2344_vm4 = vcmp.eq.f32.partialorder %v2327_v63, 0.0 }
 0x539   : > { %v782_v57 = vmul.f32 %v781_v33, %v763_v11  ;;  %v2016_v27 = vmul.f32 %v7187_v51, %v2005_v10  ;;  %v2345_v33 = vand.u32 2147483648, %v2327_v63 }
 0x53a   : > { %v7189_v19 = vpop.eup %7188 }
 0x53b   : > { %v784_v35 = vsel %vm783_vm8, %v763_v11, %v782_v57  ;;  %v2017_v42 = vmul.f32 %v7187_v51, %v2016_v27  ;;  %v2028_v30 = vmul.f32 %v7189_v19, %v2008_v46 }
 0x53c   : > { %v787_v23 = vsel %vm785_vm9, %v786_v22, %v784_v35 }
 0x53d   : > { %v8747_v14 = vmax.f32 %v787_v23, 1e-15  ;;  %v2018_v37 = vmul.f32 0.5, %v2017_v42  ;;  %v2029_v32 = vmul.f32 %v7189_v19, %v2028_v30 }
 0x53e   : > { %v7191_v38 = vpop.eup %7190 }
 0x53f   : > { %7192 = vrcp.f32 %v8747_v14  ;;  %v2019_v28 = vsub.f32 1.5, %v2018_v37  ;;  %v2336_v60 = vmul.f32 %v7191_v38, %v2327_v63  ;;  %v2030_v21 = vmul.f32 0.5, %v2029_v32 }
 0x540   : > { %v816_v22 = vand.u32 2147483647, %v8747_v14  ;;  %vm812_vm5 = vweird.f32 %v8747_v14  ;;  %vm791_vm8 = vcmp.gt.f32.partialorder %v8747_v14, 0.996 }
 0x541   : > { %v2020_v47 = vmul.f32 %v7187_v51, %v2019_v28  ;;  %v2337_v59 = vmul.f32 %v7191_v38, %v2336_v60  ;;  %v2031_v61 = vsub.f32 1.5, %v2030_v21 }
 0x542   : > { %vm817_vm7 = vcmp.eq.f32.partialorder %v816_v22, 8.507059e+37 }
 0x543   : > { %v2021_v36 = vmul.f32 %v2020_v47, %v2005_v10  ;;  %v2338_v52 = vmul.f32 0.5, %v2337_v59  ;;  %v2032_v56 = vmul.f32 %v7189_v19, %v2031_v61 }
 0x545   : > { %v7193_v0 = vpop.eup %7192  ;;  %v2023_v12 = vsel %vm2022_vm11, %v2005_v10, %v2021_v36  ;;  %v2339_v26 = vsub.f32 1.5, %v2338_v52  ;;  %v2033_v25 = vmul.f32 %v2032_v56, %v2008_v46  ;;  %v818_v10 = vand.u32 2147483648, %v8747_v14 }
 0x546   : > { %v808_v62 = vmul.f32 %v7193_v0, %v8747_v14  ;;  %v2026_v8 = vsel %vm2024_vm12, %v2025_v3, %v2023_v12  ;;  %vm813_vm3 = vweird.f32 %v7193_v0 }
 0x547   : > { %v8751_v18 = vmax.f32 %v2026_v8, 1e-15  ;;  %v2340_v34 = vmul.f32 %v7191_v38, %v2339_v26  ;;  %v2035_v39 = vsel %vm2034_vm13, %v2008_v46, %v2033_v25  ;;  %vm814_vm6 = vmor %vm812_vm5, %vm813_vm3  ;;  %v819_v23 = vor.u32 1.1754944e-38, %v818_v10 }
 0x548   : > { %v809_v11 = vsub.f32 1.0, %v808_v62  ;;  %v2038_v2 = vsel %vm2036_vm15, %v2037_v7, %v2035_v39 }
 0x549   : > { %7194 = vrcp.f32 %v8751_v18  ;;  %v8754_v4 = vmax.f32 %v2038_v2, 1e-15  ;;  %v2341_v5 = vmul.f32 %v2340_v34, %v2327_v63  ;;  %v2080_v37 = vand.u32 2147483647, %v8751_v18 }
 0x54a   : > { %v810_v6 = vmul.f32 %v7193_v0, %v809_v11  ;;  %v2082_v60 = vand.u32 2147483648, %v8751_v18  ;;  %vm2076_vm9 = vweird.f32 %v8751_v18  ;;  %vm2067_vm13 = vcmp.gt.f32.partialorder %v8751_v18, 0.996 }
 0x54b   : > { %7196 = vrcp.f32 %v8754_v4  ;;  %v2343_v51 = vsel %vm2342_vm2, %v2327_v63, %v2341_v5  ;;  %vm8773_vm12 = vcmp.eq.f32.partialorder %v2080_v37, 8.507059e+37  ;;  %v2095_v11 = vand.u32 2147483647, %v8754_v4 }
 0x54c   : > { %v811_v57 = vadd.f32 %v7193_v0, %v810_v6  ;;  %v2346_v46 = vsel %vm2344_vm4, %v2345_v33, %v2343_v51  ;;  %v2083_v26 = vor.u32 1.1754944e-38, %v2082_v60  ;;  %v2097_v39 = vand.u32 2147483648, %v8754_v4 }
 0x54d   : > { %v8763_v19 = vmax.f32 %v2346_v46, 1e-15  ;;  %vm2091_vm2 = vweird.f32 %v8754_v4  ;;  %vm8808_vm5 = vcmp.eq.f32.partialorder %v2095_v11, 8.507059e+37 }
 0x54e   : > { %v815_v42 = vsel %vm814_vm6, %v7193_v0, %v811_v57 }
 0x54f   : > { %v7195_v27 = vpop.eup %7194  ;;  %v820_v38 = vsel %vm817_vm7, %v819_v23, %v815_v42  ;;  %v6947_v63 = vclamps-f32 %v8763_v19, 0.9999999  ;;  %v2392_v33 = vand.u32 2147483647, %v8763_v19  ;;  %vm2068_vm7 = vcmp.gt.f32.partialorder %v8754_v4, 0.996 }
 0x550   : > { %v8759_v35 = vpop.xlane.xlu1 %2013  ;;  %v2072_v30 = vmul.f32 %v7195_v27, %v8751_v18  ;;  %v821_v21 = vmul.f32 0.996, %v820_v38  ;;  %vm2077_vm11 = vweird.f32 %v7195_v27 }
 0x551   : > { %7198 = vrsqrt.f32 %v8759_v35  ;;  %v7197_v32 = vpop.eup %7196  ;;  %v2365_v47 = vadd.f32 1.0, %v6947_v63  ;;  %v2371_v59 = vsub.f32 1.0, %v6947_v63  ;;  %vm8790_vm15 = vmor %vm2076_vm9, %vm2077_vm11  ;;  %vm2058_vm4 = vcmp.eq.f32.partialorder %v8759_v35, inf }
 0x552   : > { %7200 = vrcp.f32 %v8763_v19  ;;  %v2073_v28 = vsub.f32 1.0, %v2072_v30  ;;  %v2087_v0 = vmul.f32 %v7197_v32, %v8754_v4  ;;  %v823_v52 = vmul.f32 %v821_v21, %v8588_v20 }
 0x553   : > { %7202 = vlog2.f32 %v2365_v47  ;;  %vm2092_vm3 = vweird.f32 %v7197_v32  ;;  %v2061_v10 = vand.u32 2147483648, %v8759_v35  ;;  %vm2060_vm6 = vcmp.eq.f32.partialorder %v8759_v35, 0.0 }
 0x554   : > { %v2074_v62 = vmul.f32 %v7195_v27, %v2073_v28  ;;  %v2088_v56 = vsub.f32 1.0, %v2087_v0  ;;  %7204 = vlog2.f32 %v2371_v59  ;;  %v8784_v8 = vsel %vm791_vm8, %v823_v52, %v8588_v20  ;;  %vm2093_vm9 = vmor %vm2091_vm2, %vm2092_vm3 }
 0x555   : > { %v1453_v2 = vmul.f32 %v8784_v8, %v8784_v8  ;;  %v2098_v30 = vor.u32 1.1754944e-38, %v2097_v39  ;;  %vm2388_vm11 = vweird.f32 %v8763_v19 }
 0x556   : > { %v2075_v12 = vadd.f32 %v7195_v27, %v2074_v62  ;;  %v2089_v6 = vmul.f32 %v7197_v32, %v2088_v56 }
 0x557   : > { %v7199_v61 = vpop.eup %7198  ;;  %v8821_v37 = vsel %vm476_vm0, %v1453_v2, 0.0 }
 0x558   : > { %v2052_v3 = vmul.f32 %v7199_v61, %v8759_v35  ;;  %v8786_v25 = vpop.eup %7200  ;;  %v2079_v20 = vsel %vm8790_vm15, %v7195_v27, %v2075_v12  ;;  %v2090_v23 = vadd.f32 %v7197_v32, %v2089_v6  ;;  %v1462_v62 = vrot.slane %v8821_v37, 4 }
 0x559   : > { %v2384_v14 = vmul.f32 %v8786_v25, %v8763_v19  ;;  %v2084_v51 = vsel %vm8773_vm12, %v2083_v26, %v2079_v20  ;;  %v7203_v27 = vpop.eup %7202  ;;  %vm2389_vm8 = vweird.f32 %v8786_v25 }
 0x55a   : > { %v2053_v7 = vmul.f32 %v7199_v61, %v2052_v3  ;;  %v8797_v5 = vpop.xlane.xlu0 %2010  ;;  %v2085_v42 = vmul.f32 0.996, %v2084_v51  ;;  %v7205_v38 = vpop.eup %7204  ;;  %v2368_v28 = vmul.f32 0.6931472, %v7203_v27  ;;  %v2094_v21 = vsel %vm2093_vm9, %v7197_v32, %v2090_v23  ;;  %vm8843_vm12 = vmor %vm2388_vm11, %vm2389_vm8 }
 0x55b   : > { %7206 = vrsqrt.f32 %v8797_v5  ;;  %v2385_v46 = vsub.f32 1.0, %v2384_v14  ;;  %v2374_v59 = vmul.f32 0.6931472, %v7205_v38  ;;  %v2099_v0 = vsel %vm8808_vm5, %v2098_v30, %v2094_v21 }
 0x55c   : > { %v2054_v22 = vmul.f32 0.5, %v2053_v7  ;;  %v2131_v47 = vmul.f32 %v2085_v42, %v8632_v40  ;;  %v2394_v3 = vand.u32 2147483648, %v8763_v19  ;;  %v2100_v56 = vmul.f32 0.996, %v2099_v0 }
 0x55d   : > { %v2386_v60 = vmul.f32 %v8786_v25, %v2385_v46  ;;  %v2377_v32 = vsub.f32 %v2368_v28, %v2374_v59  ;;  %v1463_v26 = vadd.f32 %v1462_v62, %v8821_v37  ;;  %vm2046_vm15 = vcmp.eq.f32.partialorder %v8797_v5, inf }
 0x55e   : > { %v2055_v63 = vsub.f32 1.5, %v2054_v22  ;;  %v8833_v12 = vsel %vm2067_vm13, %v2131_v47, %v8632_v40  ;;  %vm8847_vm13 = vcmp.eq.f32.partialorder %v2392_v33, 8.507059e+37  ;;  %v2132_v39 = vmul.f32 %v2100_v56, %v8642_v1 }
 0x55f   : > { %v2387_v52 = vadd.f32 %v8786_v25, %v2386_v60  ;;  %v2147_v34 = vmul.f32 %v8833_v12, %v8833_v12  ;;  %v2379_v18 = vmul.f32 0.5, %v2377_v32  ;;  %v1464_v2 = vrot.slane %v1463_v26, 2 }
 0x560   : > { %v2056_v36 = vmul.f32 %v7199_v61, %v2055_v63  ;;  %v2395_v22 = vor.u32 1.1754944e-38, %v2394_v3  ;;  %v2049_v60 = vand.u32 2147483648, %v8797_v5  ;;  %vm2048_vm2 = vcmp.eq.f32.partialorder %v8797_v5, 0.0 }
 0x561   : > { %v7207_v11 = vpop.eup %7206  ;;  %v2391_v19 = vsel %vm8843_vm12, %v8786_v25, %v2387_v52  ;;  %v2151_v57 = vsel %vm476_vm0, %v2147_v34, 0.0  ;;  %v2381_v51 = vmul.f32 %v2379_v18, %v8738_v13  ;;  %v8865_v25 = vsel %vm2068_vm7, %v2132_v39, %v8642_v1 }
 0x562   : > { %v2040_v7 = vmul.f32 %v7207_v11, %v8797_v5  ;;  %v2057_v61 = vmul.f32 %v2056_v36, %v8759_v35  ;;  %2152 = vadd.xlane.f32.xlu2 %v2151_v57  ;;  %v1465_v46 = vadd.f32 %v1464_v2, %v1463_v26  ;;  %v2396_v42 = vsel %vm8847_vm13, %v2395_v22, %v2391_v19 }
 0x563   : > { %v2148_v30 = vmul.f32 %v8865_v25, %v8865_v25  ;;  %v2397_v38 = vmul.f32 %v2396_v42, %v2381_v51 }
 0x564   : > { %v2041_v20 = vmul.f32 %v7207_v11, %v2040_v7  ;;  %v2059_v14 = vsel %vm2058_vm4, %v8759_v35, %v2057_v61  ;;  %v1466_v35 = vrot.slane %v1465_v46, 1 }
 0x565   : > { %v2062_v33 = vsel %vm2060_vm6, %v2061_v10, %v2059_v14  ;;  %v2154_v63 = vsel %vm476_vm0, %v2148_v30, 0.0  ;;  %6949 = vmatpush.xpose.msk.msra.mxu0 %vm476_vm0, %v2397_v38 }
 0x566   : > { %v2042_v23 = vmul.f32 0.5, %v2041_v20  ;;  %v2066_v27 = vmax.f32 %v2062_v33, 1e-15  ;;  %2155 = vadd.xlane.f32.xlu0 %v2154_v63  ;;  %v1467_v1 = vadd.f32 %v1466_v35, %v1465_v46 }
 0x568   : > { %v2043_v10 = vsub.f32 1.5, %v2042_v23  ;;  %7208 = vrcp.f32 %v2066_v27  ;;  %v2127_v3 = vand.u32 2147483648, %v2066_v27  ;;  %vm2121_vm4 = vweird.f32 %v2066_v27 }
 0x569   : > { %7210 = vrsqrt.f32 %v1467_v1  ;;  %vm2070_vm7 = vcmp.gt.f32.partialorder %v2066_v27, 0.996  ;;  %vm1487_vm9 = vcmp.eq.f32.partialorder %v1467_v1, inf  ;;  %v1490_v42 = vand.u32 2147483648, %v1467_v1 }
 0x56a   : > { %v2044_v4 = vmul.f32 %v7207_v11, %v2043_v10  ;;  %v2125_v11 = vand.u32 2147483647, %v2066_v27  ;;  %v2128_v61 = vor.u32 1.1754944e-38, %v2127_v3  ;;  %vm1489_vm12 = vcmp.eq.f32.partialorder %v1467_v1, 0.0 }
 0x56c   : > { %v2045_v28 = vmul.f32 %v2044_v4, %v8797_v5  ;;  %vm2126_vm6 = vcmp.eq.f32.partialorder %v2125_v11, 8.507059e+37 }
 0x56e   : > { %v7209_v21 = vpop.eup %7208  ;;  %v2047_v47 = vsel %vm2046_vm15, %v8797_v5, %v2045_v28 }
 0x56f   : > { %v2050_v59 = vsel %vm2048_vm2, %v2049_v60, %v2047_v47  ;;  %v2117_v0 = vmul.f32 %v7209_v21, %v2066_v27  ;;  %v7211_v36 = vpop.eup %7210  ;;  %vm2122_vm3 = vweird.f32 %v7209_v21 }
 0x570   : > { %v2065_v62 = vmax.f32 %v2050_v59, 1e-15  ;;  %v1481_v32 = vmul.f32 %v7211_v36, %v1467_v1  ;;  %vm2123_vm5 = vmor %vm2121_vm4, %vm2122_vm3 }
 0x571   : > { %v2118_v52 = vsub.f32 1.0, %v2117_v0 }
 0x572   : > { %7212 = vrcp.f32 %v2065_v62  ;;  %v1482_v7 = vmul.f32 %v7211_v36, %v1481_v32  ;;  %v2110_v57 = vand.u32 2147483647, %v2065_v62  ;;  %v2112_v22 = vand.u32 2147483648, %v2065_v62 }
 0x573   : > { %v2119_v56 = vmul.f32 %v7209_v21, %v2118_v52  ;;  %vm2106_vm11 = vweird.f32 %v2065_v62  ;;  %vm2069_vm2 = vcmp.gt.f32.partialorder %v2065_v62, 0.996 }
 0x574   : > { %v1483_v6 = vmul.f32 0.5, %v1482_v7  ;;  %v2113_v35 = vor.u32 1.1754944e-38, %v2112_v22  ;;  %vm2111_vm15 = vcmp.eq.f32.partialorder %v2110_v57, 8.507059e+37 }
 0x575   : > { %v2120_v26 = vadd.f32 %v7209_v21, %v2119_v56 }
 0x576   : > { %v1484_v39 = vsub.f32 1.5, %v1483_v6 }
 0x577   : > { %v2124_v34 = vsel %vm2123_vm5, %v7209_v21, %v2120_v26 }
 0x578   : > { %v7213_v5 = vpop.eup %7212  ;;  %v2129_v40 = vsel %vm2126_vm6, %v2128_v61, %v2124_v34  ;;  %v1485_v14 = vmul.f32 %v7211_v36, %v1484_v39 }
 0x579   : > { %v2102_v18 = vmul.f32 %v7213_v5, %v2065_v62  ;;  %v2130_v19 = vmul.f32 0.996, %v2129_v40  ;;  %vm2107_vm8 = vweird.f32 %v7213_v5 }
 0x57a   : > { %v1486_v46 = vmul.f32 %v1485_v14, %v1467_v1  ;;  %vm2108_vm13 = vmor %vm2106_vm11, %vm2107_vm8 }
 0x57b   : > { %v2103_v2 = vsub.f32 1.0, %v2102_v18  ;;  %v2134_v20 = vmul.f32 %v2130_v19, %v8710_v29 }
 0x57c   : > { %v1488_v38 = vsel %vm1487_vm9, %v1467_v1, %v1486_v46 }
 0x57d   : > { %v2104_v33 = vmul.f32 %v7213_v5, %v2103_v2  ;;  %v8880_v51 = vsel %vm2070_vm7, %v2134_v20, %v8710_v29  ;;  %v1491_v27 = vsel %vm1489_vm12, %v1490_v42, %v1488_v38 }
 0x57e   : > { %v2150_v23 = vmul.f32 %v8880_v51, %v8880_v51  ;;  %v1493_v29 = vmax.f32 %v1491_v27, 1e-15 }
 0x57f   : > { %v2105_v30 = vadd.f32 %v7213_v5, %v2104_v33 }
 0x580   : > { %v2160_v10 = vsel %vm476_vm0, %v2150_v23, 0.0  ;;  %7214 = vrcp.f32 %v1493_v29  ;;  %v1522_v52 = vand.u32 2147483648, %v1493_v29  ;;  %v1520_v56 = vand.u32 2147483647, %v1493_v29 }
 0x581   : > { %v2109_v63 = vsel %vm2108_vm13, %v7213_v5, %v2105_v30  ;;  %2161 = vadd.xlane.f32.xlu2 %v2160_v10  ;;  %vm1516_vm4 = vweird.f32 %v1493_v29  ;;  %vm1495_vm7 = vcmp.gt.f32.partialorder %v1493_v29, 0.996 }
 0x582   : > { %v2114_v4 = vsel %vm2111_vm15, %v2113_v35, %v2109_v63  ;;  %v1523_v62 = vor.u32 1.1754944e-38, %v1522_v52  ;;  %vm1521_vm6 = vcmp.eq.f32.partialorder %v1520_v56, 8.507059e+37 }
 0x583   : > { %v2115_v28 = vmul.f32 0.996, %v2114_v4 }
 0x585   : > { %v2133_v60 = vmul.f32 %v2115_v28, %v8720_v15 }
 0x586   : > { %v7215_v47 = vpop.eup %7214 }
 0x587   : > { %v8887_v21 = vsel %vm2069_vm2, %v2133_v60, %v8720_v15  ;;  %v1512_v0 = vmul.f32 %v7215_v47, %v1493_v29  ;;  %vm1517_vm3 = vweird.f32 %v7215_v47 }
 0x588   : > { %v2149_v1 = vmul.f32 %v8887_v21, %v8887_v21  ;;  %vm1518_vm5 = vmor %vm1516_vm4, %vm1517_vm3 }
 0x589   : > { %v1513_v36 = vsub.f32 1.0, %v1512_v0 }
 0x58a   : > { %v2157_v59 = vsel %vm476_vm0, %v2149_v1, 0.0 }
 0x58b   : > { %2158 = vadd.xlane.f32.xlu1 %v2157_v59  ;;  %v1514_v3 = vmul.f32 %v7215_v47, %v1513_v36  ;;  %v1541_v36 = vrot.slane %v8410_v55, 4 }
 0x58d   : > { %v1515_v11 = vadd.f32 %v7215_v47, %v1514_v3 }
 0x58f   : > { %v1519_v32 = vsel %vm1518_vm5, %v7215_v47, %v1515_v11 }
 0x590   : > { %v1524_v15 = vsel %vm1521_vm6, %v1523_v62, %v1519_v32 }
 0x591   : > { %v1525_v26 = vmul.f32 0.996, %v1524_v15  ;;  %v1542_v15 = vadd.f32 %v1541_v36, %v8410_v55 }
 0x593   : > { %v1527_v7 = vmul.f32 %v1525_v26, %v8784_v8 }
 0x595   : > { %v8894_v61 = vsel %vm1495_vm7, %v1527_v7, %v8784_v8 }
 0x596   : > { %v2320_v34 = vmul.f32 %v8894_v61, %v8894_v61 }
 0x598   : > { %v8899_v6 = vsel %vm476_vm0, %v2320_v34, 0.0 }
 0x599   : > { %v2329_v5 = vrot.slane %v8899_v6, 4 }
 0x59b   : > { %v2330_v40 = vadd.f32 %v2329_v5, %v8899_v6 }
 0x59d   : > { %v2331_v18 = vrot.slane %v2330_v40, 2 }
 0x59f   : > { %v2332_v19 = vadd.f32 %v2331_v18, %v2330_v40  ;;  %v1543_v40 = vrot.slane %v1542_v15, 2  ;;  %v1549_v18 = vadd.f32 %v8458_v50, %v8447_v45 }
 0x5a1   : > { %v2333_v39 = vrot.slane %v2332_v19, 1 }
 0x5a3   : > { %v2334_v2 = vadd.f32 %v2333_v39, %v2332_v19  ;;  %v1544_v19 = vadd.f32 %v1543_v40, %v1542_v15 }
 0x5a5   : > { %7216 = vrsqrt.f32 %v2334_v2  ;;  %vm2354_vm8 = vcmp.eq.f32.partialorder %v2334_v2, inf  ;;  %v2357_v42 = vand.u32 2147483648, %v2334_v2  ;;  %vm2356_vm9 = vcmp.eq.f32.partialorder %v2334_v2, 0.0 }
 0x5ab   : > { %v7217_v20 = vpop.eup %7216 }
 0x5ac   : > { %v2348_v14 = vmul.f32 %v7217_v20, %v2334_v2 }
 0x5ae   : > { %v2349_v57 = vmul.f32 %v7217_v20, %v2348_v14 }
 0x5b0   : > { %v2350_v22 = vmul.f32 0.5, %v2349_v57 }
 0x5b2   : > { %v2351_v33 = vsub.f32 1.5, %v2350_v22 }
 0x5b4   : > { %v2352_v46 = vmul.f32 %v7217_v20, %v2351_v33  ;;  %v1545_v20 = vrot.slane %v1544_v19, 1 }
 0x5b6   : > { %v2353_v23 = vmul.f32 %v2352_v46, %v2334_v2  ;;  %v8909_v22 = vadd.f32 %v1545_v20, %v1544_v19  ;;  %v453_v20 = vld [vmem:[%s11312_s3 + $0x18] sm:$0xff] }
 0x5b7   : > { %3049 = vmatpush.msrb.mxu0 %v453_v20 }
 0x5b8   : > { %v2355_v30 = vsel %vm2354_vm8, %v2334_v2, %v2353_v23  ;;  %v1550_v2 = vrot.slane %v1549_v18, 4 }
 0x5b9   : > { %v2358_v38 = vsel %vm2356_vm9, %v2357_v42, %v2355_v30 }
 0x5ba   : > { %v2360_v35 = vmax.f32 %v2358_v38, 1e-15  ;;  %v1551_v57 = vadd.f32 %v1550_v2, %v1549_v18 }
 0x5bc   : > { %v6948_v10 = vclamps-f32 %v2360_v35, 0.9999999  ;;  %7218 = vrcp.f32 %v2360_v35  ;;  %v2409_v3 = vand.u32 2147483648, %v2360_v35  ;;  %vm2403_vm12 = vweird.f32 %v2360_v35 }
 0x5bd   : > { %v2407_v11 = vand.u32 2147483647, %v2360_v35  ;;  %v1552_v42 = vrot.slane %v1551_v57, 2 }
 0x5be   : > { %v2366_v27 = vadd.f32 1.0, %v6948_v10  ;;  %v2372_v63 = vsub.f32 1.0, %v6948_v10  ;;  %v2410_v26 = vor.u32 1.1754944e-38, %v2409_v3 }
 0x5bf   : > { %vm2408_vm15 = vcmp.eq.f32.partialorder %v2407_v11, 8.507059e+37 }
 0x5c0   : > { %7220 = vlog2.f32 %v2366_v27 }
 0x5c1   : > { %7222 = vlog2.f32 %v2372_v63 }
 0x5c2   : > { %v7219_v29 = vpop.eup %7218 }
 0x5c3   : > { %v2399_v4 = vmul.f32 %v7219_v29, %v2360_v35  ;;  %vm2404_vm11 = vweird.f32 %v7219_v29  ;;  %v1553_v35 = vadd.f32 %v1552_v42, %v1551_v57  ;;  %v451_v57 = vld [vmem:[%s11312_s3 + $0x8] sm:$0xff] }
 0x5c4   : > { %vm2405_vm13 = vmor %vm2403_vm12, %vm2404_vm11 }
 0x5c5   : > { %v2400_v28 = vsub.f32 1.0, %v2399_v4 }
 0x5c6   : > { %v7221_v60 = vpop.eup %7220 }
 0x5c7   : > { %v7223_v1 = vpop.eup %7222  ;;  %v2370_v47 = vmul.f32 0.6931472, %v7221_v60  ;;  %v2401_v59 = vmul.f32 %v7219_v29, %v2400_v28  ;;  %v1554_v28 = vrot.slane %v1553_v35, 1 }
 0x5c8   : > { %v2376_v0 = vmul.f32 0.6931472, %v7223_v1 }
 0x5c9   : > { %v2402_v52 = vadd.f32 %v7219_v29, %v2401_v59  ;;  %v8915_v3 = vadd.f32 %v1554_v28, %v1553_v35 }
 0x5ca   : > { %v2378_v56 = vsub.f32 %v2370_v47, %v2376_v0 }
 0x5cb   : > { %v2406_v32 = vsel %vm2405_vm13, %v7219_v29, %v2402_v52 }
 0x5cc   : > { %v2380_v62 = vmul.f32 0.5, %v2378_v56  ;;  %v2411_v34 = vsel %vm2408_vm15, %v2410_v26, %v2406_v32 }
 0x5ce   : > { %v2382_v7 = vmul.f32 %v2380_v62, %v8894_v61 }
 0x5d0   : > { %v2412_v5 = vmul.f32 %v2411_v34, %v2382_v7 }
 0x5d2   : > { %6952 = vmatpush.xpose.msk.msra.mxu1 %vm476_vm0, %v2412_v5 }
 0x5d5   : > { %v2153_v39 = vpop.xlane.xlu2 %2152 }
 0x5d6   : > { %7224 = vrsqrt.f32 %v2153_v39  ;;  %vm2170_vm2 = vcmp.eq.f32.partialorder %v2153_v39, inf  ;;  %v2173_v60 = vand.u32 2147483648, %v2153_v39  ;;  %vm2172_vm3 = vcmp.eq.f32.partialorder %v2153_v39, 0.0 }
 0x5d9   : > { %v2156_v14 = vpop.xlane.xlu0 %2155 }
 0x5da   : > { %7226 = vrsqrt.f32 %v2156_v14  ;;  %vm2182_vm4 = vcmp.eq.f32.partialorder %v2156_v14, inf  ;;  %v2185_v56 = vand.u32 2147483648, %v2156_v14  ;;  %vm2184_vm5 = vcmp.eq.f32.partialorder %v2156_v14, 0.0 }
 0x5db   : > { %7228 = vrsqrt.f32 %v8909_v22 }
 0x5dc   : > { %v7225_v55 = vpop.eup %7224 }
 0x5dd   : > { %v2164_v33 = vmul.f32 %v7225_v55, %v2153_v39 }
 0x5df   : > { %v2165_v46 = vmul.f32 %v7225_v55, %v2164_v33 }
 0x5e0   : > { %v7227_v23 = vpop.eup %7226 }
 0x5e1   : > { %v2166_v30 = vmul.f32 0.5, %v2165_v46  ;;  %v2176_v38 = vmul.f32 %v7227_v23, %v2156_v14  ;;  %v7229_v63 = vpop.eup %7228 }
 0x5e2   : > { %v1557_v59 = vmul.f32 %v7229_v63, %v8909_v22 }
 0x5e3   : > { %v2167_v45 = vsub.f32 1.5, %v2166_v30  ;;  %v2177_v50 = vmul.f32 %v7227_v23, %v2176_v38  ;;  %v450_v30 = vld [vmem:[%s11312_s3] sm:$0xff] }
 0x5e4   : > { %v1558_v32 = vmul.f32 %v7229_v63, %v1557_v59 }
 0x5e5   : > { %v2168_v10 = vmul.f32 %v7225_v55, %v2167_v45  ;;  %v2178_v27 = vmul.f32 0.5, %v2177_v50 }
 0x5e6   : > { %v1559_v18 = vmul.f32 0.5, %v1558_v32 }
 0x5e7   : > { %v2169_v29 = vmul.f32 %v2168_v10, %v2153_v39  ;;  %v2179_v4 = vsub.f32 1.5, %v2178_v27 }
 0x5e8   : > { %v1560_v46 = vsub.f32 1.5, %v1559_v18 }
 0x5e9   : > { %v2171_v1 = vsel %vm2170_vm2, %v2153_v39, %v2169_v29  ;;  %v2180_v47 = vmul.f32 %v7227_v23, %v2179_v4 }
 0x5ea   : > { %v2174_v0 = vsel %vm2172_vm3, %v2173_v60, %v2171_v1  ;;  %v1561_v29 = vmul.f32 %v7229_v63, %v1560_v46  ;;  %vm1563_vm3 = vcmp.eq.f32.partialorder %v8909_v22, inf }
 0x5eb   : > { %v8913_v36 = vmax.f32 %v2174_v0, 1e-15  ;;  %v2181_v52 = vmul.f32 %v2180_v47, %v2156_v14 }
 0x5ec   : > { %v1562_v18 = vmul.f32 %v1561_v29, %v8909_v22 }
 0x5ed   : > { %7230 = vrcp.f32 %v8913_v36  ;;  %v2183_v11 = vsel %vm2182_vm4, %v2156_v14, %v2181_v52  ;;  %v6943_v62 = vclamps-f32 %v8913_v36, 0.9999999  ;;  %v452_v14 = vld [vmem:[%s11312_s3 + $0x10] sm:$0xff]  ;;  %v2270_v63 = vand.u32 2147483648, %v8913_v36 }
 0x5ee   : > { %v2186_v15 = vsel %vm2184_vm5, %v2185_v56, %v2183_v11  ;;  %7232 = vrsqrt.f32 %v8915_v3  ;;  %3050 = vmatpush.msrb.mxu0 %v452_v14  ;;  %v2268_v11 = vand.u32 2147483647, %v8913_v36  ;;  %vm2264_vm7 = vweird.f32 %v8913_v36 }
 0x5ef   : > { %v8919_v26 = vmax.f32 %v2186_v15, 1e-15  ;;  %v2223_v7 = vadd.f32 1.0, %v6943_v62  ;;  %v2235_v34 = vsub.f32 1.0, %v6943_v62  ;;  %v2271_v14 = vor.u32 1.1754944e-38, %v2270_v63 }
 0x5f0   : > { %3051 = vmatpush.msrb.mxu0 %v451_v57  ;;  %vm2269_vm9 = vcmp.eq.f32.partialorder %v2268_v11, 8.507059e+37  ;;  %vm1565_vm5 = vcmp.eq.f32.partialorder %v8909_v22, 0.0 }
 0x5f1   : > { %7234 = vrcp.f32 %v8919_v26  ;;  %v6944_v40 = vclamps-f32 %v8919_v26, 0.9999999  ;;  %vm2279_vm12 = vweird.f32 %v8919_v26 }
 0x5f2   : > { %3052 = vmatpush.msrb.mxu0 %v450_v30 }
 0x5f3   : > { %v7231_v19 = vpop.eup %7230  ;;  %v2224_v39 = vadd.f32 1.0, %v6944_v40  ;;  %v2236_v2 = vsub.f32 1.0, %v6944_v40 }
 0x5f4   : > { %v8923_v5 = vpop.xlane.xlu2 %2161  ;;  %v2260_v55 = vmul.f32 %v7231_v19, %v8913_v36  ;;  %v8937_v33 = vpop.eup %7232  ;;  %vm2265_vm6 = vweird.f32 %v7231_v19 }
 0x5f5   : > { %7236 = vrsqrt.f32 %v8923_v5  ;;  %v1569_v56 = vmul.f32 %v8937_v33, %v8915_v3  ;;  %vm8955_vm8 = vmor %vm2264_vm7, %vm2265_vm6  ;;  %vm2206_vm13 = vcmp.eq.f32.partialorder %v8923_v5, inf  ;;  %vm2208_vm15 = vcmp.eq.f32.partialorder %v8923_v5, 0.0 }
 0x5f6   : > { %7238 = vlog2.f32 %v2223_v7  ;;  %v2261_v23 = vsub.f32 1.0, %v2260_v55 }
 0x5f7   : > { %7240 = vlog2.f32 %v2235_v34  ;;  %v8939_v42 = vpop.eup %7234  ;;  %v1570_v36 = vmul.f32 %v8937_v33, %v1569_v56 }
 0x5f8   : > { %7242 = vlog2.f32 %v2224_v39  ;;  %v2262_v45 = vmul.f32 %v7231_v19, %v2261_v23  ;;  %v2275_v50 = vmul.f32 %v8939_v42, %v8919_v26  ;;  %vm2280_vm11 = vweird.f32 %v8939_v42 }
 0x5f9   : > { %7244 = vlog2.f32 %v2236_v2  ;;  %vm2281_vm2 = vmor %vm2279_vm12, %vm2280_vm11  ;;  %v1571_v56 = vmul.f32 0.5, %v1570_v36 }
 0x5fa   : > { %v2276_v28 = vsub.f32 1.0, %v2275_v50  ;;  %v2263_v0 = vadd.f32 %v7231_v19, %v2262_v45 }
 0x5fb   : > { %v7237_v38 = vpop.eup %7236 }
 0x5fc   : > { %v7239_v35 = vpop.eup %7238  ;;  %v2200_v10 = vmul.f32 %v7237_v38, %v8923_v5  ;;  %v2277_v40 = vmul.f32 %v8939_v42, %v2276_v28  ;;  %v2267_v20 = vsel %vm8955_vm8, %v7231_v19, %v2263_v0  ;;  %vm1575_vm8 = vcmp.eq.f32.partialorder %v8915_v3, inf }
 0x5fd   : > { %v7241_v27 = vpop.eup %7240  ;;  %v2228_v4 = vmul.f32 0.6931472, %v7239_v35  ;;  %v2272_v45 = vsel %vm2269_vm9, %v2271_v14, %v2267_v20  ;;  %v2285_v35 = vand.u32 2147483648, %v8919_v26  ;;  %v457_v14 = vld [vmem:[%s11313_s4 + $0x18] sm:$0xff]  ;;  %vm1577_vm9 = vcmp.eq.f32.partialorder %v8915_v3, 0.0 }
 0x5fe   : > { %v7243_v60 = vpop.eup %7242  ;;  %v8947_v1 = vpop.xlane.xlu1 %2158  ;;  %v2201_v47 = vmul.f32 %v7237_v38, %v2200_v10  ;;  %v2240_v59 = vmul.f32 0.6931472, %v7241_v27  ;;  %v2278_v23 = vadd.f32 %v8939_v42, %v2277_v40  ;;  %3364 = vmatpush.msrb.mxu1 %v457_v14 }
 0x5ff   : > { %v7245_v52 = vpop.eup %7244  ;;  %7246 = vrsqrt.f32 %v8947_v1  ;;  %v2230_v15 = vmul.f32 0.6931472, %v7243_v60  ;;  %vm2194_vm6 = vcmp.eq.f32.partialorder %v8947_v1, inf  ;;  %v2197_v40 = vand.u32 2147483648, %v8947_v1 }
 0x600   : > { %v2202_v62 = vmul.f32 0.5, %v2201_v47  ;;  %v2247_v32 = vsub.f32 %v2228_v4, %v2240_v59  ;;  %v2242_v34 = vmul.f32 0.6931472, %v7245_v52  ;;  %v2282_v60 = vsel %vm2281_vm2, %v8939_v42, %v2278_v23 }
 0x601   : > { %v1564_v59 = vsel %vm1563_vm3, %v8909_v22, %v1562_v18  ;;  %v1566_v52 = vand.u32 2147483648, %v8909_v22  ;;  %vm2196_vm7 = vcmp.eq.f32.partialorder %v8947_v1, 0.0 }
 0x602   : > { %v2203_v39 = vsub.f32 1.5, %v2202_v62  ;;  %v2251_v2 = vmul.f32 0.5, %v2247_v32  ;;  %v2248_v55 = vsub.f32 %v2230_v15, %v2242_v34  ;;  %v1572_v15 = vsub.f32 1.5, %v1571_v56 }
 0x603   : > { %v1567_v32 = vsel %vm1565_vm5, %v1566_v52, %v1564_v59 }
 0x604   : > { %v2204_v57 = vmul.f32 %v7237_v38, %v2203_v39  ;;  %v2255_v46 = vmul.f32 %v2251_v2, %v8833_v12  ;;  %v2252_v50 = vmul.f32 0.5, %v2248_v55  ;;  %v2283_v38 = vand.u32 2147483647, %v8919_v26  ;;  %v456_v55 = vld [vmem:[%s11313_s4 + $0x10] sm:$0xff] }
 0x605   : > { %v7247_v30 = vpop.eup %7246  ;;  %v2209_v12 = vand.u32 2147483648, %v8923_v5  ;;  %v2286_v26 = vor.u32 1.1754944e-38, %v2285_v35  ;;  %v8985_v42 = vmax.f32 %v1567_v32, 1e-15  ;;  %v1573_v18 = vmul.f32 %v8937_v33, %v1572_v15  ;;  %v455_v33 = vld [vmem:[%s11313_s4 + $0x8] sm:$0xff]  ;;  %3365 = vmatpush.msrb.mxu1 %v456_v55 }
 0x606   : > { %v2188_v19 = vmul.f32 %v7247_v30, %v8947_v1  ;;  %v2205_v10 = vmul.f32 %v2204_v57, %v8923_v5  ;;  %v2273_v27 = vmul.f32 %v2272_v45, %v2255_v46  ;;  %v2256_v28 = vmul.f32 %v2252_v50, %v8865_v25 }
 0x607   : > { %vm2284_vm4 = vcmp.eq.f32.partialorder %v2283_v38, 8.507059e+37  ;;  %7248 = vrcp.f32 %v8985_v42  ;;  %v1574_v57 = vmul.f32 %v1573_v18, %v8915_v3  ;;  %3366 = vmatpush.msrb.mxu1 %v455_v33 }
 0x608   : > { %v2189_v29 = vmul.f32 %v7247_v30, %v2188_v19  ;;  %v2207_v4 = vsel %vm2206_vm13, %v8923_v5, %v2205_v10  ;;  %6950 = vmatmul.msk.f32.vlgmr.msra.gmra.mxu0 %vm476_vm0, %v2273_v27  ;;  %v2287_v11 = vsel %vm2284_vm4, %v2286_v26, %v2282_v60  ;;  %vm1589_vm4 = vweird.f32 %v8985_v42 }
 0x609   : > { %v2210_v47 = vsel %vm2208_vm15, %v2209_v12, %v2207_v4  ;;  %v2288_v62 = vmul.f32 %v2287_v11, %v2256_v28  ;;  %v1576_v35 = vsel %vm1575_vm8, %v8915_v3, %v1574_v57 }
 0x60a   : > { %v2190_v0 = vmul.f32 0.5, %v2189_v29  ;;  %v8983_v5 = vmax.f32 %v2210_v47, 1e-15 }
 0x60c   : > { %v2191_v63 = vsub.f32 1.5, %v2190_v0  ;;  %v6946_v34 = vclamps-f32 %v8983_v5, 0.9999999  ;;  %7250 = vrcp.f32 %v8983_v5  ;;  %v2315_v57 = vand.u32 2147483648, %v8983_v5 }
 0x60d   : > { %v9012_v45 = vpop.eup %7248  ;;  %vm2309_vm5 = vweird.f32 %v8983_v5 }
 0x60e   : > { %v2192_v25 = vmul.f32 %v7247_v30, %v2191_v63  ;;  %v2226_v20 = vadd.f32 1.0, %v6946_v34  ;;  %v2238_v36 = vsub.f32 1.0, %v6946_v34  ;;  %v454_v30 = vld [vmem:[%s11313_s4] sm:$0xff]  ;;  %v1585_v38 = vmul.f32 %v9012_v45, %v8985_v42 }
 0x60f   : > { %3367 = vmatpush.msrb.mxu1 %v454_v30  ;;  %vm1590_vm2 = vweird.f32 %v9012_v45 }
 0x610   : > { %v2193_v7 = vmul.f32 %v2192_v25, %v8947_v1  ;;  %6951 = vmatmul.msk.f32.gmra.mxu0 %vm476_vm0, %v2288_v62  ;;  %v1586_v52 = vsub.f32 1.0, %v1585_v38 }
 0x612   : > { %v2195_v22 = vsel %vm2194_vm6, %v8947_v1, %v2193_v7  ;;  %v9015_v50 = vpop.eup %7250  ;;  %vm1591_vm6 = vmor %vm1589_vm4, %vm1590_vm2 }
 0x613   : > { %v2198_v39 = vsel %vm2196_vm7, %v2197_v40, %v2195_v22  ;;  %v2305_v27 = vmul.f32 %v9015_v50, %v8983_v5  ;;  %vm2310_vm3 = vweird.f32 %v9015_v50 }
 0x614   : > { %v2213_v2 = vmax.f32 %v2198_v39, 1e-15  ;;  %vm2311_vm7 = vmor %vm2309_vm5, %vm2310_vm3 }
 0x615   : > { %v2306_v0 = vsub.f32 1.0, %v2305_v27 }
 0x616   : > { %7252 = vrcp.f32 %v2213_v2  ;;  %v6945_v1 = vclamps-f32 %v2213_v2, 0.9999999  ;;  %v2300_v32 = vand.u32 2147483648, %v2213_v2  ;;  %vm2294_vm12 = vweird.f32 %v2213_v2 }
 0x617   : > { %7254 = vlog2.f32 %v2226_v20  ;;  %v2298_v15 = vand.u32 2147483647, %v2213_v2  ;;  %v2307_v22 = vmul.f32 %v9015_v50, %v2306_v0 }
 0x618   : > { %6959 = vmatmul.msk.f32.vlgmr.msrb.gmra.mxu0 %vm476_vm0, %v8738_v13  ;;  %v2225_v46 = vadd.f32 1.0, %v6945_v1  ;;  %v2237_v23 = vsub.f32 1.0, %v6945_v1  ;;  %7256 = vlog2.f32 %v2238_v36  ;;  %v1578_v13 = vand.u32 2147483648, %v8915_v3 }
 0x619   : > { %v2301_v18 = vor.u32 1.1754944e-38, %v2300_v32  ;;  %vm2299_vm15 = vcmp.eq.f32.partialorder %v2298_v15, 8.507059e+37  ;;  %v2308_v33 = vadd.f32 %v9015_v50, %v2307_v22 }
 0x61a   : > { %7258 = vlog2.f32 %v2225_v46  ;;  %v1579_v12 = vsel %vm1577_vm9, %v1578_v13, %v1576_v35  ;;  %v2313_v46 = vand.u32 2147483647, %v8983_v5 }
 0x61b   : > { %7260 = vlog2.f32 %v2237_v23  ;;  %v9026_v47 = vmax.f32 %v1579_v12, 1e-15  ;;  %v2312_v13 = vsel %vm2311_vm7, %v9015_v50, %v2308_v33 }
 0x61c   : > { %v7253_v19 = vpop.eup %7252  ;;  %vm2314_vm9 = vcmp.eq.f32.partialorder %v2313_v46, 8.507059e+37 }
 0x61d   : > { %v2290_v10 = vmul.f32 %v7253_v19, %v2213_v2  ;;  %v7255_v29 = vpop.eup %7254  ;;  %vm2295_vm11 = vweird.f32 %v7253_v19  ;;  %7262 = vrcp.f32 %v9026_v47  ;;  %v1595_v2 = vand.u32 2147483648, %v8985_v42 }
 0x61e   : > { %v7257_v4 = vpop.eup %7256  ;;  %v2234_v11 = vmul.f32 0.6931472, %v7255_v29  ;;  %vm2296_vm13 = vmor %vm2294_vm12, %vm2295_vm11  ;;  %vm1582_vm12 = vcmp.gt.f32.partialorder %v8985_v42, 0.996  ;;  %vm1583_vm3 = vcmp.gt.f32.partialorder %v9026_v47, 0.996 }
 0x61f   : > { %v2291_v28 = vsub.f32 1.0, %v2290_v10  ;;  %v2246_v63 = vmul.f32 0.6931472, %v7257_v4  ;;  %v2316_v10 = vor.u32 1.1754944e-38, %v2315_v57 }
 0x620   : > { %v7259_v60 = vpop.eup %7258  ;;  %6960 = vmatmul.msk.f32.gmra.mxu0 %vm476_vm0, %v8894_v61  ;;  %v1587_v61 = vmul.f32 %v9012_v45, %v1586_v52 }
 0x621   : > { %v7261_v26 = vpop.eup %7260  ;;  %v2232_v59 = vmul.f32 0.6931472, %v7259_v60  ;;  %v2292_v3 = vmul.f32 %v7253_v19, %v2291_v28  ;;  %v2250_v40 = vsub.f32 %v2234_v11, %v2246_v63  ;;  %v2317_v38 = vsel %vm2314_vm9, %v2316_v10, %v2312_v13 }
 0x622   : > { %v2244_v56 = vmul.f32 0.6931472, %v7261_v26  ;;  %v1588_v14 = vadd.f32 %v9012_v45, %v1587_v61  ;;  %v1608_v60 = vand.u32 2147483647, %v9026_v47 }
 0x623   : > { %v2293_v62 = vadd.f32 %v7253_v19, %v2292_v3  ;;  %v7263_v55 = vpop.eup %7262  ;;  %v2254_v1 = vmul.f32 0.5, %v2250_v40 }
 0x624   : > { %v2249_v25 = vsub.f32 %v2232_v59, %v2244_v56  ;;  %v1592_v23 = vsel %vm1591_vm6, %v9012_v45, %v1588_v14  ;;  %v1600_v30 = vmul.f32 %v7263_v55, %v9026_v47  ;;  %vm1605_vm11 = vweird.f32 %v7263_v55 }
 0x625   : > { %v2297_v34 = vsel %vm2296_vm13, %v7253_v19, %v2293_v62  ;;  %v2258_v35 = vmul.f32 %v2254_v1, %v8880_v51  ;;  %v1596_v19 = vor.u32 1.1754944e-38, %v1595_v2  ;;  %v1610_v51 = vand.u32 2147483648, %v9026_v47 }
 0x626   : > { %v2253_v7 = vmul.f32 0.5, %v2249_v25  ;;  %v2302_v20 = vsel %vm2299_vm15, %v2301_v18, %v2297_v34  ;;  %v1601_v12 = vsub.f32 1.0, %v1600_v30  ;;  %vm1604_vm13 = vweird.f32 %v9026_v47 }
 0x627   : > { %v2318_v29 = vmul.f32 %v2317_v38, %v2258_v35  ;;  %vm1606_vm15 = vmor %vm1604_vm13, %vm1605_vm11  ;;  %v1611_v59 = vor.u32 1.1754944e-38, %v1610_v51  ;;  %vm1609_vm2 = vcmp.eq.f32.partialorder %v1608_v60, 8.507059e+37 }
 0x628   : > { %v2257_v39 = vmul.f32 %v2253_v7, %v8887_v21  ;;  %v1593_v21 = vand.u32 2147483647, %v8985_v42  ;;  %v1602_v5 = vmul.f32 %v7263_v55, %v1601_v12 }
 0x62a   : > { %v2303_v36 = vmul.f32 %v2302_v20, %v2257_v39  ;;  %vm1594_vm8 = vcmp.eq.f32.partialorder %v1593_v21, 8.507059e+37  ;;  %v1603_v28 = vadd.f32 %v7263_v55, %v1602_v5 }
 0x62b   : > { %v1597_v27 = vsel %vm1594_vm8, %v1596_v19, %v1592_v23 }
 0x62c   : > { %6953 = vmatmul.msk.f32.vlgmr.msra.gmra.mxu1 %vm476_vm0, %v2303_v36  ;;  %v1598_v4 = vmul.f32 0.996, %v1597_v27  ;;  %v1607_v26 = vsel %vm1606_vm15, %v7263_v55, %v1603_v28 }
 0x62d   : > { %v1612_v0 = vsel %vm1609_vm2, %v1611_v59, %v1607_v26 }
 0x62e   : > { %v1614_v45 = vmul.f32 %v1598_v4, %v8388_v44  ;;  %v1615_v3 = vmul.f32 %v1598_v4, %v8402_v54  ;;  %v1613_v42 = vmul.f32 0.996, %v1612_v0 }
 0x630   : > { %v1622_v50 = vsel %vm1582_vm12, %v1614_v45, %v8388_v44  ;;  %v1623_v52 = vsel %vm1582_vm12, %v1615_v3, %v8402_v54  ;;  %v1616_v44 = vmul.f32 %v1613_v42, %v8415_v9  ;;  %v1617_v11 = vmul.f32 %v1613_v42, %v8421_v16 }
 0x631   : > { %v3272_v34 = vmul.f32 %v1622_v50, %v1622_v50  ;;  %v3273_v2 = vmul.f32 %v1623_v52, %v1623_v52 }
 0x632   : > { %v9061_v56 = vsel %vm1583_vm3, %v1616_v44, %v8415_v9  ;;  %v9067_v63 = vsel %vm1583_vm3, %v1617_v11, %v8421_v16 }
 0x633   : > { %v3276_v40 = vsel %vm476_vm0, %v3272_v34, 0.0  ;;  %v3279_v33 = vsel %vm476_vm0, %v3273_v2, 0.0 }
 0x634   : > { %6954 = vmatmul.msk.f32.gmra.mxu1 %vm476_vm0, %v2318_v29 }
 0x63c   : > { %6963 = vmatmul.msk.f32.vlgmr.msrb.gmra.mxu1 %vm476_vm0, %v1622_v50 }
 0x644   : > { %6964 = vmatmul.msk.f32.gmra.mxu1 %vm476_vm0, %v1623_v52 }
 0x64c   : > { %6965 = vmatmul.msk.f32.gmra.mxu1 %vm476_vm0, %v9061_v56 }
 0x654   : > { %6966 = vmatmul.msk.f32.gmra.mxu1 %vm476_vm0, %v9067_v63 }
 0x685   : > { %v2439_v54 = vpop.f32.mrf.mxu0 }
 0x686   : > { %7264 = vtanh.f32 %v2439_v54 }
 0x68c   : > { %v9071_v62 = vpop.eup %7264 }
 0x68d   : > { %v2442_v32 = vpop.f32.mrf.mxu0  ;;  %v2481_v47 = vmul.f32 %v9071_v62, %v9071_v62 }
 0x68e   : > { %7266 = vtanh.f32 %v2442_v32 }
 0x68f   : > { %v2485_v25 = vsel %vm561_vm1, %v2481_v47, 0.0 }
 0x690   : > { %2486 = vadd.xlane.f32.xlu0 %v2485_v25 }
 0x694   : > { %v9076_v15 = vpop.eup %7266 }
 0x695   : > { %v2482_v61 = vmul.f32 %v9076_v15, %v9076_v15  ;;  %v9095_v21 = vpop.f32.mrf.mxu0 }
 0x696   : > { %v3060_v19 = vmul.f32 %v9095_v21, %v9095_v21 }
 0x697   : > { %v2488_v7 = vsel %vm561_vm1, %v2482_v61, 0.0 }
 0x698   : > { %2489 = vadd.xlane.f32.xlu1 %v2488_v7 }
 0x69d   : > { %v9104_v35 = vpop.f32.mrf.mxu0 }
 0x69e   : > { %v3061_v13 = vmul.f32 %v9104_v35, %v9104_v35 }
 0x6a0   : > { %3277 = vadd.xlane.f32.xlu1 %v3276_v40 }
 0x6a9   : > { %v2471_v22 = vpop.f32.mrf.mxu1 }
 0x6aa   : > { %7268 = vtanh.f32 %v2471_v22 }
 0x6b0   : > { %v9082_v18 = vpop.eup %7268 }
 0x6b1   : > { %v2474_v39 = vpop.f32.mrf.mxu1  ;;  %v2483_v20 = vmul.f32 %v9082_v18, %v9082_v18 }
 0x6b2   : > { %7270 = vtanh.f32 %v2474_v39 }
 0x6b3   : > { %v2491_v14 = vsel %vm561_vm1, %v2483_v20, 0.0 }
 0x6b4   : > { %2492 = vadd.xlane.f32.xlu2 %v2491_v14 }
 0x6b8   : > { %v9087_v55 = vpop.eup %7270 }
 0x6b9   : > { %v9089_v36 = vpop.f32.mrf.mxu1  ;;  %v2484_v1 = vmul.f32 %v9087_v55, %v9087_v55 }
 0x6ba   : > { %v3381_v30 = vmul.f32 %v9089_v36, %v9089_v36 }
 0x6bb   : > { %v2494_v57 = vsel %vm561_vm1, %v2484_v1, 0.0 }
 0x6bc   : > { %3280 = vadd.xlane.f32.xlu2 %v3279_v33  ;;  %2495 = vadd.xlane.f32.xlu0 %v2494_v57 }
 0x6c1   : > { %v9097_v46 = vpop.f32.mrf.mxu1 }
 0x6c2   : > { %v3382_v23 = vmul.f32 %v9097_v46, %v9097_v46 }
 0x6c4   : > { %3003 = vadd.xlane.f32.xlu2 %v8899_v6  ;;  %3387 = vadd.xlane.f32.xlu1 %v3382_v23 }
 0x6c5   : > { %3385 = vadd.xlane.f32.xlu0 %v3381_v30 }
 0x6cc   : > { %3064 = vadd.xlane.f32.xlu1 %v3061_v13 }
 0x6cd   : > { %3001 = vadd.xlane.f32.xlu0 %v8743_v31 }
 0x6d4   : > { %3062 = vadd.xlane.f32.xlu1 %v3060_v19 }
 0x703   : > { %v2487_v10 = vpop.xlane.xlu0 %2486 }
 0x704   : > { %7272 = vrsqrt.f32 %v2487_v10  ;;  %vm2504_vm4 = vcmp.eq.f32.partialorder %v2487_v10, inf  ;;  %v2507_v31 = vand.u32 2147483648, %v2487_v10  ;;  %vm2506_vm5 = vcmp.eq.f32.partialorder %v2487_v10, 0.0 }
 0x70a   : > { %v7273_v27 = vpop.eup %7272 }
 0x70b   : > { %v2498_v38 = vmul.f32 %v7273_v27, %v2487_v10  ;;  %v2490_v12 = vpop.xlane.xlu1 %2489 }
 0x70c   : > { %7274 = vrsqrt.f32 %v2490_v12  ;;  %vm2516_vm6 = vcmp.eq.f32.partialorder %v2490_v12, inf  ;;  %v2519_v44 = vand.u32 2147483648, %v2490_v12  ;;  %vm2518_vm7 = vcmp.eq.f32.partialorder %v2490_v12, 0.0 }
 0x70d   : > { %v2499_v6 = vmul.f32 %v7273_v27, %v2498_v38 }
 0x70f   : > { %v2500_v29 = vmul.f32 0.5, %v2499_v6 }
 0x711   : > { %v2501_v4 = vsub.f32 1.5, %v2500_v29 }
 0x712   : > { %v7275_v5 = vpop.eup %7274 }
 0x713   : > { %v2502_v45 = vmul.f32 %v7273_v27, %v2501_v4  ;;  %v2510_v28 = vmul.f32 %v7275_v5, %v2490_v12 }
 0x715   : > { %v2503_v51 = vmul.f32 %v2502_v45, %v2487_v10  ;;  %v2511_v50 = vmul.f32 %v7275_v5, %v2510_v28 }
 0x717   : > { %v2505_v60 = vsel %vm2504_vm4, %v2487_v10, %v2503_v51  ;;  %v2512_v26 = vmul.f32 0.5, %v2511_v50 }
 0x718   : > { %v2508_v59 = vsel %vm2506_vm5, %v2507_v31, %v2505_v60 }
 0x719   : > { %v2545_v3 = vmax.f32 %v2508_v59, 1e-15  ;;  %v2513_v0 = vsub.f32 1.5, %v2512_v26 }
 0x71b   : > { %7276 = vrcp.f32 %v2545_v3  ;;  %v2514_v52 = vmul.f32 %v7275_v5, %v2513_v0  ;;  %v2568_v34 = vand.u32 2147483648, %v2545_v3  ;;  %v2566_v22 = vand.u32 2147483647, %v2545_v3 }
 0x71c   : > { %7278 = vtanh.f32 %v2545_v3  ;;  %vm2562_vm9 = vweird.f32 %v2545_v3 }
 0x71d   : > { %v2515_v42 = vmul.f32 %v2514_v52, %v2490_v12  ;;  %v2569_v2 = vor.u32 1.1754944e-38, %v2568_v34  ;;  %vm2567_vm12 = vcmp.eq.f32.partialorder %v2566_v22, 8.507059e+37 }
 0x71f   : > { %v2517_v11 = vsel %vm2516_vm6, %v2490_v12, %v2515_v42 }
 0x720   : > { %v2520_v54 = vsel %vm2518_vm7, %v2519_v44, %v2517_v11  ;;  %v3617_v44 = vand.u32 2147483647, %v9089_v36 }
 0x721   : > { %v7277_v32 = vpop.eup %7276  ;;  %v2546_v47 = vmax.f32 %v2520_v54, 1e-15 }
 0x722   : > { %v2558_v25 = vmul.f32 %v7277_v32, %v2545_v3  ;;  %vm2563_vm8 = vweird.f32 %v7277_v32  ;;  %v7279_v39 = vpop.eup %7278 }
 0x723   : > { %7280 = vrcp.f32 %v2546_v47  ;;  %vm2564_vm11 = vmor %vm2562_vm9, %vm2563_vm8  ;;  %v2553_v33 = vmul.f32 %v7279_v39, %v9071_v62  ;;  %v2583_v6 = vand.u32 2147483648, %v2546_v47  ;;  %v2581_v4 = vand.u32 2147483647, %v2546_v47 }
 0x724   : > { %v2559_v61 = vsub.f32 1.0, %v2558_v25  ;;  %vm2577_vm15 = vweird.f32 %v2546_v47 }
 0x725   : > { %v2584_v50 = vor.u32 1.1754944e-38, %v2583_v6  ;;  %vm2582_vm3 = vcmp.eq.f32.partialorder %v2581_v4, 8.507059e+37  ;;  %v3275_v4 = vmul.f32 %v9067_v63, %v9067_v63 }
 0x726   : > { %v2560_v7 = vmul.f32 %v7277_v32, %v2559_v61 }
 0x727   : > { %v2493_v40 = vpop.xlane.xlu2 %2492 }
 0x728   : > { %7282 = vrsqrt.f32 %v2493_v40  ;;  %v2561_v14 = vadd.f32 %v7277_v32, %v2560_v7  ;;  %vm2528_vm4 = vcmp.eq.f32.partialorder %v2493_v40, inf  ;;  %v2531_v54 = vand.u32 2147483648, %v2493_v40 }
 0x729   : > { %v7281_v20 = vpop.eup %7280  ;;  %7284 = vtanh.f32 %v2546_v47  ;;  %vm2530_vm5 = vcmp.eq.f32.partialorder %v2493_v40, 0.0 }
 0x72a   : > { %v2573_v1 = vmul.f32 %v7281_v20, %v2546_v47  ;;  %v2565_v57 = vsel %vm2564_vm11, %v7277_v32, %v2561_v14  ;;  %vm2578_vm13 = vweird.f32 %v7281_v20 }
 0x72b   : > { %v2570_v23 = vsel %vm2567_vm12, %v2569_v2, %v2565_v57  ;;  %vm2579_vm2 = vmor %vm2577_vm15, %vm2578_vm13 }
 0x72c   : > { %v2574_v30 = vsub.f32 1.0, %v2573_v1  ;;  %v9112_v13 = vmul.f32 %v2570_v23, %v2553_v33  ;;  %v3618_v33 = vand.u32 2147483647, %v9097_v46 }
 0x72e   : > { %v7283_v19 = vpop.eup %7282  ;;  %v2575_v10 = vmul.f32 %v7281_v20, %v2574_v30  ;;  %v2617_v12 = vmul.f32 %v9112_v13, %v9112_v13  ;;  %v3179_v30 = vand.u32 2147483647, %v9104_v35 }
 0x72f   : > { %v2522_v27 = vmul.f32 %v7283_v19, %v2493_v40  ;;  %v2496_v38 = vpop.xlane.xlu0 %2495  ;;  %v7285_v28 = vpop.eup %7284 }
 0x730   : > { %7286 = vrsqrt.f32 %v2496_v38  ;;  %v2621_v62 = vsel %vm561_vm1, %v2617_v12, 0.0  ;;  %v2576_v5 = vadd.f32 %v7281_v20, %v2575_v10  ;;  %v2554_v0 = vmul.f32 %v7285_v28, %v9076_v15 }
 0x731   : > { %v2523_v29 = vmul.f32 %v7283_v19, %v2522_v27  ;;  %2622 = vadd.xlane.f32.xlu2 %v2621_v62  ;;  %vm2540_vm6 = vcmp.eq.f32.partialorder %v2496_v38, inf  ;;  %vm2542_vm7 = vcmp.eq.f32.partialorder %v2496_v38, 0.0 }
 0x732   : > { %v2580_v51 = vsel %vm2579_vm2, %v7281_v20, %v2576_v5  ;;  %v2543_v20 = vand.u32 2147483648, %v2496_v38 }
 0x733   : > { %v2524_v45 = vmul.f32 0.5, %v2523_v29  ;;  %v2585_v26 = vsel %vm2582_vm3, %v2584_v50, %v2580_v51  ;;  %v9129_v51 = vpop.xlane.xlu1 %3277 }
 0x734   : > { %v9119_v11 = vmul.f32 %v2585_v26, %v2554_v0 }
 0x735   : > { %v2525_v31 = vsub.f32 1.5, %v2524_v45 }
 0x736   : > { %v7287_v60 = vpop.eup %7286  ;;  %v2618_v34 = vmul.f32 %v9119_v11, %v9119_v11 }
 0x737   : > { %v2526_v59 = vmul.f32 %v7283_v19, %v2525_v31  ;;  %v2534_v3 = vmul.f32 %v7287_v60, %v2496_v38  ;;  %v9131_v31 = vpop.xlane.xlu2 %3280 }
 0x738   : > { %v2624_v22 = vsel %vm561_vm1, %v2618_v34, 0.0 }
 0x739   : > { %v2527_v52 = vmul.f32 %v2526_v59, %v2493_v40  ;;  %v2535_v42 = vmul.f32 %v7287_v60, %v2534_v3  ;;  %3621 = vadd.xlane.f32.xlu2 %v3617_v44  ;;  %2625 = vadd.xlane.f32.xlu0 %v2624_v22 }
 0x73b   : > { %v2529_v32 = vsel %vm2528_vm4, %v2493_v40, %v2527_v52  ;;  %v2536_v47 = vmul.f32 0.5, %v2535_v42  ;;  %vm3295_vm4 = vcmp.eq.f32.partialorder %v9129_v51, inf }
 0x73c   : > { %v2532_v25 = vsel %vm2530_vm5, %v2531_v54, %v2529_v32  ;;  %vm3297_vm5 = vcmp.eq.f32.partialorder %v9129_v51, 0.0 }
 0x73d   : > { %v2547_v61 = vmax.f32 %v2532_v25, 1e-15  ;;  %v2537_v7 = vsub.f32 1.5, %v2536_v47 }
 0x73f   : > { %7288 = vrcp.f32 %v2547_v61  ;;  %v2538_v15 = vmul.f32 %v7287_v60, %v2537_v7  ;;  %vm2592_vm8 = vweird.f32 %v2547_v61  ;;  %v2596_v12 = vand.u32 2147483647, %v2547_v61  ;;  %v9146_v34 = vpop.xlane.xlu2 %3003 }
 0x740   : > { %v2598_v6 = vand.u32 2147483648, %v2547_v61  ;;  %v3285_v60 = vsel %vm476_vm0, %v3275_v4, 0.0 }
 0x741   : > { %v2539_v39 = vmul.f32 %v2538_v15, %v2496_v38  ;;  %3623 = vadd.xlane.f32.xlu0 %v3618_v33  ;;  %vm2597_vm12 = vcmp.eq.f32.partialorder %v2596_v12, 8.507059e+37  ;;  %v9157_v33 = vpop.xlane.xlu1 %3387 }
 0x742   : > { %v2599_v5 = vor.u32 1.1754944e-38, %v2598_v6 }
 0x743   : > { %v2541_v14 = vsel %vm2540_vm6, %v2496_v38, %v2539_v39  ;;  %vm3307_vm6 = vcmp.eq.f32.partialorder %v9131_v31, inf }
 0x744   : > { %v2544_v2 = vsel %vm2542_vm7, %v2543_v20, %v2541_v14  ;;  %v9151_v20 = vpop.f32.mrf.mxu1  ;;  %vm3309_vm7 = vcmp.eq.f32.partialorder %v9131_v31, 0.0 }
 0x745   : > { %v7289_v40 = vpop.eup %7288  ;;  %v2548_v1 = vmax.f32 %v2544_v2, 1e-15  ;;  %v3274_v2 = vmul.f32 %v9061_v56, %v9061_v56 }
 0x746   : > { %v2588_v57 = vmul.f32 %v7289_v40, %v2547_v61  ;;  %vm2593_vm9 = vweird.f32 %v7289_v40 }
 0x747   : > { %7290 = vrcp.f32 %v2548_v1  ;;  %vm2594_vm11 = vmor %vm2592_vm8, %vm2593_vm9  ;;  %v2611_v63 = vand.u32 2147483647, %v2548_v1  ;;  %v2613_v3 = vand.u32 2147483648, %v2548_v1  ;;  %vm2607_vm15 = vweird.f32 %v2548_v1 }
 0x748   : > { %v2589_v23 = vsub.f32 1.0, %v2588_v57  ;;  %7292 = vtanh.f32 %v2547_v61  ;;  %v3282_v57 = vsel %vm476_vm0, %v3274_v2, 0.0  ;;  %vm3024_vm8 = vcmp.eq.f32.partialorder %v9146_v34, inf }
 0x749   : > { %3182 = vadd.xlane.f32.xlu0 %v3179_v30  ;;  %7294 = vtanh.f32 %v2548_v1  ;;  %v2614_v42 = vor.u32 1.1754944e-38, %v2613_v3  ;;  %vm2612_vm3 = vcmp.eq.f32.partialorder %v2611_v63, 8.507059e+37  ;;  %vm3026_vm9 = vcmp.eq.f32.partialorder %v9146_v34, 0.0 }
 0x74a   : > { %v2590_v19 = vmul.f32 %v7289_v40, %v2589_v23  ;;  %7296 = vrsqrt.f32 %v9129_v51 }
 0x74b   : > { %7298 = vrsqrt.f32 %v9131_v31 }
 0x74c   : > { %v2591_v27 = vadd.f32 %v7289_v40, %v2590_v19  ;;  %7300 = vrsqrt.f32 %v9146_v34  ;;  %v9160_v19 = vpop.xlane.xlu0 %3385 }
 0x74d   : > { %v7291_v10 = vpop.eup %7290  ;;  %7302 = vrsqrt.f32 %v9160_v19 }
 0x74e   : > { %v7293_v38 = vpop.eup %7292  ;;  %v2603_v29 = vmul.f32 %v7291_v10, %v2548_v1  ;;  %v2595_v62 = vsel %vm2594_vm11, %v7289_v40, %v2591_v27  ;;  %vm2608_vm13 = vweird.f32 %v7291_v10  ;;  %v9164_v27 = vpop.f32.mrf.mxu1  ;;  %7304 = vrsqrt.f32 %v9157_v33 }
 0x74f   : > { %v2555_v45 = vmul.f32 %v7293_v38, %v9082_v18  ;;  %v2600_v50 = vsel %vm2597_vm12, %v2599_v5, %v2595_v62  ;;  %v7295_v52 = vpop.eup %7294  ;;  %vm2609_vm2 = vmor %vm2607_vm15, %vm2608_vm13  ;;  %v3384_v6 = vmul.f32 %v9164_v27, %v9164_v27  ;;  %vm3400_vm11 = vcmp.eq.f32.partialorder %v9160_v19, inf }
 0x750   : > { %v2604_v28 = vsub.f32 1.0, %v2603_v29  ;;  %v2556_v54 = vmul.f32 %v7295_v52, %v9087_v55  ;;  %v7297_v61 = vpop.eup %7296  ;;  %v3178_v55 = vand.u32 2147483647, %v9095_v21  ;;  %vm3412_vm12 = vcmp.eq.f32.partialorder %v9157_v33, inf }
 0x751   : > { %v9134_v26 = vmul.f32 %v2600_v50, %v2555_v45  ;;  %3286 = vadd.xlane.f32.xlu0 %v3285_v60  ;;  %v7299_v22 = vpop.eup %7298  ;;  %v3289_v39 = vmul.f32 %v7297_v61, %v9129_v51  ;;  %v9171_v45 = vpop.xlane.xlu1 %3064  ;;  %vm3402_vm13 = vcmp.eq.f32.partialorder %v9160_v19, 0.0  ;;  %vm3414_vm15 = vcmp.eq.f32.partialorder %v9157_v33, 0.0 }
 0x752   : > { %v2605_v59 = vmul.f32 %v7291_v10, %v2604_v28  ;;  %v3301_v14 = vmul.f32 %v7299_v22, %v9131_v31  ;;  %v7301_v23 = vpop.eup %7300  ;;  %7306 = vrsqrt.f32 %v9171_v45 }
 0x753   : > { %v2619_v18 = vmul.f32 %v9134_v26, %v9134_v26  ;;  %v3290_v40 = vmul.f32 %v7297_v61, %v3289_v39  ;;  %v3018_v56 = vmul.f32 %v7301_v23, %v9146_v34  ;;  %v7303_v5 = vpop.eup %7302 }
 0x754   : > { %v2606_v0 = vadd.f32 %v7291_v10, %v2605_v59  ;;  %v3302_v1 = vmul.f32 %v7299_v22, %v3301_v14  ;;  %v9173_v28 = vpop.xlane.xlu0 %3001  ;;  %v7305_v50 = vpop.eup %7304  ;;  %v3394_v3 = vmul.f32 %v7303_v5, %v9160_v19 }
 0x755   : > { %v2627_v44 = vsel %vm561_vm1, %v2619_v18, 0.0  ;;  %v3291_v30 = vmul.f32 0.5, %v3290_v40  ;;  %v3019_v4 = vmul.f32 %v7301_v23, %v3018_v56  ;;  %7308 = vrsqrt.f32 %v9173_v28 }
 0x756   : > { %v2610_v32 = vsel %vm2609_vm2, %v7291_v10, %v2606_v0  ;;  %2628 = vadd.xlane.f32.xlu1 %v2627_v44  ;;  %v3383_v10 = vmul.f32 %v9151_v20, %v9151_v20  ;;  %v3303_v12 = vmul.f32 0.5, %v3302_v1  ;;  %v3406_v18 = vmul.f32 %v7305_v50, %v9157_v33 }
 0x757   : > { %v2615_v47 = vsel %vm2612_vm3, %v2614_v42, %v2610_v32  ;;  %v3292_v38 = vsub.f32 1.5, %v3291_v30  ;;  %v3020_v59 = vmul.f32 0.5, %v3019_v4  ;;  %v3619_v0 = vand.u32 2147483647, %v9151_v20 }
 0x758   : > { %v9142_v25 = vmul.f32 %v2615_v47, %v2556_v54  ;;  %v3304_v29 = vsub.f32 1.5, %v3303_v12  ;;  %v3395_v54 = vmul.f32 %v7303_v5, %v3394_v3  ;;  %v3298_v32 = vand.u32 2147483648, %v9129_v51  ;;  %v7307_v47 = vpop.eup %7306 }
 0x759   : > { %v3293_v62 = vmul.f32 %v7297_v61, %v3292_v38  ;;  %v3021_v42 = vsub.f32 1.5, %v3020_v59  ;;  %v3407_v61 = vmul.f32 %v7305_v50, %v3406_v18  ;;  %v3079_v2 = vmul.f32 %v7307_v47, %v9171_v45 }
 0x75a   : > { %v2620_v7 = vmul.f32 %v9142_v25, %v9142_v25  ;;  %v3305_v60 = vmul.f32 %v7299_v22, %v3304_v29  ;;  %v3396_v14 = vmul.f32 0.5, %v3395_v54  ;;  %v3027_v4 = vand.u32 2147483648, %v9146_v34 }
 0x75b   : > { %v3294_v63 = vmul.f32 %v3293_v62, %v9129_v51  ;;  %v3022_v39 = vmul.f32 %v7301_v23, %v3021_v42  ;;  %v3080_v56 = vmul.f32 %v7307_v47, %v3079_v2  ;;  %v9197_v23 = vpop.xlane.xlu1 %3062  ;;  %vm3085_vm2 = vcmp.eq.f32.partialorder %v9171_v45, inf }
 0x75c   : > { %v2630_v15 = vsel %vm561_vm1, %v2620_v7, 0.0  ;;  %v3306_v52 = vmul.f32 %v3305_v60, %v9131_v31  ;;  %v7309_v7 = vpop.eup %7308 }
 0x75d   : > { %2631 = vadd.xlane.f32.xlu2 %v2630_v15  ;;  %v3296_v44 = vsel %vm3295_vm4, %v9129_v51, %v3294_v63  ;;  %v3006_v51 = vmul.f32 %v7309_v7, %v9173_v28  ;;  %v3023_v30 = vmul.f32 %v3022_v39, %v9146_v34  ;;  %v3081_v62 = vmul.f32 0.5, %v3080_v56 }
 0x75e   : > { %3180 = vadd.xlane.f32.xlu1 %v3178_v55  ;;  %v3299_v15 = vsel %vm3297_vm5, %v3298_v32, %v3296_v44  ;;  %v3308_v22 = vsel %vm3307_vm6, %v9131_v31, %v3306_v52  ;;  %v3310_v55 = vand.u32 2147483648, %v9131_v31  ;;  %v3403_v39 = vand.u32 2147483648, %v9160_v19 }
 0x75f   : > { %v9191_v40 = vmax.f32 %v3299_v15, 1e-15  ;;  %v3007_v31 = vmul.f32 %v7309_v7, %v3006_v51  ;;  %v3415_v51 = vand.u32 2147483648, %v9157_v33  ;;  %vm3012_vm4 = vcmp.eq.f32.partialorder %v9173_v28, inf }
 0x760   : > { %v3311_v1 = vsel %vm3309_vm7, %v3310_v55, %v3308_v22  ;;  %vm3087_vm5 = vcmp.eq.f32.partialorder %v9171_v45, 0.0  ;;  %vm3014_vm7 = vcmp.eq.f32.partialorder %v9173_v28, 0.0 }
 0x761   : > { %v9195_v12 = vmax.f32 %v3311_v1, 1e-15  ;;  %7310 = vrcp.f32 %v9191_v40  ;;  %v3008_v63 = vmul.f32 0.5, %v3007_v31  ;;  %v6967_v3 = vclamps-f32 %v9191_v40, 0.9999999 }
 0x762   : > { %7312 = vrsqrt.f32 %v9197_v23  ;;  %vm3450_vm3 = vweird.f32 %v9191_v40 }
 0x763   : > { %7314 = vrcp.f32 %v9195_v12  ;;  %v3009_v54 = vsub.f32 1.5, %v3008_v63  ;;  %v3525_v15 = vsub.f32 1.0, %v6967_v3  ;;  %v6968_v22 = vclamps-f32 %v9195_v12, 0.9999999 }
 0x765   : > { %3283 = vadd.xlane.f32.xlu2 %v3282_v57  ;;  %v3408_v57 = vmul.f32 0.5, %v3407_v61  ;;  %v3010_v1 = vmul.f32 %v7309_v7, %v3009_v54  ;;  %v3514_v56 = vadd.f32 1.0, %v6968_v22 }
 0x766   : > { %3389 = vadd.xlane.f32.xlu1 %v3383_v10  ;;  %v3397_v10 = vsub.f32 1.5, %v3396_v14 }
 0x767   : > { %v3409_v38 = vsub.f32 1.5, %v3408_v57  ;;  %v9207_v18 = vpop.eup %7310 }
 0x768   : > { %v3398_v29 = vmul.f32 %v7303_v5, %v3397_v10  ;;  %v3082_v5 = vsub.f32 1.5, %v3081_v62  ;;  %v9212_v42 = vpop.eup %7312  ;;  %v3454_v62 = vand.u32 2147483647, %v9191_v40  ;;  %vm3451_vm6 = vweird.f32 %v9207_v18 }
 0x769   : > { %v3410_v60 = vmul.f32 %v7305_v50, %v3409_v38  ;;  %v9215_v32 = vpop.eup %7314  ;;  %v3513_v50 = vadd.f32 1.0, %v6967_v3  ;;  %v3067_v14 = vmul.f32 %v9212_v42, %v9197_v23 }
 0x76a   : > { %v3083_v55 = vmul.f32 %v7307_v47, %v3082_v5  ;;  %v3461_v57 = vmul.f32 %v9215_v32, %v9195_v12 }
 0x76b   : > { %v3411_v44 = vmul.f32 %v3410_v60, %v9157_v33  ;;  %v3068_v31 = vmul.f32 %v9212_v42, %v3067_v14 }
 0x76c   : > { %v3084_v38 = vmul.f32 %v3083_v55, %v9171_v45  ;;  %v3462_v7 = vsub.f32 1.0, %v3461_v57 }
 0x76d   : > { %3391 = vadd.xlane.f32.xlu2 %v3384_v6  ;;  %v3025_v6 = vsel %vm3024_vm8, %v9146_v34, %v3023_v30  ;;  %v3446_v34 = vmul.f32 %v9207_v18, %v9191_v40  ;;  %v3413_v2 = vsel %vm3412_vm12, %v9157_v33, %v3411_v44  ;;  %vm3466_vm8 = vweird.f32 %v9215_v32 }
 0x76e   : > { %v3028_v59 = vsel %vm3026_vm9, %v3027_v4, %v3025_v6  ;;  %v3416_v47 = vsel %vm3414_vm15, %v3415_v51, %v3413_v2  ;;  %v3526_v6 = vsub.f32 1.0, %v6968_v22  ;;  %v3086_v3 = vsel %vm3085_vm2, %v9171_v45, %v3084_v38 }
 0x76f   : > { %v9210_v52 = vmax.f32 %v3028_v59, 1e-15  ;;  %v3447_v10 = vsub.f32 1.0, %v3446_v34  ;;  %v9244_v60 = vmax.f32 %v3416_v47, 1e-15  ;;  %v3088_v59 = vand.u32 2147483648, %v9171_v45 }
 0x770   : > { %v3463_v54 = vmul.f32 %v9215_v32, %v3462_v7  ;;  %vm9266_vm9 = vcmp.eq.f32.partialorder %v3454_v62, 8.507059e+37  ;;  %v3471_v38 = vand.u32 2147483648, %v9195_v12  ;;  %vm3465_vm12 = vweird.f32 %v9195_v12 }
 0x771   : > { %7316 = vrcp.f32 %v9210_v52  ;;  %v3448_v33 = vmul.f32 %v9207_v18, %v3447_v10  ;;  %v6962_v63 = vclamps-f32 %v9210_v52, 0.9999999  ;;  %v3089_v22 = vsel %vm3087_vm5, %v3088_v59, %v3086_v3 }
 0x772   : > { %7318 = vlog2.f32 %v3513_v50  ;;  %v3015_v50 = vand.u32 2147483648, %v9173_v28  ;;  %v3464_v51 = vadd.f32 %v9215_v32, %v3463_v54  ;;  %v3469_v7 = vand.u32 2147483647, %v9195_v12 }
 0x773   : > { %7320 = vlog2.f32 %v3525_v15  ;;  %v3449_v2 = vadd.f32 %v9207_v18, %v3448_v33 }
 0x774   : > { %7322 = vlog2.f32 %v3514_v56  ;;  %v9264_v56 = vmax.f32 %v3089_v22, 1e-15  ;;  %vm3470_vm15 = vcmp.eq.f32.partialorder %v3469_v7, 8.507059e+37 }
 0x775   : > { %3625 = vadd.xlane.f32.xlu2 %v3619_v0  ;;  %v3399_v0 = vmul.f32 %v3398_v29, %v9160_v19  ;;  %7324 = vlog2.f32 %v3526_v6 }
 0x777   : > { %v3401_v61 = vsel %vm3400_vm11, %v9160_v19, %v3399_v0  ;;  %v3011_v19 = vmul.f32 %v3010_v1, %v9173_v28  ;;  %v9238_v4 = vpop.eup %7316  ;;  %v3069_v0 = vmul.f32 0.5, %v3068_v31  ;;  %v3133_v1 = vsub.f32 1.0, %v6962_v63  ;;  %vm9279_vm11 = vmor %vm3450_vm3, %vm3451_vm6 }
 0x778   : > { %v3404_v30 = vsel %vm3402_vm13, %v3403_v39, %v3401_v61  ;;  %v7319_v5 = vpop.eup %7318  ;;  %v3108_v34 = vmul.f32 %v9238_v4, %v9210_v52  ;;  %v3456_v61 = vand.u32 2147483648, %v9191_v40  ;;  %v3127_v39 = vadd.f32 1.0, %v6962_v63  ;;  %vm9291_vm13 = vmor %vm3465_vm12, %vm3466_vm8 }
 0x779   : > { %v9235_v29 = vmax.f32 %v3404_v30, 1e-15  ;;  %v3013_v44 = vsel %vm3012_vm4, %v9173_v28, %v3011_v19  ;;  %v7321_v15 = vpop.eup %7320  ;;  %v3070_v14 = vsub.f32 1.5, %v3069_v0  ;;  %v3518_v45 = vmul.f32 0.6931472, %v7319_v5 }
 0x77a   : > { %v3016_v55 = vsel %vm3014_vm7, %v3015_v50, %v3013_v44  ;;  %v7323_v57 = vpop.eup %7322  ;;  %v3109_v30 = vsub.f32 1.0, %v3108_v34  ;;  %v3530_v28 = vmul.f32 0.6931472, %v7321_v15  ;;  %v3453_v62 = vsel %vm9279_vm11, %v9207_v18, %v3449_v2 }
 0x77b   : > { %7326 = vrcp.f32 %v9235_v29  ;;  %v7325_v10 = vpop.eup %7324  ;;  %v9273_v6 = vmax.f32 %v3016_v55, 1e-15  ;;  %v3071_v33 = vmul.f32 %v9212_v42, %v3070_v14  ;;  %v3457_v59 = vor.u32 1.1754944e-38, %v3456_v61 }
 0x77c   : > { %7328 = vrcp.f32 %v9244_v60  ;;  %v3468_v12 = vsel %vm9291_vm13, %v9215_v32, %v3464_v51  ;;  %v3520_v3 = vmul.f32 0.6931472, %v7323_v57  ;;  %v3532_v42 = vmul.f32 0.6931472, %v7325_v10 }
 0x77d   : > { %7330 = vlog2.f32 %v3127_v39  ;;  %v3110_v0 = vmul.f32 %v9238_v4, %v3109_v30  ;;  %v3537_v18 = vsub.f32 %v3518_v45, %v3530_v28  ;;  %v3472_v44 = vor.u32 1.1754944e-38, %v3471_v38 }
 0x77e   : > { %7332 = vlog2.f32 %v3133_v1  ;;  %v3458_v54 = vsel %vm9266_vm9, %v3457_v59, %v3453_v62  ;;  %v3072_v34 = vmul.f32 %v3071_v33, %v9197_v23  ;;  %v3538_v22 = vsub.f32 %v3520_v3, %v3532_v42 }
 0x77f   : > { %7334 = vrcp.f32 %v9264_v56  ;;  %v3459_v32 = vmul.f32 %v3458_v54, %v9235_v29  ;;  %v3473_v61 = vsel %vm3470_vm15, %v3472_v44, %v3468_v12  ;;  %v3111_v39 = vadd.f32 %v9238_v4, %v3110_v0 }
 0x780   : > { %7336 = vrcp.f32 %v9273_v6  ;;  %vm3113_vm2 = vweird.f32 %v9238_v4  ;;  %v3541_v14 = vmul.f32 0.5, %v3537_v18  ;;  %v3118_v1 = vand.u32 2147483648, %v9210_v52 }
 0x781   : > { %v9271_v31 = vpop.eup %7326  ;;  %vm3073_vm3 = vcmp.eq.f32.partialorder %v9197_v23, inf  ;;  %v3474_v45 = vmul.f32 %v3473_v61, %v9244_v60  ;;  %vm3112_vm4 = vweird.f32 %v9210_v52  ;;  %v3116_v51 = vand.u32 2147483647, %v9210_v52 }
 0x782   : > { %v9295_v63 = vpop.eup %7328  ;;  %v3558_v5 = vmul.f32 %v9271_v31, %v9235_v29  ;;  %v3074_v10 = vsel %vm3073_vm3, %v9197_v23, %v3072_v34  ;;  %v3545_v47 = vmul.f32 %v3541_v14, %v3459_v32  ;;  %vm9326_vm5 = vmor %vm3112_vm4, %vm3113_vm2  ;;  %v3542_v7 = vmul.f32 0.5, %v3538_v22 }
 0x783   : > { %v3573_v50 = vmul.f32 %v9295_v63, %v9244_v60  ;;  %v7331_v15 = vpop.eup %7330  ;;  %v3115_v52 = vsel %vm9326_vm5, %v9238_v4, %v3111_v39  ;;  %v3076_v59 = vand.u32 2147483648, %v9197_v23  ;;  %v3119_v12 = vor.u32 1.1754944e-38, %v3118_v1 }
 0x784   : > { %v7333_v55 = vpop.eup %7332  ;;  %v3559_v2 = vsub.f32 1.0, %v3558_v5  ;;  %v3131_v33 = vmul.f32 0.6931472, %v7331_v15  ;;  %v6961_v3 = vclamps-f32 %v9273_v6, 0.9999999  ;;  %vm3075_vm6 = vcmp.eq.f32.partialorder %v9197_v23, 0.0 }
 0x785   : > { %v9320_v30 = vpop.eup %7334  ;;  %v3574_v28 = vsub.f32 1.0, %v3573_v50  ;;  %v3137_v62 = vmul.f32 0.6931472, %v7333_v55  ;;  %vm3562_vm7 = vweird.f32 %v9235_v29  ;;  %v3546_v42 = vmul.f32 %v3542_v7, %v3474_v45 }
 0x786   : > { %v9330_v19 = vpop.eup %7336  ;;  %v3560_v40 = vmul.f32 %v9271_v31, %v3559_v2  ;;  %vm3117_vm8 = vcmp.eq.f32.partialorder %v3116_v51, 8.507059e+37  ;;  %v3077_v0 = vsel %vm3075_vm6, %v3076_v59, %v3074_v10  ;;  %v3164_v4 = vmul.f32 %v9320_v30, %v9264_v56 }
 0x787   : > { %v3575_v18 = vmul.f32 %v9295_v63, %v3574_v28  ;;  %v3120_v5 = vsel %vm3117_vm8, %v3119_v12, %v3115_v52  ;;  %vm3563_vm9 = vweird.f32 %v9271_v31  ;;  %v3139_v44 = vsub.f32 %v3131_v33, %v3137_v62 }
 0x788   : > { %v3093_v54 = vmul.f32 %v9330_v19, %v9273_v6  ;;  %v3561_v23 = vadd.f32 %v9271_v31, %v3560_v40  ;;  %v3566_v32 = vand.u32 2147483647, %v9235_v29  ;;  %v3568_v50 = vand.u32 2147483648, %v9235_v29  ;;  %vm9360_vm12 = vmor %vm3562_vm7, %vm3563_vm9 }
 0x789   : > { %v3126_v61 = vadd.f32 1.0, %v6961_v3  ;;  %vm3578_vm11 = vweird.f32 %v9295_v63  ;;  %v3121_v22 = vmul.f32 %v3120_v5, %v9264_v56  ;;  %v3576_v39 = vadd.f32 %v9295_v63, %v3575_v18 }
 0x78a   : > { %v3583_v55 = vand.u32 2147483648, %v9244_v60  ;;  %v3165_v14 = vsub.f32 1.0, %v3164_v4  ;;  %v3132_v2 = vsub.f32 1.0, %v6961_v3  ;;  %v9354_v1 = vmax.f32 %v3077_v0, 1e-15 }
 0x78b   : > { %v3141_v10 = vmul.f32 0.5, %v3139_v44  ;;  %v3565_v28 = vsel %vm9360_vm12, %v9271_v31, %v3561_v23  ;;  %vm3577_vm13 = vweird.f32 %v9244_v60  ;;  %v3581_v38 = vand.u32 2147483647, %v9244_v60 }
 0x78c   : > { %vm3567_vm15 = vcmp.eq.f32.partialorder %v3566_v32, 8.507059e+37  ;;  %v3569_v33 = vor.u32 1.1754944e-38, %v3568_v50  ;;  %vm9371_vm2 = vmor %vm3577_vm13, %vm3578_vm11  ;;  %v3584_v40 = vor.u32 1.1754944e-38, %v3583_v55  ;;  %v3166_v60 = vmul.f32 %v9320_v30, %v3165_v14 }
 0x78d   : > { %v3143_v62 = vmul.f32 %v3141_v10, %v3121_v22  ;;  %v3580_v31 = vsel %vm9371_vm2, %v9295_v63, %v3576_v39  ;;  %vm3582_vm3 = vcmp.eq.f32.partialorder %v3581_v38, 8.507059e+37  ;;  %vm3168_vm4 = vweird.f32 %v9264_v56 }
 0x78e   : > { %v3585_v5 = vsel %vm3582_vm3, %v3584_v40, %v3580_v31  ;;  %vm3169_vm5 = vweird.f32 %v9320_v30  ;;  %v3167_v32 = vadd.f32 %v9320_v30, %v3166_v60  ;;  %v3174_v50 = vand.u32 2147483648, %v9264_v56 }
 0x78f   : > { %vm3098_vm7 = vweird.f32 %v9330_v19  ;;  %vm3097_vm9 = vweird.f32 %v9273_v6  ;;  %v3101_v55 = vand.u32 2147483647, %v9273_v6 }
 0x790   : > { %vm9408_vm12 = vmor %vm3097_vm9, %vm3098_vm7 }
 0x791   : > { %vm3102_vm2 = vcmp.eq.f32.partialorder %v3101_v55, 8.507059e+37 }
 0x7a4   : > { %v9315_v57 = vpop.xlane.xlu2 %2622 }
 0x7a5   : > { %7338 = vrsqrt.f32 %v9315_v57  ;;  %vm2640_vm8 = vcmp.eq.f32.partialorder %v9315_v57, inf  ;;  %vm2642_vm11 = vcmp.eq.f32.partialorder %v9315_v57, 0.0 }
 0x7a6   : > { %7340 = vtanh.f32 %v3545_v47  ;;  %v3094_v47 = vsub.f32 1.0, %v3093_v54 }
 0x7a7   : > { %7342 = vtanh.f32 %v3546_v42  ;;  %v3570_v42 = vsel %vm3567_vm15, %v3569_v33, %v3565_v28  ;;  %vm3170_vm15 = vmor %vm3168_vm4, %vm3169_vm5 }
 0x7a8   : > { %7344 = vlog2.f32 %v3126_v61  ;;  %v3095_v0 = vmul.f32 %v9330_v19, %v3094_v47 }
 0x7a9   : > { %7346 = vlog2.f32 %v3132_v2 }
 0x7ab   : > { %v7339_v34 = vpop.eup %7338 }
 0x7ac   : > { %v2634_v15 = vmul.f32 %v7339_v34, %v9315_v57  ;;  %v7341_v7 = vpop.eup %7340  ;;  %v9375_v59 = vpop.xlane.xlu0 %2625 }
 0x7ad   : > { %v7343_v12 = vpop.eup %7342  ;;  %7348 = vrsqrt.f32 %v9375_v59  ;;  %v3553_v18 = vmul.f32 %v7341_v7, %v9089_v36  ;;  %v3622_v4 = vpop.xlane.xlu2 %3621  ;;  %v3096_v36 = vadd.f32 %v9330_v19, %v3095_v0  ;;  %vm2652_vm5 = vcmp.eq.f32.partialorder %v9375_v59, inf }
 0x7ae   : > { %v2635_v45 = vmul.f32 %v7339_v34, %v2634_v15  ;;  %7350 = vrcp.f32 %v9354_v1  ;;  %v7345_v44 = vpop.eup %7344  ;;  %v3554_v23 = vmul.f32 %v7343_v12, %v9097_v46  ;;  %vm3629_vm6 = vcmp.eq.f32.partialorder %v3622_v4, 0.0 }
 0x7af   : > { %7352 = vtanh.f32 %v3143_v62  ;;  %v3571_v54 = vmul.f32 %v3570_v42, %v3553_v18  ;;  %v2643_v15 = vand.u32 2147483648, %v9315_v57  ;;  %v3103_v46 = vand.u32 2147483648, %v9273_v6 }
 0x7b0   : > { %v2636_v52 = vmul.f32 0.5, %v2635_v45  ;;  %v3129_v14 = vmul.f32 0.6931472, %v7345_v44  ;;  %v3586_v28 = vmul.f32 %v3585_v5, %v3554_v23  ;;  %v3100_v6 = vsel %vm9408_vm12, %v9330_v19, %v3096_v36 }
 0x7b1   : > { %v9404_v10 = vsel %vm3629_vm6, 0.0, %v3571_v54  ;;  %v3172_v62 = vand.u32 2147483647, %v9264_v56  ;;  %v3104_v31 = vor.u32 1.1754944e-38, %v3103_v46  ;;  %v3171_v12 = vsel %vm3170_vm15, %v9320_v30, %v3167_v32 }
 0x7b2   : > { %v2637_v3 = vsub.f32 1.5, %v2636_v52  ;;  %v3645_v40 = vmul.f32 %v9404_v10, %v9404_v10  ;;  %v3175_v18 = vor.u32 1.1754944e-38, %v3174_v50  ;;  %vm2654_vm6 = vcmp.eq.f32.partialorder %v9375_v59, 0.0 }
 0x7b3   : > { %v3105_v42 = vsel %vm3102_vm2, %v3104_v31, %v3100_v6  ;;  %vm3173_vm3 = vcmp.eq.f32.partialorder %v3172_v62, 8.507059e+37  ;;  %vm3153_vm12 = vweird.f32 %v9354_v1 }
 0x7b4   : > { %v2638_v63 = vmul.f32 %v7339_v34, %v2637_v3  ;;  %v7347_v34 = vpop.eup %7346  ;;  %v3624_v47 = vpop.xlane.xlu0 %3623  ;;  %v3176_v54 = vsel %vm3173_vm3, %v3175_v18, %v3171_v12  ;;  %v3106_v56 = vmul.f32 %v3105_v42, %v9354_v1 }
 0x7b5   : > { %v7349_v22 = vpop.eup %7348  ;;  %vm3630_vm13 = vcmp.eq.f32.partialorder %v3624_v47, 0.0  ;;  %v3135_v52 = vmul.f32 0.6931472, %v7347_v34  ;;  %v2655_v47 = vand.u32 2147483648, %v9375_v59 }
 0x7b6   : > { %v2639_v61 = vmul.f32 %v2638_v63, %v9315_v57  ;;  %v9400_v2 = vpop.eup %7350  ;;  %v2646_v51 = vmul.f32 %v7349_v22, %v9375_v59  ;;  %v9417_v29 = vsel %vm3630_vm13, 0.0, %v3586_v28 }
 0x7b7   : > { %v3646_v60 = vmul.f32 %v9417_v29, %v9417_v29  ;;  %v3138_v4 = vsub.f32 %v3129_v14, %v3135_v52  ;;  %v3149_v5 = vmul.f32 %v9400_v2, %v9354_v1  ;;  %vm3154_vm9 = vweird.f32 %v9400_v2 }
 0x7b8   : > { %v2641_v39 = vsel %vm2640_vm8, %v9315_v57, %v2639_v61  ;;  %v7353_v57 = vpop.eup %7352  ;;  %v2647_v33 = vmul.f32 %v7349_v22, %v2646_v51  ;;  %vm3155_vm15 = vmor %vm3153_vm12, %vm3154_vm9 }
 0x7b9   : > { %v2644_v45 = vsel %vm2642_vm11, %v2643_v15, %v2641_v39  ;;  %v3147_v3 = vmul.f32 %v7353_v57, %v9104_v35  ;;  %v3649_v0 = vadd.f32 %v3646_v60, %v3645_v40  ;;  %v3140_v35 = vmul.f32 0.5, %v3138_v4 }
 0x7ba   : > { %v9412_v7 = vmax.f32 %v2644_v45, 1e-15  ;;  %v2648_v19 = vmul.f32 0.5, %v2647_v33  ;;  %v3150_v15 = vsub.f32 1.0, %v3149_v5 }
 0x7bb   : > { %v3650_v44 = vrot.slane %v3649_v0, 4  ;;  %v3177_v36 = vmul.f32 %v3176_v54, %v3147_v3  ;;  %v3142_v55 = vmul.f32 %v3140_v35, %v3106_v56 }
 0x7bc   : > { %7354 = vrcp.f32 %v9412_v7  ;;  %v2649_v63 = vsub.f32 1.5, %v2648_v19  ;;  %v3183_v61 = vpop.xlane.xlu0 %3182  ;;  %v3151_v28 = vmul.f32 %v9400_v2, %v3150_v15  ;;  %v2700_v62 = vand.u32 2147483648, %v9412_v7 }
 0x7bd   : > { %v3651_v30 = vadd.f32 %v3650_v44, %v3649_v0  ;;  %vm3185_vm4 = vcmp.eq.f32.partialorder %v3183_v61, 0.0  ;;  %7356 = vtanh.f32 %v3142_v55  ;;  %v2698_v60 = vand.u32 2147483647, %v9412_v7 }
 0x7be   : > { %v2650_v23 = vmul.f32 %v7349_v22, %v2649_v63  ;;  %v9435_v50 = vsel %vm3185_vm4, 0.0, %v3177_v36  ;;  %vm2694_vm8 = vweird.f32 %v9412_v7  ;;  %v3152_v42 = vadd.f32 %v9400_v2, %v3151_v28 }
 0x7bf   : > { %v3652_v46 = vrot.slane %v3651_v30, 2  ;;  %v3193_v39 = vmul.f32 %v9435_v50, %v9435_v50  ;;  %v2701_v18 = vor.u32 1.1754944e-38, %v2700_v62  ;;  %v3159_v63 = vand.u32 2147483648, %v9354_v1 }
 0x7c0   : > { %v2651_v32 = vmul.f32 %v2650_v23, %v9375_v59  ;;  %vm2699_vm13 = vcmp.eq.f32.partialorder %v2698_v60, 8.507059e+37  ;;  %v3157_v44 = vand.u32 2147483647, %v9354_v1  ;;  %v3156_v36 = vsel %vm3155_vm15, %v9400_v2, %v3152_v42 }
 0x7c1   : > { %v3653_v45 = vadd.f32 %v3652_v46, %v3651_v30  ;;  %v3200_v51 = vrot.slane %v3193_v39, 4  ;;  %v3160_v30 = vor.u32 1.1754944e-38, %v3159_v63  ;;  %vm2685_vm3 = vcmp.gt.f32.partialorder %v9412_v7, 0.996 }
 0x7c2   : > { %v7355_v34 = vpop.eup %7354  ;;  %v2653_v14 = vsel %vm2652_vm5, %v9375_v59, %v2651_v32  ;;  %vm3158_vm2 = vcmp.eq.f32.partialorder %v3157_v44, 8.507059e+37 }
 0x7c3   : > { %v2690_v22 = vmul.f32 %v7355_v34, %v9412_v7  ;;  %v3654_v57 = vrot.slane %v3653_v45, 1  ;;  %v3201_v6 = vadd.f32 %v3200_v51, %v3193_v39  ;;  %v2656_v52 = vsel %vm2654_vm6, %v2655_v47, %v2653_v14  ;;  %v7357_v4 = vpop.eup %7356 }
 0x7c4   : > { %vm2695_vm7 = vweird.f32 %v7355_v34  ;;  %v9450_v12 = vmax.f32 %v2656_v52, 1e-15  ;;  %v3146_v61 = vmul.f32 %v7357_v4, %v9095_v21  ;;  %v3161_v1 = vsel %vm3158_vm2, %v3160_v30, %v3156_v36 }
 0x7c5   : > { %v2691_v38 = vsub.f32 1.0, %v2690_v22  ;;  %v9446_v31 = vadd.f32 %v3654_v57, %v3653_v45  ;;  %v3202_v40 = vrot.slane %v3201_v6, 2  ;;  %vm2696_vm11 = vmor %vm2694_vm8, %vm2695_vm7 }
 0x7c6   : > { %v3162_v39 = vmul.f32 %v3161_v1, %v3146_v61  ;;  %vm2686_vm15 = vcmp.gt.f32.partialorder %v9450_v12, 0.996 }
 0x7c7   : > { %v2692_v33 = vmul.f32 %v7355_v34, %v2691_v38  ;;  %7358 = vrsqrt.f32 %v9446_v31  ;;  %v3203_v59 = vadd.f32 %v3202_v40, %v3201_v6  ;;  %vm3670_vm5 = vcmp.eq.f32.partialorder %v9446_v31, inf }
 0x7c8   : > { %vm3672_vm6 = vcmp.eq.f32.partialorder %v9446_v31, 0.0 }
 0x7c9   : > { %v2693_v19 = vadd.f32 %v7355_v34, %v2692_v33  ;;  %v9454_v3 = vpop.xlane.xlu1 %2628  ;;  %v3204_v5 = vrot.slane %v3203_v59, 1 }
 0x7ca   : > { %7360 = vrsqrt.f32 %v9454_v3 }
 0x7cb   : > { %v2697_v0 = vsel %vm2696_vm11, %v7355_v34, %v2693_v19  ;;  %7362 = vrcp.f32 %v9450_v12  ;;  %v9464_v23 = vadd.f32 %v3204_v5, %v3203_v59  ;;  %v3620_v5 = vand.u32 2147483647, %v9164_v27 }
 0x7cc   : > { %v2702_v54 = vsel %vm2699_vm13, %v2701_v18, %v2697_v0  ;;  %v3673_v0 = vand.u32 2147483648, %v9446_v31  ;;  %vm2709_vm11 = vweird.f32 %v9450_v12 }
 0x7cd   : > { %v2703_v56 = vmul.f32 0.996, %v2702_v54  ;;  %v7359_v34 = vpop.eup %7358  ;;  %7364 = vrsqrt.f32 %v9464_v23  ;;  %vm3225_vm8 = vcmp.eq.f32.partialorder %v9464_v23, inf  ;;  %vm3227_vm9 = vcmp.eq.f32.partialorder %v9464_v23, 0.0 }
 0x7ce   : > { %v3664_v32 = vmul.f32 %v7359_v34, %v9446_v31 }
 0x7cf   : > { %v2749_v35 = vmul.f32 %v2703_v56, %v9112_v13 }
 0x7d0   : > { %v9471_v15 = vpop.eup %7360  ;;  %v3665_v46 = vmul.f32 %v7359_v34, %v3664_v32  ;;  %v9473_v22 = vpop.xlane.xlu2 %2631 }
 0x7d1   : > { %v3181_v55 = vpop.xlane.xlu1 %3180  ;;  %v9476_v21 = vpop.eup %7362  ;;  %v9479_v2 = vsel %vm2685_vm3, %v2749_v35, %v9112_v13  ;;  %v2658_v47 = vmul.f32 %v9471_v15, %v9454_v3  ;;  %7366 = vrsqrt.f32 %v9473_v22  ;;  %vm2664_vm3 = vcmp.eq.f32.partialorder %v9454_v3, inf }
 0x7d2   : > { %vm3184_vm4 = vcmp.eq.f32.partialorder %v3181_v55, 0.0  ;;  %v3666_v14 = vmul.f32 0.5, %v3665_v46  ;;  %v2765_v51 = vmul.f32 %v9479_v2, %v9479_v2  ;;  %v2705_v13 = vmul.f32 %v9476_v21, %v9450_v12 }
 0x7d3   : > { %v9481_v45 = vsel %vm3184_vm4, 0.0, %v3162_v39  ;;  %v7365_v7 = vpop.eup %7364  ;;  %v2659_v40 = vmul.f32 %v9471_v15, %v2658_v47  ;;  %vm2710_vm7 = vweird.f32 %v9476_v21  ;;  %v3228_v39 = vand.u32 2147483648, %v9464_v23 }
 0x7d4   : > { %v3192_v28 = vmul.f32 %v9481_v45, %v9481_v45  ;;  %v3667_v38 = vsub.f32 1.5, %v3666_v14  ;;  %v2769_v57 = vsel %vm561_vm1, %v2765_v51, 0.0  ;;  %v3219_v6 = vmul.f32 %v7365_v7, %v9464_v23  ;;  %vm2711_vm12 = vmor %vm2709_vm11, %vm2710_vm7 }
 0x7d5   : > { %2770 = vadd.xlane.f32.xlu0 %v2769_v57  ;;  %v2706_v59 = vsub.f32 1.0, %v2705_v13  ;;  %v2660_v56 = vmul.f32 0.5, %v2659_v40 }
 0x7d6   : > { %v3194_v52 = vrot.slane %v3192_v28, 4  ;;  %v3668_v33 = vmul.f32 %v7359_v34, %v3667_v38  ;;  %v3220_v62 = vmul.f32 %v7365_v7, %v3219_v6  ;;  %v2713_v38 = vand.u32 2147483647, %v9450_v12 }
 0x7d7   : > { %v9496_v42 = vpop.eup %7366  ;;  %v2707_v30 = vmul.f32 %v9476_v21, %v2706_v59  ;;  %v2661_v1 = vsub.f32 1.5, %v2660_v56 }
 0x7d8   : > { %v3195_v60 = vadd.f32 %v3194_v52, %v3192_v28  ;;  %v3669_v19 = vmul.f32 %v3668_v33, %v9446_v31  ;;  %v3221_v18 = vmul.f32 0.5, %v3220_v62  ;;  %v2670_v34 = vmul.f32 %v9496_v42, %v9473_v22  ;;  %v9519_v47 = vpop.xlane.xlu2 %3283 }
 0x7d9   : > { %v2708_v14 = vadd.f32 %v9476_v21, %v2707_v30  ;;  %v2715_v28 = vand.u32 2147483648, %v9450_v12  ;;  %v2662_v13 = vmul.f32 %v9471_v15, %v2661_v1  ;;  %vm2714_vm13 = vcmp.eq.f32.partialorder %v2713_v38, 8.507059e+37 }
 0x7da   : > { %v3196_v4 = vrot.slane %v3195_v60, 2  ;;  %v3671_v63 = vsel %vm3670_vm5, %v9446_v31, %v3669_v19  ;;  %v3222_v54 = vsub.f32 1.5, %v3221_v18  ;;  %v2671_v55 = vmul.f32 %v9496_v42, %v2670_v34 }
 0x7db   : > { %v3674_v44 = vsel %vm3672_vm6, %v3673_v0, %v3671_v63  ;;  %v2712_v52 = vsel %vm2711_vm12, %v9476_v21, %v2708_v14  ;;  %v2716_v62 = vor.u32 1.1754944e-38, %v2715_v28  ;;  %v2663_v15 = vmul.f32 %v2662_v13, %v9454_v3 }
 0x7dc   : > { %v3197_v61 = vadd.f32 %v3196_v4, %v3195_v60  ;;  %v9503_v36 = vmax.f32 %v3674_v44, 1e-15  ;;  %v3223_v35 = vmul.f32 %v7365_v7, %v3222_v54  ;;  %v9534_v60 = vpop.xlane.xlu0 %3286  ;;  %v2667_v44 = vand.u32 2147483648, %v9454_v3 }
 0x7dd   : > { %3627 = vadd.xlane.f32.xlu0 %v3620_v5  ;;  %v2717_v19 = vsel %vm2714_vm13, %v2716_v62, %v2712_v52  ;;  %v2665_v34 = vsel %vm2664_vm3, %v9454_v3, %v2663_v15  ;;  %vm2676_vm3 = vcmp.eq.f32.partialorder %v9473_v22, inf }
 0x7de   : > { %v3198_v32 = vrot.slane %v3197_v61, 1  ;;  %7368 = vrcp.f32 %v9503_v36  ;;  %v3224_v31 = vmul.f32 %v3223_v35, %v9464_v23  ;;  %v3702_v0 = vand.u32 2147483648, %v9503_v36 }
 0x7df   : > { %v3700_v21 = vand.u32 2147483647, %v9503_v36  ;;  %v2718_v54 = vmul.f32 0.996, %v2717_v19  ;;  %vm3696_vm4 = vweird.f32 %v9503_v36  ;;  %vm3689_vm5 = vcmp.gt.f32.partialorder %v9503_v36, 0.996 }
 0x7e0   : > { %v9510_v46 = vadd.f32 %v3198_v32, %v3197_v61  ;;  %v3226_v51 = vsel %vm3225_vm8, %v9464_v23, %v3224_v31  ;;  %v2672_v23 = vmul.f32 0.5, %v2671_v55  ;;  %v3703_v35 = vor.u32 1.1754944e-38, %v3702_v0 }
 0x7e1   : > { %v3229_v7 = vsel %vm3227_vm9, %v3228_v39, %v3226_v51  ;;  %v2750_v31 = vmul.f32 %v2718_v54, %v9119_v11  ;;  %vm3701_vm7 = vcmp.eq.f32.partialorder %v3700_v21, 8.507059e+37  ;;  %vm2666_vm8 = vcmp.eq.f32.partialorder %v9454_v3, 0.0 }
 0x7e2   : > { %7370 = vrsqrt.f32 %v9510_v46  ;;  %v9525_v57 = vmax.f32 %v3229_v7, 1e-15  ;;  %v2673_v18 = vsub.f32 1.5, %v2672_v23  ;;  %vm3213_vm9 = vcmp.eq.f32.partialorder %v9510_v46, inf }
 0x7e3   : > { %7372 = vrsqrt.f32 %v9519_v47  ;;  %v9558_v7 = vsel %vm2686_vm15, %v2750_v31, %v9119_v11  ;;  %v2668_v31 = vsel %vm2666_vm8, %v2667_v44, %v2665_v34 }
 0x7e4   : > { %v7369_v6 = vpop.eup %7368  ;;  %7374 = vrcp.f32 %v9525_v57  ;;  %v2674_v55 = vmul.f32 %v9496_v42, %v2673_v18  ;;  %v3260_v13 = vand.u32 2147483648, %v9525_v57  ;;  %v3258_v42 = vand.u32 2147483647, %v9525_v57 }
 0x7e5   : > { %v3692_v33 = vmul.f32 %v7369_v6, %v9503_v36  ;;  %vm3697_vm2 = vweird.f32 %v7369_v6  ;;  %7376 = vrsqrt.f32 %v9534_v60  ;;  %vm3254_vm12 = vweird.f32 %v9525_v57 }
 0x7e6   : > { %vm3698_vm6 = vmor %vm3696_vm4, %vm3697_vm2  ;;  %vm3259_vm15 = vcmp.eq.f32.partialorder %v3258_v42, 8.507059e+37  ;;  %vm3215_vm2 = vcmp.eq.f32.partialorder %v9510_v46, 0.0  ;;  %vm3233_vm4 = vcmp.gt.f32.partialorder %v9525_v57, 0.996 }
 0x7e7   : > { %v3693_v40 = vsub.f32 1.0, %v3692_v33  ;;  %v2766_v33 = vmul.f32 %v9558_v7, %v9558_v7 }
 0x7e8   : > { %v7371_v59 = vpop.eup %7370 }
 0x7e9   : > { %v3694_v4 = vmul.f32 %v7369_v6, %v3693_v40  ;;  %v3207_v63 = vmul.f32 %v7371_v59, %v9510_v46  ;;  %v9541_v5 = vpop.eup %7372  ;;  %v3216_v40 = vand.u32 2147483648, %v9510_v46  ;;  %v2772_v0 = vsel %vm561_vm1, %v2766_v33, 0.0  ;;  %v9618_v33 = vpop.xlane.xlu2 %3391 }
 0x7ea   : > { %v7375_v56 = vpop.eup %7374  ;;  %v3313_v28 = vmul.f32 %v9541_v5, %v9519_v47  ;;  %2773 = vadd.xlane.f32.xlu1 %v2772_v0 }
 0x7eb   : > { %v3695_v61 = vadd.f32 %v7369_v6, %v3694_v4  ;;  %v3208_v30 = vmul.f32 %v7371_v59, %v3207_v63  ;;  %v3250_v32 = vmul.f32 %v7375_v56, %v9525_v57  ;;  %v9562_v23 = vpop.eup %7376  ;;  %vm3255_vm11 = vweird.f32 %v7375_v56 }
 0x7ec   : > { %v3314_v19 = vmul.f32 %v9541_v5, %v3313_v28  ;;  %vm3256_vm13 = vmor %vm3254_vm12, %vm3255_vm11 }
 0x7ed   : > { %v3699_v1 = vsel %vm3698_vm6, %v7369_v6, %v3695_v61  ;;  %v3209_v39 = vmul.f32 0.5, %v3208_v30  ;;  %v3251_v51 = vsub.f32 1.0, %v3250_v32  ;;  %v9593_v30 = vpop.xlane.xlu1 %3389 }
 0x7ee   : > { %v3704_v14 = vsel %vm3701_vm7, %v3703_v35, %v3699_v1  ;;  %7378 = vrsqrt.f32 %v9593_v30  ;;  %vm3319_vm7 = vcmp.eq.f32.partialorder %v9519_v47, inf }
 0x7ef   : > { %v3705_v38 = vmul.f32 0.996, %v3704_v14  ;;  %v3210_v6 = vsub.f32 1.5, %v3209_v39  ;;  %v3252_v52 = vmul.f32 %v7375_v56, %v3251_v51  ;;  %v3315_v14 = vmul.f32 0.5, %v3314_v19 }
 0x7f1   : > { %v3721_v62 = vmul.f32 %v3705_v38, %v9404_v10  ;;  %v3722_v11 = vmul.f32 %v3705_v38, %v9417_v29  ;;  %v3211_v12 = vmul.f32 %v7371_v59, %v3210_v6  ;;  %v3253_v15 = vadd.f32 %v7375_v56, %v3252_v52 }
 0x7f2   : > { %v3261_v59 = vor.u32 1.1754944e-38, %v3260_v13  ;;  %v3316_v57 = vsub.f32 1.5, %v3315_v14 }
 0x7f3   : > { %v9576_v18 = vsel %vm3689_vm5, %v3721_v62, %v9404_v10  ;;  %v9581_v4 = vsel %vm3689_vm5, %v3722_v11, %v9417_v29  ;;  %v3212_v21 = vmul.f32 %v3211_v12, %v9510_v46  ;;  %v3257_v61 = vsel %vm3256_vm13, %v7375_v56, %v3253_v15 }
 0x7f4   : > { %v3825_v63 = vmul.f32 %v9576_v18, %v9576_v18  ;;  %v3826_v54 = vmul.f32 %v9581_v4, %v9581_v4  ;;  %v3262_v10 = vsel %vm3259_vm15, %v3261_v59, %v3257_v61  ;;  %v2675_v29 = vmul.f32 %v2674_v55, %v9473_v22  ;;  %v9620_v62 = vpop.eup %7378 }
 0x7f5   : > { %v3214_v36 = vsel %vm3213_vm9, %v9510_v46, %v3212_v21  ;;  %v3263_v32 = vmul.f32 0.996, %v3262_v10  ;;  %v3325_v56 = vmul.f32 %v9562_v23, %v9534_v60  ;;  %v9605_v46 = vmax.f32 %v2668_v31, 1e-15 }
 0x7f6   : > { %v3829_v35 = vadd.f32 %v3826_v54, %v3825_v63  ;;  %v3217_v1 = vsel %vm3215_vm2, %v3216_v40, %v3214_v36  ;;  %v2677_v3 = vsel %vm2676_vm3, %v9473_v22, %v2675_v29  ;;  %v2679_v55 = vand.u32 2147483648, %v9473_v22 }
 0x7f7   : > { %v9599_v39 = vmax.f32 %v3217_v1, 1e-15  ;;  %v3265_v28 = vmul.f32 %v3263_v32, %v9435_v50  ;;  %v3326_v13 = vmul.f32 %v9562_v23, %v3325_v56  ;;  %vm2678_vm5 = vcmp.eq.f32.partialorder %v9473_v22, 0.0 }
 0x7f8   : > { %v3830_v51 = vrot.slane %v3829_v35, 4  ;;  %v2680_v52 = vsel %vm2678_vm5, %v2679_v55, %v2677_v3  ;;  %v3317_v19 = vmul.f32 %v9541_v5, %v3316_v57  ;;  %v3418_v21 = vmul.f32 %v9620_v62, %v9593_v30 }
 0x7f9   : > { %7380 = vrcp.f32 %v9599_v39  ;;  %v9610_v34 = vsel %vm3233_vm4, %v3265_v28, %v9435_v50  ;;  %v3327_v40 = vmul.f32 0.5, %v3326_v13  ;;  %v9622_v15 = vmax.f32 %v2680_v52, 1e-15 }
 0x7fa   : > { %v3831_v44 = vadd.f32 %v3830_v51, %v3829_v35  ;;  %v3734_v38 = vmul.f32 %v9610_v34, %v9610_v34  ;;  %7382 = vrcp.f32 %v9605_v46  ;;  %v3318_v29 = vmul.f32 %v3317_v19, %v9519_v47 }
 0x7fb   : > { %7384 = vrsqrt.f32 %v9618_v33  ;;  %v3328_v36 = vsub.f32 1.5, %v3327_v40  ;;  %v3245_v32 = vand.u32 2147483648, %v9599_v39  ;;  %v3419_v31 = vmul.f32 %v9620_v62, %v3418_v21 }
 0x7fc   : > { %v3832_v6 = vrot.slane %v3831_v44, 2  ;;  %v3741_v42 = vrot.slane %v3734_v38, 4  ;;  %7386 = vrcp.f32 %v9622_v15  ;;  %v3243_v56 = vand.u32 2147483647, %v9599_v39 }
 0x7fd   : > { %v9644_v28 = vmul.f32 %v9562_v23, %v3328_v36  ;;  %vm3239_vm8 = vweird.f32 %v9599_v39  ;;  %vm3321_vm9 = vcmp.eq.f32.partialorder %v9519_v47, 0.0  ;;  %v3322_v55 = vand.u32 2147483648, %v9519_v47 }
 0x7fe   : > { %v3833_v50 = vadd.f32 %v3832_v6, %v3831_v44  ;;  %v3742_v12 = vadd.f32 %v3741_v42, %v3734_v38  ;;  %v3320_v44 = vsel %vm3319_vm7, %v9519_v47, %v3318_v29  ;;  %v3246_v57 = vor.u32 1.1754944e-38, %v3245_v32 }
 0x7ff   : > { %v7381_v11 = vpop.eup %7380  ;;  %v9653_v6 = vmul.f32 0.5, %v3419_v31  ;;  %vm3244_vm12 = vcmp.eq.f32.partialorder %v3243_v56, 8.507059e+37  ;;  %v2728_v19 = vand.u32 2147483647, %v9605_v46  ;;  %vm2724_vm15 = vweird.f32 %v9605_v46 }
 0x800   : > { %v3834_v0 = vrot.slane %v3833_v50, 1  ;;  %v3235_v22 = vmul.f32 %v7381_v11, %v9599_v39  ;;  %v3743_v59 = vrot.slane %v3742_v12, 2  ;;  %v7383_v61 = vpop.eup %7382  ;;  %vm3240_vm6 = vweird.f32 %v7381_v11 }
 0x801   : > { %v9636_v1 = vpop.eup %7384  ;;  %v2720_v14 = vmul.f32 %v7383_v61, %v9605_v46  ;;  %vm3241_vm11 = vmor %vm3239_vm8, %vm3240_vm6  ;;  %vm2725_vm13 = vweird.f32 %v7383_v61  ;;  %vm3232_vm3 = vcmp.gt.f32.partialorder %v9599_v39, 0.996  ;;  %vm2729_vm5 = vcmp.eq.f32.partialorder %v2728_v19, 8.507059e+37 }
 0x802   : > { %v9629_v63 = vadd.f32 %v3834_v0, %v3833_v50  ;;  %v3236_v54 = vsub.f32 1.0, %v3235_v22  ;;  %v3744_v10 = vadd.f32 %v3743_v59, %v3742_v12  ;;  %v9650_v13 = vpop.eup %7386  ;;  %v3430_v23 = vmul.f32 %v9636_v1, %v9618_v33  ;;  %vm2726_vm2 = vmor %vm2724_vm15, %vm2725_vm13 }
 0x803   : > { %v2721_v38 = vsub.f32 1.0, %v2720_v14  ;;  %v3323_v50 = vsel %vm3321_vm9, %v3322_v55, %v3320_v44  ;;  %v2730_v59 = vand.u32 2147483648, %v9605_v46  ;;  %vm2740_vm6 = vweird.f32 %v9650_v13 }
 0x804   : > { %7388 = vrsqrt.f32 %v9629_v63  ;;  %v3745_v5 = vrot.slane %v3744_v10, 1  ;;  %v3237_v35 = vmul.f32 %v7381_v11, %v3236_v54  ;;  %v9661_v54 = vmax.f32 %v3323_v50, 1e-15 }
 0x805   : > { %v2722_v12 = vmul.f32 %v7383_v61, %v2721_v38  ;;  %vm3850_vm4 = vcmp.eq.f32.partialorder %v9629_v63, inf  ;;  %vm2739_vm7 = vweird.f32 %v9622_v15  ;;  %vm2687_vm8 = vcmp.gt.f32.partialorder %v9605_v46, 0.996 }
 0x806   : > { %v9641_v51 = vadd.f32 %v3745_v5, %v3744_v10  ;;  %v3238_v3 = vadd.f32 %v7381_v11, %v3237_v35  ;;  %v2735_v10 = vmul.f32 %v9650_v13, %v9622_v15  ;;  %v2731_v5 = vor.u32 1.1754944e-38, %v2730_v59  ;;  %vm2741_vm9 = vmor %vm2739_vm7, %vm2740_vm6 }
 0x807   : > { %v2723_v22 = vadd.f32 %v7383_v61, %v2722_v12  ;;  %v3853_v59 = vand.u32 2147483648, %v9629_v63  ;;  %vm2688_vm15 = vcmp.gt.f32.partialorder %v9622_v15, 0.996  ;;  %vm3426_vm6 = vcmp.eq.f32.partialorder %v9593_v30, 0.0 }
 0x808   : > { %7390 = vrsqrt.f32 %v9641_v51  ;;  %v3242_v42 = vsel %vm3241_vm11, %v7381_v11, %v3238_v3  ;;  %v3431_v11 = vmul.f32 %v9636_v1, %v3430_v23  ;;  %v2736_v31 = vsub.f32 1.0, %v2735_v10 }
 0x809   : > { %v3247_v47 = vsel %vm3244_vm12, %v3246_v57, %v3242_v42  ;;  %v2727_v29 = vsel %vm2726_vm2, %v7383_v61, %v2723_v22  ;;  %v2743_v57 = vand.u32 2147483647, %v9622_v15  ;;  %v2745_v23 = vand.u32 2147483648, %v9622_v15 }
 0x80a   : > { %v7389_v52 = vpop.eup %7388  ;;  %v3248_v0 = vmul.f32 0.996, %v3247_v47  ;;  %v2732_v3 = vsel %vm2729_vm5, %v2731_v5, %v2727_v29  ;;  %v2737_v55 = vmul.f32 %v9650_v13, %v2736_v31  ;;  %vm3852_vm12 = vcmp.eq.f32.partialorder %v9629_v63, 0.0 }
 0x80b   : > { %v3844_v40 = vmul.f32 %v7389_v52, %v9629_v63  ;;  %v2733_v61 = vmul.f32 0.996, %v2732_v3  ;;  %vm2744_vm11 = vcmp.eq.f32.partialorder %v2743_v57, 8.507059e+37  ;;  %v2746_v47 = vor.u32 1.1754944e-38, %v2745_v23 }
 0x80c   : > { %v3264_v36 = vmul.f32 %v3248_v0, %v9481_v45  ;;  %v2738_v12 = vadd.f32 %v9650_v13, %v2737_v55  ;;  %v3421_v31 = vsub.f32 1.5, %v9653_v6  ;;  %vm3766_vm13 = vcmp.eq.f32.partialorder %v9641_v51, inf }
 0x80d   : > { %v3845_v21 = vmul.f32 %v7389_v52, %v3844_v40  ;;  %v2751_v50 = vmul.f32 %v2733_v61, %v9134_v26  ;;  %v3330_v55 = vmul.f32 %v9644_v28, %v9534_v60  ;;  %7392 = vrcp.f32 %v9661_v54 }
 0x80e   : > { %v7391_v35 = vpop.eup %7390  ;;  %v9671_v14 = vsel %vm3232_vm3, %v3264_v36, %v9481_v45  ;;  %vm3768_vm2 = vcmp.eq.f32.partialorder %v9641_v51, 0.0  ;;  %v3422_v57 = vmul.f32 %v9620_v62, %v3421_v31  ;;  %vm3331_vm3 = vcmp.eq.f32.partialorder %v9534_v60, inf }
 0x80f   : > { %v3846_v32 = vmul.f32 0.5, %v3845_v21  ;;  %v3760_v56 = vmul.f32 %v7391_v35, %v9641_v51  ;;  %v3733_v39 = vmul.f32 %v9671_v14, %v9671_v14  ;;  %v9687_v22 = vsel %vm2687_vm8, %v2751_v50, %v9134_v26 }
 0x810   : > { %v2767_v10 = vmul.f32 %v9687_v22, %v9687_v22  ;;  %vm3424_vm5 = vcmp.eq.f32.partialorder %v9593_v30, inf  ;;  %vm3436_vm7 = vcmp.eq.f32.partialorder %v9618_v33, inf  ;;  %vm3438_vm8 = vcmp.eq.f32.partialorder %v9618_v33, 0.0 }
 0x811   : > { %v3847_v44 = vsub.f32 1.5, %v3846_v32  ;;  %v3761_v38 = vmul.f32 %v7391_v35, %v3760_v56  ;;  %v3735_v45 = vrot.slane %v3733_v39, 4 }
 0x813   : > { %v3848_v42 = vmul.f32 %v7389_v52, %v3847_v44  ;;  %v3762_v40 = vmul.f32 0.5, %v3761_v38  ;;  %v3736_v0 = vadd.f32 %v3735_v45, %v3733_v39  ;;  %v2742_v52 = vsel %vm2741_vm9, %v9650_v13, %v2738_v12  ;;  %v9724_v62 = vpop.eup %7392 }
 0x814   : > { %v2747_v46 = vsel %vm2744_vm11, %v2746_v47, %v2742_v52  ;;  %v2775_v13 = vsel %vm561_vm1, %v2767_v10, 0.0  ;;  %v3432_v44 = vmul.f32 0.5, %v3431_v11  ;;  %v3332_v47 = vsel %vm3331_vm3, %v9534_v60, %v3330_v55 }
 0x815   : > { %v3849_v19 = vmul.f32 %v3848_v42, %v9629_v63  ;;  %v3763_v21 = vsub.f32 1.5, %v3762_v40  ;;  %v3737_v29 = vrot.slane %v3736_v0, 2  ;;  %v2748_v5 = vmul.f32 0.996, %v2747_v46  ;;  %2776 = vadd.xlane.f32.xlu1 %v2775_v13 }
 0x816   : > { %v3433_v50 = vsub.f32 1.5, %v3432_v44  ;;  %v3334_v52 = vand.u32 2147483648, %v9534_v60 }
 0x817   : > { %v3851_v36 = vsel %vm3850_vm4, %v9629_v63, %v3849_v19  ;;  %v3764_v26 = vmul.f32 %v7391_v35, %v3763_v21  ;;  %v3738_v3 = vadd.f32 %v3737_v29, %v3736_v0  ;;  %v2752_v39 = vmul.f32 %v2748_v5, %v9142_v25 }
 0x818   : > { %v3854_v32 = vsel %vm3852_vm12, %v3853_v59, %v3851_v36  ;;  %v3769_v35 = vand.u32 2147483648, %v9641_v51  ;;  %v3423_v19 = vmul.f32 %v3422_v57, %v9593_v30  ;;  %v3434_v59 = vmul.f32 %v9636_v1, %v3433_v50 }
 0x819   : > { %v9699_v56 = vmax.f32 %v3854_v32, 1e-15  ;;  %v3765_v61 = vmul.f32 %v3764_v26, %v9641_v51  ;;  %v3739_v38 = vrot.slane %v3738_v3, 1  ;;  %v9714_v23 = vsel %vm2688_vm15, %v2752_v39, %v9142_v25 }
 0x81a   : > { %v2768_v15 = vmul.f32 %v9714_v23, %v9714_v23  ;;  %vm3333_vm4 = vcmp.eq.f32.partialorder %v9534_v60, 0.0  ;;  %v6969_v36 = vclamps-f32 %v9661_v54, 0.9999999  ;;  %v3425_v29 = vsel %vm3424_vm5, %v9593_v30, %v3423_v19 }
 0x81b   : > { %v6973_v6 = vclamps-f32 %v9699_v56, 0.9999999  ;;  %v3767_v11 = vsel %vm3766_vm13, %v9641_v51, %v3765_v61  ;;  %v9719_v40 = vadd.f32 %v3739_v38, %v3738_v3  ;;  %v3335_v46 = vsel %vm3333_vm4, %v3334_v52, %v3332_v47 }
 0x81c   : > { %v3770_v45 = vsel %vm3768_vm2, %v3769_v35, %v3767_v11  ;;  %v2778_v0 = vsel %vm561_vm1, %v2768_v15, 0.0  ;;  %v3476_v1 = vmul.f32 %v9724_v62, %v9661_v54  ;;  %v3427_v32 = vand.u32 2147483648, %v9593_v30 }
 0x81d   : > { %v3873_v42 = vadd.f32 1.0, %v6973_v6  ;;  %v3879_v28 = vsub.f32 1.0, %v6973_v6  ;;  %v9716_v12 = vmax.f32 %v3770_v45, 1e-15  ;;  %2779 = vadd.xlane.f32.xlu2 %v2778_v0  ;;  %v3435_v60 = vmul.f32 %v3434_v59, %v9618_v33 }
 0x81e   : > { %v9742_v13 = vmax.f32 %v3335_v46, 1e-15  ;;  %v3428_v39 = vsel %vm3426_vm6, %v3427_v32, %v3425_v29  ;;  %v3515_v61 = vadd.f32 1.0, %v6969_v36  ;;  %v3477_v6 = vsub.f32 1.0, %v3476_v1 }
 0x81f   : > { %7394 = vlog2.f32 %v3873_v42  ;;  %v6972_v25 = vclamps-f32 %v9716_v12, 0.9999999  ;;  %v3527_v35 = vsub.f32 1.0, %v6969_v36  ;;  %v3437_v42 = vsel %vm3436_vm7, %v9618_v33, %v3435_v60 }
 0x820   : > { %7396 = vlog2.f32 %v3879_v28  ;;  %v9751_v30 = vmax.f32 %v3428_v39, 1e-15  ;;  %v3439_v45 = vand.u32 2147483648, %v9618_v33  ;;  %v3478_v52 = vmul.f32 %v9724_v62, %v3477_v6 }
 0x821   : > { %7398 = vrcp.f32 %v9699_v56  ;;  %v3778_v21 = vadd.f32 1.0, %v6972_v25  ;;  %v3784_v10 = vsub.f32 1.0, %v6972_v25  ;;  %vm3754_vm9 = vcmp.eq.f32.partialorder %v9719_v40, inf }
 0x822   : > { %7400 = vrsqrt.f32 %v9719_v40  ;;  %v3440_v0 = vsel %vm3438_vm8, %v3439_v45, %v3437_v42  ;;  %v3757_v36 = vand.u32 2147483648, %v9719_v40  ;;  %v3904_v33 = vand.u32 2147483648, %v9699_v56 }
 0x823   : > { %7402 = vrcp.f32 %v9716_v12  ;;  %v3902_v32 = vand.u32 2147483647, %v9699_v56  ;;  %vm3898_vm12 = vweird.f32 %v9699_v56  ;;  %v3819_v45 = vand.u32 2147483647, %v9716_v12 }
 0x824   : > { %7404 = vlog2.f32 %v3778_v21  ;;  %v3905_v42 = vor.u32 1.1754944e-38, %v3904_v33  ;;  %vm3815_vm3 = vweird.f32 %v9716_v12  ;;  %vm3756_vm4 = vcmp.eq.f32.partialorder %v9719_v40, 0.0 }
 0x825   : > { %v7395_v5 = vpop.eup %7394  ;;  %7406 = vlog2.f32 %v3784_v10  ;;  %vm3903_vm2 = vcmp.eq.f32.partialorder %v3902_v32, 8.507059e+37  ;;  %vm3820_vm6 = vcmp.eq.f32.partialorder %v3819_v45, 8.507059e+37  ;;  %vm3481_vm7 = vweird.f32 %v9724_v62 }
 0x826   : > { %v7397_v26 = vpop.eup %7396  ;;  %v3876_v31 = vmul.f32 0.6931472, %v7395_v5  ;;  %7408 = vrcp.f32 %v9742_v13  ;;  %vm3480_vm8 = vweird.f32 %v9661_v54 }
 0x827   : > { %v7399_v3 = vpop.eup %7398  ;;  %v3882_v44 = vmul.f32 0.6931472, %v7397_v26  ;;  %7410 = vlog2.f32 %v3515_v61 }
 0x828   : > { %v7401_v55 = vpop.eup %7400  ;;  %v3894_v25 = vmul.f32 %v7399_v3, %v9699_v56  ;;  %7412 = vlog2.f32 %v3527_v35  ;;  %vm3899_vm11 = vweird.f32 %v7399_v3 }
 0x829   : > { %v9746_v38 = vpop.eup %7402  ;;  %v3885_v11 = vsub.f32 %v3876_v31, %v3882_v44  ;;  %v3748_v57 = vmul.f32 %v7401_v55, %v9719_v40  ;;  %v6970_v44 = vclamps-f32 %v9742_v13, 0.9999999  ;;  %vm3900_vm13 = vmor %vm3898_vm12, %vm3899_vm11  ;;  %7414 = vrcp.f32 %v9751_v30 }
 0x82a   : > { %v7405_v28 = vpop.eup %7404  ;;  %v3895_v10 = vsub.f32 1.0, %v3894_v25  ;;  %v3811_v29 = vmul.f32 %v9746_v38, %v9716_v12  ;;  %vm3816_vm15 = vweird.f32 %v9746_v38  ;;  %vm3495_vm12 = vweird.f32 %v9742_v13 }
 0x82b   : > { %v7407_v50 = vpop.eup %7406  ;;  %v3782_v15 = vmul.f32 0.6931472, %v7405_v28  ;;  %v3749_v47 = vmul.f32 %v7401_v55, %v3748_v57  ;;  %v3887_v59 = vmul.f32 0.5, %v3885_v11  ;;  %v3821_v11 = vand.u32 2147483648, %v9716_v12  ;;  %vm3817_vm5 = vmor %vm3815_vm3, %vm3816_vm15 }
 0x82c   : > { %v3788_v19 = vmul.f32 0.6931472, %v7407_v50  ;;  %v3896_v5 = vmul.f32 %v7399_v3, %v3895_v10  ;;  %v9763_v60 = vpop.eup %7408  ;;  %v3812_v31 = vsub.f32 1.0, %v3811_v29  ;;  %v3528_v32 = vsub.f32 1.0, %v6970_v44 }
 0x82d   : > { %v3750_v21 = vmul.f32 0.5, %v3749_v47  ;;  %v7411_v39 = vpop.eup %7410  ;;  %v3890_v61 = vmul.f32 %v3887_v59, %v9581_v4  ;;  %v3822_v10 = vor.u32 1.1754944e-38, %v3821_v11 }
 0x82e   : > { %v3790_v46 = vsub.f32 %v3782_v15, %v3788_v19  ;;  %v3897_v35 = vadd.f32 %v7399_v3, %v3896_v5  ;;  %v7413_v57 = vpop.eup %7412  ;;  %v3813_v28 = vmul.f32 %v9746_v38, %v3812_v31  ;;  %v3889_v15 = vmul.f32 %v3887_v59, %v9576_v18 }
 0x82f   : > { %v3751_v1 = vsub.f32 1.5, %v3750_v21  ;;  %v3491_v59 = vmul.f32 %v9763_v60, %v9742_v13  ;;  %v3484_v31 = vand.u32 2147483647, %v9661_v54  ;;  %v9797_v11 = vpop.eup %7414 }
 0x830   : > { %v3792_v26 = vmul.f32 0.5, %v3790_v46  ;;  %v3901_v50 = vsel %vm3900_vm13, %v7399_v3, %v3897_v35  ;;  %v3814_v25 = vadd.f32 %v9746_v38, %v3813_v28  ;;  %v3534_v28 = vmul.f32 0.6931472, %v7413_v57 }
 0x831   : > { %v3752_v6 = vmul.f32 %v7401_v55, %v3751_v1  ;;  %v3906_v47 = vsel %vm3903_vm2, %v3905_v42, %v3901_v50  ;;  %v3516_v1 = vadd.f32 1.0, %v6970_v44  ;;  %v3492_v35 = vsub.f32 1.0, %v3491_v59 }
 0x832   : > { %v3794_v55 = vmul.f32 %v3792_v26, %v9610_v34  ;;  %v3908_v21 = vmul.f32 %v3906_v47, %v3890_v61  ;;  %v3818_v46 = vsel %vm3817_vm5, %v9746_v38, %v3814_v25  ;;  %v3907_v12 = vmul.f32 %v3906_v47, %v3889_v15 }
 0x833   : > { %v3753_v56 = vmul.f32 %v3752_v6, %v9719_v40  ;;  %v3823_v29 = vsel %vm3820_vm6, %v3822_v10, %v3818_v46  ;;  %v3479_v38 = vadd.f32 %v9724_v62, %v3478_v52  ;;  %v3486_v61 = vand.u32 2147483648, %v9661_v54 }
 0x834   : > { %3942 = vmatpush.msrb.mxu2 %v3908_v21  ;;  %v3824_v5 = vmul.f32 %v3823_v29, %v3794_v55  ;;  %v3522_v42 = vmul.f32 0.6931472, %v7411_v39  ;;  %vm3485_vm11 = vcmp.eq.f32.partialorder %v3484_v31, 8.507059e+37  ;;  %v3493_v54 = vmul.f32 %v9763_v60, %v3492_v35 }
 0x835   : > { %v3755_v19 = vsel %vm3754_vm9, %v9719_v40, %v3753_v56  ;;  %vm3482_vm9 = vmor %vm3480_vm8, %vm3481_vm7  ;;  %vm3496_vm13 = vweird.f32 %v9763_v60  ;;  %v3501_v46 = vand.u32 2147483648, %v9742_v13  ;;  %vm3593_vm7 = vweird.f32 %v9797_v11 }
 0x836   : > { %v3758_v3 = vsel %vm3756_vm4, %v3757_v36, %v3755_v19  ;;  %3943 = vmatpush.msrb.mxu2 %v3907_v12  ;;  %v9791_v36 = vmax.f32 %v3440_v0, 1e-15  ;;  %v3483_v52 = vsel %vm3482_vm9, %v9724_v62, %v3479_v38  ;;  %v3487_v0 = vor.u32 1.1754944e-38, %v3486_v61  ;;  %vm9817_vm2 = vmor %vm3495_vm12, %vm3496_vm13 }
 0x837   : > { %v9784_v33 = vmax.f32 %v3758_v3, 1e-15  ;;  %v3539_v47 = vsub.f32 %v3522_v42, %v3534_v28  ;;  %v3494_v21 = vadd.f32 %v9763_v60, %v3493_v54  ;;  %v3499_v3 = vand.u32 2147483647, %v9742_v13 }
 0x838   : > { %4581 = vmatpush.msra.mxu2 %v3824_v5  ;;  %v3488_v56 = vsel %vm3485_vm11, %v3487_v0, %v3483_v52  ;;  %v3502_v52 = vor.u32 1.1754944e-38, %v3501_v46  ;;  %vm3592_vm8 = vweird.f32 %v9751_v30  ;;  %vm3607_vm12 = vweird.f32 %v9791_v36 }
 0x839   : > { %v6971_v26 = vclamps-f32 %v9784_v33, 0.9999999  ;;  %7416 = vrcp.f32 %v9784_v33  ;;  %v3489_v19 = vmul.f32 %v3488_v56, %v9751_v30  ;;  %v3543_v5 = vmul.f32 0.5, %v3539_v47  ;;  %vm3594_vm11 = vmor %vm3592_vm8, %vm3593_vm7 }
 0x83a   : > { %7418 = vlog2.f32 %v3516_v1  ;;  %v3806_v38 = vand.u32 2147483648, %v9784_v33  ;;  %vm3800_vm3 = vweird.f32 %v9784_v33  ;;  %vm3500_vm5 = vcmp.eq.f32.partialorder %v3499_v3, 8.507059e+37 }
 0x83b   : > { %v3777_v6 = vadd.f32 1.0, %v6971_v26  ;;  %v3783_v44 = vsub.f32 1.0, %v6971_v26  ;;  %7420 = vlog2.f32 %v3528_v32  ;;  %v3588_v32 = vmul.f32 %v9797_v11, %v9751_v30 }
 0x83c   : > { %v3547_v35 = vmul.f32 %v3543_v5, %v3489_v19  ;;  %v3807_v56 = vor.u32 1.1754944e-38, %v3806_v38  ;;  %v3611_v5 = vand.u32 2147483647, %v9791_v36 }
 0x83d   : > { %7422 = vlog2.f32 %v3777_v6  ;;  %v3804_v6 = vand.u32 2147483647, %v9784_v33  ;;  %v3589_v54 = vsub.f32 1.0, %v3588_v32 }
 0x83e   : > { %7424 = vlog2.f32 %v3783_v44  ;;  %v3498_v44 = vsel %vm9817_vm2, %v9763_v60, %v3494_v21  ;;  %vm3612_vm2 = vcmp.eq.f32.partialorder %v3611_v5, 8.507059e+37 }
 0x83f   : > { %v7417_v45 = vpop.eup %7416  ;;  %7426 = vrcp.f32 %v9791_v36  ;;  %vm3805_vm6 = vcmp.eq.f32.partialorder %v3804_v6, 8.507059e+37  ;;  %v3626_v6 = vpop.xlane.xlu2 %3625 }
 0x840   : > { %v3796_v50 = vmul.f32 %v7417_v45, %v9784_v33  ;;  %v7419_v15 = vpop.eup %7418  ;;  %vm3801_vm15 = vweird.f32 %v7417_v45  ;;  %7428 = vtanh.f32 %v3547_v35 }
 0x841   : > { %v7421_v55 = vpop.eup %7420  ;;  %v3524_v29 = vmul.f32 0.6931472, %v7419_v15  ;;  %vm3802_vm4 = vmor %vm3800_vm3, %vm3801_vm15  ;;  %vm3631_vm3 = vcmp.eq.f32.partialorder %v3626_v6, 0.0 }
 0x842   : > { %v3797_v25 = vsub.f32 1.0, %v3796_v50  ;;  %v3536_v1 = vmul.f32 0.6931472, %v7421_v55  ;;  %v3503_v50 = vsel %vm3500_vm5, %v3502_v52, %v3498_v44 }
 0x843   : > { %v7423_v62 = vpop.eup %7422  ;;  %v3504_v33 = vmul.f32 %v3503_v50, %v9791_v36 }
 0x844   : > { %v7425_v39 = vpop.eup %7424  ;;  %v3780_v57 = vmul.f32 0.6931472, %v7423_v62  ;;  %v3798_v10 = vmul.f32 %v7417_v45, %v3797_v25  ;;  %v3540_v28 = vsub.f32 %v3524_v29, %v3536_v1  ;;  %v3590_v62 = vmul.f32 %v9797_v11, %v3589_v54 }
 0x845   : > { %v9808_v59 = vpop.eup %7426  ;;  %v3786_v12 = vmul.f32 0.6931472, %v7425_v39 }
 0x846   : > { %v3799_v26 = vadd.f32 %v7417_v45, %v3798_v10  ;;  %v3603_v0 = vmul.f32 %v9808_v59, %v9791_v36  ;;  %v3544_v25 = vmul.f32 0.5, %v3540_v28  ;;  %v3591_v21 = vadd.f32 %v9797_v11, %v3590_v62  ;;  %v7429_v39 = vpop.eup %7428 }
 0x847   : > { %v3789_v61 = vsub.f32 %v3780_v57, %v3786_v12  ;;  %v3598_v57 = vand.u32 2147483648, %v9751_v30  ;;  %v3596_v10 = vand.u32 2147483647, %v9751_v30  ;;  %vm3608_vm9 = vweird.f32 %v9808_v59 }
 0x848   : > { %v3803_v42 = vsel %vm3802_vm4, %v7417_v45, %v3799_v26  ;;  %v3604_v60 = vsub.f32 1.0, %v3603_v0  ;;  %v3548_v19 = vmul.f32 %v3544_v25, %v3504_v33  ;;  %v9837_v3 = vpop.xlane.xlu0 %2770  ;;  %v3613_v12 = vand.u32 2147483648, %v9791_v36  ;;  %vm3609_vm13 = vmor %vm3607_vm12, %vm3608_vm9 }
 0x849   : > { %v3791_v13 = vmul.f32 0.5, %v3789_v61  ;;  %v3808_v55 = vsel %vm3805_vm6, %v3807_v56, %v3803_v42  ;;  %v3555_v29 = vmul.f32 %v7429_v39, %v9151_v20  ;;  %v3595_v1 = vsel %vm3594_vm11, %v9797_v11, %v3591_v21 }
 0x84a   : > { %v3605_v45 = vmul.f32 %v9808_v59, %v3604_v60  ;;  %7430 = vtanh.f32 %v3548_v19  ;;  %v3599_v32 = vor.u32 1.1754944e-38, %v3598_v57  ;;  %vm3597_vm15 = vcmp.eq.f32.partialorder %v3596_v10, 8.507059e+37 }
 0x84b   : > { %v3793_v15 = vmul.f32 %v3791_v13, %v9671_v14  ;;  %v3614_v31 = vor.u32 1.1754944e-38, %v3613_v12  ;;  %7432 = vrsqrt.f32 %v9837_v3  ;;  %vm2788_vm5 = vcmp.eq.f32.partialorder %v9837_v3, inf }
 0x84c   : > { %v3606_v46 = vadd.f32 %v9808_v59, %v3605_v45  ;;  %v3600_v38 = vsel %vm3597_vm15, %v3599_v32, %v3595_v1  ;;  %v2791_v32 = vand.u32 2147483648, %v9837_v3  ;;  %vm2790_vm6 = vcmp.eq.f32.partialorder %v9837_v3, 0.0 }
 0x84d   : > { %v3809_v47 = vmul.f32 %v3808_v55, %v3793_v15  ;;  %v3601_v61 = vmul.f32 %v3600_v38, %v3555_v29 }
 0x84e   : > { %v3610_v30 = vsel %vm3609_vm13, %v9808_v59, %v3606_v46 }
 0x84f   : > { %4552 = vmatpush.msra.mxu0 %v3809_v47  ;;  %v3615_v44 = vsel %vm3612_vm2, %v3614_v31, %v3610_v30  ;;  %v9849_v11 = vsel %vm3631_vm3, 0.0, %v3601_v61 }
 0x850   : > { %v7431_v26 = vpop.eup %7430  ;;  %v3628_v36 = vpop.xlane.xlu0 %3627  ;;  %v3647_v59 = vmul.f32 %v9849_v11, %v9849_v11 }
 0x851   : > { %v3556_v20 = vmul.f32 %v7431_v26, %v9164_v27  ;;  %vm3632_vm4 = vcmp.eq.f32.partialorder %v3628_v36, 0.0  ;;  %v7433_v13 = vpop.eup %7432 }
 0x852   : > { %v2782_v27 = vmul.f32 %v7433_v13, %v9837_v3 }
 0x853   : > { %v3616_v35 = vmul.f32 %v3615_v44, %v3556_v20 }
 0x854   : > { %v2783_v50 = vmul.f32 %v7433_v13, %v2782_v27 }
 0x855   : > { %v9851_v52 = vsel %vm3632_vm4, 0.0, %v3616_v35 }
 0x856   : > { %v3648_v0 = vmul.f32 %v9851_v52, %v9851_v52  ;;  %v2784_v60 = vmul.f32 0.5, %v2783_v50 }
 0x858   : > { %v3656_v42 = vadd.f32 %v3648_v0, %v3647_v59  ;;  %v2785_v19 = vsub.f32 1.5, %v2784_v60 }
 0x85a   : > { %v3657_v28 = vrot.slane %v3656_v42, 4  ;;  %v2786_v21 = vmul.f32 %v7433_v13, %v2785_v19 }
 0x85c   : > { %v3658_v56 = vadd.f32 %v3657_v28, %v3656_v42  ;;  %v2787_v46 = vmul.f32 %v2786_v21, %v9837_v3 }
 0x85d   : > { %v2774_v54 = vpop.xlane.xlu1 %2773 }
 0x85e   : > { %7434 = vrsqrt.f32 %v2774_v54  ;;  %v3659_v15 = vrot.slane %v3658_v56, 2  ;;  %v2789_v5 = vsel %vm2788_vm5, %v9837_v3, %v2787_v46  ;;  %vm2800_vm9 = vcmp.eq.f32.partialorder %v2774_v54, inf }
 0x85f   : > { %v2792_v26 = vsel %vm2790_vm6, %v2791_v32, %v2789_v5  ;;  %v2803_v3 = vand.u32 2147483648, %v2774_v54  ;;  %vm2802_vm11 = vcmp.eq.f32.partialorder %v2774_v54, 0.0 }
 0x860   : > { %v3660_v33 = vadd.f32 %v3659_v15, %v3658_v56  ;;  %v9863_v6 = vmax.f32 %v2792_v26, 1e-15 }
 0x862   : > { %v3661_v47 = vrot.slane %v3660_v33, 1  ;;  %v6955_v13 = vclamps-f32 %v9863_v6, 0.9999999  ;;  %vm2882_vm4 = vweird.f32 %v9863_v6 }
 0x864   : > { %v7435_v55 = vpop.eup %7434  ;;  %v3662_v25 = vadd.f32 %v3661_v47, %v3660_v33  ;;  %v2841_v28 = vadd.f32 1.0, %v6955_v13  ;;  %v2853_v27 = vsub.f32 1.0, %v6955_v13 }
 0x865   : > { %v2794_v62 = vmul.f32 %v7435_v55, %v2774_v54 }
 0x866   : > { %7436 = vrsqrt.f32 %v3662_v25  ;;  %vm3682_vm7 = vcmp.eq.f32.partialorder %v3662_v25, inf  ;;  %v3685_v44 = vand.u32 2147483648, %v3662_v25  ;;  %vm3684_vm8 = vcmp.eq.f32.partialorder %v3662_v25, 0.0 }
 0x867   : > { %v2795_v45 = vmul.f32 %v7435_v55, %v2794_v62  ;;  %7438 = vrcp.f32 %v9863_v6 }
 0x869   : > { %v2796_v57 = vmul.f32 0.5, %v2795_v45 }
 0x86b   : > { %v2797_v29 = vsub.f32 1.5, %v2796_v57 }
 0x86c   : > { %v7437_v39 = vpop.eup %7436 }
 0x86d   : > { %v3676_v10 = vmul.f32 %v7437_v39, %v3662_v25  ;;  %v2798_v38 = vmul.f32 %v7435_v55, %v2797_v29  ;;  %v7439_v56 = vpop.eup %7438 }
 0x86e   : > { %v2878_v47 = vmul.f32 %v7439_v56, %v9863_v6  ;;  %vm2883_vm2 = vweird.f32 %v7439_v56 }
 0x86f   : > { %v3677_v12 = vmul.f32 %v7437_v39, %v3676_v10  ;;  %v2799_v20 = vmul.f32 %v2798_v38, %v2774_v54  ;;  %vm9887_vm5 = vmor %vm2882_vm4, %vm2883_vm2 }
 0x870   : > { %v2879_v21 = vsub.f32 1.0, %v2878_v47 }
 0x871   : > { %v3678_v1 = vmul.f32 0.5, %v3677_v12  ;;  %v2801_v0 = vsel %vm2800_vm9, %v2774_v54, %v2799_v20 }
 0x872   : > { %v2804_v42 = vsel %vm2802_vm11, %v2803_v3, %v2801_v0  ;;  %v2880_v32 = vmul.f32 %v7439_v56, %v2879_v21 }
 0x873   : > { %v3679_v30 = vsub.f32 1.5, %v3678_v1  ;;  %v9870_v15 = vmax.f32 %v2804_v42, 1e-15  ;;  %v2888_v1 = vand.u32 2147483648, %v9863_v6 }
 0x875   : > { %v3680_v31 = vmul.f32 %v7437_v39, %v3679_v30  ;;  %vm2897_vm9 = vweird.f32 %v9870_v15 }
 0x877   : > { %v3681_v61 = vmul.f32 %v3680_v31, %v3662_v25 }
 0x879   : > { %v3683_v36 = vsel %vm3682_vm7, %v3662_v25, %v3681_v61  ;;  %v6956_v25 = vclamps-f32 %v9870_v15, 0.9999999  ;;  %v2881_v61 = vadd.f32 %v7439_v56, %v2880_v32 }
 0x87a   : > { %v3686_v35 = vsel %vm3684_vm8, %v3685_v44, %v3683_v36  ;;  %v2886_v44 = vand.u32 2147483647, %v9863_v6 }
 0x87b   : > { %v9865_v59 = vmax.f32 %v3686_v35, 1e-15  ;;  %v2842_v39 = vadd.f32 1.0, %v6956_v25  ;;  %v2854_v57 = vsub.f32 1.0, %v6956_v25  ;;  %v2885_v42 = vsel %vm9887_vm5, %v7439_v56, %v2881_v61 }
 0x87c   : > { %vm2887_vm7 = vcmp.eq.f32.partialorder %v2886_v44, 8.507059e+37 }
 0x87d   : > { %7440 = vrcp.f32 %v9865_v59  ;;  %v3717_v60 = vand.u32 2147483648, %v9865_v59  ;;  %v3715_v19 = vand.u32 2147483647, %v9865_v59  ;;  %vm3711_vm13 = vweird.f32 %v9865_v59 }
 0x87e   : > { %7442 = vlog2.f32 %v2841_v28  ;;  %v2889_v28 = vor.u32 1.1754944e-38, %v2888_v1  ;;  %vm3690_vm6 = vcmp.gt.f32.partialorder %v9865_v59, 0.996  ;;  %v2901_v1 = vand.u32 2147483647, %v9870_v15 }
 0x87f   : > { %7444 = vlog2.f32 %v2853_v27  ;;  %v3718_v12 = vor.u32 1.1754944e-38, %v3717_v60  ;;  %vm3716_vm3 = vcmp.eq.f32.partialorder %v3715_v19, 8.507059e+37 }
 0x880   : > { %7446 = vrcp.f32 %v9870_v15 }
 0x883   : > { %v7441_v50 = vpop.eup %7440 }
 0x884   : > { %v3707_v33 = vmul.f32 %v7441_v50, %v9865_v59  ;;  %vm3712_vm12 = vweird.f32 %v7441_v50  ;;  %v7443_v45 = vpop.eup %7442 }
 0x885   : > { %v7445_v10 = vpop.eup %7444  ;;  %v2846_v29 = vmul.f32 0.6931472, %v7443_v45  ;;  %vm3713_vm15 = vmor %vm3711_vm13, %vm3712_vm12 }
 0x886   : > { %v3708_v55 = vsub.f32 1.0, %v3707_v33  ;;  %v2858_v5 = vmul.f32 0.6931472, %v7445_v10  ;;  %v9884_v26 = vpop.eup %7446 }
 0x887   : > { %v2893_v6 = vmul.f32 %v9884_v26, %v9870_v15  ;;  %vm2898_vm8 = vweird.f32 %v9884_v26 }
 0x888   : > { %v9876_v54 = vpop.xlane.xlu1 %2776  ;;  %v3709_v62 = vmul.f32 %v7441_v50, %v3708_v55  ;;  %v2865_v31 = vsub.f32 %v2846_v29, %v2858_v5  ;;  %vm2899_vm13 = vmor %vm2897_vm9, %vm2898_vm8 }
 0x889   : > { %7448 = vrsqrt.f32 %v9876_v54  ;;  %vm2812_vm11 = vcmp.eq.f32.partialorder %v9876_v54, inf  ;;  %vm2814_vm12 = vcmp.eq.f32.partialorder %v9876_v54, 0.0 }
 0x88a   : > { %v3710_v46 = vadd.f32 %v7441_v50, %v3709_v62  ;;  %7450 = vlog2.f32 %v2842_v39  ;;  %v2869_v13 = vmul.f32 0.5, %v2865_v31  ;;  %v2890_v62 = vsel %vm2887_vm7, %v2889_v28, %v2885_v42 }
 0x88b   : > { %7452 = vlog2.f32 %v2854_v57 }
 0x88c   : > { %v3714_v30 = vsel %vm3713_vm15, %v7441_v50, %v3710_v46  ;;  %v2873_v60 = vmul.f32 %v2869_v13, %v9479_v2  ;;  %v2894_v2 = vsub.f32 1.0, %v2893_v6  ;;  %vm2902_vm15 = vcmp.eq.f32.partialorder %v2901_v1, 8.507059e+37 }
 0x88d   : > { %v3719_v38 = vsel %vm3716_vm3, %v3718_v12, %v3714_v30 }
 0x88e   : > { %v3720_v36 = vmul.f32 0.996, %v3719_v38  ;;  %v2891_v39 = vmul.f32 %v2890_v62, %v2873_v60  ;;  %v2895_v29 = vmul.f32 %v9884_v26, %v2894_v2 }
 0x88f   : > { %v7449_v20 = vpop.eup %7448 }
 0x890   : > { %v2806_v0 = vmul.f32 %v7449_v20, %v9876_v54  ;;  %v9892_v3 = vpop.xlane.xlu2 %2779  ;;  %v3723_v27 = vmul.f32 %v3720_v36, %v9849_v11  ;;  %v3724_v50 = vmul.f32 %v3720_v36, %v9851_v52  ;;  %v7451_v33 = vpop.eup %7450  ;;  %2937 = vxpose.xlu0.b32.start [1/2] (short) (narrow) %v2891_v39, 8  ;;  %6979 = vmatmul.msk.f32.vlgmr.msra.gmra.mxu0 %vm561_vm1, %v2891_v39 }
 0x891   : > { %7454 = vrsqrt.f32 %v9892_v3  ;;  %v7453_v47 = vpop.eup %7452  ;;  %v2848_v19 = vmul.f32 0.6931472, %v7451_v33  ;;  %v2896_v31 = vadd.f32 %v9884_v26, %v2895_v29  ;;  %vm2824_vm2 = vcmp.eq.f32.partialorder %v9892_v3, inf }
 0x892   : > { %v2807_v55 = vmul.f32 %v7449_v20, %v2806_v0  ;;  %v9904_v56 = vsel %vm3690_vm6, %v3723_v27, %v9849_v11  ;;  %v9907_v25 = vsel %vm3690_vm6, %v3724_v50, %v9851_v52  ;;  %v2860_v57 = vmul.f32 0.6931472, %v7453_v47 }
 0x893   : > { %v3827_v45 = vmul.f32 %v9904_v56, %v9904_v56  ;;  %v3828_v21 = vmul.f32 %v9907_v25, %v9907_v25  ;;  %v2903_v11 = vand.u32 2147483648, %v9870_v15  ;;  %v2815_v0 = vand.u32 2147483648, %v9876_v54 }
 0x894   : > { %v2808_v59 = vmul.f32 0.5, %v2807_v55  ;;  %v2866_v12 = vsub.f32 %v2848_v19, %v2860_v57  ;;  %v2900_v13 = vsel %vm2899_vm13, %v9884_v26, %v2896_v31  ;;  %vm2826_vm3 = vcmp.eq.f32.partialorder %v9892_v3, 0.0 }
 0x895   : > { %v3836_v10 = vadd.f32 %v3828_v21, %v3827_v45  ;;  %v2904_v35 = vor.u32 1.1754944e-38, %v2903_v11 }
 0x896   : > { %v2809_v46 = vsub.f32 1.5, %v2808_v59  ;;  %v2870_v38 = vmul.f32 0.5, %v2866_v12 }
 0x897   : > { %v7455_v52 = vpop.eup %7454  ;;  %v3837_v5 = vrot.slane %v3836_v10, 4  ;;  %v2905_v27 = vsel %vm2902_vm15, %v2904_v35, %v2900_v13 }
 0x898   : > { %v2810_v32 = vmul.f32 %v7449_v20, %v2809_v46  ;;  %v2818_v30 = vmul.f32 %v7455_v52, %v9892_v3  ;;  %v2874_v20 = vmul.f32 %v2870_v38, %v9558_v7 }
 0x899   : > { %v3838_v61 = vadd.f32 %v3837_v5, %v3836_v10 }
 0x89a   : > { %v2811_v44 = vmul.f32 %v2810_v32, %v9876_v54  ;;  %v2819_v36 = vmul.f32 %v7455_v52, %v2818_v30  ;;  %v2906_v6 = vmul.f32 %v2905_v27, %v2874_v20 }
 0x89b   : > { %v3839_v15 = vrot.slane %v3838_v61, 2 }
 0x89c   : > { %v2813_v42 = vsel %vm2812_vm11, %v9876_v54, %v2811_v44  ;;  %v2820_v28 = vmul.f32 0.5, %v2819_v36  ;;  %2938 = vxpose.xlu0.b32.end [2/2] (short) (narrow) %v2906_v6, 8  ;;  %6980 = vmatmul.msk.f32.gmra.mxu0 %vm561_vm1, %v2906_v6  ;;  %v2827_v54 = vand.u32 2147483648, %v9892_v3 }
 0x89d   : > { %v2816_v50 = vsel %vm2814_vm12, %v2815_v0, %v2813_v42  ;;  %v3840_v33 = vadd.f32 %v3839_v15, %v3838_v61 }
 0x89e   : > { %v2831_v55 = vmax.f32 %v2816_v50, 1e-15  ;;  %v2821_v60 = vsub.f32 1.5, %v2820_v28 }
 0x89f   : > { %v3841_v47 = vrot.slane %v3840_v33, 1 }
 0x8a0   : > { %7456 = vrcp.f32 %v2831_v55  ;;  %v2822_v7 = vmul.f32 %v7455_v52, %v2821_v60  ;;  %v6957_v26 = vclamps-f32 %v2831_v55, 0.9999999  ;;  %v2918_v44 = vand.u32 2147483648, %v2831_v55 }
 0x8a1   : > { %v9931_v62 = vadd.f32 %v3841_v47, %v3840_v33  ;;  %vm2912_vm5 = vweird.f32 %v2831_v55  ;;  %v2916_v20 = vand.u32 2147483647, %v2831_v55 }
 0x8a2   : > { %v2823_v19 = vmul.f32 %v2822_v7, %v9892_v3  ;;  %v2843_v45 = vadd.f32 1.0, %v6957_v26  ;;  %v2855_v21 = vsub.f32 1.0, %v6957_v26  ;;  %v2919_v27 = vor.u32 1.1754944e-38, %v2918_v44 }
 0x8a3   : > { %7458 = vrsqrt.f32 %v9931_v62  ;;  %vm2917_vm7 = vcmp.eq.f32.partialorder %v2916_v20, 8.507059e+37  ;;  %vm3862_vm8 = vcmp.eq.f32.partialorder %v9931_v62, inf  ;;  %vm3864_vm11 = vcmp.eq.f32.partialorder %v9931_v62, 0.0 }
 0x8a4   : > { %v2825_v59 = vsel %vm2824_vm2, %v9892_v3, %v2823_v19  ;;  %7460 = vlog2.f32 %v2843_v45 }
 0x8a5   : > { %v2828_v57 = vsel %vm2826_vm3, %v2827_v54, %v2825_v59  ;;  %7462 = vlog2.f32 %v2855_v21  ;;  %v3865_v54 = vand.u32 2147483648, %v9931_v62 }
 0x8a6   : > { %v7457_v39 = vpop.eup %7456  ;;  %v9939_v2 = vmax.f32 %v2828_v57, 1e-15 }
 0x8a7   : > { %v2908_v10 = vmul.f32 %v7457_v39, %v2831_v55  ;;  %vm2913_vm4 = vweird.f32 %v7457_v39 }
 0x8a8   : > { %7464 = vrcp.f32 %v9939_v2  ;;  %v6958_v11 = vclamps-f32 %v9939_v2, 0.9999999  ;;  %vm2914_vm6 = vmor %vm2912_vm5, %vm2913_vm4  ;;  %vm2927_vm12 = vweird.f32 %v9939_v2 }
 0x8a9   : > { %v2909_v46 = vsub.f32 1.0, %v2908_v10  ;;  %v7459_v52 = vpop.eup %7458  ;;  %v2931_v10 = vand.u32 2147483647, %v9939_v2 }
 0x8aa   : > { %v7461_v12 = vpop.eup %7460  ;;  %v3856_v29 = vmul.f32 %v7459_v52, %v9931_v62  ;;  %v2844_v5 = vadd.f32 1.0, %v6958_v11  ;;  %v2856_v32 = vsub.f32 1.0, %v6958_v11 }
 0x8ab   : > { %v2910_v1 = vmul.f32 %v7457_v39, %v2909_v46  ;;  %v7463_v3 = vpop.eup %7462  ;;  %v2850_v30 = vmul.f32 0.6931472, %v7461_v12  ;;  %vm2932_vm15 = vcmp.eq.f32.partialorder %v2931_v10, 8.507059e+37 }
 0x8ac   : > { %v3857_v38 = vmul.f32 %v7459_v52, %v3856_v29  ;;  %v2862_v31 = vmul.f32 0.6931472, %v7463_v3  ;;  %7466 = vlog2.f32 %v2844_v5 }
 0x8ad   : > { %v2911_v61 = vadd.f32 %v7457_v39, %v2910_v1  ;;  %7468 = vlog2.f32 %v2856_v32 }
 0x8ae   : > { %v7465_v36 = vpop.eup %7464  ;;  %v3858_v35 = vmul.f32 0.5, %v3857_v38  ;;  %v2867_v0 = vsub.f32 %v2850_v30, %v2862_v31 }
 0x8af   : > { %v2923_v13 = vmul.f32 %v7465_v36, %v9939_v2  ;;  %v2915_v28 = vsel %vm2914_vm6, %v7457_v39, %v2911_v61  ;;  %vm2928_vm9 = vweird.f32 %v7465_v36 }
 0x8b0   : > { %v3859_v15 = vsub.f32 1.5, %v3858_v35  ;;  %v2871_v42 = vmul.f32 0.5, %v2867_v0  ;;  %v2920_v7 = vsel %vm2917_vm7, %v2919_v27, %v2915_v28  ;;  %vm2929_vm13 = vmor %vm2927_vm12, %vm2928_vm9 }
 0x8b1   : > { %v2924_v50 = vsub.f32 1.0, %v2923_v13 }
 0x8b2   : > { %v7467_v6 = vpop.eup %7466  ;;  %v3860_v33 = vmul.f32 %v7459_v52, %v3859_v15  ;;  %v2875_v60 = vmul.f32 %v2871_v42, %v9687_v22  ;;  %v2933_v22 = vand.u32 2147483648, %v9939_v2 }
 0x8b3   : > { %v7469_v47 = vpop.eup %7468  ;;  %v2852_v26 = vmul.f32 0.6931472, %v7467_v6  ;;  %v2925_v19 = vmul.f32 %v7465_v36, %v2924_v50 }
 0x8b4   : > { %v3861_v55 = vmul.f32 %v3860_v33, %v9931_v62  ;;  %v9948_v45 = vmul.f32 %v2920_v7, %v2875_v60  ;;  %v2864_v21 = vmul.f32 0.6931472, %v7469_v47  ;;  %v2934_v29 = vor.u32 1.1754944e-38, %v2933_v22 }
 0x8b5   : > { %v2926_v59 = vadd.f32 %v7465_v36, %v2925_v19 }
 0x8b6   : > { %v3863_v39 = vsel %vm3862_vm8, %v9931_v62, %v3861_v55  ;;  %2969 = vxpose.xlu1.b32.start [1/2] (short) (narrow) %v9948_v45, 8  ;;  %v2868_v57 = vsub.f32 %v2852_v26, %v2864_v21 }
 0x8b7   : > { %v3866_v46 = vsel %vm3864_vm11, %v3865_v54, %v3863_v39  ;;  %v2930_v12 = vsel %vm2929_vm13, %v7465_v36, %v2926_v59 }
 0x8b8   : > { %v3868_v11 = vmax.f32 %v3866_v46, 1e-15  ;;  %v2872_v52 = vmul.f32 0.5, %v2868_v57  ;;  %v2935_v32 = vsel %vm2932_vm15, %v2934_v29, %v2930_v12 }
 0x8ba   : > { %v6974_v1 = vclamps-f32 %v3868_v11, 0.9999999  ;;  %7470 = vrcp.f32 %v3868_v11  ;;  %v2876_v5 = vmul.f32 %v2872_v52, %v9714_v23  ;;  %v3920_v15 = vand.u32 2147483648, %v3868_v11 }
 0x8bb   : > { %vm3914_vm3 = vweird.f32 %v3868_v11  ;;  %v3918_v42 = vand.u32 2147483647, %v3868_v11 }
 0x8bc   : > { %v3874_v3 = vadd.f32 1.0, %v6974_v1  ;;  %v3880_v30 = vsub.f32 1.0, %v6974_v1  ;;  %v2936_v38 = vmul.f32 %v2935_v32, %v2876_v5  ;;  %v3921_v50 = vor.u32 1.1754944e-38, %v3920_v15 }
 0x8bd   : > { %vm3919_vm5 = vcmp.eq.f32.partialorder %v3918_v42, 8.507059e+37 }
 0x8be   : > { %7472 = vlog2.f32 %v3874_v3  ;;  %2970 = vxpose.xlu1.b32.end [2/2] (short) (narrow) %v2936_v38, 8 }
 0x8bf   : > { %7474 = vlog2.f32 %v3880_v30 }
 0x8c0   : > { %v7471_v31 = vpop.eup %7470 }
 0x8c1   : > { %v3910_v2 = vmul.f32 %v7471_v31, %v3868_v11  ;;  %vm3915_vm2 = vweird.f32 %v7471_v31 }
 0x8c2   : > { %vm3916_vm4 = vmor %vm3914_vm3, %vm3915_vm2 }
 0x8c3   : > { %v3911_v61 = vsub.f32 1.0, %v3910_v2 }
 0x8c4   : > { %v7473_v44 = vpop.eup %7472 }
 0x8c5   : > { %v7475_v35 = vpop.eup %7474  ;;  %v3878_v0 = vmul.f32 0.6931472, %v7473_v44  ;;  %v3912_v36 = vmul.f32 %v7471_v31, %v3911_v61 }
 0x8c6   : > { %v3884_v20 = vmul.f32 0.6931472, %v7475_v35 }
 0x8c7   : > { %v3913_v13 = vadd.f32 %v7471_v31, %v3912_v36 }
 0x8c8   : > { %v3886_v23 = vsub.f32 %v3878_v0, %v3884_v20 }
 0x8c9   : > { %v3917_v27 = vsel %vm3916_vm4, %v7471_v31, %v3913_v13 }
 0x8ca   : > { %v3888_v28 = vmul.f32 0.5, %v3886_v23  ;;  %v3922_v60 = vsel %vm3919_vm5, %v3921_v50, %v3917_v27 }
 0x8cc   : > { %v3892_v6 = vmul.f32 %v3888_v28, %v9907_v25  ;;  %v3891_v33 = vmul.f32 %v3888_v28, %v9904_v56 }
 0x8ce   : > { %v3924_v47 = vmul.f32 %v3922_v60, %v3892_v6  ;;  %v3923_v7 = vmul.f32 %v3922_v60, %v3891_v33 }
 0x8d0   : > { %3965 = vmatpush.msra.mxu3 %v3924_v47 }
 0x8d2   : > { %3966 = vmatpush.msra.mxu3 %v3923_v7 }
 0x90d   : > { %v4554_v26 = vpop.f32.mrf.mxu0 }
 0x90e   : > { %v4589_v55 = vmul.f32 %v4554_v26, %v4554_v26 }
 0x919   : > { %v4557_v19 = vpop.f32.mrf.mxu0 }
 0x91a   : > { %v4590_v21 = vmul.f32 %v4557_v19, %v4557_v19 }
 0x91c   : > { %v4593_v54 = vadd.f32 %v4590_v21, %v4589_v55 }
 0x91e   : > { %v4594_v59 = vrot.slane %v4593_v54, 4 }
 0x920   : > { %v4595_v22 = vadd.f32 %v4594_v59, %v4593_v54 }
 0x922   : > { %v4596_v39 = vrot.slane %v4595_v22, 2 }
 0x924   : > { %v4597_v57 = vadd.f32 %v4596_v39, %v4595_v22 }
 0x926   : > { %v4598_v10 = vrot.slane %v4597_v57, 1 }
 0x928   : > { %v4599_v46 = vadd.f32 %v4598_v10, %v4597_v57 }
 0x92a   : > { %7476 = vrsqrt.f32 %v4599_v46  ;;  %vm4614_vm6 = vcmp.eq.f32.partialorder %v4599_v46, inf  ;;  %v4617_v30 = vand.u32 2147483648, %v4599_v46  ;;  %vm4616_vm7 = vcmp.eq.f32.partialorder %v4599_v46, 0.0 }
 0x930   : > { %v7477_v11 = vpop.eup %7476 }
 0x931   : > { %v4608_v52 = vmul.f32 %v7477_v11, %v4599_v46 }
 0x933   : > { %v4609_v12 = vmul.f32 %v7477_v11, %v4608_v52 }
 0x935   : > { %v4610_v29 = vmul.f32 0.5, %v4609_v12 }
 0x937   : > { %v4611_v1 = vsub.f32 1.5, %v4610_v29 }
 0x938   : > { %v2953_v5 = vpop.trf.xlu0 }
 0x939   : > { %v4612_v32 = vmul.f32 %v7477_v11, %v4611_v1  ;;  %6975 = vmatmul.msk.f32.vlgmr.msrb.gmra.mxu2 %vm1002_vm14, %v2953_v5 }
 0x93b   : > { %v4613_v3 = vmul.f32 %v4612_v32, %v4599_v46 }
 0x93d   : > { %v4615_v31 = vsel %vm4614_vm6, %v4599_v46, %v4613_v3 }
 0x93e   : > { %v4618_v2 = vsel %vm4616_vm7, %v4617_v30, %v4615_v31 }
 0x93f   : > { %v4631_v61 = vmax.f32 %v4618_v2, 1e-15 }
 0x941   : > { %6981 = vmatmul.msk.f32.vlgmr.msra.gmra.mxu2 %vm561_vm1, %v9948_v45  ;;  %7478 = vrcp.f32 %v4631_v61  ;;  %v4650_v36 = vand.u32 2147483648, %v4631_v61  ;;  %v4648_v13 = vand.u32 2147483647, %v4631_v61  ;;  %vm4644_vm9 = vweird.f32 %v4631_v61 }
 0x942   : > { %7480 = vtanh.f32 %v4631_v61 }
 0x943   : > { %v4651_v42 = vor.u32 1.1754944e-38, %v4650_v36  ;;  %vm4649_vm12 = vcmp.eq.f32.partialorder %v4648_v13, 8.507059e+37 }
 0x947   : > { %v7479_v44 = vpop.eup %7478 }
 0x948   : > { %v4640_v35 = vmul.f32 %v7479_v44, %v4631_v61  ;;  %vm4645_vm8 = vweird.f32 %v7479_v44  ;;  %v7481_v15 = vpop.eup %7480 }
 0x949   : > { %6982 = vmatmul.msk.f32.gmra.mxu2 %vm561_vm1, %v2936_v38  ;;  %vm4646_vm11 = vmor %vm4644_vm9, %vm4645_vm8  ;;  %v4635_v28 = vmul.f32 %v7481_v15, %v4554_v26  ;;  %v4636_v27 = vmul.f32 %v7481_v15, %v4557_v19 }
 0x94a   : > { %v4641_v0 = vsub.f32 1.0, %v4640_v35 }
 0x94c   : > { %v4642_v20 = vmul.f32 %v7479_v44, %v4641_v0 }
 0x94e   : > { %v4643_v23 = vadd.f32 %v7479_v44, %v4642_v20 }
 0x950   : > { %v4647_v50 = vsel %vm4646_vm11, %v7479_v44, %v4643_v23 }
 0x951   : > { %v4652_v45 = vsel %vm4649_vm12, %v4651_v42, %v4647_v50 }
 0x952   : > { %v4653_v6 = vmul.f32 %v4652_v45, %v4635_v28  ;;  %v4654_v33 = vmul.f32 %v4652_v45, %v4636_v27 }
 0x954   : > { %v4671_v60 = vmul.f32 %v4653_v6, %v4653_v6  ;;  %v4672_v47 = vmul.f32 %v4654_v33, %v4654_v33 }
 0x956   : > { %v4675_v38 = vadd.f32 %v4672_v47, %v4671_v60 }
 0x958   : > { %v4676_v55 = vrot.slane %v4675_v38, 4 }
 0x95a   : > { %v2985_v7 = vpop.trf.xlu1  ;;  %v4677_v21 = vadd.f32 %v4676_v55, %v4675_v38 }
 0x95b   : > { %6976 = vmatmul.msk.f32.vlgmr.msra.gmra.mxu3 %vm1002_vm14, %v2985_v7 }
 0x95c   : > { %v4678_v54 = vrot.slane %v4677_v21, 2 }
 0x95e   : > { %v4679_v59 = vadd.f32 %v4678_v54, %v4677_v21 }
 0x960   : > { %v4680_v22 = vrot.slane %v4679_v59, 1 }
 0x962   : > { %v4681_v39 = vadd.f32 %v4680_v22, %v4679_v59 }
 0x964   : > { %7482 = vrsqrt.f32 %v4681_v39  ;;  %vm4696_vm13 = vcmp.eq.f32.partialorder %v4681_v39, inf  ;;  %v4699_v12 = vand.u32 2147483648, %v4681_v39  ;;  %vm4698_vm15 = vcmp.eq.f32.partialorder %v4681_v39, 0.0 }
 0x96a   : > { %v7483_v26 = vpop.eup %7482 }
 0x96b   : > { %v4690_v19 = vmul.f32 %v7483_v26, %v4681_v39 }
 0x96d   : > { %v4691_v57 = vmul.f32 %v7483_v26, %v4690_v19 }
 0x96f   : > { %v4692_v10 = vmul.f32 0.5, %v4691_v57 }
 0x971   : > { %v4693_v46 = vsub.f32 1.5, %v4692_v10 }
 0x973   : > { %v4694_v11 = vmul.f32 %v7483_v26, %v4693_v46 }
 0x975   : > { %v4695_v52 = vmul.f32 %v4694_v11, %v4681_v39 }
 0x977   : > { %v4697_v29 = vsel %vm4696_vm13, %v4681_v39, %v4695_v52 }
 0x978   : > { %v4700_v1 = vsel %vm4698_vm15, %v4699_v12, %v4697_v29 }
 0x979   : > { %v4713_v5 = vmax.f32 %v4700_v1, 1e-15 }
 0x97b   : > { %7484 = vrcp.f32 %v4713_v5  ;;  %v4728_v31 = vand.u32 2147483648, %v4713_v5  ;;  %v4726_v61 = vand.u32 2147483647, %v4713_v5  ;;  %vm4722_vm3 = vweird.f32 %v4713_v5 }
 0x97c   : > { %vm4715_vm6 = vcmp.gt.f32.partialorder %v4713_v5, 0.996 }
 0x97d   : > { %v4729_v35 = vor.u32 1.1754944e-38, %v4728_v31  ;;  %vm4727_vm5 = vcmp.eq.f32.partialorder %v4726_v61, 8.507059e+37 }
 0x981   : > { %v7485_v32 = vpop.eup %7484 }
 0x982   : > { %v4718_v3 = vmul.f32 %v7485_v32, %v4713_v5  ;;  %vm4723_vm2 = vweird.f32 %v7485_v32 }
 0x983   : > { %vm4724_vm4 = vmor %vm4722_vm3, %vm4723_vm2 }
 0x984   : > { %v4719_v30 = vsub.f32 1.0, %v4718_v3  ;;  %v4805_v3 = vsub.f32 1.0, %v9629_v63 }
 0x986   : > { %v4720_v2 = vmul.f32 %v7485_v32, %v4719_v30 }
 0x988   : > { %v4721_v44 = vadd.f32 %v7485_v32, %v4720_v2 }
 0x98a   : > { %v4725_v0 = vsel %vm4724_vm4, %v7485_v32, %v4721_v44 }
 0x98b   : > { %v4730_v36 = vsel %vm4727_vm5, %v4729_v35, %v4725_v0 }
 0x98c   : > { %v4731_v20 = vmul.f32 0.996, %v4730_v36 }
 0x98e   : > { %v4747_v13 = vmul.f32 %v4731_v20, %v4653_v6  ;;  %v4748_v15 = vmul.f32 %v4731_v20, %v4654_v33 }
 0x990   : > { %v4755_v23 = vsel %vm4715_vm6, %v4747_v13, %v4653_v6  ;;  %v4756_v42 = vsel %vm4715_vm6, %v4748_v15, %v4654_v33 }
 0x991   : > { %v4759_v28 = vmul.f32 %v4755_v23, %v4755_v23  ;;  %v4760_v27 = vmul.f32 %v4756_v42, %v4756_v42  ;;  %v4777_v50 = vmul.f32 %v4755_v23, %v9576_v18  ;;  %v4778_v45 = vmul.f32 %v4756_v42, %v9581_v4 }
 0x992   : > { %v4807_v44 = vmul.f32 %v4805_v3, %v4755_v23  ;;  %v4808_v35 = vmul.f32 %v4805_v3, %v4756_v42 }
 0x993   : > { %v4763_v60 = vadd.f32 %v4760_v27, %v4759_v28  ;;  %v4781_v47 = vadd.f32 %v4778_v45, %v4777_v50 }
 0x995   : > { %v4764_v38 = vrot.slane %v4763_v60, 4  ;;  %v4782_v7 = vrot.slane %v4781_v47, 4 }
 0x997   : > { %v4765_v55 = vadd.f32 %v4764_v38, %v4763_v60  ;;  %v4783_v21 = vadd.f32 %v4782_v7, %v4781_v47 }
 0x999   : > { %v4766_v54 = vrot.slane %v4765_v55, 2  ;;  %v4784_v59 = vrot.slane %v4783_v21, 2 }
 0x99b   : > { %v4767_v22 = vadd.f32 %v4766_v54, %v4765_v55  ;;  %v4785_v39 = vadd.f32 %v4784_v59, %v4783_v21 }
 0x99d   : > { %v4768_v26 = vrot.slane %v4767_v22, 1  ;;  %v4786_v19 = vrot.slane %v4785_v39, 1 }
 0x99f   : > { %v4769_v6 = vadd.f32 %v4768_v26, %v4767_v22  ;;  %v4787_v33 = vadd.f32 %v4786_v19, %v4785_v39 }
 0x9a1   : > { %v4795_v57 = vmul.f32 2.0, %v4787_v33  ;;  %v4815_v46 = vmul.f32 %v4769_v6, %v9629_v63 }
 0x9a3   : > { %v4797_v10 = vadd.f32 1.0, %v4795_v57 }
 0x9a5   : > { %v4817_v11 = vadd.f32 %v4815_v46, %v4797_v10  ;;  %v4799_v29 = vadd.f32 %v4797_v10, %v4769_v6 }
 0x9a7   : > { %v4819_v52 = vmax.f32 %v4817_v11, 1e-15  ;;  %v4801_v32 = vmul.f32 %v4799_v29, %v9576_v18  ;;  %v4802_v31 = vmul.f32 %v4799_v29, %v9581_v4 }
 0x9a9   : > { %7486 = vrcp.f32 %v4819_v52  ;;  %v4832_v30 = vand.u32 2147483648, %v4819_v52  ;;  %v4830_v61 = vand.u32 2147483647, %v4819_v52  ;;  %vm4826_vm8 = vweird.f32 %v4819_v52 }
 0x9aa   : > { %v4811_v20 = vadd.f32 %v4807_v44, %v4801_v32  ;;  %v4812_v13 = vadd.f32 %v4808_v35, %v4802_v31 }
 0x9ab   : > { %v4833_v36 = vor.u32 1.1754944e-38, %v4832_v30  ;;  %vm4831_vm11 = vcmp.eq.f32.partialorder %v4830_v61, 8.507059e+37 }
 0x9af   : > { %v7487_v12 = vpop.eup %7486 }
 0x9b0   : > { %v4822_v1 = vmul.f32 %v7487_v12, %v4819_v52  ;;  %vm4827_vm7 = vweird.f32 %v7487_v12 }
 0x9b1   : > { %vm4828_vm9 = vmor %vm4826_vm8, %vm4827_vm7 }
 0x9b2   : > { %v4823_v5 = vsub.f32 1.0, %v4822_v1 }
 0x9b4   : > { %v4824_v2 = vmul.f32 %v7487_v12, %v4823_v5 }
 0x9b6   : > { %v4825_v0 = vadd.f32 %v7487_v12, %v4824_v2 }
 0x9b8   : > { %v4829_v15 = vsel %vm4828_vm9, %v7487_v12, %v4825_v0 }
 0x9b9   : > { %v4834_v28 = vsel %vm4831_vm11, %v4833_v36, %v4829_v15 }
 0x9ba   : > { %v9971_v18 = vmul.f32 %v4834_v28, %v4811_v20  ;;  %v9973_v63 = vmul.f32 %v4834_v28, %v4812_v13 }
 0x9bc   : > { %v9975_v27 = vpop.f32.mrf.mxu2  ;;  %v4853_v4 = vmul.f32 %v9971_v18, %v9971_v18  ;;  %v4854_v23 = vmul.f32 %v9973_v63, %v9973_v63 }
 0x9bd   : > { %v3971_v42 = vmul.f32 %v9975_v27, %v9975_v27 }
 0x9be   : > { %v4857_v50 = vadd.f32 %v4854_v23, %v4853_v4 }
 0x9bf   : > { %v3973_v45 = vrot.slane %v3971_v42, 4 }
 0x9c0   : > { %v4858_v60 = vrot.slane %v4857_v50, 4 }
 0x9c1   : > { %v3974_v47 = vadd.f32 %v3973_v45, %v3971_v42 }
 0x9c2   : > { %v4859_v38 = vadd.f32 %v4858_v60, %v4857_v50 }
 0x9c3   : > { %v3975_v7 = vrot.slane %v3974_v47, 2 }
 0x9c4   : > { %v9983_v55 = vpop.f32.mrf.mxu2  ;;  %v4860_v21 = vrot.slane %v4859_v38, 2 }
 0x9c5   : > { %v3976_v54 = vadd.f32 %v3975_v7, %v3974_v47  ;;  %v4591_v33 = vmul.f32 %v9983_v55, %v9983_v55 }
 0x9c6   : > { %v4861_v59 = vadd.f32 %v4860_v21, %v4859_v38 }
 0x9c7   : > { %v3977_v22 = vrot.slane %v3976_v54, 1 }
 0x9c8   : > { %v4862_v39 = vrot.slane %v4861_v59, 1 }
 0x9c9   : > { %v3978_v26 = vadd.f32 %v3977_v22, %v3976_v54 }
 0x9ca   : > { %v4863_v19 = vadd.f32 %v4862_v39, %v4861_v59 }
 0x9cb   : > { %7488 = vrsqrt.f32 %v3978_v26  ;;  %vm3992_vm12 = vcmp.eq.f32.partialorder %v3978_v26, inf  ;;  %v3995_v28 = vand.u32 2147483648, %v3978_v26  ;;  %vm3994_vm13 = vcmp.eq.f32.partialorder %v3978_v26, 0.0 }
 0x9cc   : > { %v9985_v6 = vpop.f32.mrf.mxu2  ;;  %7490 = vrsqrt.f32 %v4863_v19  ;;  %vm4878_vm15 = vcmp.eq.f32.partialorder %v4863_v19, inf  ;;  %v4881_v50 = vand.u32 2147483648, %v4863_v19  ;;  %vm4880_vm2 = vcmp.eq.f32.partialorder %v4863_v19, 0.0 }
 0x9cd   : > { %v4592_v57 = vmul.f32 %v9985_v6, %v9985_v6 }
 0x9cf   : > { %v4600_v10 = vadd.f32 %v4592_v57, %v4591_v33 }
 0x9d1   : > { %v7489_v46 = vpop.eup %7488  ;;  %v4601_v52 = vrot.slane %v4600_v10, 4 }
 0x9d2   : > { %v3986_v11 = vmul.f32 %v7489_v46, %v3978_v26  ;;  %v7491_v12 = vpop.eup %7490 }
 0x9d3   : > { %v4872_v29 = vmul.f32 %v7491_v12, %v4863_v19  ;;  %v4602_v5 = vadd.f32 %v4601_v52, %v4600_v10 }
 0x9d4   : > { %v3987_v1 = vmul.f32 %v7489_v46, %v3986_v11 }
 0x9d5   : > { %v4873_v32 = vmul.f32 %v7491_v12, %v4872_v29  ;;  %v4603_v30 = vrot.slane %v4602_v5, 2 }
 0x9d6   : > { %v3988_v3 = vmul.f32 0.5, %v3987_v1 }
 0x9d7   : > { %v4874_v31 = vmul.f32 0.5, %v4873_v32  ;;  %v4604_v61 = vadd.f32 %v4603_v30, %v4602_v5 }
 0x9d8   : > { %v3989_v2 = vsub.f32 1.5, %v3988_v3 }
 0x9d9   : > { %v4875_v44 = vsub.f32 1.5, %v4874_v31  ;;  %v4605_v0 = vrot.slane %v4604_v61, 1 }
 0x9da   : > { %v3990_v35 = vmul.f32 %v7489_v46, %v3989_v2 }
 0x9db   : > { %v4876_v36 = vmul.f32 %v7491_v12, %v4875_v44  ;;  %v9991_v13 = vadd.f32 %v4605_v0, %v4604_v61 }
 0x9dc   : > { %v3991_v20 = vmul.f32 %v3990_v35, %v3978_v26 }
 0x9dd   : > { %v4877_v23 = vmul.f32 %v4876_v36, %v4863_v19  ;;  %7492 = vrsqrt.f32 %v9991_v13  ;;  %vm4626_vm3 = vcmp.eq.f32.partialorder %v9991_v13, inf  ;;  %vm4628_vm5 = vcmp.eq.f32.partialorder %v9991_v13, 0.0 }
 0x9de   : > { %v9993_v15 = vpop.f32.mrf.mxu3  ;;  %v3993_v42 = vsel %vm3992_vm12, %v3978_v26, %v3991_v20  ;;  %v4629_v36 = vand.u32 2147483648, %v9991_v13 }
 0x9df   : > { %v3972_v4 = vmul.f32 %v9993_v15, %v9993_v15  ;;  %v3996_v45 = vsel %vm3994_vm13, %v3995_v28, %v3993_v42  ;;  %v4879_v47 = vsel %vm4878_vm15, %v4863_v19, %v4877_v23 }
 0x9e0   : > { %v4009_v38 = vmax.f32 %v3996_v45, 1e-15  ;;  %v4882_v7 = vsel %vm4880_vm2, %v4881_v50, %v4879_v47 }
 0x9e1   : > { %v3979_v60 = vrot.slane %v3972_v4, 4  ;;  %v9998_v54 = vmax.f32 %v4882_v7, 1e-15 }
 0x9e2   : > { %7494 = vrcp.f32 %v4009_v38  ;;  %v4024_v5 = vand.u32 2147483647, %v4009_v38  ;;  %v4026_v30 = vand.u32 2147483648, %v4009_v38  ;;  %vm4020_vm8 = vweird.f32 %v4009_v38 }
 0x9e3   : > { %v3980_v21 = vadd.f32 %v3979_v60, %v3972_v4  ;;  %v7493_v22 = vpop.eup %7492  ;;  %7496 = vrcp.f32 %v9998_v54  ;;  %v4908_v3 = vand.u32 2147483647, %v9998_v54  ;;  %v4910_v2 = vand.u32 2147483648, %v9998_v54 }
 0x9e4   : > { %v4620_v39 = vmul.f32 %v7493_v22, %v9991_v13  ;;  %7498 = vtanh.f32 %v4009_v38  ;;  %vm4904_vm7 = vweird.f32 %v9998_v54  ;;  %vm4025_vm9 = vcmp.eq.f32.partialorder %v4024_v5, 8.507059e+37 }
 0x9e5   : > { %v3981_v59 = vrot.slane %v3980_v21, 2  ;;  %vm4909_vm11 = vcmp.eq.f32.partialorder %v4908_v3, 8.507059e+37  ;;  %v4027_v4 = vor.u32 1.1754944e-38, %v4026_v30  ;;  %v4911_v50 = vor.u32 1.1754944e-38, %v4910_v2 }
 0x9e6   : > { %v4621_v33 = vmul.f32 %v7493_v22, %v4620_v39  ;;  %vm4897_vm15 = vcmp.gt.f32.partialorder %v9998_v54, 0.996 }
 0x9e7   : > { %v3982_v26 = vadd.f32 %v3981_v59, %v3980_v21 }
 0x9e8   : > { %v7495_v10 = vpop.eup %7494  ;;  %v4622_v46 = vmul.f32 0.5, %v4621_v33 }
 0x9e9   : > { %v3983_v57 = vrot.slane %v3982_v26, 1  ;;  %v7497_v11 = vpop.eup %7496  ;;  %v4016_v19 = vmul.f32 %v7495_v10, %v4009_v38  ;;  %vm4021_vm4 = vweird.f32 %v7495_v10 }
 0x9ea   : > { %v4900_v12 = vmul.f32 %v7497_v11, %v9998_v54  ;;  %v4623_v29 = vsub.f32 1.5, %v4622_v46  ;;  %v7499_v44 = vpop.eup %7498  ;;  %vm4905_vm6 = vweird.f32 %v7497_v11  ;;  %vm4022_vm12 = vmor %vm4020_vm8, %vm4021_vm4 }
 0x9eb   : > { %v10002_v52 = vadd.f32 %v3983_v57, %v3982_v26  ;;  %v4017_v1 = vsub.f32 1.0, %v4016_v19  ;;  %vm4906_vm13 = vmor %vm4904_vm7, %vm4905_vm6  ;;  %v4013_v45 = vmul.f32 %v7499_v44, %v9975_v27 }
 0x9ec   : > { %v4901_v32 = vsub.f32 1.0, %v4900_v12  ;;  %v4624_v31 = vmul.f32 %v7493_v22, %v4623_v29 }
 0x9ed   : > { %7500 = vrsqrt.f32 %v10002_v52  ;;  %v4018_v61 = vmul.f32 %v7495_v10, %v4017_v1  ;;  %vm4004_vm2 = vcmp.eq.f32.partialorder %v10002_v52, inf }
 0x9ee   : > { %v4902_v35 = vmul.f32 %v7497_v11, %v4901_v32  ;;  %v4625_v0 = vmul.f32 %v4624_v31, %v9991_v13 }
 0x9ef   : > { %v4019_v20 = vadd.f32 %v7495_v10, %v4018_v61 }
 0x9f0   : > { %v4903_v28 = vadd.f32 %v7497_v11, %v4902_v35  ;;  %v4627_v23 = vsel %vm4626_vm3, %v9991_v13, %v4625_v0  ;;  %vm4006_vm3 = vcmp.eq.f32.partialorder %v10002_v52, 0.0 }
 0x9f1   : > { %v4023_v60 = vsel %vm4022_vm12, %v7495_v10, %v4019_v20  ;;  %v4630_v47 = vsel %vm4628_vm5, %v4629_v36, %v4627_v23 }
 0x9f2   : > { %v4907_v7 = vsel %vm4906_vm13, %v7497_v11, %v4903_v28  ;;  %v4028_v38 = vsel %vm4025_vm9, %v4027_v4, %v4023_v60  ;;  %v4632_v21 = vmax.f32 %v4630_v47, 1e-15 }
 0x9f3   : > { %v7501_v42 = vpop.eup %7500  ;;  %v4912_v22 = vsel %vm4909_vm11, %v4911_v50, %v4907_v7  ;;  %v10020_v39 = vmul.f32 %v4028_v38, %v4013_v45 }
 0x9f4   : > { %v3998_v59 = vmul.f32 %v7501_v42, %v10002_v52  ;;  %v4913_v26 = vmul.f32 0.996, %v4912_v22  ;;  %7502 = vrcp.f32 %v4632_v21  ;;  %v4664_v36 = vand.u32 2147483647, %v4632_v21 }
 0x9f5   : > { %v4045_v33 = vmul.f32 %v10020_v39, %v10020_v39  ;;  %7504 = vtanh.f32 %v4632_v21  ;;  %v4666_v20 = vand.u32 2147483648, %v4632_v21  ;;  %vm4660_vm5 = vweird.f32 %v4632_v21 }
 0x9f6   : > { %v3999_v57 = vmul.f32 %v7501_v42, %v3998_v59  ;;  %v4929_v27 = vmul.f32 %v4913_v26, %v9971_v18  ;;  %v4930_v10 = vmul.f32 %v4913_v26, %v9973_v63  ;;  %vm4665_vm7 = vcmp.eq.f32.partialorder %v4664_v36, 8.507059e+37 }
 0x9f7   : > { %v4047_v13 = vrot.slane %v4045_v33, 4  ;;  %v4667_v38 = vor.u32 1.1754944e-38, %v4666_v20 }
 0x9f8   : > { %v4000_v46 = vmul.f32 0.5, %v3999_v57  ;;  %v10028_v11 = vsel %vm4897_vm15, %v4929_v27, %v9971_v18  ;;  %v10031_v19 = vsel %vm4897_vm15, %v4930_v10, %v9973_v63  ;;  %v4007_v63 = vand.u32 2147483648, %v10002_v52 }
 0x9f9   : > { %v4941_v12 = vmul.f32 %v10028_v11, %v10028_v11  ;;  %v4942_v29 = vmul.f32 %v10031_v19, %v10031_v19  ;;  %v4048_v1 = vadd.f32 %v4047_v13, %v4045_v33 }
 0x9fa   : > { %v4001_v5 = vsub.f32 1.5, %v4000_v46  ;;  %v7503_v32 = vpop.eup %7502 }
 0x9fb   : > { %v4945_v3 = vadd.f32 %v4942_v29, %v4941_v12  ;;  %v4049_v30 = vrot.slane %v4048_v1, 2  ;;  %v4656_v54 = vmul.f32 %v7503_v32, %v4632_v21  ;;  %vm4661_vm4 = vweird.f32 %v7503_v32  ;;  %v7505_v23 = vpop.eup %7504 }
 0x9fc   : > { %v4002_v31 = vmul.f32 %v7501_v42, %v4001_v5  ;;  %vm4662_vm6 = vmor %vm4660_vm5, %vm4661_vm4  ;;  %v4637_v59 = vmul.f32 %v7505_v23, %v9983_v55  ;;  %v4638_v22 = vmul.f32 %v7505_v23, %v9985_v6 }
 0x9fd   : > { %v4946_v2 = vrot.slane %v4945_v3, 4  ;;  %v4050_v18 = vadd.f32 %v4049_v30, %v4048_v1  ;;  %v4657_v61 = vsub.f32 1.0, %v4656_v54 }
 0x9fe   : > { %v4003_v44 = vmul.f32 %v4002_v31, %v10002_v52 }
 0x9ff   : > { %v4947_v35 = vadd.f32 %v4946_v2, %v4945_v3  ;;  %v4051_v0 = vrot.slane %v4050_v18, 1  ;;  %v4658_v28 = vmul.f32 %v7503_v32, %v4657_v61 }
 0xa00   : > { %v4005_v4 = vsel %vm4004_vm2, %v10002_v52, %v4003_v44 }
 0xa01   : > { %v4948_v42 = vrot.slane %v4947_v35, 2  ;;  %v10042_v50 = vadd.f32 %v4051_v0, %v4050_v18  ;;  %v4008_v45 = vsel %vm4006_vm3, %v4007_v63, %v4005_v4  ;;  %v4659_v60 = vadd.f32 %v7503_v32, %v4658_v28 }
 0xa02   : > { %v4010_v47 = vmax.f32 %v4008_v45, 1e-15 }
 0xa03   : > { %v4949_v7 = vadd.f32 %v4948_v42, %v4947_v35  ;;  %7506 = vrsqrt.f32 %v10042_v50  ;;  %v4663_v26 = vsel %vm4662_vm6, %v7503_v32, %v4659_v60  ;;  %vm4066_vm13 = vcmp.eq.f32.partialorder %v10042_v50, inf }
 0xa04   : > { %7508 = vrcp.f32 %v4010_v47  ;;  %v4668_v33 = vsel %vm4665_vm7, %v4667_v38, %v4663_v26  ;;  %v4041_v32 = vand.u32 2147483648, %v4010_v47  ;;  %vm4035_vm8 = vweird.f32 %v4010_v47 }
 0xa05   : > { %v4950_v52 = vrot.slane %v4949_v7, 1  ;;  %v10047_v57 = vmul.f32 %v4668_v33, %v4637_v59  ;;  %v10049_v27 = vmul.f32 %v4668_v33, %v4638_v22  ;;  %7510 = vtanh.f32 %v4010_v47 }
 0xa06   : > { %v4039_v30 = vand.u32 2147483647, %v4010_v47  ;;  %v4042_v0 = vor.u32 1.1754944e-38, %v4041_v32  ;;  %v4069_v38 = vand.u32 2147483648, %v10042_v50  ;;  %vm4068_vm15 = vcmp.eq.f32.partialorder %v10042_v50, 0.0 }
 0xa07   : > { %v4951_v21 = vadd.f32 %v4950_v52, %v4949_v7  ;;  %v4673_v10 = vmul.f32 %v10047_v57, %v10047_v57  ;;  %v4674_v13 = vmul.f32 %v10049_v27, %v10049_v27 }
 0xa08   : > { %vm4040_vm12 = vcmp.eq.f32.partialorder %v4039_v30, 8.507059e+37 }
 0xa09   : > { %v7507_v46 = vpop.eup %7506  ;;  %7512 = vrsqrt.f32 %v4951_v21  ;;  %v4682_v12 = vadd.f32 %v4674_v13, %v4673_v10  ;;  %vm4966_vm2 = vcmp.eq.f32.partialorder %v4951_v21, inf  ;;  %vm4968_vm3 = vcmp.eq.f32.partialorder %v4951_v21, 0.0 }
 0xa0a   : > { %v7509_v55 = vpop.eup %7508  ;;  %v4060_v6 = vmul.f32 %v7507_v46, %v10042_v50 }
 0xa0b   : > { %v4031_v29 = vmul.f32 %v7509_v55, %v4010_v47  ;;  %v4683_v5 = vrot.slane %v4682_v12, 4  ;;  %vm4036_vm9 = vweird.f32 %v7509_v55  ;;  %v7511_v54 = vpop.eup %7510 }
 0xa0c   : > { %v4061_v1 = vmul.f32 %v7507_v46, %v4060_v6  ;;  %vm4037_vm11 = vmor %vm4035_vm8, %vm4036_vm9  ;;  %v4014_v36 = vmul.f32 %v7511_v54, %v9993_v15  ;;  %v4969_v6 = vand.u32 2147483648, %v4951_v21 }
 0xa0d   : > { %v4032_v3 = vsub.f32 1.0, %v4031_v29  ;;  %v4684_v2 = vadd.f32 %v4683_v5, %v4682_v12 }
 0xa0e   : > { %v4062_v31 = vmul.f32 0.5, %v4061_v1 }
 0xa0f   : > { %v7513_v18 = vpop.eup %7512  ;;  %v4033_v63 = vmul.f32 %v7509_v55, %v4032_v3  ;;  %v4685_v35 = vrot.slane %v4684_v2, 2 }
 0xa10   : > { %v4960_v61 = vmul.f32 %v7513_v18, %v4951_v21  ;;  %v4063_v44 = vsub.f32 1.5, %v4062_v31 }
 0xa11   : > { %v4034_v20 = vadd.f32 %v7509_v55, %v4033_v63  ;;  %v4686_v23 = vadd.f32 %v4685_v35, %v4684_v2 }
 0xa12   : > { %v4961_v28 = vmul.f32 %v7513_v18, %v4960_v61  ;;  %v4064_v4 = vmul.f32 %v7507_v46, %v4063_v44 }
 0xa13   : > { %v4038_v42 = vsel %vm4037_vm11, %v7509_v55, %v4034_v20  ;;  %v4687_v47 = vrot.slane %v4686_v23, 1 }
 0xa14   : > { %v4962_v45 = vmul.f32 0.5, %v4961_v28  ;;  %v4065_v60 = vmul.f32 %v4064_v4, %v10042_v50  ;;  %v4043_v7 = vsel %vm4040_vm12, %v4042_v0, %v4038_v42 }
 0xa15   : > { %v10060_v59 = vmul.f32 %v4043_v7, %v4014_v36  ;;  %v10064_v26 = vadd.f32 %v4687_v47, %v4686_v23 }
 0xa16   : > { %v4963_v22 = vsub.f32 1.5, %v4962_v45  ;;  %v4067_v15 = vsel %vm4066_vm13, %v10042_v50, %v4065_v60 }
 0xa17   : > { %v4070_v52 = vsel %vm4068_vm15, %v4069_v38, %v4067_v15  ;;  %v4046_v33 = vmul.f32 %v10060_v59, %v10060_v59  ;;  %7514 = vrsqrt.f32 %v10064_v26  ;;  %vm4708_vm7 = vcmp.eq.f32.partialorder %v10064_v26, inf }
 0xa18   : > { %v4964_v10 = vmul.f32 %v7513_v18, %v4963_v22  ;;  %v10068_v13 = vmax.f32 %v4070_v52, 1e-15  ;;  %vm4710_vm9 = vcmp.eq.f32.partialorder %v10064_v26, 0.0 }
 0xa19   : > { %v4053_v46 = vrot.slane %v4046_v33, 4 }
 0xa1a   : > { %v4965_v55 = vmul.f32 %v4964_v10, %v4951_v21  ;;  %7516 = vrcp.f32 %v10068_v13  ;;  %v4096_v36 = vand.u32 2147483647, %v10068_v13  ;;  %v4098_v20 = vand.u32 2147483648, %v10068_v13 }
 0xa1b   : > { %v4054_v12 = vadd.f32 %v4053_v46, %v4046_v33  ;;  %vm4092_vm5 = vweird.f32 %v10068_v13  ;;  %v4711_v33 = vand.u32 2147483648, %v10064_v26  ;;  %vm4085_vm12 = vcmp.gt.f32.partialorder %v10068_v13, 0.996 }
 0xa1c   : > { %v4967_v29 = vsel %vm4966_vm2, %v4951_v21, %v4965_v55  ;;  %v4099_v47 = vor.u32 1.1754944e-38, %v4098_v20  ;;  %vm4097_vm8 = vcmp.eq.f32.partialorder %v4096_v36, 8.507059e+37 }
 0xa1d   : > { %v4970_v50 = vsel %vm4968_vm3, %v4969_v6, %v4967_v29  ;;  %v4055_v1 = vrot.slane %v4054_v12, 2  ;;  %v7515_v5 = vpop.eup %7514 }
 0xa1e   : > { %v10072_v32 = vmax.f32 %v4970_v50, 1e-15  ;;  %v4702_v3 = vmul.f32 %v7515_v5, %v10064_v26 }
 0xa1f   : > { %v4056_v30 = vadd.f32 %v4055_v1, %v4054_v12 }
 0xa20   : > { %v7517_v54 = vpop.eup %7516  ;;  %v6983_v31 = vclamps-f32 %v10072_v32, 0.9999999  ;;  %7518 = vrcp.f32 %v10072_v32  ;;  %v4703_v18 = vmul.f32 %v7515_v5, %v4702_v3  ;;  %v5018_v10 = vand.u32 2147483647, %v10072_v32 }
 0xa21   : > { %v4088_v2 = vmul.f32 %v7517_v54, %v10068_v13  ;;  %v4057_v63 = vrot.slane %v4056_v30, 1  ;;  %vm4093_vm4 = vweird.f32 %v7517_v54  ;;  %v5020_v3 = vand.u32 2147483648, %v10072_v32 }
 0xa22   : > { %v4989_v61 = vadd.f32 1.0, %v6983_v31  ;;  %v4995_v44 = vsub.f32 1.0, %v6983_v31  ;;  %v4704_v35 = vmul.f32 0.5, %v4703_v18  ;;  %vm4094_vm6 = vmor %vm4092_vm5, %vm4093_vm4  ;;  %vm5014_vm13 = vweird.f32 %v10072_v32 }
 0xa23   : > { %v4089_v21 = vsub.f32 1.0, %v4088_v2  ;;  %v10078_v0 = vadd.f32 %v4057_v63, %v4056_v30  ;;  %vm5019_vm2 = vcmp.eq.f32.partialorder %v5018_v10, 8.507059e+37  ;;  %v5021_v36 = vor.u32 1.1754944e-38, %v5020_v3 }
 0xa24   : > { %7520 = vlog2.f32 %v4989_v61  ;;  %v4705_v4 = vsub.f32 1.5, %v4704_v35 }
 0xa25   : > { %7522 = vlog2.f32 %v4995_v44  ;;  %v4090_v28 = vmul.f32 %v7517_v54, %v4089_v21  ;;  %vm4078_vm3 = vcmp.eq.f32.partialorder %v10078_v0, inf }
 0xa26   : > { %v7519_v23 = vpop.eup %7518  ;;  %7524 = vrsqrt.f32 %v10078_v0  ;;  %v4706_v45 = vmul.f32 %v7515_v5, %v4705_v4 }
 0xa27   : > { %v4091_v42 = vadd.f32 %v7517_v54, %v4090_v28  ;;  %v5010_v60 = vmul.f32 %v7519_v23, %v10072_v32  ;;  %vm5015_vm11 = vweird.f32 %v7519_v23 }
 0xa28   : > { %v4707_v38 = vmul.f32 %v4706_v45, %v10064_v26  ;;  %vm5016_vm15 = vmor %vm5014_vm13, %vm5015_vm11 }
 0xa29   : > { %v4095_v7 = vsel %vm4094_vm6, %v7517_v54, %v4091_v42  ;;  %v5011_v22 = vsub.f32 1.0, %v5010_v60  ;;  %vm4080_vm6 = vcmp.eq.f32.partialorder %v10078_v0, 0.0 }
 0xa2a   : > { %v7521_v15 = vpop.eup %7520  ;;  %v4100_v52 = vsel %vm4097_vm8, %v4099_v47, %v4095_v7  ;;  %v4709_v12 = vsel %vm4708_vm7, %v10064_v26, %v4707_v38 }
 0xa2b   : > { %v7523_v46 = vpop.eup %7522  ;;  %v4992_v55 = vmul.f32 0.6931472, %v7521_v15  ;;  %v4101_v6 = vmul.f32 0.996, %v4100_v52  ;;  %v5012_v29 = vmul.f32 %v7519_v23, %v5011_v22  ;;  %v4712_v5 = vsel %vm4710_vm9, %v4711_v33, %v4709_v12 }
 0xa2c   : > { %v7525_v50 = vpop.eup %7524  ;;  %v4998_v1 = vmul.f32 0.6931472, %v7523_v46  ;;  %v10093_v54 = vmax.f32 %v4712_v5, 1e-15 }
 0xa2d   : > { %v4117_v30 = vmul.f32 %v4101_v6, %v10020_v39  ;;  %v4072_v31 = vmul.f32 %v7525_v50, %v10078_v0  ;;  %v5013_v2 = vadd.f32 %v7519_v23, %v5012_v29  ;;  %v4081_v6 = vand.u32 2147483648, %v10078_v0 }
 0xa2e   : > { %v5001_v18 = vsub.f32 %v4992_v55, %v4998_v1  ;;  %7526 = vrcp.f32 %v10093_v54  ;;  %v4743_v46 = vand.u32 2147483648, %v10093_v54  ;;  %vm4737_vm5 = vweird.f32 %v10093_v54 }
 0xa2f   : > { %v10098_v63 = vsel %vm4085_vm12, %v4117_v30, %v10020_v39  ;;  %v4073_v21 = vmul.f32 %v7525_v50, %v4072_v31  ;;  %v5017_v35 = vsel %vm5016_vm15, %v7519_v23, %v5013_v2  ;;  %vm4716_vm9 = vcmp.gt.f32.partialorder %v10093_v54, 0.996 }
 0xa30   : > { %v5003_v26 = vmul.f32 0.5, %v5001_v18  ;;  %v4125_v61 = vmul.f32 %v10098_v63, %v10098_v63  ;;  %v4139_v44 = vmul.f32 %v10098_v63, %v9671_v14  ;;  %v5022_v32 = vsel %vm5019_vm2, %v5021_v36, %v5017_v35 }
 0xa31   : > { %v4074_v4 = vmul.f32 0.5, %v4073_v21  ;;  %v4744_v18 = vor.u32 1.1754944e-38, %v4743_v46 }
 0xa32   : > { %v5006_v13 = vmul.f32 %v5003_v26, %v10031_v19  ;;  %v4127_v39 = vrot.slane %v4125_v61, 4  ;;  %v4141_v20 = vrot.slane %v4139_v44, 4  ;;  %v5005_v28 = vmul.f32 %v5003_v26, %v10028_v11 }
 0xa33   : > { %v4075_v38 = vsub.f32 1.5, %v4074_v4  ;;  %v4741_v11 = vand.u32 2147483647, %v10093_v54 }
 0xa34   : > { %v4128_v42 = vadd.f32 %v4127_v39, %v4125_v61  ;;  %v4142_v45 = vadd.f32 %v4141_v20, %v4139_v44  ;;  %v5023_v60 = vmul.f32 %v5022_v32, %v5005_v28  ;;  %v5024_v47 = vmul.f32 %v5022_v32, %v5006_v13  ;;  %v7527_v7 = vpop.eup %7526 }
 0xa35   : > { %v4733_v23 = vmul.f32 %v7527_v7, %v10093_v54  ;;  %v4076_v52 = vmul.f32 %v7525_v50, %v4075_v38  ;;  %vm4738_vm4 = vweird.f32 %v7527_v7  ;;  %vm4742_vm8 = vcmp.eq.f32.partialorder %v4741_v11, 8.507059e+37 }
 0xa36   : > { %v4129_v22 = vrot.slane %v4128_v42, 2  ;;  %v4143_v15 = vrot.slane %v4142_v45, 2  ;;  %7528 = vtanh.f32 %v5023_v60  ;;  %vm4739_vm7 = vmor %vm4737_vm5, %vm4738_vm4 }
 0xa37   : > { %v4734_v10 = vsub.f32 1.0, %v4733_v23  ;;  %7530 = vtanh.f32 %v5024_v47  ;;  %v4077_v55 = vmul.f32 %v4076_v52, %v10078_v0 }
 0xa38   : > { %v4130_v19 = vadd.f32 %v4129_v22, %v4128_v42  ;;  %v4144_v33 = vadd.f32 %v4143_v15, %v4142_v45 }
 0xa39   : > { %v4735_v1 = vmul.f32 %v7527_v7, %v4734_v10  ;;  %v4079_v50 = vsel %vm4078_vm3, %v10078_v0, %v4077_v55 }
 0xa3a   : > { %v4131_v12 = vrot.slane %v4130_v19, 1  ;;  %v4145_v29 = vrot.slane %v4144_v33, 1  ;;  %v4082_v31 = vsel %vm4080_vm6, %v4081_v6, %v4079_v50  ;;  %v4161_v50 = vsub.f32 1.0, %v9719_v40 }
 0xa3b   : > { %v4736_v30 = vadd.f32 %v7527_v7, %v4735_v1  ;;  %v10119_v26 = vmax.f32 %v4082_v31, 1e-15 }
 0xa3c   : > { %v4132_v5 = vadd.f32 %v4131_v12, %v4130_v19  ;;  %v4146_v3 = vadd.f32 %v4145_v29, %v4144_v33  ;;  %v10117_v2 = vpop.eup %7528 }
 0xa3d   : > { %v10121_v61 = vpop.eup %7530  ;;  %v4740_v21 = vsel %vm4739_vm7, %v7527_v7, %v4736_v30  ;;  %7532 = vrcp.f32 %v10119_v26  ;;  %v5045_v39 = vmul.f32 %v10117_v2, %v10117_v2  ;;  %v4111_v33 = vand.u32 2147483647, %v10119_v26 }
 0xa3e   : > { %v4153_v44 = vmul.f32 2.0, %v4146_v3  ;;  %v4745_v35 = vsel %vm4742_vm8, %v4744_v18, %v4740_v21  ;;  %v4167_v0 = vmul.f32 %v4132_v5, %v9719_v40  ;;  %v5046_v20 = vmul.f32 %v10121_v61, %v10121_v61 }
 0xa3f   : > { %v4746_v13 = vmul.f32 0.996, %v4745_v35  ;;  %v4113_v55 = vand.u32 2147483648, %v10119_v26  ;;  %vm4107_vm11 = vweird.f32 %v10119_v26  ;;  %vm10155_vm13 = vcmp.eq.f32.partialorder %v4111_v33, 8.507059e+37 }
 0xa40   : > { %v4155_v36 = vadd.f32 1.0, %v4153_v44  ;;  %v5049_v47 = vadd.f32 %v5046_v20, %v5045_v39  ;;  %vm4086_vm5 = vcmp.gt.f32.partialorder %v10119_v26, 0.996 }
 0xa41   : > { %v4749_v4 = vmul.f32 %v4746_v13, %v10047_v57  ;;  %v4750_v32 = vmul.f32 %v4746_v13, %v10049_v27  ;;  %v4114_v35 = vor.u32 1.1754944e-38, %v4113_v55 }
 0xa42   : > { %v4169_v28 = vadd.f32 %v4167_v0, %v4155_v36  ;;  %v5050_v10 = vrot.slane %v5049_v47, 4  ;;  %v4157_v11 = vadd.f32 %v4155_v36, %v4132_v5 }
 0xa43   : > { %v10135_v45 = vsel %vm4716_vm9, %v4749_v4, %v10047_v57  ;;  %v10138_v60 = vsel %vm4716_vm9, %v4750_v32, %v10049_v27  ;;  %v7533_v7 = vpop.eup %7532 }
 0xa44   : > { %v10132_v42 = vmax.f32 %v4169_v28, 1e-15  ;;  %v4761_v38 = vmul.f32 %v10135_v45, %v10135_v45  ;;  %v4762_v22 = vmul.f32 %v10138_v60, %v10138_v60  ;;  %v4779_v15 = vmul.f32 %v10135_v45, %v9904_v56 }
 0xa45   : > { %v4780_v54 = vmul.f32 %v10138_v60, %v9907_v25  ;;  %v4103_v27 = vmul.f32 %v7533_v7, %v10119_v26  ;;  %v5051_v29 = vadd.f32 %v5050_v10, %v5049_v47  ;;  %vm4108_vm12 = vweird.f32 %v7533_v7 }
 0xa46   : > { %7534 = vrcp.f32 %v10132_v42  ;;  %v4770_v57 = vadd.f32 %v4762_v22, %v4761_v38  ;;  %v4159_v5 = vmul.f32 %v4157_v11, %v9671_v14  ;;  %v4182_v40 = vand.u32 2147483647, %v10132_v42  ;;  %vm4109_vm15 = vmor %vm4107_vm11, %vm4108_vm12 }
 0xa47   : > { %v4788_v23 = vadd.f32 %v4780_v54, %v4779_v15  ;;  %v4104_v46 = vsub.f32 1.0, %v4103_v27  ;;  %v5052_v36 = vrot.slane %v5051_v29, 2  ;;  %v4184_v20 = vand.u32 2147483648, %v10132_v42 }
 0xa48   : > { %v4771_v52 = vrot.slane %v4770_v57, 4  ;;  %v4163_v22 = vmul.f32 %v4161_v50, %v10098_v63  ;;  %vm4178_vm3 = vweird.f32 %v10132_v42  ;;  %vm4183_vm6 = vcmp.eq.f32.partialorder %v4182_v40, 8.507059e+37 }
 0xa49   : > { %v4789_v19 = vrot.slane %v4788_v23, 4  ;;  %v4105_v3 = vmul.f32 %v7533_v7, %v4104_v46  ;;  %v5053_v4 = vadd.f32 %v5052_v36, %v5051_v29 }
 0xa4a   : > { %v4772_v6 = vadd.f32 %v4771_v52, %v4770_v57  ;;  %v4185_v52 = vor.u32 1.1754944e-38, %v4184_v20  ;;  %v4165_v33 = vadd.f32 %v4163_v22, %v4159_v5  ;;  %v4806_v22 = vsub.f32 1.0, %v9931_v62 }
 0xa4b   : > { %v4790_v12 = vadd.f32 %v4789_v19, %v4788_v23  ;;  %v4106_v21 = vadd.f32 %v7533_v7, %v4105_v3  ;;  %v5054_v54 = vrot.slane %v5053_v4, 1 }
 0xa4c   : > { %v7535_v1 = vpop.eup %7534  ;;  %v4773_v31 = vrot.slane %v4772_v6, 2 }
 0xa4d   : > { %v4174_v30 = vmul.f32 %v7535_v1, %v10132_v42  ;;  %v4791_v18 = vrot.slane %v4790_v12, 2  ;;  %vm4179_vm2 = vweird.f32 %v7535_v1  ;;  %v4110_v28 = vsel %vm4109_vm15, %v7533_v7, %v4106_v21 }
 0xa4e   : > { %v4774_v13 = vadd.f32 %v4773_v31, %v4772_v6  ;;  %v4115_v14 = vsel %vm10155_vm13, %v4114_v35, %v4110_v28  ;;  %vm4180_vm4 = vmor %vm4178_vm3, %vm4179_vm2  ;;  %v10169_v19 = vadd.f32 %v5054_v54, %v5053_v4 }
 0xa4f   : > { %v4175_v0 = vsub.f32 1.0, %v4174_v30  ;;  %v4792_v39 = vadd.f32 %v4791_v18, %v4790_v12  ;;  %v4116_v15 = vmul.f32 0.996, %v4115_v14 }
 0xa50   : > { %v4775_v47 = vrot.slane %v4774_v13, 1  ;;  %7536 = vrsqrt.f32 %v10169_v19  ;;  %vm5070_vm9 = vcmp.eq.f32.partialorder %v10169_v19, inf  ;;  %vm5072_vm11 = vcmp.eq.f32.partialorder %v10169_v19, 0.0 }
 0xa51   : > { %v4176_v32 = vmul.f32 %v7535_v1, %v4175_v0  ;;  %v4793_v38 = vrot.slane %v4792_v39, 1  ;;  %v4118_v7 = vmul.f32 %v4116_v15, %v10060_v59 }
 0xa52   : > { %v4776_v23 = vadd.f32 %v4775_v47, %v4774_v13 }
 0xa53   : > { %v4177_v57 = vadd.f32 %v7535_v1, %v4176_v32  ;;  %v4794_v27 = vadd.f32 %v4793_v38, %v4792_v39  ;;  %v10173_v42 = vsel %vm4086_vm5, %v4118_v7, %v10060_v59  ;;  %v4809_v7 = vmul.f32 %v4806_v22, %v10135_v45 }
 0xa54   : > { %v4816_v46 = vmul.f32 %v4776_v23, %v9931_v62  ;;  %v4126_v26 = vmul.f32 %v10173_v42, %v10173_v42  ;;  %v4140_v12 = vmul.f32 %v10173_v42, %v9610_v34 }
 0xa55   : > { %v4181_v10 = vsel %vm4180_vm4, %v7535_v1, %v4177_v57  ;;  %v4796_v63 = vmul.f32 2.0, %v4794_v27 }
 0xa56   : > { %v4186_v11 = vsel %vm4183_vm6, %v4185_v52, %v4181_v10  ;;  %v4133_v50 = vrot.slane %v4126_v26, 4  ;;  %v4147_v3 = vrot.slane %v4140_v12, 4  ;;  %v7537_v31 = vpop.eup %7536 }
 0xa57   : > { %v10176_v55 = vmul.f32 %v4186_v11, %v4165_v33  ;;  %v4798_v6 = vadd.f32 1.0, %v4796_v63  ;;  %v5064_v0 = vmul.f32 %v7537_v31, %v10169_v19 }
 0xa58   : > { %v4134_v18 = vadd.f32 %v4133_v50, %v4126_v26  ;;  %v4148_v44 = vadd.f32 %v4147_v3, %v4140_v12  ;;  %v4810_v26 = vmul.f32 %v4806_v22, %v10138_v60  ;;  %v5073_v3 = vand.u32 2147483648, %v10169_v19 }
 0xa59   : > { %v4203_v29 = vmul.f32 %v10176_v55, %v10176_v55  ;;  %v4818_v1 = vadd.f32 %v4816_v46, %v4798_v6  ;;  %v5065_v20 = vmul.f32 %v7537_v31, %v5064_v0  ;;  %v4800_v28 = vadd.f32 %v4798_v6, %v4776_v23 }
 0xa5a   : > { %v4135_v21 = vrot.slane %v4134_v18, 2  ;;  %v4149_v36 = vrot.slane %v4148_v44, 2 }
 0xa5b   : > { %v4205_v30 = vrot.slane %v4203_v29, 4  ;;  %v4820_v59 = vmax.f32 %v4818_v1, 1e-15  ;;  %v5066_v14 = vmul.f32 0.5, %v5065_v20  ;;  %v4803_v52 = vmul.f32 %v4800_v28, %v9904_v56 }
 0xa5c   : > { %v4136_v40 = vadd.f32 %v4135_v21, %v4134_v18  ;;  %v4150_v39 = vadd.f32 %v4149_v36, %v4148_v44  ;;  %v4804_v23 = vmul.f32 %v4800_v28, %v9907_v25 }
 0xa5d   : > { %v4206_v5 = vadd.f32 %v4205_v30, %v4203_v29  ;;  %7538 = vrcp.f32 %v4820_v59  ;;  %v5067_v27 = vsub.f32 1.5, %v5066_v14  ;;  %v4846_v63 = vand.u32 2147483647, %v4820_v59 }
 0xa5e   : > { %v4137_v4 = vrot.slane %v4136_v40, 1  ;;  %v4151_v38 = vrot.slane %v4150_v39, 1  ;;  %v4848_v11 = vand.u32 2147483648, %v4820_v59  ;;  %vm4842_vm8 = vweird.f32 %v4820_v59 }
 0xa5f   : > { %v4207_v35 = vrot.slane %v4206_v5, 2  ;;  %v5068_v6 = vmul.f32 %v7537_v31, %v5067_v27  ;;  %v4813_v25 = vadd.f32 %v4809_v7, %v4803_v52  ;;  %v4814_v1 = vadd.f32 %v4810_v26, %v4804_v23 }
 0xa60   : > { %v4152_v57 = vadd.f32 %v4151_v38, %v4150_v39  ;;  %v4138_v10 = vadd.f32 %v4137_v4, %v4136_v40  ;;  %v4849_v50 = vor.u32 1.1754944e-38, %v4848_v11  ;;  %vm4847_vm13 = vcmp.eq.f32.partialorder %v4846_v63, 8.507059e+37 }
 0xa61   : > { %v4208_v13 = vadd.f32 %v4207_v35, %v4206_v5  ;;  %v5069_v29 = vmul.f32 %v5068_v6, %v10169_v19 }
 0xa62   : > { %v4154_v62 = vmul.f32 2.0, %v4152_v57  ;;  %v4168_v12 = vmul.f32 %v4138_v10, %v9641_v51 }
 0xa63   : > { %v7539_v32 = vpop.eup %7538  ;;  %v4209_v47 = vrot.slane %v4208_v13, 1 }
 0xa64   : > { %v4838_v15 = vmul.f32 %v7539_v32, %v4820_v59  ;;  %vm4843_vm7 = vweird.f32 %v7539_v32  ;;  %v4156_v45 = vadd.f32 1.0, %v4154_v62  ;;  %v5071_v59 = vsel %vm5070_vm9, %v10169_v19, %v5069_v29 }
 0xa65   : > { %v10186_v54 = vadd.f32 %v4209_v47, %v4208_v13  ;;  %vm4844_vm12 = vmor %vm4842_vm8, %vm4843_vm7  ;;  %v5074_v44 = vsel %vm5072_vm11, %v5073_v3, %v5071_v59 }
 0xa66   : > { %v4839_v33 = vsub.f32 1.0, %v4838_v15  ;;  %v4170_v60 = vadd.f32 %v4168_v12, %v4156_v45  ;;  %v5087_v0 = vmax.f32 %v5074_v44, 1e-15  ;;  %v4158_v52 = vadd.f32 %v4156_v45, %v4138_v10 }
 0xa67   : > { %7540 = vrsqrt.f32 %v10186_v54  ;;  %vm4224_vm15 = vcmp.eq.f32.partialorder %v10186_v54, inf  ;;  %vm4226_vm2 = vcmp.eq.f32.partialorder %v10186_v54, 0.0  ;;  %v4227_v27 = vand.u32 2147483648, %v10186_v54 }
 0xa68   : > { %v4840_v46 = vmul.f32 %v7539_v32, %v4839_v33  ;;  %v4172_v36 = vmax.f32 %v4170_v60, 1e-15  ;;  %v4160_v12 = vmul.f32 %v4158_v52, %v9610_v34  ;;  %v5104_v10 = vand.u32 2147483647, %v5087_v0 }
 0xa69   : > { %vm5100_vm8 = vweird.f32 %v5087_v0 }
 0xa6a   : > { %v4841_v56 = vadd.f32 %v7539_v32, %v4840_v46  ;;  %7542 = vrcp.f32 %v4172_v36  ;;  %v4162_v46 = vsub.f32 1.0, %v9641_v51  ;;  %vm4193_vm4 = vweird.f32 %v4172_v36 }
 0xa6b   : > { %7544 = vrcp.f32 %v5087_v0  ;;  %vm5105_vm11 = vcmp.eq.f32.partialorder %v5104_v10, 8.507059e+37 }
 0xa6c   : > { %v4845_v30 = vsel %vm4844_vm12, %v7539_v32, %v4841_v56  ;;  %7546 = vtanh.f32 %v5087_v0  ;;  %v4164_v29 = vmul.f32 %v4162_v46, %v10173_v42 }
 0xa6d   : > { %v7541_v31 = vpop.eup %7540  ;;  %v4850_v18 = vsel %vm4847_vm13, %v4849_v50, %v4845_v30  ;;  %v5106_v50 = vand.u32 2147483648, %v5087_v0 }
 0xa6e   : > { %v4218_v5 = vmul.f32 %v7541_v31, %v10186_v54  ;;  %v10202_v21 = vmul.f32 %v4850_v18, %v4813_v25  ;;  %v10204_v35 = vmul.f32 %v4850_v18, %v4814_v1  ;;  %v4199_v25 = vand.u32 2147483648, %v4172_v36 }
 0xa6f   : > { %v4166_v30 = vadd.f32 %v4164_v29, %v4160_v12 }
 0xa70   : > { %v4219_v40 = vmul.f32 %v7541_v31, %v4218_v5  ;;  %v4855_v13 = vmul.f32 %v10202_v21, %v10202_v21  ;;  %v4856_v39 = vmul.f32 %v10204_v35, %v10204_v35  ;;  %v7543_v38 = vpop.eup %7542  ;;  %v4200_v34 = vor.u32 1.1754944e-38, %v4199_v25 }
 0xa71   : > { %v4189_v15 = vmul.f32 %v7543_v38, %v4172_v36  ;;  %v7545_v57 = vpop.eup %7544  ;;  %vm4194_vm3 = vweird.f32 %v7543_v38 }
 0xa72   : > { %v4220_v20 = vmul.f32 0.5, %v4219_v40  ;;  %v4864_v28 = vadd.f32 %v4856_v39, %v4855_v13  ;;  %v5096_v63 = vmul.f32 %v7545_v57, %v5087_v0  ;;  %vm5101_vm5 = vweird.f32 %v7545_v57  ;;  %v7547_v3 = vpop.eup %7546  ;;  %vm4195_vm6 = vmor %vm4193_vm4, %vm4194_vm3 }
 0xa73   : > { %v4190_v23 = vsub.f32 1.0, %v4189_v15  ;;  %vm5102_vm9 = vmor %vm5100_vm8, %vm5101_vm5  ;;  %v5091_v5 = vmul.f32 %v7547_v3, %v10117_v2 }
 0xa74   : > { %v4221_v19 = vsub.f32 1.5, %v4220_v20  ;;  %v4865_v4 = vrot.slane %v4864_v28, 4  ;;  %v5097_v56 = vsub.f32 1.0, %v5096_v63 }
 0xa75   : > { %v4191_v26 = vmul.f32 %v7543_v38, %v4190_v23 }
 0xa76   : > { %v4222_v32 = vmul.f32 %v7541_v31, %v4221_v19  ;;  %v4866_v47 = vadd.f32 %v4865_v4, %v4864_v28  ;;  %v5098_v51 = vmul.f32 %v7545_v57, %v5097_v56  ;;  %v5107_v31 = vor.u32 1.1754944e-38, %v5106_v50 }
 0xa77   : > { %v4192_v1 = vadd.f32 %v7543_v38, %v4191_v26 }
 0xa78   : > { %v4223_v14 = vmul.f32 %v4222_v32, %v10186_v54  ;;  %v4867_v22 = vrot.slane %v4866_v47, 2  ;;  %v5099_v60 = vadd.f32 %v7545_v57, %v5098_v51 }
 0xa79   : > { %v4196_v42 = vsel %vm4195_vm6, %v7543_v38, %v4192_v1 }
 0xa7a   : > { %v4225_v7 = vsel %vm4224_vm15, %v10186_v54, %v4223_v14  ;;  %v4868_v33 = vadd.f32 %v4867_v22, %v4866_v47  ;;  %v4197_v54 = vand.u32 2147483647, %v4172_v36  ;;  %v5092_v36 = vmul.f32 %v7547_v3, %v10121_v61 }
 0xa7b   : > { %v4228_v11 = vsel %vm4226_vm2, %v4227_v27, %v4225_v7  ;;  %v5103_v40 = vsel %vm5102_vm9, %v7545_v57, %v5099_v60 }
 0xa7c   : > { %v10216_v62 = vmax.f32 %v4228_v11, 1e-15  ;;  %v4869_v6 = vrot.slane %v4868_v33, 1  ;;  %vm4198_vm7 = vcmp.eq.f32.partialorder %v4197_v54, 8.507059e+37  ;;  %v5108_v39 = vsel %vm5105_vm11, %v5107_v31, %v5103_v40 }
 0xa7d   : > { %v4201_v59 = vsel %vm4198_vm7, %v4200_v34, %v4196_v42  ;;  %v10231_v28 = vmul.f32 %v5108_v39, %v5091_v5  ;;  %v10233_v0 = vmul.f32 %v5108_v39, %v5092_v36 }
 0xa7e   : > { %7548 = vrcp.f32 %v10216_v62  ;;  %v10221_v45 = vadd.f32 %v4869_v6, %v4868_v33  ;;  %v10224_v44 = vmul.f32 %v4201_v59, %v4166_v30  ;;  %v4256_v32 = vand.u32 2147483648, %v10216_v62 }
 0xa7f   : > { %v5127_v61 = vmul.f32 %v10231_v28, %v10231_v28  ;;  %v5128_v38 = vmul.f32 %v10233_v0, %v10233_v0  ;;  %v4254_v22 = vand.u32 2147483647, %v10216_v62  ;;  %vm4250_vm13 = vweird.f32 %v10216_v62 }
 0xa80   : > { %7550 = vrsqrt.f32 %v10221_v45  ;;  %v4204_v20 = vmul.f32 %v10224_v44, %v10224_v44  ;;  %v4257_v7 = vor.u32 1.1754944e-38, %v4256_v32  ;;  %vm4243_vm3 = vcmp.gt.f32.partialorder %v10216_v62, 0.996 }
 0xa81   : > { %v5131_v27 = vadd.f32 %v5128_v38, %v5127_v61  ;;  %vm4255_vm2 = vcmp.eq.f32.partialorder %v4254_v22, 8.507059e+37  ;;  %vm4890_vm4 = vcmp.eq.f32.partialorder %v10221_v45, inf  ;;  %v4893_v30 = vand.u32 2147483648, %v10221_v45 }
 0xa82   : > { %v4211_v2 = vrot.slane %v4204_v20, 4  ;;  %vm4892_vm5 = vcmp.eq.f32.partialorder %v10221_v45, 0.0 }
 0xa83   : > { %v5132_v63 = vrot.slane %v5131_v27, 4 }
 0xa84   : > { %v7549_v18 = vpop.eup %7548  ;;  %v4212_v57 = vadd.f32 %v4211_v2, %v4204_v20 }
 0xa85   : > { %v4246_v13 = vmul.f32 %v7549_v18, %v10216_v62  ;;  %vm4251_vm12 = vweird.f32 %v7549_v18  ;;  %v5133_v56 = vadd.f32 %v5132_v63, %v5131_v27 }
 0xa86   : > { %v7551_v19 = vpop.eup %7550  ;;  %vm4252_vm15 = vmor %vm4250_vm13, %vm4251_vm12  ;;  %v4213_v23 = vrot.slane %v4212_v57, 2 }
 0xa87   : > { %v4247_v4 = vsub.f32 1.0, %v4246_v13  ;;  %v4884_v47 = vmul.f32 %v7551_v19, %v10221_v45  ;;  %v5134_v54 = vrot.slane %v5133_v56, 2 }
 0xa88   : > { %v4214_v26 = vadd.f32 %v4213_v23, %v4212_v57 }
 0xa89   : > { %v4248_v14 = vmul.f32 %v7549_v18, %v4247_v4  ;;  %v4885_v15 = vmul.f32 %v7551_v19, %v4884_v47  ;;  %v5135_v50 = vadd.f32 %v5134_v54, %v5133_v56 }
 0xa8a   : > { %v4215_v25 = vrot.slane %v4214_v26, 1 }
 0xa8b   : > { %v4249_v52 = vadd.f32 %v7549_v18, %v4248_v14  ;;  %v4886_v33 = vmul.f32 0.5, %v4885_v15  ;;  %v5136_v60 = vrot.slane %v5135_v50, 1 }
 0xa8c   : > { %v4216_v51 = vadd.f32 %v4215_v25, %v4214_v26 }
 0xa8d   : > { %v4253_v11 = vsel %vm4252_vm15, %v7549_v18, %v4249_v52  ;;  %v4887_v6 = vsub.f32 1.5, %v4886_v33  ;;  %v5137_v18 = vadd.f32 %v5136_v60, %v5135_v50 }
 0xa8e   : > { %v4258_v46 = vsel %vm4255_vm2, %v4257_v7, %v4253_v11  ;;  %7552 = vrsqrt.f32 %v4216_v51  ;;  %vm4236_vm9 = vcmp.eq.f32.partialorder %v4216_v51, inf  ;;  %v4239_v63 = vand.u32 2147483648, %v4216_v51 }
 0xa8f   : > { %v4259_v12 = vmul.f32 0.996, %v4258_v46  ;;  %v4888_v29 = vmul.f32 %v7551_v19, %v4887_v6  ;;  %vm4238_vm12 = vcmp.eq.f32.partialorder %v4216_v51, 0.0  ;;  %vm5152_vm13 = vcmp.eq.f32.partialorder %v5137_v18, inf }
 0xa90   : > { %vm5154_vm2 = vcmp.eq.f32.partialorder %v5137_v18, 0.0 }
 0xa91   : > { %v4275_v10 = vmul.f32 %v4259_v12, %v10176_v55  ;;  %v4889_v1 = vmul.f32 %v4888_v29, %v10221_v45 }
 0xa93   : > { %v10247_v3 = vsel %vm4243_vm3, %v4275_v10, %v10176_v55  ;;  %v4891_v42 = vsel %vm4890_vm4, %v10221_v45, %v4889_v1 }
 0xa94   : > { %v4283_v34 = vmul.f32 %v10247_v3, %v10247_v3  ;;  %v4894_v62 = vsel %vm4892_vm5, %v4893_v30, %v4891_v42  ;;  %v7553_v55 = vpop.eup %7552 }
 0xa95   : > { %v4896_v31 = vmax.f32 %v4894_v62, 1e-15  ;;  %v4230_v40 = vmul.f32 %v7553_v55, %v4216_v51 }
 0xa96   : > { %v4285_v59 = vrot.slane %v4283_v34, 4 }
 0xa97   : > { %7554 = vrcp.f32 %v4896_v31  ;;  %v4231_v39 = vmul.f32 %v7553_v55, %v4230_v40  ;;  %v4925_v14 = vand.u32 2147483648, %v4896_v31  ;;  %v4923_v57 = vand.u32 2147483647, %v4896_v31 }
 0xa98   : > { %v4286_v5 = vadd.f32 %v4285_v59, %v4283_v34  ;;  %7556 = vrsqrt.f32 %v5137_v18  ;;  %vm4919_vm7 = vweird.f32 %v4896_v31  ;;  %v5155_v34 = vand.u32 2147483648, %v5137_v18 }
 0xa99   : > { %v4232_v47 = vmul.f32 0.5, %v4231_v39  ;;  %v4926_v23 = vor.u32 1.1754944e-38, %v4925_v14  ;;  %vm4924_vm11 = vcmp.eq.f32.partialorder %v4923_v57, 8.507059e+37  ;;  %vm4898_vm15 = vcmp.gt.f32.partialorder %v4896_v31, 0.996 }
 0xa9a   : > { %v4287_v36 = vrot.slane %v4286_v5, 2 }
 0xa9b   : > { %v4233_v38 = vsub.f32 1.5, %v4232_v47 }
 0xa9c   : > { %v4288_v13 = vadd.f32 %v4287_v36, %v4286_v5 }
 0xa9d   : > { %v7555_v20 = vpop.eup %7554  ;;  %v4234_v27 = vmul.f32 %v7553_v55, %v4233_v38 }
 0xa9e   : > { %v4289_v19 = vrot.slane %v4288_v13, 1  ;;  %v7557_v4 = vpop.eup %7556  ;;  %v4915_v32 = vmul.f32 %v7555_v20, %v4896_v31  ;;  %vm4920_vm6 = vweird.f32 %v7555_v20 }
 0xa9f   : > { %v5146_v2 = vmul.f32 %v7557_v4, %v5137_v18  ;;  %v4235_v33 = vmul.f32 %v4234_v27, %v4216_v51  ;;  %vm4921_vm8 = vmor %vm4919_vm7, %vm4920_vm6 }
 0xaa0   : > { %v10255_v45 = vadd.f32 %v4289_v19, %v4288_v13  ;;  %v4916_v61 = vsub.f32 1.0, %v4915_v32 }
 0xaa1   : > { %v5147_v22 = vmul.f32 %v7557_v4, %v5146_v2  ;;  %v4237_v6 = vsel %vm4236_vm9, %v4216_v51, %v4235_v33 }
 0xaa2   : > { %7558 = vrsqrt.f32 %v10255_v45  ;;  %v4917_v15 = vmul.f32 %v7555_v20, %v4916_v61  ;;  %v4240_v12 = vsel %vm4238_vm12, %v4239_v63, %v4237_v6  ;;  %vm4304_vm4 = vcmp.eq.f32.partialorder %v10255_v45, inf }
 0xaa3   : > { %v5148_v52 = vmul.f32 0.5, %v5147_v22  ;;  %v10259_v10 = vmax.f32 %v4240_v12, 1e-15  ;;  %v4307_v14 = vand.u32 2147483648, %v10255_v45 }
 0xaa4   : > { %v4918_v7 = vadd.f32 %v7555_v20, %v4917_v15 }
 0xaa5   : > { %v5149_v11 = vsub.f32 1.5, %v5148_v52  ;;  %7560 = vrcp.f32 %v10259_v10  ;;  %v4269_v19 = vand.u32 2147483647, %v10259_v10  ;;  %vm4265_vm5 = vweird.f32 %v10259_v10 }
 0xaa6   : > { %v4922_v46 = vsel %vm4921_vm8, %v7555_v20, %v4918_v7  ;;  %vm4306_vm8 = vcmp.eq.f32.partialorder %v10255_v45, 0.0  ;;  %vm4244_vm12 = vcmp.gt.f32.partialorder %v10259_v10, 0.996 }
 0xaa7   : > { %v4927_v56 = vsel %vm4924_vm11, %v4926_v23, %v4922_v46  ;;  %v5150_v29 = vmul.f32 %v7557_v4, %v5149_v11  ;;  %v4271_v4 = vand.u32 2147483648, %v10259_v10  ;;  %vm4270_vm7 = vcmp.eq.f32.partialorder %v4269_v19, 8.507059e+37 }
 0xaa8   : > { %v7559_v26 = vpop.eup %7558  ;;  %v4928_v54 = vmul.f32 0.996, %v4927_v56 }
 0xaa9   : > { %v4298_v25 = vmul.f32 %v7559_v26, %v10255_v45  ;;  %v5151_v1 = vmul.f32 %v5150_v29, %v5137_v18  ;;  %v4272_v27 = vor.u32 1.1754944e-38, %v4271_v4 }
 0xaaa   : > { %v4931_v50 = vmul.f32 %v4928_v54, %v10202_v21  ;;  %v4932_v30 = vmul.f32 %v4928_v54, %v10204_v35 }
 0xaab   : > { %v5153_v51 = vsel %vm5152_vm13, %v5137_v18, %v5151_v1  ;;  %v4299_v59 = vmul.f32 %v7559_v26, %v4298_v25  ;;  %v7561_v13 = vpop.eup %7560 }
 0xaac   : > { %v10265_v42 = vsel %vm4898_vm15, %v4931_v50, %v10202_v21  ;;  %v10268_v62 = vsel %vm4898_vm15, %v4932_v30, %v10204_v35  ;;  %v5156_v60 = vsel %vm5154_vm2, %v5155_v34, %v5153_v51  ;;  %v4261_v18 = vmul.f32 %v7561_v13, %v10259_v10 }
 0xaad   : > { %v4943_v5 = vmul.f32 %v10265_v42, %v10265_v42  ;;  %v4944_v55 = vmul.f32 %v10268_v62, %v10268_v62  ;;  %v10274_v36 = vmax.f32 %v5156_v60, 1e-15  ;;  %v4300_v40 = vmul.f32 0.5, %v4299_v59 }
 0xaae   : > { %v4262_v20 = vsub.f32 1.0, %v4261_v18  ;;  %vm4266_vm3 = vweird.f32 %v7561_v13 }
 0xaaf   : > { %v4952_v31 = vadd.f32 %v4944_v55, %v4943_v5  ;;  %7562 = vrcp.f32 %v10274_v36  ;;  %v4301_v35 = vsub.f32 1.5, %v4300_v40  ;;  %vm4267_vm6 = vmor %vm4265_vm5, %vm4266_vm3  ;;  %v5184_v12 = vand.u32 2147483648, %v10274_v36 }
 0xab0   : > { %v4263_v2 = vmul.f32 %v7561_v13, %v4262_v20  ;;  %v5182_v29 = vand.u32 2147483647, %v10274_v36  ;;  %vm5178_vm11 = vweird.f32 %v10274_v36  ;;  %vm5171_vm2 = vcmp.gt.f32.partialorder %v10274_v36, 0.996 }
 0xab1   : > { %v4953_v21 = vrot.slane %v4952_v31, 4  ;;  %v4302_v32 = vmul.f32 %v7559_v26, %v4301_v35  ;;  %v5185_v30 = vor.u32 1.1754944e-38, %v5184_v12 }
 0xab2   : > { %v4264_v15 = vadd.f32 %v7561_v13, %v4263_v2  ;;  %vm5183_vm15 = vcmp.eq.f32.partialorder %v5182_v29, 8.507059e+37 }
 0xab3   : > { %v4954_v39 = vadd.f32 %v4953_v21, %v4952_v31  ;;  %v4303_v38 = vmul.f32 %v4302_v32, %v10255_v45 }
 0xab4   : > { %v4268_v33 = vsel %vm4267_vm6, %v7561_v13, %v4264_v15 }
 0xab5   : > { %v4955_v47 = vrot.slane %v4954_v39, 2  ;;  %v7563_v61 = vpop.eup %7562  ;;  %v4305_v52 = vsel %vm4304_vm4, %v10255_v45, %v4303_v38  ;;  %v4273_v11 = vsel %vm4270_vm7, %v4272_v27, %v4268_v33 }
 0xab6   : > { %v5174_v57 = vmul.f32 %v7563_v61, %v10274_v36  ;;  %v4308_v63 = vsel %vm4306_vm8, %v4307_v14, %v4305_v52  ;;  %v4274_v26 = vmul.f32 0.996, %v4273_v11  ;;  %vm5179_vm9 = vweird.f32 %v7563_v61 }
 0xab7   : > { %v4956_v22 = vadd.f32 %v4955_v47, %v4954_v39  ;;  %v10287_v46 = vmax.f32 %v4308_v63, 1e-15  ;;  %vm5180_vm13 = vmor %vm5178_vm11, %vm5179_vm9 }
 0xab8   : > { %v5175_v23 = vsub.f32 1.0, %v5174_v57  ;;  %v4276_v45 = vmul.f32 %v4274_v26, %v10224_v44 }
 0xab9   : > { %v4957_v7 = vrot.slane %v4956_v22, 1  ;;  %v6977_v25 = vclamps-f32 %v10287_v46, 0.9999999  ;;  %7564 = vrcp.f32 %v10287_v46  ;;  %v4356_v15 = vand.u32 2147483648, %v10287_v46 }
 0xaba   : > { %v5176_v56 = vmul.f32 %v7563_v61, %v5175_v23  ;;  %v10300_v34 = vsel %vm4244_vm12, %v4276_v45, %v10224_v44  ;;  %vm4350_vm4 = vweird.f32 %v10287_v46 }
 0xabb   : > { %v10289_v6 = vadd.f32 %v4957_v7, %v4956_v22  ;;  %v4327_v1 = vadd.f32 1.0, %v6977_v25  ;;  %v4333_v50 = vsub.f32 1.0, %v6977_v25  ;;  %v4284_v60 = vmul.f32 %v10300_v34, %v10300_v34 }
 0xabc   : > { %v5177_v54 = vadd.f32 %v7563_v61, %v5176_v56  ;;  %v4357_v56 = vor.u32 1.1754944e-38, %v4356_v15 }
 0xabd   : > { %7566 = vrsqrt.f32 %v10289_v6  ;;  %v4291_v31 = vrot.slane %v4284_v60, 4  ;;  %vm4978_vm6 = vcmp.eq.f32.partialorder %v10289_v6, inf  ;;  %vm4980_vm8 = vcmp.eq.f32.partialorder %v10289_v6, 0.0 }
 0xabe   : > { %v5181_v51 = vsel %vm5180_vm13, %v7563_v61, %v5177_v54  ;;  %7568 = vlog2.f32 %v4327_v1 }
 0xabf   : > { %v5186_v59 = vsel %vm5183_vm15, %v5185_v30, %v5181_v51  ;;  %7570 = vlog2.f32 %v4333_v50  ;;  %v7565_v5 = vpop.eup %7564  ;;  %v4292_v44 = vadd.f32 %v4291_v31, %v4284_v60 }
 0xac0   : > { %v5187_v55 = vmul.f32 0.996, %v5186_v59  ;;  %v4346_v13 = vmul.f32 %v7565_v5, %v10287_v46  ;;  %vm4351_vm3 = vweird.f32 %v7565_v5 }
 0xac1   : > { %v4293_v4 = vrot.slane %v4292_v44, 2  ;;  %vm4352_vm5 = vmor %vm4350_vm4, %vm4351_vm3 }
 0xac2   : > { %v5203_v21 = vmul.f32 %v5187_v55, %v10231_v28  ;;  %v4347_v18 = vsub.f32 1.0, %v4346_v13  ;;  %v5204_v2 = vmul.f32 %v5187_v55, %v10233_v0 }
 0xac3   : > { %v7567_v40 = vpop.eup %7566  ;;  %v4294_v14 = vadd.f32 %v4293_v4, %v4292_v44 }
 0xac4   : > { %v4972_v10 = vmul.f32 %v7567_v40, %v10289_v6  ;;  %v7569_v35 = vpop.eup %7568  ;;  %v10311_v20 = vsel %vm5171_vm2, %v5203_v21, %v10231_v28  ;;  %v4348_v22 = vmul.f32 %v7565_v5, %v4347_v18  ;;  %v4354_v28 = vand.u32 2147483647, %v10287_v46 }
 0xac5   : > { %v7571_v19 = vpop.eup %7570  ;;  %v5736_v32 = vmul.f32 %v10311_v20, %v10311_v20  ;;  %v4330_v61 = vmul.f32 0.6931472, %v7569_v35  ;;  %v4295_v52 = vrot.slane %v4294_v14, 1  ;;  %v10322_v23 = vsel %vm5171_vm2, %v5204_v2, %v10233_v0 }
 0xac6   : > { %v4973_v39 = vmul.f32 %v7567_v40, %v4972_v10  ;;  %v4336_v38 = vmul.f32 0.6931472, %v7571_v19  ;;  %v4349_v7 = vadd.f32 %v7565_v5, %v4348_v22  ;;  %vm4355_vm7 = vcmp.eq.f32.partialorder %v4354_v28, 8.507059e+37 }
 0xac7   : > { %5740 = vadd.xlane.f32.xlu2 %v5736_v32  ;;  %v4296_v11 = vadd.f32 %v4295_v52, %v4294_v14  ;;  %v4981_v46 = vand.u32 2147483648, %v10289_v6  ;;  %v5737_v36 = vmul.f32 %v10322_v23, %v10322_v23 }
 0xac8   : > { %v4974_v47 = vmul.f32 0.5, %v4973_v39  ;;  %v4339_v27 = vsub.f32 %v4330_v61, %v4336_v38  ;;  %v4353_v26 = vsel %vm4352_vm5, %v7565_v5, %v4349_v7 }
 0xac9   : > { %7572 = vrsqrt.f32 %v4296_v11  ;;  %v4358_v0 = vsel %vm4355_vm7, %v4357_v56, %v4353_v26  ;;  %vm4316_vm9 = vcmp.eq.f32.partialorder %v4296_v11, inf  ;;  %v4319_v61 = vand.u32 2147483648, %v4296_v11 }
 0xaca   : > { %v4975_v57 = vsub.f32 1.5, %v4974_v47  ;;  %v4341_v63 = vmul.f32 0.5, %v4339_v27  ;;  %vm4318_vm13 = vcmp.eq.f32.partialorder %v4296_v11, 0.0 }
 0xacc   : > { %v4976_v33 = vmul.f32 %v7567_v40, %v4975_v57  ;;  %v4343_v29 = vmul.f32 %v4341_v63, %v10247_v3 }
 0xace   : > { %v4977_v12 = vmul.f32 %v4976_v33, %v10289_v6  ;;  %v4359_v45 = vmul.f32 %v4358_v0, %v4343_v29 }
 0xacf   : > { %5742 = vadd.xlane.f32.xlu2 %v5737_v36  ;;  %v7573_v3 = vpop.eup %7572 }
 0xad0   : > { %v4979_v25 = vsel %vm4978_vm6, %v10289_v6, %v4977_v12  ;;  %7574 = vtanh.f32 %v4359_v45  ;;  %v4310_v60 = vmul.f32 %v7573_v3, %v4296_v11 }
 0xad1   : > { %v4982_v54 = vsel %vm4980_vm8, %v4981_v46, %v4979_v25 }
 0xad2   : > { %v4984_v1 = vmax.f32 %v4982_v54, 1e-15  ;;  %v4311_v5 = vmul.f32 %v7573_v3, %v4310_v60 }
 0xad4   : > { %v6984_v50 = vclamps-f32 %v4984_v1, 0.9999999  ;;  %7576 = vrcp.f32 %v4984_v1  ;;  %v4312_v40 = vmul.f32 0.5, %v4311_v5  ;;  %v5034_v14 = vand.u32 2147483647, %v4984_v1 }
 0xad5   : > { %v5036_v22 = vand.u32 2147483648, %v4984_v1  ;;  %vm5030_vm12 = vweird.f32 %v4984_v1 }
 0xad6   : > { %v4990_v30 = vadd.f32 1.0, %v6984_v50  ;;  %v4996_v51 = vsub.f32 1.0, %v6984_v50  ;;  %v10332_v59 = vpop.eup %7574  ;;  %v4313_v10 = vsub.f32 1.5, %v4312_v40  ;;  %vm5035_vm2 = vcmp.eq.f32.partialorder %v5034_v14, 8.507059e+37 }
 0xad7   : > { %v4377_v55 = vmul.f32 %v10332_v59, %v10332_v59  ;;  %v5037_v26 = vor.u32 1.1754944e-38, %v5036_v22 }
 0xad8   : > { %7578 = vlog2.f32 %v4990_v30  ;;  %v4314_v35 = vmul.f32 %v7573_v3, %v4313_v10 }
 0xad9   : > { %7580 = vlog2.f32 %v4996_v51  ;;  %v4379_v13 = vrot.slane %v4377_v55, 4 }
 0xada   : > { %v7577_v6 = vpop.eup %7576  ;;  %v4315_v2 = vmul.f32 %v4314_v35, %v4296_v11 }
 0xadb   : > { %v5026_v31 = vmul.f32 %v7577_v6, %v4984_v1  ;;  %v4380_v44 = vadd.f32 %v4379_v13, %v4377_v55  ;;  %vm5031_vm11 = vweird.f32 %v7577_v6 }
 0xadc   : > { %v4317_v27 = vsel %vm4316_vm9, %v4296_v11, %v4315_v2  ;;  %vm5032_vm15 = vmor %vm5030_vm12, %vm5031_vm11 }
 0xadd   : > { %v5027_v21 = vsub.f32 1.0, %v5026_v31  ;;  %v4381_v32 = vrot.slane %v4380_v44, 2  ;;  %v4320_v28 = vsel %vm4318_vm13, %v4319_v61, %v4317_v27 }
 0xade   : > { %v7579_v18 = vpop.eup %7578  ;;  %v4322_v63 = vmax.f32 %v4320_v28, 1e-15 }
 0xadf   : > { %v7581_v39 = vpop.eup %7580  ;;  %v4994_v19 = vmul.f32 0.6931472, %v7579_v18  ;;  %v5028_v4 = vmul.f32 %v7577_v6, %v5027_v21  ;;  %v4382_v15 = vadd.f32 %v4381_v32, %v4380_v44 }
 0xae0   : > { %v5000_v47 = vmul.f32 0.6931472, %v7581_v39  ;;  %v6978_v46 = vclamps-f32 %v4322_v63, 0.9999999  ;;  %7582 = vrcp.f32 %v4322_v63  ;;  %v4369_v35 = vand.u32 2147483647, %v4322_v63 }
 0xae1   : > { %v5029_v38 = vadd.f32 %v7577_v6, %v5028_v4  ;;  %v4383_v52 = vrot.slane %v4382_v15, 1  ;;  %v4371_v39 = vand.u32 2147483648, %v4322_v63  ;;  %vm4365_vm4 = vweird.f32 %v4322_v63 }
 0xae2   : > { %v5002_v57 = vsub.f32 %v4994_v19, %v5000_v47  ;;  %v4328_v11 = vadd.f32 1.0, %v6978_v46  ;;  %v4334_v45 = vsub.f32 1.0, %v6978_v46  ;;  %vm4370_vm6 = vcmp.eq.f32.partialorder %v4369_v35, 8.507059e+37 }
 0xae3   : > { %v5033_v33 = vsel %vm5032_vm15, %v7577_v6, %v5029_v38  ;;  %v4384_v56 = vadd.f32 %v4383_v52, %v4382_v15  ;;  %v4372_v14 = vor.u32 1.1754944e-38, %v4371_v39 }
 0xae4   : > { %v5004_v7 = vmul.f32 0.5, %v5002_v57  ;;  %v5038_v36 = vsel %vm5035_vm2, %v5037_v26, %v5033_v33 }
 0xae5   : > { %7584 = vrsqrt.f32 %v4384_v56  ;;  %vm4398_vm7 = vcmp.eq.f32.partialorder %v4384_v56, inf  ;;  %v4401_v22 = vand.u32 2147483648, %v4384_v56  ;;  %vm4400_vm8 = vcmp.eq.f32.partialorder %v4384_v56, 0.0 }
 0xae6   : > { %v5008_v12 = vmul.f32 %v5004_v7, %v10268_v62  ;;  %v5007_v29 = vmul.f32 %v5004_v7, %v10265_v42  ;;  %v7583_v54 = vpop.eup %7582 }
 0xae7   : > { %v4361_v50 = vmul.f32 %v7583_v54, %v4322_v63  ;;  %vm4366_vm3 = vweird.f32 %v7583_v54 }
 0xae8   : > { %v5039_v0 = vmul.f32 %v5038_v36, %v5007_v29  ;;  %v5040_v25 = vmul.f32 %v5038_v36, %v5008_v12  ;;  %vm4367_vm5 = vmor %vm4365_vm4, %vm4366_vm3 }
 0xae9   : > { %v4362_v30 = vsub.f32 1.0, %v4361_v50 }
 0xaea   : > { %7586 = vtanh.f32 %v5039_v0 }
 0xaeb   : > { %7588 = vtanh.f32 %v5040_v25  ;;  %v7585_v1 = vpop.eup %7584  ;;  %v4363_v5 = vmul.f32 %v7583_v54, %v4362_v30 }
 0xaec   : > { %7590 = vlog2.f32 %v4328_v11  ;;  %v4392_v3 = vmul.f32 %v7585_v1, %v4384_v56 }
 0xaed   : > { %7592 = vlog2.f32 %v4334_v45  ;;  %v4364_v44 = vadd.f32 %v7583_v54, %v4363_v5 }
 0xaee   : > { %v4393_v42 = vmul.f32 %v7585_v1, %v4392_v3 }
 0xaef   : > { %v4368_v61 = vsel %vm4367_vm5, %v7583_v54, %v4364_v44 }
 0xaf0   : > { %v10338_v62 = vpop.eup %7586  ;;  %v4394_v40 = vmul.f32 0.5, %v4393_v42  ;;  %v4373_v28 = vsel %vm4370_vm6, %v4372_v14, %v4368_v61 }
 0xaf1   : > { %v10340_v51 = vpop.eup %7588  ;;  %v5047_v60 = vmul.f32 %v10338_v62, %v10338_v62 }
 0xaf2   : > { %v7591_v55 = vpop.eup %7590  ;;  %v5048_v6 = vmul.f32 %v10340_v51, %v10340_v51  ;;  %v4395_v18 = vsub.f32 1.5, %v4394_v40 }
 0xaf3   : > { %v7593_v31 = vpop.eup %7592  ;;  %v4332_v13 = vmul.f32 0.6931472, %v7591_v55 }
 0xaf4   : > { %v5056_v10 = vadd.f32 %v5048_v6, %v5047_v60  ;;  %v4338_v21 = vmul.f32 0.6931472, %v7593_v31  ;;  %v4396_v32 = vmul.f32 %v7585_v1, %v4395_v18 }
 0xaf6   : > { %v5057_v19 = vrot.slane %v5056_v10, 4  ;;  %v4340_v4 = vsub.f32 %v4332_v13, %v4338_v21  ;;  %v4397_v38 = vmul.f32 %v4396_v32, %v4384_v56 }
 0xaf8   : > { %v5058_v47 = vadd.f32 %v5057_v19, %v5056_v10  ;;  %v4342_v2 = vmul.f32 0.5, %v4340_v4  ;;  %v4399_v27 = vsel %vm4398_vm7, %v4384_v56, %v4397_v38 }
 0xaf9   : > { %v4402_v52 = vsel %vm4400_vm8, %v4401_v22, %v4399_v27 }
 0xafa   : > { %v5059_v15 = vrot.slane %v5058_v47, 2  ;;  %v4344_v57 = vmul.f32 %v4342_v2, %v10300_v34  ;;  %v4415_v63 = vmax.f32 %v4402_v52, 1e-15 }
 0xafc   : > { %v5060_v7 = vadd.f32 %v5059_v15, %v5058_v47  ;;  %v4374_v33 = vmul.f32 %v4373_v28, %v4344_v57  ;;  %v4432_v31 = vand.u32 2147483648, %v4415_v63  ;;  %vm4426_vm12 = vweird.f32 %v4415_v63 }
 0xafd   : > { %v4430_v10 = vand.u32 2147483647, %v4415_v63 }
 0xafe   : > { %v5061_v26 = vrot.slane %v5060_v7, 1  ;;  %7594 = vtanh.f32 %v4374_v33  ;;  %v4433_v19 = vor.u32 1.1754944e-38, %v4432_v31 }
 0xaff   : > { %7596 = vrcp.f32 %v4415_v63  ;;  %vm4431_vm2 = vcmp.eq.f32.partialorder %v4430_v10, 8.507059e+37 }
 0xb00   : > { %v5062_v12 = vadd.f32 %v5061_v26, %v5060_v7 }
 0xb02   : > { %7598 = vrsqrt.f32 %v5062_v12  ;;  %vm5082_vm11 = vcmp.eq.f32.partialorder %v5062_v12, inf  ;;  %v5085_v13 = vand.u32 2147483648, %v5062_v12  ;;  %vm5084_vm13 = vcmp.eq.f32.partialorder %v5062_v12, 0.0 }
 0xb03   : > { %7600 = vtanh.f32 %v4415_v63 }
 0xb04   : > { %v10347_v29 = vpop.eup %7594 }
 0xb05   : > { %v4378_v46 = vmul.f32 %v10347_v29, %v10347_v29  ;;  %v7597_v36 = vpop.eup %7596 }
 0xb06   : > { %v4422_v34 = vmul.f32 %v7597_v36, %v4415_v63  ;;  %vm4427_vm9 = vweird.f32 %v7597_v36 }
 0xb07   : > { %v4385_v0 = vrot.slane %v4378_v46, 4  ;;  %vm4428_vm15 = vmor %vm4426_vm12, %vm4427_vm9 }
 0xb08   : > { %v7599_v25 = vpop.eup %7598  ;;  %v4423_v45 = vsub.f32 1.0, %v4422_v34 }
 0xb09   : > { %v5076_v56 = vmul.f32 %v7599_v25, %v5062_v12  ;;  %v4386_v11 = vadd.f32 %v4385_v0, %v4378_v46  ;;  %v7601_v35 = vpop.eup %7600 }
 0xb0a   : > { %v4424_v30 = vmul.f32 %v7597_v36, %v4423_v45  ;;  %v4419_v2 = vmul.f32 %v7601_v35, %v10332_v59 }
 0xb0b   : > { %v5077_v54 = vmul.f32 %v7599_v25, %v5076_v56  ;;  %v4387_v1 = vrot.slane %v4386_v11, 2 }
 0xb0c   : > { %v4425_v6 = vadd.f32 %v7597_v36, %v4424_v30 }
 0xb0d   : > { %v5078_v50 = vmul.f32 0.5, %v5077_v54  ;;  %v4388_v3 = vadd.f32 %v4387_v1, %v4386_v11 }
 0xb0e   : > { %v4429_v18 = vsel %vm4428_vm15, %v7597_v36, %v4425_v6 }
 0xb0f   : > { %v5079_v42 = vsub.f32 1.5, %v5078_v50  ;;  %v4389_v60 = vrot.slane %v4388_v3, 1  ;;  %v4434_v32 = vsel %vm4431_vm2, %v4433_v19, %v4429_v18 }
 0xb10   : > { %v10352_v38 = vmul.f32 %v4434_v32, %v4419_v2 }
 0xb11   : > { %v5080_v5 = vmul.f32 %v7599_v25, %v5079_v42  ;;  %v4390_v55 = vadd.f32 %v4389_v60, %v4388_v3 }
 0xb12   : > { %v4451_v57 = vmul.f32 %v10352_v38, %v10352_v38 }
 0xb13   : > { %v5081_v40 = vmul.f32 %v5080_v5, %v5062_v12  ;;  %7602 = vrsqrt.f32 %v4390_v55  ;;  %vm4410_vm3 = vcmp.eq.f32.partialorder %v4390_v55, inf  ;;  %vm4412_vm5 = vcmp.eq.f32.partialorder %v4390_v55, 0.0 }
 0xb14   : > { %v4453_v63 = vrot.slane %v4451_v57, 4 }
 0xb15   : > { %v5083_v21 = vsel %vm5082_vm11, %v5062_v12, %v5081_v40  ;;  %v4413_v12 = vand.u32 2147483648, %v4390_v55 }
 0xb16   : > { %v5086_v44 = vsel %vm5084_vm13, %v5085_v13, %v5083_v21  ;;  %v4454_v11 = vadd.f32 %v4453_v63, %v4451_v57 }
 0xb17   : > { %v5088_v39 = vmax.f32 %v5086_v44, 1e-15 }
 0xb18   : > { %v4455_v5 = vrot.slane %v4454_v11, 2 }
 0xb19   : > { %v7603_v4 = vpop.eup %7602  ;;  %7604 = vrcp.f32 %v5088_v39  ;;  %v5122_v7 = vand.u32 2147483648, %v5088_v39  ;;  %v5120_v59 = vand.u32 2147483647, %v5088_v39  ;;  %vm5116_vm6 = vweird.f32 %v5088_v39 }
 0xb1a   : > { %v4404_v47 = vmul.f32 %v7603_v4, %v4390_v55  ;;  %7606 = vtanh.f32 %v5088_v39 }
 0xb1b   : > { %v5123_v25 = vor.u32 1.1754944e-38, %v5122_v7  ;;  %vm5121_vm8 = vcmp.eq.f32.partialorder %v5120_v59, 8.507059e+37 }
 0xb1c   : > { %v4405_v61 = vmul.f32 %v7603_v4, %v4404_v47 }
 0xb1e   : > { %v4406_v14 = vmul.f32 0.5, %v4405_v61 }
 0xb1f   : > { %v7605_v22 = vpop.eup %7604 }
 0xb20   : > { %v4407_v15 = vsub.f32 1.5, %v4406_v14  ;;  %v5112_v27 = vmul.f32 %v7605_v22, %v5088_v39  ;;  %vm5117_vm4 = vweird.f32 %v7605_v22  ;;  %v7607_v46 = vpop.eup %7606 }
 0xb21   : > { %vm5118_vm7 = vmor %vm5116_vm6, %vm5117_vm4  ;;  %v5093_v45 = vmul.f32 %v7607_v46, %v10338_v62  ;;  %v5094_v54 = vmul.f32 %v7607_v46, %v10340_v51  ;;  %v4456_v51 = vadd.f32 %v4455_v5, %v4454_v11 }
 0xb22   : > { %v4408_v28 = vmul.f32 %v7603_v4, %v4407_v15  ;;  %v5113_v52 = vsub.f32 1.0, %v5112_v27 }
 0xb23   : > { %v4457_v44 = vrot.slane %v4456_v51, 1 }
 0xb24   : > { %v4409_v33 = vmul.f32 %v4408_v28, %v4390_v55  ;;  %v5114_v26 = vmul.f32 %v7605_v22, %v5113_v52 }
 0xb25   : > { %v10366_v2 = vadd.f32 %v4457_v44, %v4456_v51 }
 0xb26   : > { %v4411_v36 = vsel %vm4410_vm3, %v4390_v55, %v4409_v33  ;;  %v5115_v0 = vadd.f32 %v7605_v22, %v5114_v26 }
 0xb27   : > { %v4414_v34 = vsel %vm4412_vm5, %v4413_v12, %v4411_v36  ;;  %vm4472_vm3 = vcmp.eq.f32.partialorder %v10366_v2, inf }
 0xb28   : > { %v4416_v56 = vmax.f32 %v4414_v34, 1e-15  ;;  %v5119_v1 = vsel %vm5118_vm7, %v7605_v22, %v5115_v0  ;;  %vm4474_vm7 = vcmp.eq.f32.partialorder %v10366_v2, 0.0 }
 0xb29   : > { %v5124_v50 = vsel %vm5121_vm8, %v5123_v25, %v5119_v1 }
 0xb2a   : > { %v10358_v3 = vmul.f32 %v5124_v50, %v5093_v45  ;;  %v10360_v30 = vmul.f32 %v5124_v50, %v5094_v54  ;;  %7608 = vrcp.f32 %v4416_v56  ;;  %v4447_v21 = vand.u32 2147483648, %v4416_v56 }
 0xb2b   : > { %7610 = vtanh.f32 %v4416_v56  ;;  %v4445_v35 = vand.u32 2147483647, %v4416_v56  ;;  %vm4441_vm11 = vweird.f32 %v4416_v56 }
 0xb2c   : > { %v5129_v42 = vmul.f32 %v10358_v3, %v10358_v3  ;;  %v5130_v60 = vmul.f32 %v10360_v30, %v10360_v30  ;;  %v4448_v47 = vor.u32 1.1754944e-38, %v4447_v21  ;;  %7612 = vrsqrt.f32 %v10366_v2 }
 0xb2d   : > { %vm4446_vm13 = vcmp.eq.f32.partialorder %v4445_v35, 8.507059e+37 }
 0xb2e   : > { %v5138_v55 = vadd.f32 %v5130_v60, %v5129_v42 }
 0xb30   : > { %v7609_v6 = vpop.eup %7608  ;;  %v5139_v62 = vrot.slane %v5138_v55, 4 }
 0xb31   : > { %v4437_v40 = vmul.f32 %v7609_v6, %v4416_v56  ;;  %vm4442_vm9 = vweird.f32 %v7609_v6  ;;  %v7611_v39 = vpop.eup %7610 }
 0xb32   : > { %v5140_v31 = vadd.f32 %v5139_v62, %v5138_v55  ;;  %vm4443_vm12 = vmor %vm4441_vm11, %vm4442_vm9  ;;  %v4420_v61 = vmul.f32 %v7611_v39, %v10347_v29  ;;  %v7613_v52 = vpop.eup %7612  ;;  %v4475_v39 = vand.u32 2147483648, %v10366_v2 }
 0xb33   : > { %v4438_v13 = vsub.f32 1.0, %v4437_v40  ;;  %v4466_v29 = vmul.f32 %v7613_v52, %v10366_v2 }
 0xb34   : > { %v5141_v10 = vrot.slane %v5140_v31, 2 }
 0xb35   : > { %v4439_v18 = vmul.f32 %v7609_v6, %v4438_v13  ;;  %v4467_v0 = vmul.f32 %v7613_v52, %v4466_v29  ;;  %v7018_v29 = vld [vmem:[%s11315_s6] ss:$0 sm:$0xff] }
 0xb36   : > { %v5142_v19 = vadd.f32 %v5141_v10, %v5140_v31 }
 0xb37   : > { %v4440_v4 = vadd.f32 %v7609_v6, %v4439_v18  ;;  %v4468_v11 = vmul.f32 0.5, %v4467_v0 }
 0xb38   : > { %v5143_v32 = vrot.slane %v5142_v19, 1 }
 0xb39   : > { %v4444_v14 = vsel %vm4443_vm12, %v7609_v6, %v4440_v4  ;;  %v4469_v42 = vsub.f32 1.5, %v4468_v11 }
 0xb3a   : > { %v5144_v22 = vadd.f32 %v5143_v32, %v5142_v19  ;;  %v4449_v15 = vsel %vm4446_vm13, %v4448_v47, %v4444_v14 }
 0xb3b   : > { %v10369_v57 = vmul.f32 %v4449_v15, %v4420_v61  ;;  %v4470_v62 = vmul.f32 %v7613_v52, %v4469_v42 }
 0xb3c   : > { %7614 = vrsqrt.f32 %v5144_v22  ;;  %vm5164_vm15 = vcmp.eq.f32.partialorder %v5144_v22, inf  ;;  %v5167_v54 = vand.u32 2147483648, %v5144_v22  ;;  %vm5166_vm2 = vcmp.eq.f32.partialorder %v5144_v22, 0.0 }
 0xb3d   : > { %v4452_v27 = vmul.f32 %v10369_v57, %v10369_v57  ;;  %v4471_v31 = vmul.f32 %v4470_v62, %v10366_v2 }
 0xb3f   : > { %v4459_v28 = vrot.slane %v4452_v27, 4  ;;  %v4473_v35 = vsel %vm4472_vm3, %v10366_v2, %v4471_v31 }
 0xb41   : > { %v4460_v7 = vadd.f32 %v4459_v28, %v4452_v27  ;;  %v4476_v27 = vsel %vm4474_vm7, %v4475_v39, %v4473_v35 }
 0xb42   : > { %v7615_v33 = vpop.eup %7614 }
 0xb43   : > { %v5158_v63 = vmul.f32 %v7615_v33, %v5144_v22  ;;  %v4461_v26 = vrot.slane %v4460_v7, 2 }
 0xb45   : > { %v5159_v59 = vmul.f32 %v7615_v33, %v5158_v63  ;;  %v4462_v12 = vadd.f32 %v4461_v26, %v4460_v7 }
 0xb47   : > { %v5160_v46 = vmul.f32 0.5, %v5159_v59  ;;  %v4463_v36 = vrot.slane %v4462_v12, 1 }
 0xb49   : > { %v5161_v34 = vsub.f32 1.5, %v5160_v46  ;;  %v4464_v25 = vadd.f32 %v4463_v36, %v4462_v12 }
 0xb4b   : > { %v5162_v56 = vmul.f32 %v7615_v33, %v5161_v34  ;;  %7616 = vrsqrt.f32 %v4464_v25  ;;  %vm4484_vm4 = vcmp.eq.f32.partialorder %v4464_v25, inf  ;;  %vm4486_vm5 = vcmp.eq.f32.partialorder %v4464_v25, 0.0 }
 0xb4c   : > { %v4487_v4 = vand.u32 2147483648, %v4464_v25  ;;  %v4489_v33 = vmax.f32 %v4476_v27, 1e-15 }
 0xb4d   : > { %v5163_v45 = vmul.f32 %v5162_v56, %v5144_v22 }
 0xb4f   : > { %v5165_v1 = vsel %vm5164_vm15, %v5144_v22, %v5163_v45 }
 0xb50   : > { %v5168_v50 = vsel %vm5166_vm2, %v5167_v54, %v5165_v1 }
 0xb51   : > { %v7617_v60 = vpop.eup %7616  ;;  %v5170_v5 = vmax.f32 %v5168_v50, 1e-15 }
 0xb52   : > { %v4478_v55 = vmul.f32 %v7617_v60, %v4464_v25 }
 0xb53   : > { %7618 = vrcp.f32 %v5170_v5  ;;  %v5199_v19 = vand.u32 2147483648, %v5170_v5  ;;  %v5197_v47 = vand.u32 2147483647, %v5170_v5  ;;  %vm5193_vm8 = vweird.f32 %v5170_v5 }
 0xb54   : > { %v4479_v6 = vmul.f32 %v7617_v60, %v4478_v55  ;;  %vm5172_vm12 = vcmp.gt.f32.partialorder %v5170_v5, 0.996 }
 0xb55   : > { %v5200_v28 = vor.u32 1.1754944e-38, %v5199_v19  ;;  %vm5198_vm11 = vcmp.eq.f32.partialorder %v5197_v47, 8.507059e+37  ;;  %v7019_v47 = vld [vmem:[%s11314_s5] ss:$0 sm:$0xff] }
 0xb56   : > { %v4480_v51 = vmul.f32 0.5, %v4479_v6 }
 0xb58   : > { %v4481_v40 = vsub.f32 1.5, %v4480_v51 }
 0xb59   : > { %v7619_v13 = vpop.eup %7618 }
 0xb5a   : > { %v5189_v10 = vmul.f32 %v7619_v13, %v5170_v5  ;;  %v4482_v21 = vmul.f32 %v7617_v60, %v4481_v40  ;;  %vm5194_vm6 = vweird.f32 %v7619_v13 }
 0xb5b   : > { %vm5195_vm9 = vmor %vm5193_vm8, %vm5194_vm6  ;;  %vm4498_vm6 = vweird.f32 %v4489_v33 }
 0xb5c   : > { %v5190_v44 = vsub.f32 1.0, %v5189_v10  ;;  %v4483_v18 = vmul.f32 %v4482_v21, %v4464_v25  ;;  %v4504_v10 = vand.u32 2147483648, %v4489_v33  ;;  %v4502_v21 = vand.u32 2147483647, %v4489_v33 }
 0xb5e   : > { %v5191_v32 = vmul.f32 %v7619_v13, %v5190_v44  ;;  %v4485_v61 = vsel %vm4484_vm4, %v4464_v25, %v4483_v18  ;;  %v5804_v18 = vmul.f32 %v7018_v29, %v10322_v23  ;;  %v4505_v35 = vor.u32 1.1754944e-38, %v4504_v10  ;;  %v5741_v23 = vpop.xlane.xlu2 %5740 }
 0xb5f   : > { %v4488_v14 = vsel %vm4486_vm5, %v4487_v4, %v4485_v61  ;;  %vm4503_vm8 = vcmp.eq.f32.partialorder %v4502_v21, 8.507059e+37 }
 0xb60   : > { %v5192_v22 = vadd.f32 %v7619_v13, %v5191_v32  ;;  %v4490_v15 = vmax.f32 %v4488_v14, 1e-15 }
 0xb62   : > { %v5196_v52 = vsel %vm5195_vm9, %v7619_v13, %v5192_v22  ;;  %7620 = vrcp.f32 %v4490_v15  ;;  %v4519_v25 = vand.u32 2147483648, %v4490_v15  ;;  %v4517_v45 = vand.u32 2147483647, %v4490_v15 }
 0xb63   : > { %v5201_v7 = vsel %vm5198_vm11, %v5200_v28, %v5196_v52  ;;  %7622 = vrcp.f32 %v4489_v33  ;;  %vm4513_vm15 = vweird.f32 %v4490_v15  ;;  %vm4492_vm4 = vcmp.gt.f32.partialorder %v4490_v15, 0.996 }
 0xb64   : > { %v5202_v63 = vmul.f32 0.996, %v5201_v7  ;;  %vm4518_vm3 = vcmp.eq.f32.partialorder %v4517_v45, 8.507059e+37  ;;  %vm4491_vm9 = vcmp.gt.f32.partialorder %v4489_v33, 0.996  ;;  %7624 = vrsqrt.f32 %v5741_v23 }
 0xb65   : > { %vm5755_vm11 = vcmp.eq.f32.partialorder %v5741_v23, inf }
 0xb66   : > { %v5205_v26 = vmul.f32 %v5202_v63, %v10358_v3  ;;  %v5206_v0 = vmul.f32 %v5202_v63, %v10360_v30  ;;  %v5743_v22 = vpop.xlane.xlu2 %5742 }
 0xb67   : > { %7626 = vrsqrt.f32 %v5743_v22 }
 0xb68   : > { %v7621_v2 = vpop.eup %7620  ;;  %v5213_v59 = vsel %vm5172_vm12, %v5205_v26, %v10358_v3  ;;  %v5214_v54 = vsel %vm5172_vm12, %v5206_v0, %v10360_v30  ;;  %v4520_v3 = vor.u32 1.1754944e-38, %v4519_v25  ;;  %v5803_v30 = vmul.f32 %v7018_v29, %v10311_v20 }
 0xb69   : > { %v5805_v12 = vmul.f32 %v7018_v29, %v5213_v59  ;;  %v5738_v46 = vmul.f32 %v5213_v59, %v5213_v59  ;;  %v4509_v36 = vmul.f32 %v7621_v2, %v4490_v15  ;;  %v7623_v56 = vpop.eup %7622  ;;  %vm4514_vm13 = vweird.f32 %v7621_v2 }
 0xb6a   : > { %vm4515_vm2 = vmor %vm4513_vm15, %vm4514_vm13  ;;  %v4494_v50 = vmul.f32 %v7623_v56, %v4489_v33  ;;  %v5739_v60 = vmul.f32 %v5214_v54, %v5214_v54  ;;  %vm4499_vm5 = vweird.f32 %v7623_v56  ;;  %v5806_v19 = vmul.f32 %v7018_v29, %v5214_v54  ;;  %v7625_v15 = vpop.eup %7624 }
 0xb6b   : > { %5811 = vadd.xlane.f32.xlu0 %v5805_v12  ;;  %5744 = vadd.xlane.f32.xlu2 %v5738_v46  ;;  %v4510_v34 = vsub.f32 1.0, %v4509_v36  ;;  %vm4500_vm7 = vmor %vm4498_vm6, %vm4499_vm5  ;;  %v5749_v27 = vmul.f32 %v7625_v15, %v5741_v23  ;;  %v5758_v36 = vand.u32 2147483648, %v5741_v23  ;;  %vm5757_vm12 = vcmp.eq.f32.partialorder %v5741_v23, 0.0 }
 0xb6c   : > { %v4495_v62 = vsub.f32 1.0, %v4494_v50  ;;  %vm5767_vm13 = vcmp.eq.f32.partialorder %v5743_v22, inf  ;;  %v5770_v25 = vand.u32 2147483648, %v5743_v22  ;;  %vm5769_vm15 = vcmp.eq.f32.partialorder %v5743_v22, 0.0 }
 0xb6d   : > { %v4511_v11 = vmul.f32 %v7621_v2, %v4510_v34  ;;  %v5750_v28 = vmul.f32 %v7625_v15, %v5749_v27 }
 0xb6e   : > { %v4496_v5 = vmul.f32 %v7623_v56, %v4495_v62 }
 0xb6f   : > { %v4512_v1 = vadd.f32 %v7621_v2, %v4511_v11  ;;  %v5751_v7 = vmul.f32 0.5, %v5750_v28 }
 0xb70   : > { %v4497_v13 = vadd.f32 %v7623_v56, %v4496_v5 }
 0xb71   : > { %v4516_v42 = vsel %vm4515_vm2, %v7621_v2, %v4512_v1  ;;  %v5752_v63 = vsub.f32 1.5, %v5751_v7 }
 0xb72   : > { %v4521_v55 = vsel %vm4518_vm3, %v4520_v3, %v4516_v42  ;;  %v4501_v44 = vsel %vm4500_vm7, %v7623_v56, %v4497_v13 }
 0xb73   : > { %v4522_v6 = vmul.f32 0.996, %v4521_v55  ;;  %5746 = vadd.xlane.f32.xlu2 %v5739_v60  ;;  %v4506_v39 = vsel %vm4503_vm8, %v4505_v35, %v4501_v44  ;;  %v5753_v29 = vmul.f32 %v7625_v15, %v5752_v63 }
 0xb75   : > { %v4524_v51 = vmul.f32 %v4522_v6, %v10369_v57  ;;  %v5754_v59 = vmul.f32 %v5753_v29, %v5741_v23 }
 0xb77   : > { %v4530_v40 = vsel %vm4492_vm4, %v4524_v51, %v10369_v57  ;;  %v4507_v57 = vmul.f32 0.996, %v4506_v39  ;;  %v5756_v46 = vsel %vm5755_vm11, %v5741_v23, %v5754_v59 }
 0xb78   : > { %v5216_v31 = vmul.f32 %v4530_v40, %v4530_v40  ;;  %v5251_v14 = vmul.f32 %v7019_v47, %v4530_v40  ;;  %v5759_v0 = vsel %vm5757_vm12, %v5758_v36, %v5756_v46 }
 0xb79   : > { %v4523_v4 = vmul.f32 %v4507_v57, %v10352_v38 }
 0xb7a   : > { %5219 = vadd.xlane.f32.xlu1 %v5216_v31 }
 0xb7b   : > { %5807 = vadd.xlane.f32.xlu2 %v5803_v30  ;;  %v4529_v20 = vsel %vm4491_vm9, %v4523_v4, %v10352_v38  ;;  %v7627_v38 = vpop.eup %7626 }
 0xb7c   : > { %v5215_v32 = vmul.f32 %v4529_v20, %v4529_v20  ;;  %v5250_v61 = vmul.f32 %v7019_v47, %v4529_v20  ;;  %v5761_v52 = vmul.f32 %v7627_v38, %v5743_v22 }
 0xb7e   : > { %v5762_v33 = vmul.f32 %v7627_v38, %v5761_v52 }
 0xb80   : > { %v5763_v26 = vmul.f32 0.5, %v5762_v33 }
 0xb82   : > { %v5764_v2 = vsub.f32 1.5, %v5763_v26 }
 0xb83   : > { %5809 = vadd.xlane.f32.xlu2 %v5804_v18 }
 0xb84   : > { %v5765_v12 = vmul.f32 %v7627_v38, %v5764_v2 }
 0xb8b   : > { %5813 = vadd.xlane.f32.xlu2 %v5806_v19 }
 0xb93   : > { %5217 = vadd.xlane.f32.xlu2 %v5215_v32 }
 0xb9b   : > { %5252 = vadd.xlane.f32.xlu2 %v5250_v61 }
 0xba3   : > { %5254 = vadd.xlane.f32.xlu2 %v5251_v14 }
 0xbab   : > { %6433 = vadd.xlane.f32.xlu2 %v8732_v43  ;;  %v5766_v43 = vmul.f32 %v5765_v12, %v5743_v22 }
 0xbad   : > { %v5768_v34 = vsel %vm5767_vm13, %v5743_v22, %v5766_v43 }
 0xbae   : > { %v5771_v56 = vsel %vm5769_vm15, %v5770_v25, %v5768_v34 }
 0xbaf   : > { %v10400_v11 = vmax.f32 %v5771_v56, 1e-15 }
 0xbb1   : > { %v6990_v1 = vclamps-f32 %v10400_v11, 0.9999999  ;;  %vm5843_vm6 = vweird.f32 %v10400_v11  ;;  %v5847_v43 = vand.u32 2147483647, %v10400_v11 }
 0xbb3   : > { %6435 = vadd.xlane.f32.xlu2 %v8821_v37  ;;  %v5796_v37 = vmax.f32 %v5759_v0, 1e-15  ;;  %v5892_v51 = vadd.f32 1.0, %v6990_v1  ;;  %v5904_v31 = vsub.f32 1.0, %v6990_v1  ;;  %v5849_v0 = vand.u32 2147483648, %v10400_v11 }
 0xbb4   : > { %vm5848_vm12 = vcmp.eq.f32.partialorder %v5847_v43, 8.507059e+37 }
 0xbb5   : > { %7628 = vrcp.f32 %v5796_v37  ;;  %v6989_v54 = vclamps-f32 %v5796_v37, 0.9999999  ;;  %v5832_v35 = vand.u32 2147483647, %v5796_v37  ;;  %v5834_v19 = vand.u32 2147483648, %v5796_v37 }
 0xbb6   : > { %7630 = vrcp.f32 %v10400_v11  ;;  %vm5828_vm3 = vweird.f32 %v5796_v37 }
 0xbb7   : > { %v5891_v60 = vadd.f32 1.0, %v6989_v54  ;;  %v5903_v62 = vsub.f32 1.0, %v6989_v54  ;;  %vm10428_vm4 = vcmp.eq.f32.partialorder %v5832_v35, 8.507059e+37  ;;  %v5835_v38 = vor.u32 1.1754944e-38, %v5834_v19 }
 0xbbb   : > { %v10403_v45 = vpop.eup %7628 }
 0xbbc   : > { %v5824_v3 = vmul.f32 %v10403_v45, %v5796_v37  ;;  %v10411_v55 = vpop.eup %7630  ;;  %vm5829_vm2 = vweird.f32 %v10403_v45 }
 0xbbd   : > { %v5839_v30 = vmul.f32 %v10411_v55, %v10400_v11  ;;  %vm10434_vm5 = vmor %vm5828_vm3, %vm5829_vm2  ;;  %vm5844_vm7 = vweird.f32 %v10411_v55 }
 0xbbe   : > { %v5825_v40 = vsub.f32 1.0, %v5824_v3  ;;  %vm10466_vm9 = vmor %vm5843_vm6, %vm5844_vm7 }
 0xbbf   : > { %v5840_v18 = vsub.f32 1.0, %v5839_v30 }
 0xbc0   : > { %v5826_v10 = vmul.f32 %v10403_v45, %v5825_v40 }
 0xbc1   : > { %v5841_v61 = vmul.f32 %v10411_v55, %v5840_v18 }
 0xbc2   : > { %v5827_v20 = vadd.f32 %v10403_v45, %v5826_v10 }
 0xbc3   : > { %v5842_v59 = vadd.f32 %v10411_v55, %v5841_v61 }
 0xbc4   : > { %v5831_v63 = vsel %vm10434_vm5, %v10403_v45, %v5827_v20 }
 0xbc5   : > { %v5836_v25 = vsel %vm10428_vm4, %v5835_v38, %v5831_v63 }
 0xbde   : > { %v10407_v50 = vpop.xlane.xlu0 %5811  ;;  %v10409_v42 = vpop.xlane.xlu2 %5744 }
 0xbdf   : > { %v5817_v6 = vand.u32 2147483647, %v10407_v50  ;;  %7632 = vrsqrt.f32 %v10409_v42  ;;  %vm5779_vm8 = vcmp.eq.f32.partialorder %v10409_v42, inf  ;;  %v5782_v45 = vand.u32 2147483648, %v10409_v42 }
 0xbe0   : > { %7634 = vlog2.f32 %v5891_v60  ;;  %vm5781_vm11 = vcmp.eq.f32.partialorder %v10409_v42, 0.0 }
 0xbe1   : > { %v10415_v5 = vmax.f32 %v5817_v6, 1e-15  ;;  %7636 = vlog2.f32 %v5903_v62  ;;  %v5846_v6 = vsel %vm10466_vm9, %v10411_v55, %v5842_v59 }
 0xbe2   : > { %7638 = vlog2.f32 %v5892_v51 }
 0xbe3   : > { %7640 = vlog2.f32 %v5904_v31 }
 0xbe4   : > { %7642 = vrcp.f32 %v10415_v5 }
 0xbe5   : > { %v7633_v13 = vpop.eup %7632 }
 0xbe6   : > { %v5773_v21 = vmul.f32 %v7633_v13, %v10409_v42  ;;  %v10422_v44 = vpop.xlane.xlu2 %5746  ;;  %v7635_v39 = vpop.eup %7634 }
 0xbe7   : > { %7644 = vrsqrt.f32 %v10422_v44  ;;  %v7637_v4 = vpop.eup %7636  ;;  %v5896_v28 = vmul.f32 0.6931472, %v7635_v39  ;;  %vm5791_vm13 = vcmp.eq.f32.partialorder %v10422_v44, inf  ;;  %vm5793_vm2 = vcmp.eq.f32.partialorder %v10422_v44, 0.0 }
 0xbe8   : > { %v5774_v57 = vmul.f32 %v7633_v13, %v5773_v21  ;;  %v7639_v32 = vpop.eup %7638  ;;  %v5908_v52 = vmul.f32 0.6931472, %v7637_v4  ;;  %v5850_v21 = vor.u32 1.1754944e-38, %v5849_v0 }
 0xbe9   : > { %v7641_v23 = vpop.eup %7640  ;;  %v5898_v26 = vmul.f32 0.6931472, %v7639_v32 }
 0xbea   : > { %v5775_v47 = vmul.f32 0.5, %v5774_v57  ;;  %v10432_v22 = vpop.eup %7642  ;;  %v5910_v12 = vmul.f32 0.6931472, %v7641_v23  ;;  %v5915_v56 = vsub.f32 %v5896_v28, %v5908_v52  ;;  %v5851_v35 = vsel %vm5848_vm12, %v5850_v21, %v5846_v6 }
 0xbeb   : > { %v5966_v34 = vmul.f32 %v10432_v22, %v10415_v5 }
 0xbec   : > { %v5776_v15 = vsub.f32 1.5, %v5775_v47  ;;  %v5916_v62 = vsub.f32 %v5898_v26, %v5910_v12  ;;  %v5919_v10 = vmul.f32 0.5, %v5915_v56  ;;  %v5794_v47 = vand.u32 2147483648, %v10422_v44 }
 0xbed   : > { %v7645_v7 = vpop.eup %7644  ;;  %v10438_v33 = vpop.xlane.xlu1 %5219  ;;  %v5967_v30 = vsub.f32 1.0, %v5966_v34 }
 0xbee   : > { %v5777_v29 = vmul.f32 %v7633_v13, %v5776_v15  ;;  %7646 = vrsqrt.f32 %v10438_v33  ;;  %v10446_v2 = vpop.xlane.xlu2 %5807  ;;  %v5785_v46 = vmul.f32 %v7645_v7, %v10422_v44  ;;  %v5920_v39 = vmul.f32 0.5, %v5916_v62 }
 0xbef   : > { %v5815_v36 = vand.u32 2147483647, %v10446_v2  ;;  %v5968_v32 = vmul.f32 %v10432_v22, %v5967_v30  ;;  %vm5240_vm15 = vcmp.eq.f32.partialorder %v10438_v33, inf  ;;  %vm5242_vm3 = vcmp.eq.f32.partialorder %v10438_v33, 0.0 }
 0xbf0   : > { %v5778_v37 = vmul.f32 %v5777_v29, %v10409_v42  ;;  %v5786_v54 = vmul.f32 %v7645_v7, %v5785_v46  ;;  %v5243_v27 = vand.u32 2147483648, %v10438_v33 }
 0xbf1   : > { %v10460_v1 = vmax.f32 %v5815_v36, 1e-15  ;;  %v10507_v46 = vadd.f32 %v10432_v22, %v5968_v32 }
 0xbf2   : > { %v5780_v60 = vsel %vm5779_vm8, %v10409_v42, %v5778_v37  ;;  %v5787_v40 = vmul.f32 0.5, %v5786_v54 }
 0xbf3   : > { %v5783_v51 = vsel %vm5781_vm11, %v5782_v45, %v5780_v60  ;;  %v5837_v31 = vmul.f32 %v5836_v25, %v10460_v1  ;;  %7648 = vrcp.f32 %v10460_v1  ;;  %v5944_v28 = vand.u32 2147483647, %v10460_v1 }
 0xbf4   : > { %v7647_v11 = vpop.eup %7646  ;;  %v10477_v13 = vmax.f32 %v5783_v51, 1e-15  ;;  %v5788_v42 = vsub.f32 1.5, %v5787_v40  ;;  %v5946_v12 = vand.u32 2147483648, %v10460_v1  ;;  %vm5940_vm4 = vweird.f32 %v10460_v1 }
 0xbf5   : > { %v5234_v18 = vmul.f32 %v7647_v11, %v10438_v33  ;;  %v5923_v55 = vmul.f32 %v5919_v10, %v5837_v31  ;;  %vm10514_vm6 = vcmp.eq.f32.partialorder %v5944_v28, 8.507059e+37  ;;  %vm5995_vm11 = vcmp.eq.f32.partialorder %v10446_v2, 0.0 }
 0xbf6   : > { %7650 = vrcp.f32 %v10477_v13  ;;  %v10481_v57 = vpop.xlane.xlu2 %5809  ;;  %v5789_v4 = vmul.f32 %v7645_v7, %v5788_v42  ;;  %v5947_v6 = vor.u32 1.1754944e-38, %v5946_v12  ;;  %v5862_v62 = vand.u32 2147483647, %v10477_v13 }
 0xbf7   : > { %v5235_v19 = vmul.f32 %v7647_v11, %v5234_v18  ;;  %v5816_v20 = vand.u32 2147483647, %v10481_v57  ;;  %7652 = vtanh.f32 %v5923_v55  ;;  %vm5858_vm8 = vweird.f32 %v10477_v13 }
 0xbf8   : > { %v5790_v14 = vmul.f32 %v5789_v4, %v10422_v44  ;;  %v6991_v30 = vclamps-f32 %v10477_v13, 0.9999999 }
 0xbf9   : > { %v7649_v61 = vpop.eup %7648  ;;  %v5236_v23 = vmul.f32 0.5, %v5235_v19  ;;  %v10491_v15 = vmax.f32 %v5816_v20, 1e-15 }
 0xbfa   : > { %v5936_v38 = vmul.f32 %v7649_v61, %v10460_v1  ;;  %v5792_v7 = vsel %vm5791_vm13, %v10422_v44, %v5790_v14  ;;  %vm5941_vm5 = vweird.f32 %v7649_v61  ;;  %v5893_v32 = vadd.f32 1.0, %v6991_v30 }
 0xbfb   : > { %v5237_v52 = vsub.f32 1.5, %v5236_v23  ;;  %v5852_v63 = vmul.f32 %v5851_v35, %v10491_v15  ;;  %7654 = vrcp.f32 %v10491_v15  ;;  %v5795_v29 = vsel %vm5793_vm2, %v5794_v47, %v5792_v7  ;;  %vm5942_vm7 = vmor %vm5940_vm4, %vm5941_vm5 }
 0xbfc   : > { %v10501_v26 = vpop.eup %7650  ;;  %v5937_v59 = vsub.f32 1.0, %v5936_v38  ;;  %v10511_v0 = vmax.f32 %v5795_v29, 1e-15  ;;  %v5959_v54 = vand.u32 2147483647, %v10491_v15  ;;  %v5961_v31 = vand.u32 2147483648, %v10491_v15 }
 0xbfd   : > { %v5854_v36 = vmul.f32 %v10501_v26, %v10477_v13  ;;  %v5238_v43 = vmul.f32 %v7647_v11, %v5237_v52  ;;  %v5924_v34 = vmul.f32 %v5920_v39, %v5852_v63  ;;  %v7653_v3 = vpop.eup %7652  ;;  %v5864_v11 = vand.u32 2147483648, %v10477_v13 }
 0xbfe   : > { %v5938_v37 = vmul.f32 %v7649_v61, %v5937_v59  ;;  %v10518_v25 = vpop.xlane.xlu2 %5813  ;;  %7656 = vrcp.f32 %v10511_v0  ;;  %vm5955_vm9 = vweird.f32 %v10491_v15  ;;  %v5931_v1 = vmul.f32 %v7653_v3, %v10446_v2 }
 0xbff   : > { %v5855_v56 = vsub.f32 1.0, %v5854_v36  ;;  %v5239_v45 = vmul.f32 %v5238_v43, %v10438_v33  ;;  %7658 = vtanh.f32 %v5924_v34  ;;  %vm10541_vm12 = vcmp.eq.f32.partialorder %v5959_v54, 8.507059e+37 }
 0xc00   : > { %v5939_v60 = vadd.f32 %v7649_v61, %v5938_v37  ;;  %vm5859_vm13 = vweird.f32 %v10501_v26  ;;  %v6992_v19 = vclamps-f32 %v10511_v0, 0.9999999  ;;  %v5962_v20 = vor.u32 1.1754944e-38, %v5961_v31 }
 0xc01   : > { %v7655_v51 = vpop.eup %7654  ;;  %v5241_v40 = vsel %vm5240_vm15, %v10438_v33, %v5239_v45  ;;  %v5856_v35 = vmul.f32 %v10501_v26, %v5855_v56  ;;  %vm5873_vm15 = vweird.f32 %v10511_v0  ;;  %v5905_v47 = vsub.f32 1.0, %v6991_v30  ;;  %vm10567_vm5 = vmor %vm5858_vm8, %vm5859_vm13 }
 0xc02   : > { %v5244_v10 = vsel %vm5242_vm3, %v5243_v27, %v5241_v40  ;;  %v5943_v21 = vsel %vm5942_vm7, %v7649_v61, %v5939_v60  ;;  %v5951_v18 = vmul.f32 %v7655_v51, %v10491_v15  ;;  %vm5956_vm2 = vweird.f32 %v7655_v51 }
 0xc03   : > { %v10537_v42 = vmax.f32 %v5244_v10, 1e-15  ;;  %v5948_v33 = vsel %vm10514_vm6, %v5947_v6, %v5943_v21  ;;  %v5877_v27 = vand.u32 2147483647, %v10511_v0  ;;  %v5857_v28 = vadd.f32 %v10501_v26, %v5856_v35  ;;  %vm5957_vm4 = vmor %vm5955_vm9, %vm5956_vm2 }
 0xc04   : > { %v5952_v39 = vsub.f32 1.0, %v5951_v18  ;;  %v7657_v4 = vpop.eup %7656  ;;  %v5949_v38 = vmul.f32 %v5948_v33, %v5931_v1  ;;  %v5879_v52 = vand.u32 2147483648, %v10511_v0  ;;  %vm5971_vm3 = vweird.f32 %v10432_v22 }
 0xc05   : > { %v7659_v61 = vpop.eup %7658  ;;  %v5869_v14 = vmul.f32 %v7657_v4, %v10511_v0  ;;  %7660 = vrcp.f32 %v10537_v42  ;;  %v5894_v59 = vadd.f32 1.0, %v6992_v19  ;;  %v5906_v36 = vsub.f32 1.0, %v6992_v19 }
 0xc06   : > { %v5953_v23 = vmul.f32 %v7655_v51, %v5952_v39  ;;  %v10557_v7 = vpop.xlane.xlu2 %5217  ;;  %7662 = vlog2.f32 %v5893_v32  ;;  %v5932_v12 = vmul.f32 %v7659_v61, %v10481_v57  ;;  %v5818_v43 = vand.u32 2147483647, %v10518_v25 }
 0xc07   : > { %v5870_v29 = vsub.f32 1.0, %v5869_v14  ;;  %7664 = vlog2.f32 %v5905_v47  ;;  %vm5874_vm6 = vweird.f32 %v7657_v4  ;;  %v5861_v56 = vsel %vm10567_vm5, %v10501_v26, %v5857_v28 }
 0xc08   : > { %v5954_v63 = vadd.f32 %v7655_v51, %v5953_v23  ;;  %7666 = vlog2.f32 %v5894_v59  ;;  %v10576_v45 = vmax.f32 %v5818_v43, 1e-15  ;;  %v10580_v13 = vsel %vm5995_vm11, 0.0, %v5949_v38  ;;  %vm5875_vm9 = vmor %vm5873_vm15, %vm5874_vm6 }
 0xc09   : > { %v5871_v44 = vmul.f32 %v7657_v4, %v5870_v29  ;;  %7668 = vlog2.f32 %v5906_v36  ;;  %vm5996_vm7 = vcmp.eq.f32.partialorder %v10481_v57, 0.0  ;;  %vm5863_vm8 = vcmp.eq.f32.partialorder %v5862_v62, 8.507059e+37 }
 0xc0a   : > { %v5958_v34 = vsel %vm5957_vm4, %v7655_v51, %v5954_v63  ;;  %7670 = vrsqrt.f32 %v10557_v7  ;;  %v5865_v6 = vor.u32 1.1754944e-38, %v5864_v11  ;;  %vm5878_vm11 = vcmp.eq.f32.partialorder %v5877_v27, 8.507059e+37 }
 0xc0b   : > { %v5963_v15 = vsel %vm10541_vm12, %v5962_v20, %v5958_v34  ;;  %v5872_v3 = vadd.f32 %v7657_v4, %v5871_v44  ;;  %v10583_v60 = vpop.eup %7660  ;;  %7672 = vrcp.f32 %v10576_v45  ;;  %v5880_v40 = vor.u32 1.1754944e-38, %v5879_v52 }
 0xc0c   : > { %v5964_v54 = vmul.f32 %v5963_v15, %v5932_v12  ;;  %v7663_v26 = vpop.eup %7662  ;;  %v6003_v30 = vmul.f32 %v10580_v13, %v10580_v13  ;;  %v5866_v62 = vsel %vm5863_vm8, %v5865_v6, %v5861_v56  ;;  %vm5970_vm12 = vweird.f32 %v10415_v5 }
 0xc0d   : > { %v5876_v2 = vsel %vm5875_vm9, %v7657_v4, %v5872_v3  ;;  %v7665_v31 = vpop.eup %7664  ;;  %v5900_v11 = vmul.f32 0.6931472, %v7663_v26  ;;  %v5976_v1 = vand.u32 2147483648, %v10415_v5  ;;  %v5974_v33 = vand.u32 2147483647, %v10415_v5  ;;  %vm10603_vm13 = vmor %vm5970_vm12, %vm5971_vm3 }
 0xc0e   : > { %v10589_v51 = vsel %vm5996_vm7, 0.0, %v5964_v54  ;;  %v7667_v10 = vpop.eup %7666  ;;  %v5881_v0 = vsel %vm5878_vm11, %v5880_v40, %v5876_v2  ;;  %v5912_v21 = vmul.f32 0.6931472, %v7665_v31  ;;  %v10598_v39 = vpop.xlane.xlu2 %5252  ;;  %v5867_v4 = vmul.f32 %v5866_v62, %v10415_v5 }
 0xc0f   : > { %v6004_v57 = vmul.f32 %v10589_v51, %v10589_v51  ;;  %v7669_v18 = vpop.eup %7668  ;;  %v5902_v35 = vmul.f32 0.6931472, %v7667_v10  ;;  %v5276_v61 = vmul.f32 %v10583_v60, %v10537_v42  ;;  %v5973_v27 = vsel %vm10603_vm13, %v10432_v22, %v10507_v46 }
 0xc10   : > { %v7671_v19 = vpop.eup %7670  ;;  %v5914_v20 = vmul.f32 0.6931472, %v7669_v18  ;;  %v5917_v32 = vsub.f32 %v5900_v11, %v5912_v21  ;;  %v5882_v5 = vmul.f32 %v5881_v0, %v10576_v45  ;;  %v5256_v29 = vand.u32 2147483647, %v10598_v39 }
 0xc11   : > { %v6007_v55 = vadd.f32 %v6004_v57, %v6003_v30  ;;  %v10609_v23 = vpop.eup %7672  ;;  %v5222_v38 = vmul.f32 %v7671_v19, %v10557_v7  ;;  %vm5975_vm15 = vcmp.eq.f32.partialorder %v5974_v33, 8.507059e+37  ;;  %v5977_v12 = vor.u32 1.1754944e-38, %v5976_v1 }
 0xc12   : > { %v5918_v28 = vsub.f32 %v5902_v35, %v5914_v20  ;;  %v5921_v52 = vmul.f32 0.5, %v5917_v32  ;;  %v5981_v63 = vmul.f32 %v10609_v23, %v10576_v45  ;;  %v5277_v44 = vsub.f32 1.0, %v5276_v61 }
 0xc13   : > { %v6008_v14 = vrot.slane %v6007_v55, 4  ;;  %v5223_v36 = vmul.f32 %v7671_v19, %v5222_v38  ;;  %v5978_v46 = vsel %vm5975_vm15, %v5977_v12, %v5973_v27  ;;  %v10621_v3 = vmax.f32 %v5256_v29, 1e-15 }
 0xc14   : > { %v5922_v43 = vmul.f32 0.5, %v5918_v28  ;;  %v5925_v34 = vmul.f32 %v5921_v52, %v5867_v4  ;;  %v5982_v37 = vsub.f32 1.0, %v5981_v63  ;;  %v5989_v26 = vand.u32 2147483647, %v10576_v45 }
 0xc15   : > { %v6009_v59 = vadd.f32 %v6008_v14, %v6007_v55  ;;  %v5224_v15 = vmul.f32 0.5, %v5223_v36  ;;  %vm5228_vm2 = vcmp.eq.f32.partialorder %v10557_v7, inf  ;;  %vm5986_vm3 = vweird.f32 %v10609_v23 }
 0xc16   : > { %7674 = vtanh.f32 %v5925_v34  ;;  %v5926_v56 = vmul.f32 %v5922_v43, %v5882_v5  ;;  %v5983_v54 = vmul.f32 %v10609_v23, %v5982_v37  ;;  %v5991_v40 = vand.u32 2147483648, %v10576_v45  ;;  %v10630_v10 = vpop.xlane.xlu2 %5254 }
 0xc17   : > { %v6010_v22 = vrot.slane %v6009_v59, 2  ;;  %v5225_v2 = vsub.f32 1.5, %v5224_v15  ;;  %v5278_v31 = vmul.f32 %v10583_v60, %v5277_v44  ;;  %v6986_v11 = vclamps-f32 %v10537_v42, 0.9999999 }
 0xc18   : > { %7676 = vtanh.f32 %v5926_v56  ;;  %v5984_v57 = vadd.f32 %v10609_v23, %v5983_v54  ;;  %vm5985_vm4 = vweird.f32 %v10576_v45  ;;  %vm5230_vm5 = vcmp.eq.f32.partialorder %v10557_v7, 0.0 }
 0xc19   : > { %v6011_v6 = vadd.f32 %v6010_v22, %v6009_v59  ;;  %v5226_v62 = vmul.f32 %v7671_v19, %v5225_v2  ;;  %v5231_v0 = vand.u32 2147483648, %v10557_v7  ;;  %7678 = vrcp.f32 %v10621_v3  ;;  %vm10642_vm7 = vmor %vm5985_vm4, %vm5986_vm3 }
 0xc1a   : > { %vm5280_vm6 = vweird.f32 %v10537_v42  ;;  %v5295_v1 = vadd.f32 1.0, %v6986_v11  ;;  %vm10646_vm8 = vcmp.eq.f32.partialorder %v5989_v26, 8.507059e+37  ;;  %v5992_v33 = vor.u32 1.1754944e-38, %v5991_v40 }
 0xc1b   : > { %v6012_v30 = vrot.slane %v6011_v6, 1  ;;  %v5227_v18 = vmul.f32 %v5226_v62, %v10557_v7  ;;  %v5301_v19 = vsub.f32 1.0, %v6986_v11  ;;  %v5257_v4 = vand.u32 2147483647, %v10630_v10 }
 0xc1c   : > { %v7675_v55 = vpop.eup %7674  ;;  %v5988_v20 = vsel %vm10642_vm7, %v10609_v23, %v5984_v57  ;;  %v5279_v32 = vadd.f32 %v10583_v60, %v5278_v31  ;;  %vm5281_vm9 = vweird.f32 %v10583_v60  ;;  %v5286_v27 = vand.u32 2147483648, %v10537_v42 }
 0xc1d   : > { %v10636_v21 = vadd.f32 %v6012_v30, %v6011_v6  ;;  %v5933_v61 = vmul.f32 %v7675_v55, %v10407_v50  ;;  %v5229_v14 = vsel %vm5228_vm2, %v10557_v7, %v5227_v18  ;;  %v10665_v23 = vmax.f32 %v5257_v4, 1e-15  ;;  %vm10679_vm12 = vmor %vm5280_vm6, %vm5281_vm9 }
 0xc1e   : > { %v7677_v47 = vpop.eup %7676  ;;  %v5232_v38 = vsel %vm5230_vm5, %v5231_v0, %v5229_v14  ;;  %v5993_v63 = vsel %vm10646_vm8, %v5992_v33, %v5988_v20  ;;  %v5284_v59 = vand.u32 2147483647, %v10537_v42  ;;  %vm5997_vm11 = vcmp.eq.f32.partialorder %v10407_v50, 0.0 }
 0xc1f   : > { %7680 = vrsqrt.f32 %v10636_v21  ;;  %v5934_v5 = vmul.f32 %v7677_v47, %v10518_v25  ;;  %v10667_v28 = vpop.eup %7678  ;;  %v5979_v52 = vmul.f32 %v5978_v46, %v5933_v61  ;;  %v10671_v29 = vmax.f32 %v5232_v38, 1e-15 }
 0xc20   : > { %7682 = vlog2.f32 %v5295_v1  ;;  %vm5998_vm13 = vcmp.eq.f32.partialorder %v10518_v25, 0.0  ;;  %v5283_v50 = vsel %vm10679_vm12, %v10583_v60, %v5279_v32  ;;  %v10696_v37 = vmul.f32 %v10667_v28, %v10621_v3 }
 0xc21   : > { %7684 = vlog2.f32 %v5301_v19  ;;  %v5994_v12 = vmul.f32 %v5993_v63, %v5934_v5  ;;  %v10684_v36 = vsel %vm5997_vm11, 0.0, %v5979_v52  ;;  %v6985_v42 = vclamps-f32 %v10671_v29, 0.9999999 }
 0xc22   : > { %7686 = vrcp.f32 %v10665_v23  ;;  %v5287_v44 = vor.u32 1.1754944e-38, %v5286_v27  ;;  %v6005_v25 = vmul.f32 %v10684_v36, %v10684_v36  ;;  %vm5285_vm15 = vcmp.eq.f32.partialorder %v5284_v59, 8.507059e+37 }
 0xc23   : > { %7688 = vrcp.f32 %v10671_v29  ;;  %v10691_v34 = vsel %vm5998_vm13, 0.0, %v5994_v12  ;;  %v5294_v56 = vadd.f32 1.0, %v6985_v42  ;;  %v5300_v54 = vsub.f32 1.0, %v6985_v42 }
 0xc24   : > { %v6006_v15 = vmul.f32 %v10691_v34, %v10691_v34  ;;  %v5288_v6 = vsel %vm5285_vm15, %v5287_v44, %v5283_v50  ;;  %vm6028_vm2 = vcmp.eq.f32.partialorder %v10636_v21, inf  ;;  %v5318_v57 = vsub.f32 1.0, %v10696_v37 }
 0xc25   : > { %v7681_v43 = vpop.eup %7680  ;;  %7690 = vlog2.f32 %v5294_v56  ;;  %v5289_v62 = vmul.f32 %v5288_v6, %v10665_v23  ;;  %vm6030_vm3 = vcmp.eq.f32.partialorder %v10636_v21, 0.0  ;;  %v6031_v55 = vand.u32 2147483648, %v10636_v21 }
 0xc26   : > { %v7683_v22 = vpop.eup %7682  ;;  %v6022_v46 = vmul.f32 %v7681_v43, %v10636_v21  ;;  %v6014_v2 = vadd.f32 %v6006_v15, %v6005_v25  ;;  %7692 = vlog2.f32 %v5300_v54  ;;  %vm5336_vm4 = vweird.f32 %v10665_v23 }
 0xc27   : > { %v7685_v60 = vpop.eup %7684  ;;  %v5299_v40 = vmul.f32 0.6931472, %v7683_v22  ;;  %vm5265_vm5 = vweird.f32 %v10671_v29  ;;  %v5269_v32 = vand.u32 2147483647, %v10671_v29  ;;  %v5271_v27 = vand.u32 2147483648, %v10671_v29 }
 0xc28   : > { %v6023_v26 = vmul.f32 %v7681_v43, %v6022_v46  ;;  %v5305_v31 = vmul.f32 0.6931472, %v7685_v60  ;;  %v10703_v30 = vpop.eup %7686  ;;  %v6015_v18 = vrot.slane %v6014_v2, 4  ;;  %v5342_v44 = vand.u32 2147483648, %v10665_v23 }
 0xc29   : > { %v7689_v11 = vpop.eup %7688  ;;  %v5332_v45 = vmul.f32 %v10703_v30, %v10665_v23  ;;  %vm5337_vm7 = vweird.f32 %v10703_v30  ;;  %v5272_v25 = vor.u32 1.1754944e-38, %v5271_v27  ;;  %v5340_v15 = vand.u32 2147483647, %v10665_v23 }
 0xc2a   : > { %v6024_v0 = vmul.f32 0.5, %v6023_v26  ;;  %v5307_v1 = vsub.f32 %v5299_v40, %v5305_v31  ;;  %v5261_v35 = vmul.f32 %v7689_v11, %v10671_v29  ;;  %v6016_v19 = vadd.f32 %v6015_v18, %v6014_v2  ;;  %vm5338_vm11 = vmor %vm5336_vm4, %vm5337_vm7 }
 0xc2b   : > { %v5333_v47 = vsub.f32 1.0, %v5332_v45  ;;  %v7691_v38 = vpop.eup %7690  ;;  %vm5266_vm6 = vweird.f32 %v7689_v11  ;;  %vm5270_vm9 = vcmp.eq.f32.partialorder %v5269_v32, 8.507059e+37  ;;  %v5343_v31 = vor.u32 1.1754944e-38, %v5342_v44 }
 0xc2c   : > { %v6025_v33 = vsub.f32 1.5, %v6024_v0  ;;  %v5309_v4 = vmul.f32 0.5, %v5307_v1  ;;  %v5262_v20 = vsub.f32 1.0, %v5261_v35  ;;  %v6017_v14 = vrot.slane %v6016_v19, 2  ;;  %v7693_v59 = vpop.eup %7692  ;;  %vm5267_vm8 = vmor %vm5265_vm5, %vm5266_vm6 }
 0xc2d   : > { %v5334_v63 = vmul.f32 %v10703_v30, %v5333_v47  ;;  %v5297_v50 = vmul.f32 0.6931472, %v7691_v38  ;;  %v5303_v37 = vmul.f32 0.6931472, %v7693_v59  ;;  %vm5341_vm12 = vcmp.eq.f32.partialorder %v5340_v15, 8.507059e+37 }
 0xc2e   : > { %v6026_v61 = vmul.f32 %v7681_v43, %v6025_v33  ;;  %v5311_v5 = vmul.f32 %v5309_v4, %v5289_v62  ;;  %v5263_v52 = vmul.f32 %v7689_v11, %v5262_v20  ;;  %v6018_v7 = vadd.f32 %v6017_v14, %v6016_v19 }
 0xc2f   : > { %v5335_v43 = vadd.f32 %v10703_v30, %v5334_v63  ;;  %v5306_v54 = vsub.f32 %v5297_v50, %v5303_v37  ;;  %v5319_v23 = vmul.f32 %v10667_v28, %v5318_v57  ;;  %vm5322_vm13 = vweird.f32 %v10667_v28 }
 0xc30   : > { %v6027_v12 = vmul.f32 %v6026_v61, %v10636_v21  ;;  %7694 = vtanh.f32 %v5311_v5  ;;  %v5264_v42 = vadd.f32 %v7689_v11, %v5263_v52  ;;  %v6019_v46 = vrot.slane %v6018_v7, 1 }
 0xc31   : > { %v5339_v2 = vsel %vm5338_vm11, %v10703_v30, %v5335_v43  ;;  %v5308_v62 = vmul.f32 0.5, %v5306_v54  ;;  %v5320_v30 = vadd.f32 %v10667_v28, %v5319_v23  ;;  %vm5347_vm15 = vcmp.eq.f32.partialorder %v10630_v10, 0.0 }
 0xc32   : > { %v6029_v22 = vsel %vm6028_vm2, %v10636_v21, %v6027_v12  ;;  %v5268_v56 = vsel %vm5267_vm8, %v7689_v11, %v5264_v42  ;;  %v10736_v26 = vadd.f32 %v6019_v46, %v6018_v7  ;;  %v5344_v11 = vsel %vm5341_vm12, %v5343_v31, %v5339_v2 }
 0xc33   : > { %v6032_v60 = vsel %vm6030_vm3, %v6031_v55, %v6029_v22  ;;  %v5273_v29 = vsel %vm5270_vm9, %v5272_v25, %v5268_v56  ;;  %v5325_v55 = vand.u32 2147483647, %v10621_v3  ;;  %v5327_v45 = vand.u32 2147483648, %v10621_v3 }
 0xc34   : > { %v10734_v6 = vmax.f32 %v6032_v60, 1e-15  ;;  %v5274_v40 = vmul.f32 %v5273_v29, %v10621_v3  ;;  %vm5321_vm2 = vweird.f32 %v10621_v3  ;;  %vm5346_vm8 = vcmp.eq.f32.partialorder %v10598_v39, 0.0 }
 0xc35   : > { %vm10756_vm3 = vmor %vm5321_vm2, %vm5322_vm13  ;;  %vm5326_vm4 = vcmp.eq.f32.partialorder %v5325_v55, 8.507059e+37  ;;  %v5328_v38 = vor.u32 1.1754944e-38, %v5327_v45  ;;  %vm6040_vm11 = vcmp.eq.f32.partialorder %v10736_v26, inf  ;;  %v6043_v31 = vand.u32 2147483648, %v10736_v26 }
 0xc36   : > { %v7695_v21 = vpop.eup %7694  ;;  %7696 = vrcp.f32 %v10734_v6  ;;  %v5310_v0 = vmul.f32 %v5308_v62, %v5274_v40  ;;  %v5324_v47 = vsel %vm10756_vm3, %v10667_v28, %v5320_v30  ;;  %v6058_v27 = vand.u32 2147483647, %v10734_v6 }
 0xc37   : > { %7698 = vrsqrt.f32 %v10736_v26  ;;  %v5315_v18 = vmul.f32 %v7695_v21, %v10630_v10  ;;  %v6060_v3 = vand.u32 2147483648, %v10734_v6  ;;  %v5329_v7 = vsel %vm5326_vm4, %v5328_v38, %v5324_v47 }
 0xc38   : > { %7700 = vtanh.f32 %v5310_v0  ;;  %vm6054_vm6 = vweird.f32 %v10734_v6  ;;  %vm6059_vm9 = vcmp.eq.f32.partialorder %v6058_v27, 8.507059e+37  ;;  %vm6047_vm12 = vcmp.gt.f32.partialorder %v10734_v6, 0.996 }
 0xc39   : > { %v5345_v1 = vmul.f32 %v5344_v11, %v5315_v18  ;;  %v6061_v37 = vor.u32 1.1754944e-38, %v6060_v3  ;;  %vm6042_vm13 = vcmp.eq.f32.partialorder %v10736_v26, 0.0 }
 0xc3b   : > { %v10749_v33 = vsel %vm5347_vm15, 0.0, %v5345_v1 }
 0xc3c   : > { %v7697_v35 = vpop.eup %7696  ;;  %v5351_v4 = vmul.f32 %v10749_v33, %v10749_v33 }
 0xc3d   : > { %v7699_v57 = vpop.eup %7698  ;;  %v6050_v19 = vmul.f32 %v7697_v35, %v10734_v6  ;;  %vm6055_vm5 = vweird.f32 %v7697_v35 }
 0xc3e   : > { %v6034_v20 = vmul.f32 %v7699_v57, %v10736_v26  ;;  %v5358_v61 = vrot.slane %v5351_v4, 4  ;;  %v7701_v14 = vpop.eup %7700  ;;  %vm6056_vm7 = vmor %vm6054_vm6, %vm6055_vm5 }
 0xc3f   : > { %v6051_v10 = vsub.f32 1.0, %v6050_v19  ;;  %v5314_v63 = vmul.f32 %v7701_v14, %v10598_v39 }
 0xc40   : > { %v6035_v5 = vmul.f32 %v7699_v57, %v6034_v20  ;;  %v5359_v59 = vadd.f32 %v5358_v61, %v5351_v4 }
 0xc41   : > { %v6052_v52 = vmul.f32 %v7697_v35, %v6051_v10  ;;  %v5330_v28 = vmul.f32 %v5329_v7, %v5314_v63 }
 0xc42   : > { %v6036_v12 = vmul.f32 0.5, %v6035_v5  ;;  %v5360_v42 = vrot.slane %v5359_v59, 2 }
 0xc43   : > { %v6053_v50 = vadd.f32 %v7697_v35, %v6052_v52  ;;  %v10768_v22 = vsel %vm5346_vm8, 0.0, %v5330_v28 }
 0xc44   : > { %v6037_v43 = vsub.f32 1.5, %v6036_v12  ;;  %v5361_v46 = vadd.f32 %v5360_v42, %v5359_v59  ;;  %v5350_v60 = vmul.f32 %v10768_v22, %v10768_v22 }
 0xc45   : > { %v6057_v44 = vsel %vm6056_vm7, %v7697_v35, %v6053_v50 }
 0xc46   : > { %v6062_v25 = vsel %vm6059_vm9, %v6061_v37, %v6057_v44  ;;  %v6038_v15 = vmul.f32 %v7699_v57, %v6037_v43  ;;  %v5362_v54 = vrot.slane %v5361_v46, 1  ;;  %v5352_v2 = vrot.slane %v5350_v60, 4 }
 0xc47   : > { %v6063_v56 = vmul.f32 0.996, %v6062_v25 }
 0xc48   : > { %v6039_v29 = vmul.f32 %v6038_v15, %v10736_v26  ;;  %v5363_v21 = vadd.f32 %v5362_v54, %v5361_v46  ;;  %v5353_v23 = vadd.f32 %v5352_v2, %v5350_v60 }
 0xc49   : > { %v6079_v40 = vmul.f32 %v6063_v56, %v10580_v13  ;;  %v6080_v39 = vmul.f32 %v6063_v56, %v10589_v51 }
 0xc4a   : > { %v6041_v62 = vsel %vm6040_vm11, %v10736_v26, %v6039_v29  ;;  %7702 = vrsqrt.f32 %v5363_v21  ;;  %v5354_v55 = vrot.slane %v5353_v23, 2  ;;  %vm5383_vm5 = vcmp.eq.f32.partialorder %v5363_v21, inf }
 0xc4b   : > { %v10781_v11 = vsel %vm6047_vm12, %v6079_v40, %v10580_v13  ;;  %v10784_v0 = vsel %vm6047_vm12, %v6080_v39, %v10589_v51  ;;  %v6044_v18 = vsel %vm6042_vm13, %v6043_v31, %v6041_v62  ;;  %v5386_v46 = vand.u32 2147483648, %v5363_v21 }
 0xc4c   : > { %v6091_v1 = vmul.f32 %v10781_v11, %v10781_v11  ;;  %v6092_v30 = vmul.f32 %v10784_v0, %v10784_v0  ;;  %v6046_v6 = vmax.f32 %v6044_v18, 1e-15  ;;  %v5355_v26 = vadd.f32 %v5354_v55, %v5353_v23 }
 0xc4d   : > { %vm5385_vm6 = vcmp.eq.f32.partialorder %v5363_v21, 0.0 }
 0xc4e   : > { %v6095_v35 = vadd.f32 %v6092_v30, %v6091_v1  ;;  %7704 = vrcp.f32 %v6046_v6  ;;  %v5356_v13 = vrot.slane %v5355_v26, 1  ;;  %v6075_v5 = vand.u32 2147483648, %v6046_v6 }
 0xc4f   : > { %v6073_v63 = vand.u32 2147483647, %v6046_v6  ;;  %vm6069_vm2 = vweird.f32 %v6046_v6  ;;  %vm6048_vm7 = vcmp.gt.f32.partialorder %v6046_v6, 0.996 }
 0xc50   : > { %v6096_v45 = vrot.slane %v6095_v35, 4  ;;  %v7703_v57 = vpop.eup %7702  ;;  %v10790_v51 = vadd.f32 %v5356_v13, %v5355_v26  ;;  %v6076_v28 = vor.u32 1.1754944e-38, %v6075_v5 }
 0xc51   : > { %v5377_v4 = vmul.f32 %v7703_v57, %v5363_v21  ;;  %vm6074_vm4 = vcmp.eq.f32.partialorder %v6073_v63, 8.507059e+37 }
 0xc52   : > { %v6097_v19 = vadd.f32 %v6096_v45, %v6095_v35  ;;  %7706 = vrsqrt.f32 %v10790_v51  ;;  %vm5371_vm8 = vcmp.eq.f32.partialorder %v10790_v51, inf  ;;  %vm5373_vm9 = vcmp.eq.f32.partialorder %v10790_v51, 0.0 }
 0xc53   : > { %v5378_v10 = vmul.f32 %v7703_v57, %v5377_v4 }
 0xc54   : > { %v7705_v20 = vpop.eup %7704  ;;  %v6098_v32 = vrot.slane %v6097_v19, 2 }
 0xc55   : > { %v6065_v47 = vmul.f32 %v7705_v20, %v6046_v6  ;;  %v5379_v14 = vmul.f32 0.5, %v5378_v10  ;;  %vm6070_vm15 = vweird.f32 %v7705_v20 }
 0xc56   : > { %v6099_v61 = vadd.f32 %v6098_v32, %v6097_v19  ;;  %vm6071_vm3 = vmor %vm6069_vm2, %vm6070_vm15 }
 0xc57   : > { %v6066_v27 = vsub.f32 1.0, %v6065_v47  ;;  %v5380_v38 = vsub.f32 1.5, %v5379_v14 }
 0xc58   : > { %v6100_v3 = vrot.slane %v6099_v61, 1  ;;  %v7707_v7 = vpop.eup %7706 }
 0xc59   : > { %v6067_v52 = vmul.f32 %v7705_v20, %v6066_v27  ;;  %v5381_v12 = vmul.f32 %v7703_v57, %v5380_v38  ;;  %v5365_v37 = vmul.f32 %v7707_v7, %v10790_v51 }
 0xc5a   : > { %v6101_v59 = vadd.f32 %v6100_v3, %v6099_v61 }
 0xc5b   : > { %v6068_v50 = vadd.f32 %v7705_v20, %v6067_v52  ;;  %v5382_v43 = vmul.f32 %v5381_v12, %v5363_v21  ;;  %v5366_v15 = vmul.f32 %v7707_v7, %v5365_v37 }
 0xc5c   : > { %7708 = vrsqrt.f32 %v6101_v59  ;;  %vm6116_vm11 = vcmp.eq.f32.partialorder %v6101_v59, inf  ;;  %v6119_v14 = vand.u32 2147483648, %v6101_v59  ;;  %vm6118_vm12 = vcmp.eq.f32.partialorder %v6101_v59, 0.0 }
 0xc5d   : > { %v6072_v42 = vsel %vm6071_vm3, %v7705_v20, %v6068_v50  ;;  %v5384_v60 = vsel %vm5383_vm5, %v5363_v21, %v5382_v43  ;;  %v5367_v2 = vmul.f32 0.5, %v5366_v15 }
 0xc5e   : > { %v6077_v44 = vsel %vm6074_vm4, %v6076_v28, %v6072_v42  ;;  %v5387_v56 = vsel %vm5385_vm6, %v5386_v46, %v5384_v60 }
 0xc5f   : > { %v6078_v25 = vmul.f32 0.996, %v6077_v44  ;;  %v10796_v40 = vmax.f32 %v5387_v56, 1e-15  ;;  %v5368_v18 = vsub.f32 1.5, %v5367_v2 }
 0xc61   : > { %v6081_v54 = vmul.f32 %v6078_v25, %v10684_v36  ;;  %v6082_v29 = vmul.f32 %v6078_v25, %v10691_v34  ;;  %7710 = vrcp.f32 %v10796_v40  ;;  %v5369_v55 = vmul.f32 %v7707_v7, %v5368_v18 }
 0xc62   : > { %v7709_v39 = vpop.eup %7708  ;;  %v5418_v28 = vand.u32 2147483648, %v10796_v40  ;;  %v5416_v42 = vand.u32 2147483647, %v10796_v40  ;;  %vm5412_vm15 = vweird.f32 %v10796_v40  ;;  %vm5391_vm5 = vcmp.gt.f32.partialorder %v10796_v40, 0.996 }
 0xc63   : > { %v6110_v31 = vmul.f32 %v7709_v39, %v6101_v59  ;;  %v10799_v62 = vsel %vm6048_vm7, %v6081_v54, %v10684_v36  ;;  %v10802_v23 = vsel %vm6048_vm7, %v6082_v29, %v10691_v34  ;;  %v5370_v26 = vmul.f32 %v5369_v55, %v10790_v51 }
 0xc64   : > { %v6093_v21 = vmul.f32 %v10799_v62, %v10799_v62  ;;  %v6094_v1 = vmul.f32 %v10802_v23, %v10802_v23  ;;  %v5374_v34 = vand.u32 2147483648, %v10790_v51  ;;  %v5419_v46 = vor.u32 1.1754944e-38, %v5418_v28 }
 0xc65   : > { %v6111_v30 = vmul.f32 %v7709_v39, %v6110_v31  ;;  %v5372_v57 = vsel %vm5371_vm8, %v10790_v51, %v5370_v26  ;;  %vm5417_vm3 = vcmp.eq.f32.partialorder %v5416_v42, 8.507059e+37 }
 0xc66   : > { %v6102_v35 = vadd.f32 %v6094_v1, %v6093_v21  ;;  %v5375_v4 = vsel %vm5373_vm9, %v5374_v34, %v5372_v57 }
 0xc67   : > { %v6112_v6 = vmul.f32 0.5, %v6111_v30  ;;  %v7711_v13 = vpop.eup %7710  ;;  %v10814_v32 = vmax.f32 %v5375_v4, 1e-15 }
 0xc68   : > { %v6103_v36 = vrot.slane %v6102_v35, 4  ;;  %v5408_v10 = vmul.f32 %v7711_v13, %v10796_v40  ;;  %vm5413_vm13 = vweird.f32 %v7711_v13 }
 0xc69   : > { %v6113_v45 = vsub.f32 1.5, %v6112_v6  ;;  %7712 = vrcp.f32 %v10814_v32  ;;  %vm5414_vm2 = vmor %vm5412_vm15, %vm5413_vm13  ;;  %v5401_v56 = vand.u32 2147483647, %v10814_v32  ;;  %v5403_v54 = vand.u32 2147483648, %v10814_v32 }
 0xc6a   : > { %v6104_v19 = vadd.f32 %v6103_v36, %v6102_v35  ;;  %v5409_v3 = vsub.f32 1.0, %v5408_v10  ;;  %vm5397_vm6 = vweird.f32 %v10814_v32  ;;  %vm5390_vm13 = vcmp.gt.f32.partialorder %v10814_v32, 0.996 }
 0xc6b   : > { %v6114_v20 = vmul.f32 %v7709_v39, %v6113_v45  ;;  %vm5402_vm9 = vcmp.eq.f32.partialorder %v5401_v56, 8.507059e+37  ;;  %v5404_v26 = vor.u32 1.1754944e-38, %v5403_v54 }
 0xc6c   : > { %v6105_v47 = vrot.slane %v6104_v19, 2  ;;  %v5410_v12 = vmul.f32 %v7711_v13, %v5409_v3 }
 0xc6d   : > { %v6115_v61 = vmul.f32 %v6114_v20, %v6101_v59 }
 0xc6e   : > { %v6106_v27 = vadd.f32 %v6105_v47, %v6104_v19  ;;  %v5411_v44 = vadd.f32 %v7711_v13, %v5410_v12 }
 0xc6f   : > { %v6117_v5 = vsel %vm6116_vm11, %v6101_v59, %v6115_v61  ;;  %v7713_v7 = vpop.eup %7712 }
 0xc70   : > { %v6120_v38 = vsel %vm6118_vm12, %v6119_v14, %v6117_v5  ;;  %v6107_v51 = vrot.slane %v6106_v27, 1  ;;  %v5393_v43 = vmul.f32 %v7713_v7, %v10814_v32  ;;  %v5415_v15 = vsel %vm5414_vm2, %v7711_v13, %v5411_v44 }
 0xc71   : > { %v10818_v52 = vmax.f32 %v6120_v38, 1e-15  ;;  %v5420_v29 = vsel %vm5417_vm3, %v5419_v46, %v5415_v15  ;;  %vm5398_vm4 = vweird.f32 %v7713_v7 }
 0xc72   : > { %v10820_v63 = vadd.f32 %v6107_v51, %v6106_v27  ;;  %v5394_v25 = vsub.f32 1.0, %v5393_v43  ;;  %v5421_v18 = vmul.f32 0.996, %v5420_v29  ;;  %vm5399_vm8 = vmor %vm5397_vm6, %vm5398_vm4 }
 0xc73   : > { %v6993_v50 = vclamps-f32 %v10818_v52, 0.9999999  ;;  %7714 = vrcp.f32 %v10818_v52  ;;  %v6168_v47 = vand.u32 2147483647, %v10818_v52  ;;  %v6170_v61 = vand.u32 2147483648, %v10818_v52 }
 0xc74   : > { %7716 = vrsqrt.f32 %v10820_v63  ;;  %v5395_v31 = vmul.f32 %v7713_v7, %v5394_v25  ;;  %v5423_v55 = vmul.f32 %v5421_v18, %v10749_v33  ;;  %vm6164_vm11 = vweird.f32 %v10818_v52 }
 0xc75   : > { %v6139_v59 = vadd.f32 1.0, %v6993_v50  ;;  %v6145_v37 = vsub.f32 1.0, %v6993_v50  ;;  %vm6169_vm15 = vcmp.eq.f32.partialorder %v6168_v47, 8.507059e+37  ;;  %v6171_v28 = vor.u32 1.1754944e-38, %v6170_v61 }
 0xc76   : > { %v5396_v30 = vadd.f32 %v7713_v7, %v5395_v31  ;;  %v10837_v13 = vsel %vm5391_vm5, %v5423_v55, %v10749_v33  ;;  %vm6128_vm2 = vcmp.eq.f32.partialorder %v10820_v63, inf  ;;  %vm6130_vm3 = vcmp.eq.f32.partialorder %v10820_v63, 0.0 }
 0xc77   : > { %7718 = vlog2.f32 %v6139_v59  ;;  %v5431_v20 = vmul.f32 %v10837_v13, %v10837_v13  ;;  %v6131_v44 = vand.u32 2147483648, %v10820_v63 }
 0xc78   : > { %7720 = vlog2.f32 %v6145_v37  ;;  %v5400_v57 = vsel %vm5399_vm8, %v7713_v7, %v5396_v30 }
 0xc79   : > { %v7715_v60 = vpop.eup %7714  ;;  %v5405_v4 = vsel %vm5402_vm9, %v5404_v26, %v5400_v57  ;;  %v5438_v5 = vrot.slane %v5431_v20, 4 }
 0xc7a   : > { %v7717_v2 = vpop.eup %7716  ;;  %v6160_v39 = vmul.f32 %v7715_v60, %v10818_v52  ;;  %vm6165_vm7 = vweird.f32 %v7715_v60  ;;  %v5406_v14 = vmul.f32 0.996, %v5405_v4 }
 0xc7b   : > { %v6122_v21 = vmul.f32 %v7717_v2, %v10820_v63  ;;  %vm10845_vm12 = vmor %vm6164_vm11, %vm6165_vm7  ;;  %v5439_v50 = vadd.f32 %v5438_v5, %v5431_v20 }
 0xc7c   : > { %v6161_v1 = vsub.f32 1.0, %v6160_v39  ;;  %v5422_v38 = vmul.f32 %v5406_v14, %v10768_v22 }
 0xc7d   : > { %v7719_v35 = vpop.eup %7718  ;;  %v6123_v6 = vmul.f32 %v7717_v2, %v6122_v21  ;;  %v5440_v46 = vrot.slane %v5439_v50, 2 }
 0xc7e   : > { %v7721_v36 = vpop.eup %7720  ;;  %v6142_v34 = vmul.f32 0.6931472, %v7719_v35  ;;  %v6162_v45 = vmul.f32 %v7715_v60, %v6161_v1  ;;  %v10855_v52 = vsel %vm5390_vm13, %v5422_v38, %v10768_v22 }
 0xc7f   : > { %v6148_v40 = vmul.f32 0.6931472, %v7721_v36  ;;  %v6124_v19 = vmul.f32 0.5, %v6123_v6  ;;  %v5430_v37 = vmul.f32 %v10855_v52, %v10855_v52 }
 0xc80   : > { %v6163_v10 = vadd.f32 %v7715_v60, %v6162_v45 }
 0xc81   : > { %v6151_v27 = vsub.f32 %v6142_v34, %v6148_v40  ;;  %v6125_v3 = vsub.f32 1.5, %v6124_v19 }
 0xc82   : > { %v6167_v12 = vsel %vm10845_vm12, %v7715_v60, %v6163_v10  ;;  %v5432_v60 = vrot.slane %v5430_v37, 4 }
 0xc83   : > { %v6153_v51 = vmul.f32 0.5, %v6151_v27  ;;  %v6126_v7 = vmul.f32 %v7717_v2, %v6125_v3  ;;  %v6172_v43 = vsel %vm6169_vm15, %v6171_v28, %v6167_v12 }
 0xc84   : > { %v5433_v29 = vadd.f32 %v5432_v60, %v5430_v37 }
 0xc85   : > { %v6155_v42 = vmul.f32 %v6153_v51, %v10781_v11  ;;  %v6156_v59 = vmul.f32 %v6153_v51, %v10784_v0  ;;  %v6127_v32 = vmul.f32 %v6126_v7, %v10820_v63  ;;  %v5441_v11 = vadd.f32 %v5440_v46, %v5439_v50 }
 0xc86   : > { %v5434_v18 = vrot.slane %v5433_v29, 2 }
 0xc87   : > { %v6173_v25 = vmul.f32 %v6172_v43, %v6155_v42  ;;  %v6174_v15 = vmul.f32 %v6172_v43, %v6156_v59  ;;  %v6129_v22 = vsel %vm6128_vm2, %v10820_v63, %v6127_v32  ;;  %v5442_v2 = vrot.slane %v5441_v11, 1 }
 0xc88   : > { %v6132_v56 = vsel %vm6130_vm3, %v6131_v44, %v6129_v22  ;;  %v5435_v35 = vadd.f32 %v5434_v18, %v5433_v29 }
 0xc89   : > { %v6191_v54 = vmax.f32 %v6173_v25, %v6174_v15  ;;  %v6134_v0 = vmax.f32 %v6132_v56, 1e-15  ;;  %v10865_v21 = vadd.f32 %v5442_v2, %v5441_v11 }
 0xc8a   : > { %v5436_v6 = vrot.slane %v5435_v35, 1 }
 0xc8b   : > { %v6192_v39 = vrot.slane %v6191_v54, 4  ;;  %v6994_v31 = vclamps-f32 %v6134_v0, 0.9999999  ;;  %7722 = vrcp.f32 %v6134_v0  ;;  %vm6180_vm5 = vweird.f32 %v6134_v0 }
 0xc8c   : > { %7724 = vrsqrt.f32 %v10865_v21  ;;  %v10868_v45 = vadd.f32 %v5436_v6, %v5435_v35  ;;  %v6184_v51 = vand.u32 2147483647, %v6134_v0  ;;  %v6186_v12 = vand.u32 2147483648, %v6134_v0 }
 0xc8d   : > { %v6193_v1 = vmax.f32 %v6191_v54, %v6192_v39  ;;  %v6140_v30 = vadd.f32 1.0, %v6994_v31  ;;  %v6146_v55 = vsub.f32 1.0, %v6994_v31  ;;  %vm5463_vm8 = vcmp.eq.f32.partialorder %v10865_v21, inf }
 0xc8e   : > { %v6187_v44 = vor.u32 1.1754944e-38, %v6186_v12  ;;  %vm6185_vm7 = vcmp.eq.f32.partialorder %v6184_v51, 8.507059e+37  ;;  %v5466_v18 = vand.u32 2147483648, %v10865_v21  ;;  %vm5465_vm9 = vcmp.eq.f32.partialorder %v10865_v21, 0.0 }
 0xc8f   : > { %v6194_v63 = vrot.slane %v6193_v1, 2  ;;  %7726 = vlog2.f32 %v6140_v30  ;;  %vm5451_vm11 = vcmp.eq.f32.partialorder %v10868_v45, inf  ;;  %vm5453_vm12 = vcmp.eq.f32.partialorder %v10868_v45, 0.0 }
 0xc90   : > { %7728 = vlog2.f32 %v6146_v55 }
 0xc91   : > { %v7723_v26 = vpop.eup %7722  ;;  %v6195_v36 = vmax.f32 %v6193_v1, %v6194_v63  ;;  %7730 = vrsqrt.f32 %v10868_v45 }
 0xc92   : > { %v6176_v34 = vmul.f32 %v7723_v26, %v6134_v0  ;;  %v7725_v40 = vpop.eup %7724  ;;  %vm6181_vm4 = vweird.f32 %v7723_v26 }
 0xc93   : > { %v6196_v57 = vrot.slane %v6195_v36, 1  ;;  %v5457_v10 = vmul.f32 %v7725_v40, %v10865_v21  ;;  %vm6182_vm6 = vmor %vm6180_vm5, %vm6181_vm4 }
 0xc94   : > { %v6177_v19 = vsub.f32 1.0, %v6176_v34  ;;  %v5454_v34 = vand.u32 2147483648, %v10868_v45 }
 0xc95   : > { %v7727_v4 = vpop.eup %7726  ;;  %v6197_v20 = vmax.f32 %v6195_v36, %v6196_v57  ;;  %v5458_v33 = vmul.f32 %v7725_v40, %v5457_v10 }
 0xc96   : > { %v7729_v47 = vpop.eup %7728  ;;  %v6144_v61 = vmul.f32 0.6931472, %v7727_v4  ;;  %v6178_v14 = vmul.f32 %v7723_v26, %v6177_v19 }
 0xc97   : > { %v6205_v27 = vsub.f32 %v6173_v25, %v6197_v20  ;;  %v6206_v3 = vsub.f32 %v6174_v15, %v6197_v20  ;;  %v6150_v5 = vmul.f32 0.6931472, %v7729_v47  ;;  %v5459_v42 = vmul.f32 0.5, %v5458_v33  ;;  %v7731_v59 = vpop.eup %7730 }
 0xc98   : > { %v6179_v38 = vadd.f32 %v7723_v26, %v6178_v14  ;;  %v5445_v43 = vmul.f32 %v7731_v59, %v10868_v45 }
 0xc99   : > { %v6209_v7 = vmul.f32 1.442695, %v6205_v27  ;;  %v6211_v50 = vmul.f32 1.442695, %v6206_v3  ;;  %v6152_v28 = vsub.f32 %v6144_v61, %v6150_v5  ;;  %v5460_v46 = vsub.f32 1.5, %v5459_v42 }
 0xc9a   : > { %v6183_v37 = vsel %vm6182_vm6, %v7723_v26, %v6179_v38  ;;  %v5446_v22 = vmul.f32 %v7731_v59, %v5445_v43 }
 0xc9b   : > { %7732 = vpow2.f32 %v6209_v7  ;;  %v6154_v32 = vmul.f32 0.5, %v6152_v28  ;;  %v6188_v60 = vsel %vm6185_vm7, %v6187_v44, %v6183_v37  ;;  %v5461_v56 = vmul.f32 %v7725_v40, %v5460_v46 }
 0xc9c   : > { %7734 = vpow2.f32 %v6211_v50  ;;  %v5447_v0 = vmul.f32 0.5, %v5446_v22 }
 0xc9d   : > { %v6157_v25 = vmul.f32 %v6154_v32, %v10799_v62  ;;  %v6158_v15 = vmul.f32 %v6154_v32, %v10802_v23  ;;  %v5462_v29 = vmul.f32 %v5461_v56, %v10865_v21 }
 0xc9e   : > { %v5448_v31 = vsub.f32 1.5, %v5447_v0 }
 0xc9f   : > { %v6189_v11 = vmul.f32 %v6188_v60, %v6157_v25  ;;  %v6190_v54 = vmul.f32 %v6188_v60, %v6158_v15  ;;  %v5464_v23 = vsel %vm5463_vm8, %v10865_v21, %v5462_v29 }
 0xca0   : > { %v5449_v55 = vmul.f32 %v7731_v59, %v5448_v31  ;;  %v5467_v35 = vsel %vm5465_vm9, %v5466_v18, %v5464_v23 }
 0xca1   : > { %v10876_v2 = vpop.eup %7732  ;;  %v6198_v39 = vmax.f32 %v6189_v11, %v6190_v54  ;;  %v10886_v63 = vmax.f32 %v5467_v35, 1e-15 }
 0xca2   : > { %v10880_v62 = vpop.eup %7734  ;;  %v5450_v36 = vmul.f32 %v5449_v55, %v10868_v45 }
 0xca3   : > { %v6217_v1 = vadd.f32 %v10880_v62, %v10876_v2  ;;  %v6199_v30 = vrot.slane %v6198_v39, 4  ;;  %v6988_v57 = vclamps-f32 %v10886_v63, 0.9999999  ;;  %7736 = vrcp.f32 %v10886_v63 }
 0xca4   : > { %v5452_v19 = vsel %vm5451_vm11, %v10868_v45, %v5450_v36  ;;  %v5516_v15 = vand.u32 2147483647, %v10886_v63  ;;  %v5518_v56 = vand.u32 2147483648, %v10886_v63  ;;  %vm5512_vm15 = vweird.f32 %v10886_v63 }
 0xca5   : > { %v6218_v6 = vrot.slane %v6217_v1, 4  ;;  %v6200_v26 = vmax.f32 %v6198_v39, %v6199_v30  ;;  %v5455_v4 = vsel %vm5453_vm12, %v5454_v34, %v5452_v19  ;;  %v5475_v20 = vadd.f32 1.0, %v6988_v57 }
 0xca6   : > { %v5481_v10 = vsub.f32 1.0, %v6988_v57  ;;  %v10895_v14 = vmax.f32 %v5455_v4, 1e-15  ;;  %vm5517_vm4 = vcmp.eq.f32.partialorder %v5516_v15, 8.507059e+37  ;;  %v5519_v34 = vor.u32 1.1754944e-38, %v5518_v56 }
 0xca7   : > { %v6219_v21 = vadd.f32 %v6218_v6, %v6217_v1  ;;  %v6201_v40 = vrot.slane %v6200_v26, 2  ;;  %7738 = vlog2.f32 %v5475_v20 }
 0xca8   : > { %v6987_v5 = vclamps-f32 %v10895_v14, 0.9999999  ;;  %7740 = vrcp.f32 %v10895_v14  ;;  %v5503_v23 = vand.u32 2147483648, %v10895_v14  ;;  %vm5497_vm5 = vweird.f32 %v10895_v14 }
 0xca9   : > { %v6220_v47 = vrot.slane %v6219_v21, 2  ;;  %v6202_v61 = vmax.f32 %v6200_v26, %v6201_v40  ;;  %v7737_v33 = vpop.eup %7736  ;;  %7742 = vlog2.f32 %v5481_v10 }
 0xcaa   : > { %v5474_v12 = vadd.f32 1.0, %v6987_v5  ;;  %v5480_v45 = vsub.f32 1.0, %v6987_v5  ;;  %v5508_v7 = vmul.f32 %v7737_v33, %v10886_v63  ;;  %vm5513_vm13 = vweird.f32 %v7737_v33 }
 0xcab   : > { %v6221_v27 = vadd.f32 %v6220_v47, %v6219_v21  ;;  %v6203_v3 = vrot.slane %v6202_v61, 1  ;;  %vm5514_vm3 = vmor %vm5512_vm15, %vm5513_vm13  ;;  %v5501_v63 = vand.u32 2147483647, %v10895_v14  ;;  %v5504_v20 = vor.u32 1.1754944e-38, %v5503_v23 }
 0xcac   : > { %7744 = vlog2.f32 %v5474_v12  ;;  %v5509_v32 = vsub.f32 1.0, %v5508_v7 }
 0xcad   : > { %v6222_v38 = vrot.slane %v6221_v27, 1  ;;  %v6204_v51 = vmax.f32 %v6202_v61, %v6203_v3  ;;  %v7739_v59 = vpop.eup %7738  ;;  %7746 = vlog2.f32 %v5480_v45  ;;  %vm5502_vm8 = vcmp.eq.f32.partialorder %v5501_v63, 8.507059e+37 }
 0xcae   : > { %v7741_v37 = vpop.eup %7740  ;;  %v5479_v22 = vmul.f32 0.6931472, %v7739_v59 }
 0xcaf   : > { %v10900_v50 = vadd.f32 %v6222_v38, %v6221_v27  ;;  %v6207_v28 = vsub.f32 %v6189_v11, %v6204_v51  ;;  %v6208_v42 = vsub.f32 %v6190_v54, %v6204_v51  ;;  %v7743_v43 = vpop.eup %7742  ;;  %v5493_v25 = vmul.f32 %v7741_v37, %v10895_v14 }
 0xcb0   : > { %v5485_v60 = vmul.f32 0.6931472, %v7743_v43  ;;  %v5510_v54 = vmul.f32 %v7737_v33, %v5509_v32  ;;  %vm5498_vm2 = vweird.f32 %v7741_v37 }
 0xcb1   : > { %7748 = vrcp.f32 %v10900_v50  ;;  %v6213_v44 = vmul.f32 1.442695, %v6207_v28  ;;  %v6215_v46 = vmul.f32 1.442695, %v6208_v42  ;;  %v5494_v11 = vsub.f32 1.0, %v5493_v25  ;;  %vm10914_vm6 = vmor %vm5497_vm5, %vm5498_vm2 }
 0xcb2   : > { %v7745_v0 = vpop.eup %7744  ;;  %v5487_v29 = vsub.f32 %v5479_v22, %v5485_v60  ;;  %v5511_v1 = vadd.f32 %v7737_v33, %v5510_v54  ;;  %v6242_v61 = vand.u32 2147483648, %v10900_v50  ;;  %vm6236_vm9 = vweird.f32 %v10900_v50 }
 0xcb3   : > { %7750 = vpow2.f32 %v6213_v44  ;;  %v7747_v39 = vpop.eup %7746  ;;  %v5477_v31 = vmul.f32 0.6931472, %v7745_v0  ;;  %v5495_v18 = vmul.f32 %v7741_v37, %v5494_v11 }
 0xcb4   : > { %7752 = vpow2.f32 %v6215_v46  ;;  %v5483_v55 = vmul.f32 0.6931472, %v7747_v39  ;;  %v5489_v35 = vmul.f32 0.5, %v5487_v29  ;;  %v5515_v36 = vsel %vm5514_vm3, %v7737_v33, %v5511_v1 }
 0xcb5   : > { %v5496_v26 = vadd.f32 %v7741_v37, %v5495_v18  ;;  %v5520_v10 = vsel %vm5517_vm4, %v5519_v34, %v5515_v36  ;;  %v6243_v28 = vor.u32 1.1754944e-38, %v6242_v61 }
 0xcb6   : > { %v5486_v57 = vsub.f32 %v5477_v31, %v5483_v55  ;;  %v5491_v21 = vmul.f32 %v5489_v35, %v10837_v13  ;;  %v6240_v13 = vand.u32 2147483647, %v10900_v50 }
 0xcb7   : > { %v7749_v30 = vpop.eup %7748  ;;  %v5500_v3 = vsel %vm10914_vm6, %v7741_v37, %v5496_v26 }
 0xcb8   : > { %v6232_v6 = vmul.f32 %v7749_v30, %v10900_v50  ;;  %v5488_v27 = vmul.f32 0.5, %v5486_v57  ;;  %v5521_v14 = vmul.f32 %v5520_v10, %v5491_v21  ;;  %vm6237_vm7 = vweird.f32 %v7749_v30 }
 0xcb9   : > { %v10912_v40 = vpop.eup %7750  ;;  %v5505_v7 = vsel %vm5502_vm8, %v5504_v20, %v5500_v3  ;;  %vm6238_vm11 = vmor %vm6236_vm9, %vm6237_vm7  ;;  %vm6241_vm12 = vcmp.eq.f32.partialorder %v6240_v13, 8.507059e+37 }
 0xcba   : > { %v6233_v19 = vsub.f32 1.0, %v6232_v6  ;;  %v10918_v47 = vpop.eup %7752  ;;  %v5490_v38 = vmul.f32 %v5488_v27, %v10855_v52  ;;  %v5528_v51 = vrot.slane %v5521_v14, 4 }
 0xcbb   : > { %v6224_v33 = vadd.f32 %v10918_v47, %v10912_v40 }
 0xcbc   : > { %v6234_v5 = vmul.f32 %v7749_v30, %v6233_v19  ;;  %v5506_v42 = vmul.f32 %v5505_v7, %v5490_v38  ;;  %v5529_v59 = vmax.f32 %v5521_v14, %v5528_v51 }
 0xcbd   : > { %v6225_v45 = vrot.slane %v6224_v33, 4 }
 0xcbe   : > { %v6235_v12 = vadd.f32 %v7749_v30, %v6234_v5  ;;  %v5522_v44 = vrot.slane %v5506_v42, 4  ;;  %v5530_v46 = vrot.slane %v5529_v59, 2 }
 0xcbf   : > { %v6226_v37 = vadd.f32 %v6225_v45, %v6224_v33 }
 0xcc0   : > { %v6239_v32 = vsel %vm6238_vm11, %v7749_v30, %v6235_v12  ;;  %v5523_v50 = vmax.f32 %v5506_v42, %v5522_v44  ;;  %v5531_v22 = vmax.f32 %v5529_v59, %v5530_v46 }
 0xcc1   : > { %v6244_v43 = vsel %vm6241_vm12, %v6243_v28, %v6239_v32  ;;  %v6227_v15 = vrot.slane %v6226_v37, 2 }
 0xcc2   : > { %v10929_v25 = vmul.f32 %v10876_v2, %v6244_v43  ;;  %v10932_v52 = vmul.f32 %v10880_v62, %v6244_v43  ;;  %v5524_v54 = vrot.slane %v5523_v50, 2  ;;  %v5532_v0 = vrot.slane %v5531_v22, 1 }
 0xcc3   : > { %v6228_v11 = vadd.f32 %v6227_v15, %v6226_v37 }
 0xcc4   : > { %v6263_v60 = vmul.f32 %v10929_v25, %v10929_v25  ;;  %v6264_v56 = vmul.f32 %v10932_v52, %v10932_v52  ;;  %v5525_v31 = vmax.f32 %v5523_v50, %v5524_v54  ;;  %v5533_v2 = vmax.f32 %v5531_v22, %v5532_v0 }
 0xcc5   : > { %v6229_v39 = vrot.slane %v6228_v11, 1 }
 0xcc6   : > { %v6267_v29 = vadd.f32 %v6264_v56, %v6263_v60  ;;  %v5526_v62 = vrot.slane %v5525_v31, 1  ;;  %v5535_v1 = vsub.f32 %v5521_v14, %v5533_v2 }
 0xcc7   : > { %v6230_v23 = vadd.f32 %v6229_v39, %v6228_v11 }
 0xcc8   : > { %v6268_v18 = vrot.slane %v6267_v29, 4  ;;  %v5527_v55 = vmax.f32 %v5525_v31, %v5526_v62  ;;  %v5538_v35 = vmul.f32 1.442695, %v5535_v1 }
 0xcc9   : > { %7754 = vrcp.f32 %v6230_v23  ;;  %v6258_v10 = vand.u32 2147483648, %v6230_v23  ;;  %v6256_v3 = vand.u32 2147483647, %v6230_v23  ;;  %vm6252_vm15 = vweird.f32 %v6230_v23 }
 0xcca   : > { %v6269_v30 = vadd.f32 %v6268_v18, %v6267_v29  ;;  %v5534_v26 = vsub.f32 %v5506_v42, %v5527_v55  ;;  %7756 = vpow2.f32 %v5538_v35 }
 0xccb   : > { %v6259_v33 = vor.u32 1.1754944e-38, %v6258_v10  ;;  %vm6257_vm3 = vcmp.eq.f32.partialorder %v6256_v3, 8.507059e+37 }
 0xccc   : > { %v6270_v6 = vrot.slane %v6269_v30, 2  ;;  %v5536_v34 = vmul.f32 1.442695, %v5534_v26 }
 0xcce   : > { %v6271_v36 = vadd.f32 %v6270_v6, %v6269_v30  ;;  %7758 = vpow2.f32 %v5536_v34 }
 0xccf   : > { %v7755_v57 = vpop.eup %7754 }
 0xcd0   : > { %v6272_v63 = vrot.slane %v6271_v36, 1  ;;  %v6248_v21 = vmul.f32 %v7755_v57, %v6230_v23  ;;  %v10938_v4 = vpop.eup %7756  ;;  %vm6253_vm13 = vweird.f32 %v7755_v57 }
 0xcd1   : > { %v5546_v61 = vrot.slane %v10938_v4, 4  ;;  %vm6254_vm2 = vmor %vm6252_vm15, %vm6253_vm13 }
 0xcd2   : > { %v6273_v19 = vadd.f32 %v6272_v63, %v6271_v36  ;;  %v6249_v20 = vsub.f32 1.0, %v6248_v21 }
 0xcd3   : > { %v5547_v14 = vadd.f32 %v10938_v4, %v5546_v61 }
 0xcd4   : > { %7760 = vrsqrt.f32 %v6273_v19  ;;  %v6250_v27 = vmul.f32 %v7755_v57, %v6249_v20  ;;  %v10942_v5 = vpop.eup %7758  ;;  %vm6288_vm4 = vcmp.eq.f32.partialorder %v6273_v19, inf  ;;  %v6291_v30 = vand.u32 2147483648, %v6273_v19 }
 0xcd5   : > { %v5540_v38 = vrot.slane %v10942_v5, 4  ;;  %v5548_v51 = vrot.slane %v5547_v14, 2  ;;  %vm6290_vm5 = vcmp.eq.f32.partialorder %v6273_v19, 0.0 }
 0xcd6   : > { %v6251_v13 = vadd.f32 %v7755_v57, %v6250_v27 }
 0xcd7   : > { %v5541_v28 = vadd.f32 %v10942_v5, %v5540_v38  ;;  %v5549_v42 = vadd.f32 %v5548_v51, %v5547_v14 }
 0xcd8   : > { %v6255_v12 = vsel %vm6254_vm2, %v7755_v57, %v6251_v13 }
 0xcd9   : > { %v6260_v7 = vsel %vm6257_vm3, %v6259_v33, %v6255_v12  ;;  %v5542_v43 = vrot.slane %v5541_v28, 2  ;;  %v5550_v44 = vrot.slane %v5549_v42, 1 }
 0xcda   : > { %v7761_v45 = vpop.eup %7760  ;;  %v10947_v59 = vmul.f32 %v10912_v40, %v6260_v7  ;;  %v10950_v32 = vmul.f32 %v10918_v47, %v6260_v7 }
 0xcdb   : > { %v6282_v37 = vmul.f32 %v7761_v45, %v6273_v19  ;;  %v5543_v50 = vadd.f32 %v5542_v43, %v5541_v28  ;;  %v5551_v22 = vadd.f32 %v5550_v44, %v5549_v42 }
 0xcdc   : > { %v6265_v46 = vmul.f32 %v10947_v59, %v10947_v59  ;;  %v6266_v15 = vmul.f32 %v10950_v32, %v10950_v32 }
 0xcdd   : > { %v5544_v56 = vrot.slane %v5543_v50, 1  ;;  %7762 = vrcp.f32 %v5551_v22  ;;  %v6283_v11 = vmul.f32 %v7761_v45, %v6282_v37  ;;  %v5576_v21 = vand.u32 2147483647, %v5551_v22 }
 0xcde   : > { %v6274_v60 = vadd.f32 %v6266_v15, %v6265_v46  ;;  %v5578_v20 = vand.u32 2147483648, %v5551_v22  ;;  %vm5572_vm7 = vweird.f32 %v5551_v22 }
 0xcdf   : > { %v5545_v54 = vadd.f32 %v5544_v56, %v5543_v50  ;;  %v6284_v0 = vmul.f32 0.5, %v6283_v11  ;;  %vm5577_vm9 = vcmp.eq.f32.partialorder %v5576_v21, 8.507059e+37 }
 0xce0   : > { %v6275_v40 = vrot.slane %v6274_v60, 4  ;;  %v5579_v3 = vor.u32 1.1754944e-38, %v5578_v20 }
 0xce1   : > { %7764 = vrcp.f32 %v5545_v54  ;;  %v6285_v29 = vsub.f32 1.5, %v6284_v0  ;;  %v5563_v27 = vand.u32 2147483648, %v5545_v54  ;;  %v5561_v14 = vand.u32 2147483647, %v5545_v54 }
 0xce2   : > { %v6276_v47 = vadd.f32 %v6275_v40, %v6274_v60  ;;  %vm5557_vm12 = vweird.f32 %v5545_v54 }
 0xce3   : > { %v7763_v31 = vpop.eup %7762  ;;  %v6286_v2 = vmul.f32 %v7761_v45, %v6285_v29  ;;  %v5564_v7 = vor.u32 1.1754944e-38, %v5563_v27  ;;  %vm5562_vm15 = vcmp.eq.f32.partialorder %v5561_v14, 8.507059e+37 }
 0xce4   : > { %v6277_v39 = vrot.slane %v6276_v47, 2  ;;  %v5568_v23 = vmul.f32 %v7763_v31, %v5551_v22  ;;  %vm5573_vm6 = vweird.f32 %v7763_v31 }
 0xce5   : > { %v6287_v62 = vmul.f32 %v6286_v2, %v6273_v19  ;;  %vm5574_vm8 = vmor %vm5572_vm7, %vm5573_vm6 }
 0xce6   : > { %v6278_v18 = vadd.f32 %v6277_v39, %v6276_v47  ;;  %v5569_v55 = vsub.f32 1.0, %v5568_v23 }
 0xce7   : > { %v7765_v35 = vpop.eup %7764  ;;  %v6289_v6 = vsel %vm6288_vm4, %v6273_v19, %v6287_v62 }
 0xce8   : > { %v6279_v1 = vrot.slane %v6278_v18, 1  ;;  %v6292_v36 = vsel %vm6290_vm5, %v6291_v30, %v6289_v6  ;;  %v5553_v34 = vmul.f32 %v7765_v35, %v5545_v54  ;;  %v5570_v63 = vmul.f32 %v7763_v31, %v5569_v55 }
 0xce9   : > { %v6305_v57 = vmax.f32 %v6292_v36, 1e-15  ;;  %vm5558_vm11 = vweird.f32 %v7765_v35 }
 0xcea   : > { %v10956_v26 = vadd.f32 %v6279_v1, %v6278_v18  ;;  %v5554_v10 = vsub.f32 1.0, %v5553_v34  ;;  %v5571_v61 = vadd.f32 %v7763_v31, %v5570_v63  ;;  %vm5559_vm13 = vmor %vm5557_vm12, %vm5558_vm11 }
 0xceb   : > { %v6322_v60 = vand.u32 2147483647, %v6305_v57  ;;  %v6324_v56 = vand.u32 2147483648, %v6305_v57  ;;  %vm6318_vm4 = vweird.f32 %v6305_v57 }
 0xcec   : > { %7766 = vrsqrt.f32 %v10956_v26  ;;  %v5555_v19 = vmul.f32 %v7765_v35, %v5554_v10  ;;  %v5575_v13 = vsel %vm5574_vm8, %v7763_v31, %v5571_v61  ;;  %vm6300_vm3 = vcmp.eq.f32.partialorder %v10956_v26, inf }
 0xced   : > { %7768 = vrcp.f32 %v6305_v57  ;;  %v5580_v33 = vsel %vm5577_vm9, %v5579_v3, %v5575_v13  ;;  %vm6323_vm6 = vcmp.eq.f32.partialorder %v6322_v60, 8.507059e+37  ;;  %v6325_v2 = vor.u32 1.1754944e-38, %v6324_v56 }
 0xcee   : > { %v5556_v51 = vadd.f32 %v7765_v35, %v5555_v19  ;;  %v10960_v12 = vmul.f32 %v10938_v4, %v5580_v33  ;;  %7770 = vtanh.f32 %v6305_v57  ;;  %vm6302_vm7 = vcmp.eq.f32.partialorder %v10956_v26, 0.0 }
 0xcf0   : > { %v5560_v42 = vsel %vm5559_vm13, %v7765_v35, %v5556_v51  ;;  %v5583_v37 = vmul.f32 %v10960_v12, %v10960_v12  ;;  %v6303_v35 = vand.u32 2147483648, %v10956_v26 }
 0xcf1   : > { %v5565_v46 = vsel %vm5562_vm15, %v5564_v7, %v5560_v42 }
 0xcf2   : > { %v7767_v38 = vpop.eup %7766  ;;  %v10966_v15 = vmul.f32 %v10942_v5, %v5565_v46  ;;  %v5590_v50 = vrot.slane %v5583_v37, 4 }
 0xcf3   : > { %v6294_v45 = vmul.f32 %v7767_v38, %v10956_v26  ;;  %v7769_v28 = vpop.eup %7768 }
 0xcf4   : > { %v6314_v44 = vmul.f32 %v7769_v28, %v6305_v57  ;;  %v5582_v11 = vmul.f32 %v10966_v15, %v10966_v15  ;;  %v5591_v40 = vadd.f32 %v5590_v50, %v5583_v37  ;;  %vm6319_vm2 = vweird.f32 %v7769_v28  ;;  %v7771_v47 = vpop.eup %7770 }
 0xcf5   : > { %v6295_v43 = vmul.f32 %v7767_v38, %v6294_v45  ;;  %vm6320_vm5 = vmor %vm6318_vm4, %vm6319_vm2  ;;  %v6309_v1 = vmul.f32 %v7771_v47, %v10929_v25  ;;  %v6310_v30 = vmul.f32 %v7771_v47, %v10932_v52 }
 0xcf6   : > { %v6315_v22 = vsub.f32 1.0, %v6314_v44  ;;  %v5584_v29 = vrot.slane %v5582_v11, 4  ;;  %v5592_v39 = vrot.slane %v5591_v40, 2 }
 0xcf7   : > { %v6296_v4 = vmul.f32 0.5, %v6295_v43 }
 0xcf8   : > { %v6316_v0 = vmul.f32 %v7769_v28, %v6315_v22  ;;  %v5585_v18 = vadd.f32 %v5584_v29, %v5582_v11  ;;  %v5593_v23 = vadd.f32 %v5592_v39, %v5591_v40 }
 0xcf9   : > { %v6297_v54 = vsub.f32 1.5, %v6296_v4 }
 0xcfa   : > { %v6317_v5 = vadd.f32 %v7769_v28, %v6316_v0  ;;  %v5586_v36 = vrot.slane %v5585_v18, 2  ;;  %v5594_v34 = vrot.slane %v5593_v23, 1 }
 0xcfb   : > { %v6298_v31 = vmul.f32 %v7767_v38, %v6297_v54 }
 0xcfc   : > { %v6321_v55 = vsel %vm6320_vm5, %v7769_v28, %v6317_v5  ;;  %v5587_v25 = vadd.f32 %v5586_v36, %v5585_v18  ;;  %v5595_v10 = vadd.f32 %v5594_v34, %v5593_v23 }
 0xcfd   : > { %v6299_v62 = vmul.f32 %v6298_v31, %v10956_v26  ;;  %v6326_v6 = vsel %vm6323_vm6, %v6325_v2, %v6321_v55 }
 0xcfe   : > { %v10979_v63 = vmul.f32 %v6326_v6, %v6309_v1  ;;  %v10981_v21 = vmul.f32 %v6326_v6, %v6310_v30  ;;  %v5588_v3 = vrot.slane %v5587_v25, 1  ;;  %7772 = vrsqrt.f32 %v5595_v10 }
 0xcff   : > { %v6301_v57 = vsel %vm6300_vm3, %v10956_v26, %v6299_v62  ;;  %vm5615_vm13 = vcmp.eq.f32.partialorder %v5595_v10, inf  ;;  %vm5617_vm15 = vcmp.eq.f32.partialorder %v5595_v10, 0.0  ;;  %v5618_v62 = vand.u32 2147483648, %v5595_v10 }
 0xd00   : > { %v6304_v20 = vsel %vm6302_vm7, %v6303_v35, %v6301_v57  ;;  %v6345_v61 = vmul.f32 %v10979_v63, %v10979_v63  ;;  %v6346_v27 = vmul.f32 %v10981_v21, %v10981_v21  ;;  %v5589_v14 = vadd.f32 %v5588_v3, %v5587_v25 }
 0xd01   : > { %v6306_v52 = vmax.f32 %v6304_v20, 1e-15 }
 0xd02   : > { %v6349_v19 = vadd.f32 %v6346_v27, %v6345_v61  ;;  %vm5603_vm2 = vcmp.eq.f32.partialorder %v5589_v14, inf  ;;  %v5606_v25 = vand.u32 2147483648, %v5589_v14  ;;  %vm5605_vm3 = vcmp.eq.f32.partialorder %v5589_v14, 0.0 }
 0xd03   : > { %7774 = vrcp.f32 %v6306_v52  ;;  %v6338_v4 = vand.u32 2147483647, %v6306_v52  ;;  %v6340_v22 = vand.u32 2147483648, %v6306_v52  ;;  %vm6334_vm9 = vweird.f32 %v6306_v52 }
 0xd04   : > { %v6350_v26 = vrot.slane %v6349_v19, 4  ;;  %7776 = vrsqrt.f32 %v5589_v14  ;;  %v7773_v33 = vpop.eup %7772 }
 0xd05   : > { %v5609_v51 = vmul.f32 %v7773_v33, %v5595_v10  ;;  %7778 = vtanh.f32 %v6306_v52  ;;  %vm6339_vm12 = vcmp.eq.f32.partialorder %v6338_v4, 8.507059e+37  ;;  %v6341_v31 = vor.u32 1.1754944e-38, %v6340_v22 }
 0xd06   : > { %v6351_v13 = vadd.f32 %v6350_v26, %v6349_v19 }
 0xd07   : > { %v5610_v28 = vmul.f32 %v7773_v33, %v5609_v51 }
 0xd08   : > { %v6352_v38 = vrot.slane %v6351_v13, 2 }
 0xd09   : > { %v7775_v45 = vpop.eup %7774  ;;  %v5611_v46 = vmul.f32 0.5, %v5610_v28 }
 0xd0a   : > { %v6353_v7 = vadd.f32 %v6352_v38, %v6351_v13  ;;  %v6330_v42 = vmul.f32 %v7775_v45, %v6306_v52  ;;  %v7777_v37 = vpop.eup %7776  ;;  %vm6335_vm8 = vweird.f32 %v7775_v45 }
 0xd0b   : > { %v5597_v44 = vmul.f32 %v7777_v37, %v5589_v14  ;;  %v5612_v11 = vsub.f32 1.5, %v5611_v46  ;;  %v7779_v54 = vpop.eup %7778  ;;  %vm6336_vm11 = vmor %vm6334_vm9, %vm6335_vm8 }
 0xd0c   : > { %v6354_v43 = vrot.slane %v6353_v7, 1  ;;  %v6331_v50 = vsub.f32 1.0, %v6330_v42  ;;  %v6311_v39 = vmul.f32 %v7779_v54, %v10947_v59  ;;  %v6312_v5 = vmul.f32 %v7779_v54, %v10950_v32 }
 0xd0d   : > { %v5598_v56 = vmul.f32 %v7777_v37, %v5597_v44  ;;  %v5613_v47 = vmul.f32 %v7773_v33, %v5612_v11 }
 0xd0e   : > { %v10987_v60 = vadd.f32 %v6354_v43, %v6353_v7  ;;  %v6332_v40 = vmul.f32 %v7775_v45, %v6331_v50 }
 0xd0f   : > { %v5599_v0 = vmul.f32 0.5, %v5598_v56  ;;  %v5614_v18 = vmul.f32 %v5613_v47, %v5595_v10 }
 0xd10   : > { %7780 = vrsqrt.f32 %v10987_v60  ;;  %v6333_v29 = vadd.f32 %v7775_v45, %v6332_v40  ;;  %vm6370_vm4 = vcmp.eq.f32.partialorder %v10987_v60, inf  ;;  %v6373_v42 = vand.u32 2147483648, %v10987_v60 }
 0xd11   : > { %v5600_v2 = vsub.f32 1.5, %v5599_v0  ;;  %v5616_v55 = vsel %vm5615_vm13, %v5595_v10, %v5614_v18  ;;  %vm6372_vm5 = vcmp.eq.f32.partialorder %v10987_v60, 0.0 }
 0xd12   : > { %v6337_v23 = vsel %vm6336_vm11, %v7775_v45, %v6333_v29  ;;  %v5619_v59 = vsel %vm5617_vm15, %v5618_v62, %v5616_v55 }
 0xd13   : > { %v6342_v1 = vsel %vm6339_vm12, %v6341_v31, %v6337_v23  ;;  %v5601_v30 = vmul.f32 %v7777_v37, %v5600_v2  ;;  %v5621_v20 = vmax.f32 %v5619_v59, 1e-15  ;;  %v6753_v31 = vlaneseq }
 0xd14   : > { %v10992_v35 = vmul.f32 %v6342_v1, %v6311_v39  ;;  %v10994_v6 = vmul.f32 %v6342_v1, %v6312_v5 }
 0xd15   : > { %v5602_v57 = vmul.f32 %v5601_v30, %v5589_v14  ;;  %7782 = vrcp.f32 %v5621_v20  ;;  %v5650_v44 = vand.u32 2147483647, %v5621_v20  ;;  %v5652_v4 = vand.u32 2147483648, %v5621_v20 }
 0xd16   : > { %v7781_v36 = vpop.eup %7780  ;;  %v6347_v32 = vmul.f32 %v10992_v35, %v10992_v35  ;;  %v6348_v52 = vmul.f32 %v10994_v6, %v10994_v6  ;;  %vm5646_vm7 = vweird.f32 %v5621_v20 }
 0xd17   : > { %v6364_v34 = vmul.f32 %v7781_v36, %v10987_v60  ;;  %v5604_v10 = vsel %vm5603_vm2, %v5589_v14, %v5602_v57  ;;  %vm5651_vm8 = vcmp.eq.f32.partialorder %v5650_v44, 8.507059e+37  ;;  %v5653_v29 = vor.u32 1.1754944e-38, %v5652_v4 }
 0xd18   : > { %v5607_v27 = vsel %vm5605_vm3, %v5606_v25, %v5604_v10  ;;  %v6356_v26 = vadd.f32 %v6348_v52, %v6347_v32 }
 0xd19   : > { %v6365_v61 = vmul.f32 %v7781_v36, %v6364_v34  ;;  %v5620_v19 = vmax.f32 %v5607_v27, 1e-15  ;;  %v6754_v34 = vshrl.u32 %v6753_v31, 7  ;;  %v6756_v27 = vand.u32 127, %v6753_v31 }
 0xd1a   : > { %v6357_v33 = vrot.slane %v6356_v26, 4 }
 0xd1b   : > { %v6366_v3 = vmul.f32 0.5, %v6365_v61  ;;  %7784 = vrcp.f32 %v5620_v19  ;;  %v7783_v51 = vpop.eup %7782  ;;  %v5635_v5 = vand.u32 2147483647, %v5620_v19  ;;  %v5637_v2 = vand.u32 2147483648, %v5620_v19 }
 0xd1c   : > { %7786 = vtanh.f32 %v5621_v20  ;;  %v6358_v45 = vadd.f32 %v6357_v33, %v6356_v26  ;;  %v5642_v28 = vmul.f32 %v7783_v51, %v5621_v20  ;;  %vm5647_vm6 = vweird.f32 %v7783_v51 }
 0xd1d   : > { %v6367_v13 = vsub.f32 1.5, %v6366_v3  ;;  %7788 = vtanh.f32 %v5620_v19  ;;  %vm5648_vm9 = vmor %vm5646_vm7, %vm5647_vm6  ;;  %vm5631_vm12 = vweird.f32 %v5620_v19  ;;  %vm5636_vm15 = vcmp.eq.f32.partialorder %v5635_v5, 8.507059e+37 }
 0xd1e   : > { %v6359_v14 = vrot.slane %v6358_v45, 2  ;;  %v5643_v43 = vsub.f32 1.0, %v5642_v28  ;;  %v5638_v57 = vor.u32 1.1754944e-38, %v5637_v2  ;;  %v6776_v33 = vadd.s32 8, %v6754_v34 }
 0xd1f   : > { %v6368_v38 = vmul.f32 %v7781_v36, %v6367_v13 }
 0xd20   : > { %v6360_v22 = vadd.f32 %v6359_v14, %v6358_v45  ;;  %v5644_v40 = vmul.f32 %v7783_v51, %v5643_v43  ;;  %vm6777_vm6 = vcmp.eq.s32.totalorder %v6776_v33, %v6756_v27 }
 0xd21   : > { %v6369_v7 = vmul.f32 %v6368_v38, %v10987_v60  ;;  %v7785_v46 = vpop.eup %7784 }
 0xd22   : > { %v5627_v11 = vmul.f32 %v7785_v46, %v5620_v19  ;;  %v7787_v54 = vpop.eup %7786  ;;  %v6361_v0 = vrot.slane %v6360_v22, 1  ;;  %vm5632_vm11 = vweird.f32 %v7785_v46 }
 0xd23   : > { %v6371_v37 = vsel %vm6370_vm4, %v10987_v60, %v6369_v7  ;;  %v5645_v60 = vadd.f32 %v7783_v51, %v5644_v40  ;;  %v5625_v18 = vmul.f32 %v7787_v54, %v10960_v12  ;;  %v7789_v1 = vpop.eup %7788  ;;  %vm5633_vm13 = vmor %vm5631_vm12, %vm5632_vm11 }
 0xd24   : > { %v6374_v50 = vsel %vm6372_vm5, %v6373_v42, %v6371_v37  ;;  %v5628_v47 = vsub.f32 1.0, %v5627_v11  ;;  %v11009_v39 = vadd.f32 %v6361_v0, %v6360_v22  ;;  %v5624_v12 = vmul.f32 %v7789_v1, %v10966_v15 }
 0xd25   : > { %v11006_v56 = vmax.f32 %v6374_v50, 1e-15  ;;  %v5649_v62 = vsel %vm5648_vm9, %v7783_v51, %v5645_v60  ;;  %vm6757_vm5 = vcmp.eq.s32.totalorder %v6754_v34, %v6756_v27  ;;  %v7861_v0 = vmov 0.0  }
 0xd26   : > { %v5629_v23 = vmul.f32 %v7785_v46, %v5628_v47  ;;  %v5654_v30 = vsel %vm5651_vm8, %v5653_v29, %v5649_v62  ;;  %v11027_v47 = vsel %vm6757_vm5, 1.0, %v7861_v0  ;;  %v11029_v60 = vsel %vm6777_vm6, 1.0, %v7861_v0 }
 0xd27   : > { %7790 = vrcp.f32 %v11006_v56  ;;  %v11013_v36 = vmul.f32 %v5654_v30, %v5625_v18  ;;  %v6400_v26 = vand.u32 2147483647, %v11006_v56  ;;  %v6402_v13 = vand.u32 2147483648, %v11006_v56 }
 0xd28   : > { %7792 = vrsqrt.f32 %v11009_v39  ;;  %v5630_v55 = vadd.f32 %v7785_v46, %v5629_v23  ;;  %vm6396_vm3 = vweird.f32 %v11006_v56  ;;  %vm6389_vm8 = vcmp.gt.f32.partialorder %v11006_v56, 0.996 }
 0xd29   : > { %v5657_v25 = vmul.f32 %v11013_v36, %v11013_v36  ;;  %v6403_v37 = vor.u32 1.1754944e-38, %v6402_v13  ;;  %vm6401_vm7 = vcmp.eq.f32.partialorder %v6400_v26, 8.507059e+37  ;;  %vm6382_vm9 = vcmp.eq.f32.partialorder %v11009_v39, inf }
 0xd2a   : > { %v5634_v32 = vsel %vm5633_vm13, %v7785_v46, %v5630_v55  ;;  %vm6384_vm11 = vcmp.eq.f32.partialorder %v11009_v39, 0.0 }
 0xd2b   : > { %v5639_v52 = vsel %vm5636_vm15, %v5638_v57, %v5634_v32  ;;  %v5664_v19 = vrot.slane %v5657_v25, 4 }
 0xd2c   : > { %v11019_v3 = vmul.f32 %v5639_v52, %v5624_v12 }
 0xd2d   : > { %v7791_v59 = vpop.eup %7790  ;;  %v5665_v45 = vadd.f32 %v5664_v19, %v5657_v25 }
 0xd2e   : > { %v6392_v20 = vmul.f32 %v7791_v59, %v11006_v56  ;;  %v7793_v61 = vpop.eup %7792  ;;  %vm6397_vm2 = vweird.f32 %v7791_v59  ;;  %v5656_v15 = vmul.f32 %v11019_v3, %v11019_v3 }
 0xd2f   : > { %v6376_v38 = vmul.f32 %v7793_v61, %v11009_v39  ;;  %v5666_v14 = vrot.slane %v5665_v45, 2  ;;  %vm6398_vm4 = vmor %vm6396_vm3, %vm6397_vm2 }
 0xd30   : > { %v6393_v10 = vsub.f32 1.0, %v6392_v20  ;;  %v5658_v42 = vrot.slane %v5656_v15, 4 }
 0xd31   : > { %v6377_v7 = vmul.f32 %v7793_v61, %v6376_v38  ;;  %v5667_v50 = vadd.f32 %v5666_v14, %v5665_v45 }
 0xd32   : > { %v6394_v51 = vmul.f32 %v7791_v59, %v6393_v10  ;;  %v5659_v46 = vadd.f32 %v5658_v42, %v5656_v15 }
 0xd33   : > { %v6378_v43 = vmul.f32 0.5, %v6377_v7  ;;  %v5668_v54 = vrot.slane %v5667_v50, 1 }
 0xd34   : > { %v6395_v28 = vadd.f32 %v7791_v59, %v6394_v51  ;;  %v5660_v40 = vrot.slane %v5659_v46, 2 }
 0xd35   : > { %v6379_v22 = vsub.f32 1.5, %v6378_v43  ;;  %v5669_v18 = vadd.f32 %v5668_v54, %v5667_v50 }
 0xd36   : > { %v6399_v44 = vsel %vm6398_vm4, %v7791_v59, %v6395_v28  ;;  %v5661_v2 = vadd.f32 %v5660_v40, %v5659_v46 }
 0xd37   : > { %v6404_v4 = vsel %vm6401_vm7, %v6403_v37, %v6399_v44  ;;  %v6380_v29 = vmul.f32 %v7793_v61, %v6379_v22  ;;  %7794 = vrsqrt.f32 %v5669_v18  ;;  %vm5689_vm12 = vcmp.eq.f32.partialorder %v5669_v18, inf }
 0xd38   : > { %v6405_v11 = vmul.f32 0.996, %v6404_v4  ;;  %v5662_v30 = vrot.slane %v5661_v2, 1  ;;  %vm5691_vm13 = vcmp.eq.f32.partialorder %v5669_v18, 0.0 }
 0xd39   : > { %v6381_v23 = vmul.f32 %v6380_v29, %v11009_v39  ;;  %v5692_v29 = vand.u32 2147483648, %v5669_v18 }
 0xd3a   : > { %v6421_v31 = vmul.f32 %v6405_v11, %v10979_v63  ;;  %v6422_v5 = vmul.f32 %v6405_v11, %v10981_v21  ;;  %v11049_v57 = vadd.f32 %v5662_v30, %v5661_v2 }
 0xd3b   : > { %v6383_v32 = vsel %vm6382_vm9, %v11009_v39, %v6381_v23 }
 0xd3c   : > { %v11036_v62 = vsel %vm6389_vm8, %v6421_v31, %v10979_v63  ;;  %v11039_v1 = vsel %vm6389_vm8, %v6422_v5, %v10981_v21  ;;  %v6385_v63 = vand.u32 2147483648, %v11009_v39  ;;  %7796 = vrsqrt.f32 %v11049_v57 }
 0xd3d   : > { %v6632_v55 = vmul.f32 %v11039_v1, %v11039_v1  ;;  %v6780_v59 = vmul.f32 %v11027_v47, %v11036_v62  ;;  %v6781_v34 = vmul.f32 %v11029_v60, %v11039_v1  ;;  %v6631_v56 = vmul.f32 %v11036_v62, %v11036_v62  ;;  %v7795_v10 = vpop.eup %7794 }
 0xd3e   : > { %v6386_v61 = vsel %vm6384_vm11, %v6385_v63, %v6383_v32  ;;  %v5683_v13 = vmul.f32 %v7795_v10, %v5669_v18  ;;  %vm5677_vm2 = vcmp.eq.f32.partialorder %v11049_v57, inf  ;;  %v5680_v63 = vand.u32 2147483648, %v11049_v57 }
 0xd3f   : > { %v6784_v21 = vsel %vm1002_vm14, %v6780_v59, 0.0  ;;  %v6785_v20 = vsel %vm1002_vm14, %v6781_v34, 0.0  ;;  %v6635_v12 = vadd.f32 %v6632_v55, %v6631_v56  ;;  %v11058_v19 = vmax.f32 %v6386_v61, 1e-15 }
 0xd40   : > { %v6786_v25 = vadd.f32 %v6785_v20, %v6784_v21  ;;  %v5684_v51 = vmul.f32 %v7795_v10, %v5683_v13  ;;  %vm5679_vm3 = vcmp.eq.f32.partialorder %v11049_v57, 0.0 }
 0xd41   : > { %v6636_v52 = vrot.slane %v6635_v12, 4  ;;  %7798 = vrcp.f32 %v11058_v19  ;;  %v6417_v55 = vand.u32 2147483648, %v11058_v19  ;;  %v6415_v56 = vand.u32 2147483647, %v11058_v19 }
 0xd42   : > { %v6787_v27 = vrot.slane %v6786_v25, 4  ;;  %v7797_v15 = vpop.eup %7796  ;;  %v5685_v42 = vmul.f32 0.5, %v5684_v51  ;;  %vm6411_vm4 = vweird.f32 %v11058_v19  ;;  %vm6390_vm7 = vcmp.gt.f32.partialorder %v11058_v19, 0.996 }
 0xd43   : > { %v6637_v26 = vadd.f32 %v6636_v52, %v6635_v12  ;;  %v5671_v28 = vmul.f32 %v7797_v15, %v11049_v57  ;;  %vm6416_vm6 = vcmp.eq.f32.partialorder %v6415_v56, 8.507059e+37 }
 0xd44   : > { %v6788_v33 = vadd.f32 %v6787_v27, %v6786_v25  ;;  %v5686_v43 = vsub.f32 1.5, %v5685_v42  ;;  %v6418_v25 = vor.u32 1.1754944e-38, %v6417_v55 }
 0xd45   : > { %v6638_v38 = vrot.slane %v6637_v26, 2  ;;  %v5672_v37 = vmul.f32 %v7797_v15, %v5671_v28 }
 0xd46   : > { %v6789_v45 = vrot.slane %v6788_v33, 2  ;;  %v5687_v22 = vmul.f32 %v7795_v10, %v5686_v43 }
 0xd47   : > { %v6639_v7 = vadd.f32 %v6638_v38, %v6637_v26  ;;  %v7799_v44 = vpop.eup %7798  ;;  %v5673_v4 = vmul.f32 0.5, %v5672_v37 }
 0xd48   : > { %v6790_v39 = vadd.f32 %v6789_v45, %v6788_v33  ;;  %v6407_v11 = vmul.f32 %v7799_v44, %v11058_v19  ;;  %v5688_v0 = vmul.f32 %v5687_v22, %v5669_v18  ;;  %vm6412_vm15 = vweird.f32 %v7799_v44 }
 0xd49   : > { %v6640_v14 = vrot.slane %v6639_v7, 1  ;;  %v5674_v54 = vsub.f32 1.5, %v5673_v4  ;;  %vm6413_vm5 = vmor %vm6411_vm4, %vm6412_vm15 }
 0xd4a   : > { %v6791_v46 = vrot.slane %v6790_v39, 1  ;;  %v6408_v31 = vsub.f32 1.0, %v6407_v11  ;;  %v5690_v2 = vsel %vm5689_vm12, %v5669_v18, %v5688_v0 }
 0xd4b   : > { %v11062_v50 = vadd.f32 %v6640_v14, %v6639_v7  ;;  %v5675_v5 = vmul.f32 %v7797_v15, %v5674_v54  ;;  %v5693_v23 = vsel %vm5691_vm13, %v5692_v29, %v5690_v2 }
 0xd4c   : > { %v6792_v40 = vadd.f32 %v6791_v46, %v6790_v39  ;;  %v6409_v30 = vmul.f32 %v7799_v44, %v6408_v31  ;;  %v11069_v34 = vmax.f32 %v5693_v23, 1e-15 }
 0xd4d   : > { %7800 = vrsqrt.f32 %v11062_v50  ;;  %v5676_v59 = vmul.f32 %v5675_v5, %v11049_v57  ;;  %vm6656_vm8 = vcmp.eq.f32.partialorder %v11062_v50, inf  ;;  %vm6658_vm9 = vcmp.eq.f32.partialorder %v11062_v50, 0.0 }
 0xd4e   : > { %6820 = vrot.lane.b32.xlu2 %v6792_v40, %s7862_s27  ;;  %v6410_v21 = vadd.f32 %v7799_v44, %v6409_v30  ;;  %7802 = vrcp.f32 %v11069_v34  ;;  %v5722_v26 = vand.u32 2147483647, %v11069_v34  ;;  %vm5718_vm11 = vweird.f32 %v11069_v34 }
 0xd4f   : > { %v5678_v12 = vsel %vm5677_vm2, %v11049_v57, %v5676_v59  ;;  %v5724_v57 = vand.u32 2147483648, %v11069_v34  ;;  %v6659_v45 = vand.u32 2147483648, %v11062_v50 }
 0xd50   : > { %v5681_v32 = vsel %vm5679_vm3, %v5680_v63, %v5678_v12  ;;  %v6414_v61 = vsel %vm6413_vm5, %v7799_v44, %v6410_v21  ;;  %vm11092_vm12 = vcmp.eq.f32.partialorder %v5722_v26, 8.507059e+37  ;;  %vm5697_vm5 = vcmp.gt.f32.partialorder %v11069_v34, 0.996 }
 0xd51   : > { %v11079_v52 = vmax.f32 %v5681_v32, 1e-15  ;;  %v6419_v27 = vsel %vm6416_vm6, %v6418_v25, %v6414_v61  ;;  %v5725_v14 = vor.u32 1.1754944e-38, %v5724_v57 }
 0xd52   : > { %v6420_v33 = vmul.f32 0.996, %v6419_v27 }
 0xd53   : > { %v7801_v20 = vpop.eup %7800  ;;  %7804 = vrcp.f32 %v11079_v52  ;;  %v5707_v44 = vand.u32 2147483647, %v11079_v52  ;;  %v5709_v46 = vand.u32 2147483648, %v11079_v52  ;;  %vm5703_vm3 = vweird.f32 %v11079_v52 }
 0xd54   : > { %v6650_v18 = vmul.f32 %v7801_v20, %v11062_v50  ;;  %v7803_v38 = vpop.eup %7802  ;;  %v6423_v7 = vmul.f32 %v6420_v33, %v10992_v35  ;;  %v6424_v28 = vmul.f32 %v6420_v33, %v10994_v6  ;;  %vm5696_vm6 = vcmp.gt.f32.partialorder %v11079_v52, 0.996 }
 0xd55   : > { %v5714_v51 = vmul.f32 %v7803_v38, %v11069_v34  ;;  %vm5719_vm13 = vweird.f32 %v7803_v38  ;;  %vm5708_vm4 = vcmp.eq.f32.partialorder %v5707_v44, 8.507059e+37  ;;  %v5710_v32 = vor.u32 1.1754944e-38, %v5709_v46 }
 0xd56   : > { %v6651_v10 = vmul.f32 %v7801_v20, %v6650_v18  ;;  %v11101_v4 = vsel %vm6390_vm7, %v6423_v7, %v10992_v35  ;;  %v11106_v22 = vsel %vm6390_vm7, %v6424_v28, %v10994_v6  ;;  %vm5720_vm2 = vmor %vm5718_vm11, %vm5719_vm13 }
 0xd57   : > { %v5715_v42 = vsub.f32 1.0, %v5714_v51  ;;  %v6633_v0 = vmul.f32 %v11101_v4, %v11101_v4  ;;  %v6634_v29 = vmul.f32 %v11106_v22, %v11106_v22  ;;  %v6782_v35 = vmul.f32 %v11027_v47, %v11101_v4 }
 0xd58   : > { %v6652_v13 = vmul.f32 0.5, %v6651_v10  ;;  %v6783_v19 = vmul.f32 %v11029_v60, %v11106_v22 }
 0xd59   : > { %v7805_v43 = vpop.eup %7804  ;;  %v5716_v40 = vmul.f32 %v7803_v38, %v5715_v42  ;;  %v6642_v23 = vadd.f32 %v6634_v29, %v6633_v0  ;;  %v6793_v30 = vsel %vm1002_vm14, %v6782_v35, 0.0 }
 0xd5a   : > { %v6653_v15 = vsub.f32 1.5, %v6652_v13  ;;  %v5699_v11 = vmul.f32 %v7805_v43, %v11079_v52  ;;  %vm5704_vm15 = vweird.f32 %v7805_v43  ;;  %v6794_v55 = vsel %vm1002_vm14, %v6783_v19, 0.0 }
 0xd5b   : > { %v5717_v31 = vadd.f32 %v7803_v38, %v5716_v40  ;;  %v11129_v63 = vadd.f32 %v6794_v55, %v6793_v30  ;;  %vm5705_vm14 = vmor %vm5703_vm3, %vm5704_vm15 }
 0xd5c   : > { %v6654_v37 = vmul.f32 %v7801_v20, %v6653_v15  ;;  %v5700_v6 = vsub.f32 1.0, %v5699_v11  ;;  %v6643_v20 = vrot.slane %v6642_v23, 4 }
 0xd5d   : > { %v5721_v60 = vsel %vm5720_vm2, %v7803_v38, %v5717_v31 }
 0xd5e   : > { %v6655_v54 = vmul.f32 %v6654_v37, %v11062_v50  ;;  %v5701_v59 = vmul.f32 %v7805_v43, %v5700_v6  ;;  %v5726_v21 = vsel %vm11092_vm12, %v5725_v14, %v5721_v60  ;;  %v6644_v25 = vadd.f32 %v6643_v20, %v6642_v23  ;;  %v11162_v20 = vpop.xlane.xlu2 %6433 }
 0xd5f   : > { %vm6444_vm3 = vcmp.eq.f32.partialorder %v11162_v20, inf }
 0xd60   : > { %v6657_v5 = vsel %vm6656_vm8, %v11062_v50, %v6655_v54  ;;  %v5702_v12 = vadd.f32 %v7805_v43, %v5701_v59  ;;  %v5727_v50 = vmul.f32 0.996, %v5726_v21  ;;  %v6645_v13 = vrot.slane %v6644_v25, 2 }
 0xd61   : > { %v6660_v2 = vsel %vm6658_vm9, %v6659_v45, %v6657_v5 }
 0xd62   : > { %v11127_v56 = vmax.f32 %v6660_v2, 1e-15  ;;  %v5706_v61 = vsel %vm5705_vm14, %v7805_v43, %v5702_v12  ;;  %v5729_v10 = vmul.f32 %v5727_v50, %v11013_v36  ;;  %v6646_v15 = vadd.f32 %v6645_v13, %v6644_v25 }
 0xd63   : > { %v5711_v57 = vsel %vm5708_vm4, %v5710_v32, %v5706_v61 }
 0xd64   : > { %v6999_v18 = vclamps-f32 %v11127_v56, 0.9999999  ;;  %7806 = vrcp.f32 %v11127_v56  ;;  %v5712_v33 = vmul.f32 0.996, %v5711_v57  ;;  %v11140_v38 = vsel %vm5697_vm5, %v5729_v10, %v11013_v36 }
 0xd65   : > { %v6761_v51 = vmul.f32 %v11027_v47, %v11140_v38  ;;  %v6647_v36 = vrot.slane %v6646_v15, 1  ;;  %vm6704_vm7 = vweird.f32 %v11127_v56  ;;  %v6708_v35 = vand.u32 2147483647, %v11127_v56 }
 0xd66   : > { %v6679_v27 = vadd.f32 1.0, %v6999_v18  ;;  %v6685_v26 = vsub.f32 1.0, %v6999_v18  ;;  %v5728_v7 = vmul.f32 %v5712_v33, %v11019_v3  ;;  %v6710_v19 = vand.u32 2147483648, %v11127_v56 }
 0xd67   : > { %v6769_v28 = vsel %vm561_vm1, %v6761_v51, 0.0  ;;  %v11155_v46 = vadd.f32 %v6647_v36, %v6646_v15  ;;  %vm6709_vm9 = vcmp.eq.f32.partialorder %v6708_v35, 8.507059e+37  ;;  %v6524_v35 = vmul.f32 %v11140_v38, %v11140_v38 }
 0xd68   : > { %7808 = vlog2.f32 %v6679_v27  ;;  %v11149_v42 = vsel %vm5696_vm6, %v5728_v7, %v11019_v3  ;;  %v6770_v44 = vrot.slane %v6769_v28, 4  ;;  %v6711_v21 = vor.u32 1.1754944e-38, %v6710_v19 }
 0xd69   : > { %7810 = vlog2.f32 %v6685_v26  ;;  %v6760_v39 = vmul.f32 %v11027_v47, %v11149_v42  ;;  %v6523_v14 = vmul.f32 %v11149_v42, %v11149_v42  ;;  %vm6668_vm11 = vcmp.eq.f32.partialorder %v11155_v46, inf }
 0xd6a   : > { %v7807_v45 = vpop.eup %7806  ;;  %7812 = vrsqrt.f32 %v11155_v46  ;;  %v6771_v31 = vadd.f32 %v6770_v44, %v6769_v28  ;;  %vm6670_vm12 = vcmp.eq.f32.partialorder %v11155_v46, 0.0  ;;  %vm6446_vm6 = vcmp.eq.f32.partialorder %v11162_v20, 0.0 }
 0xd6b   : > { %v6700_v34 = vmul.f32 %v7807_v45, %v11127_v56  ;;  %v6762_v11 = vsel %vm561_vm1, %v6760_v39, 0.0  ;;  %v6525_v40 = vrot.slane %v6523_v14, 4  ;;  %vm6705_vm8 = vweird.f32 %v7807_v45 }
 0xd6c   : > { %v6763_v3 = vrot.slane %v6762_v11, 4  ;;  %vm6706_vm1 = vmor %vm6704_vm7, %vm6705_vm8  ;;  %v6772_v50 = vrot.slane %v6771_v31, 2  ;;  %7814 = vrsqrt.f32 %v11162_v20 }
 0xd6d   : > { %v6701_v37 = vsub.f32 1.0, %v6700_v34  ;;  %v6526_v47 = vadd.f32 %v6525_v40, %v6523_v14 }
 0xd6e   : > { %v7809_v43 = vpop.eup %7808  ;;  %v6764_v6 = vadd.f32 %v6763_v3, %v6762_v11  ;;  %v6773_v51 = vadd.f32 %v6772_v50, %v6771_v31 }
 0xd6f   : > { %v7811_v52 = vpop.eup %7810  ;;  %v6682_v54 = vmul.f32 0.6931472, %v7809_v43  ;;  %v6702_v29 = vmul.f32 %v7807_v45, %v6701_v37  ;;  %v6527_v23 = vrot.slane %v6526_v47, 2 }
 0xd70   : > { %v6688_v0 = vmul.f32 0.6931472, %v7811_v52  ;;  %v6765_v30 = vrot.slane %v6764_v6, 2  ;;  %v7813_v32 = vpop.eup %7812  ;;  %v6774_v34 = vrot.slane %v6773_v51, 1 }
 0xd71   : > { %v6703_v2 = vadd.f32 %v7807_v45, %v6702_v29  ;;  %v6528_v60 = vadd.f32 %v6527_v23, %v6526_v47  ;;  %v6662_v13 = vmul.f32 %v7813_v32, %v11155_v46 }
 0xd72   : > { %v6691_v5 = vsub.f32 %v6682_v54, %v6688_v0  ;;  %v6766_v12 = vadd.f32 %v6765_v30, %v6764_v6  ;;  %v7815_v39 = vpop.eup %7814  ;;  %v6671_v0 = vand.u32 2147483648, %v11155_v46 }
 0xd73   : > { %v6707_v59 = vsel %vm6706_vm1, %v7807_v45, %v6703_v2  ;;  %v6529_v25 = vrot.slane %v6528_v60, 1  ;;  %v6663_v7 = vmul.f32 %v7813_v32, %v6662_v13  ;;  %v6438_v40 = vmul.f32 %v7815_v39, %v11162_v20 }
 0xd74   : > { %v6693_v55 = vmul.f32 0.5, %v6691_v5  ;;  %v6712_v61 = vsel %vm6709_vm9, %v6711_v21, %v6707_v59  ;;  %v6767_v10 = vrot.slane %v6766_v12, 1 }
 0xd75   : > { %v11167_v57 = vadd.f32 %v6529_v25, %v6528_v60  ;;  %v6664_v36 = vmul.f32 0.5, %v6663_v7  ;;  %v6439_v31 = vmul.f32 %v7815_v39, %v6438_v40 }
 0xd76   : > { %v6695_v56 = vmul.f32 %v6693_v55, %v11036_v62  ;;  %v6696_v18 = vmul.f32 %v6693_v55, %v11039_v1  ;;  %v6768_v33 = vadd.f32 %v6767_v10, %v6766_v12  ;;  %v6531_v55 = vrot.slane %v6524_v35, 4 }
 0xd77   : > { %7816 = vrsqrt.f32 %v11167_v57  ;;  %v6665_v37 = vsub.f32 1.5, %v6664_v36  ;;  %v6440_v59 = vmul.f32 0.5, %v6439_v31  ;;  %vm6544_vm15 = vcmp.eq.f32.partialorder %v11167_v57, inf }
 0xd78   : > { %v6713_v27 = vmul.f32 %v6712_v61, %v6695_v56  ;;  %v6714_v26 = vmul.f32 %v6712_v61, %v6696_v18  ;;  %6812 = vrot.lane.b32.xlu2 %v6768_v33, %s7863_s28  ;;  %v6532_v50 = vadd.f32 %v6531_v55, %v6524_v35  ;;  %vm6546_vm4 = vcmp.eq.f32.partialorder %v11167_v57, 0.0 }
 0xd79   : > { %v6666_v52 = vmul.f32 %v7813_v32, %v6665_v37  ;;  %v6441_v56 = vsub.f32 1.5, %v6440_v59 }
 0xd7a   : > { %v6731_v15 = vmul.f32 %v6713_v27, %v8483_v17  ;;  %v6732_v62 = vmul.f32 %v6714_v26, %v8492_v24  ;;  %v6775_v24 = vadd.f32 %v6774_v34, %v6773_v51  ;;  %v6533_v25 = vrot.slane %v6532_v50, 2 }
 0xd7b   : > { %v6667_v54 = vmul.f32 %v6666_v52, %v11155_v46  ;;  %v6442_v10 = vmul.f32 %v7815_v39, %v6441_v56  ;;  %v6517_v39 = vmul.f32 %v8703_v53, %v8415_v9 }
 0xd7c   : > { %v6735_v1 = vsel %vm476_vm0, %v6731_v15, 0.0  ;;  %v6736_v45 = vsel %vm476_vm0, %v6732_v62, 0.0  ;;  %v6534_v15 = vadd.f32 %v6533_v25, %v6532_v50 }
 0xd7d   : > { %v6737_v28 = vadd.f32 %v6736_v45, %v6735_v1  ;;  %v7817_v43 = vpop.eup %7816  ;;  %v6669_v47 = vsel %vm6668_vm11, %v11155_v46, %v6667_v54  ;;  %v6443_v45 = vmul.f32 %v6442_v10, %v11162_v20  ;;  %v6521_v40 = vmul.f32 %v6517_v39, %v8684_v48 }
 0xd7e   : > { %v6538_v17 = vmul.f32 %v7817_v43, %v11167_v57  ;;  %v6672_v6 = vsel %vm6670_vm12, %v6671_v0, %v6669_v47 }
 0xd7f   : > { %v6738_v14 = vrot.slane %v6737_v28, 4  ;;  %v6674_v5 = vmax.f32 %v6672_v6, 1e-15  ;;  %v6445_v52 = vsel %vm6444_vm3, %v11162_v20, %v6443_v45 }
 0xd80   : > { %6814 = vrot.lane.b32.xlu2 %v6775_v24, %s7863_s28  ;;  %v6539_v29 = vmul.f32 %v7817_v43, %v6538_v17 }
 0xd81   : > { %v6739_v44 = vadd.f32 %v6738_v14, %v6737_v28  ;;  %v7000_v30 = vclamps-f32 %v6674_v5, 0.9999999  ;;  %7818 = vrcp.f32 %v6674_v5  ;;  %v6726_v7 = vand.u32 2147483648, %v6674_v5 }
 0xd82   : > { %v6540_v23 = vmul.f32 0.5, %v6539_v29  ;;  %vm6720_vm2 = vweird.f32 %v6674_v5  ;;  %v6724_v34 = vand.u32 2147483647, %v6674_v5  ;;  %v6518_v14 = vmul.f32 %v8671_v58, %v8421_v16 }
 0xd83   : > { %v6740_v11 = vrot.slane %v6739_v44, 2  ;;  %v6680_v60 = vadd.f32 1.0, %v7000_v30  ;;  %v6686_v21 = vsub.f32 1.0, %v7000_v30  ;;  %v6727_v9 = vor.u32 1.1754944e-38, %v6726_v7 }
 0xd84   : > { %v6541_v12 = vsub.f32 1.5, %v6540_v23  ;;  %vm6725_vm5 = vcmp.eq.f32.partialorder %v6724_v34, 8.507059e+37  ;;  %v6522_v54 = vmul.f32 %v6518_v14, %v8664_v49 }
 0xd85   : > { %v6741_v3 = vadd.f32 %v6740_v11, %v6739_v44  ;;  %7820 = vlog2.f32 %v6680_v60  ;;  %v6535_v44 = vrot.slane %v6534_v15, 1  ;;  %v6447_v11 = vand.u32 2147483648, %v11162_v20 }
 0xd86   : > { %7822 = vlog2.f32 %v6686_v21  ;;  %v6542_v32 = vmul.f32 %v7817_v43, %v6541_v12  ;;  %v6547_v43 = vand.u32 2147483648, %v11167_v57 }
 0xd87   : > { %v6742_v19 = vrot.slane %v6741_v3, 1  ;;  %v7819_v46 = vpop.eup %7818  ;;  %v6448_v0 = vsel %vm6446_vm6, %v6447_v11, %v6445_v52  ;;  %v11209_v29 = vadd.f32 %v6535_v44, %v6534_v15  ;;  %vm6833_vm6 = vcmask 719872  }
 0xd88   : > { %v6716_v18 = vmul.f32 %v7819_v46, %v6674_v5  ;;  %v6543_v33 = vmul.f32 %v6542_v32, %v11167_v57  ;;  %vm6721_vm13 = vweird.f32 %v7819_v46  ;;  %v6796_v5 = vrot.slane %v11129_v63, 4 }
 0xd89   : > { %v6743_v2 = vadd.f32 %v6742_v19, %v6741_v3  ;;  %vm11194_vm14 = vmor %vm6720_vm2, %vm6721_vm13  ;;  %v11213_v19 = vpop.xlane.xlu2 %6435  ;;  %7824 = vrsqrt.f32 %v11209_v29  ;;  %vm6556_vm12 = vcmp.eq.f32.partialorder %v11209_v29, inf  ;;  %vm6558_vm3 = vcmp.eq.f32.partialorder %v11209_v29, 0.0 }
 0xd8a   : > { %v6717_v61 = vsub.f32 1.0, %v6716_v18  ;;  %v6545_v36 = vsel %vm6544_vm15, %v11167_v57, %v6543_v33  ;;  %7826 = vrsqrt.f32 %v11213_v19  ;;  %v6797_v59 = vadd.f32 %v6796_v5, %v11129_v63 }
 0xd8b   : > { %6804 = vrot.lane.b32.xlu2 %v6743_v2, %s7860_s26  ;;  %v7821_v27 = vpop.eup %7820  ;;  %v6548_v53 = vsel %vm6546_vm4, %v6547_v43, %v6545_v36  ;;  %vm6456_vm2 = vcmp.eq.f32.partialorder %v11213_v19, inf  ;;  %vm6458_vm4 = vcmp.eq.f32.partialorder %v11213_v19, 0.0 }
 0xd8c   : > { %v6718_v26 = vmul.f32 %v7819_v46, %v6717_v61  ;;  %v7823_v13 = vpop.eup %7822  ;;  %v6684_v51 = vmul.f32 0.6931472, %v7821_v27  ;;  %v11211_v57 = vmax.f32 %v6548_v53, 1e-15  ;;  %v6798_v25 = vrot.slane %v6797_v59, 2 }
 0xd8d   : > { %v6690_v62 = vmul.f32 0.6931472, %v7823_v13 }
 0xd8e   : > { %v6719_v1 = vadd.f32 %v7819_v46, %v6718_v26  ;;  %v6997_v20 = vclamps-f32 %v11211_v57, 0.9999999  ;;  %7828 = vrcp.f32 %v11211_v57  ;;  %v6799_v33 = vadd.f32 %v6798_v25, %v6797_v59 }
 0xd8f   : > { %v6692_v28 = vsub.f32 %v6684_v51, %v6690_v62  ;;  %v7825_v60 = vpop.eup %7824  ;;  %vm6590_vm1 = vweird.f32 %v11211_v57 }
 0xd90   : > { %v6723_v24 = vsel %vm11194_vm14, %v7819_v46, %v6719_v1  ;;  %v6567_v30 = vadd.f32 1.0, %v6997_v20  ;;  %v6573_v21 = vsub.f32 1.0, %v6997_v20  ;;  %v7827_v12 = vpop.eup %7826  ;;  %v6550_v18 = vmul.f32 %v7825_v60, %v11209_v29 }
 0xd91   : > { %v6694_v17 = vmul.f32 0.5, %v6692_v28  ;;  %v6728_v3 = vsel %vm6725_vm5, %v6727_v9, %v6723_v24  ;;  %v6450_v61 = vmul.f32 %v7827_v12, %v11213_v19  ;;  %v6800_v34 = vrot.slane %v6799_v33, 1 }
 0xd92   : > { %v6551_v26 = vmul.f32 %v7825_v60, %v6550_v18  ;;  %vm6830_vm5 = vcmask 588800  }
 0xd93   : > { %v6697_v16 = vmul.f32 %v6694_v17, %v11101_v4  ;;  %v6698_v58 = vmul.f32 %v6694_v17, %v11106_v22  ;;  %v11215_v22 = vmax.f32 %v6448_v0, 1e-15  ;;  %v6451_v51 = vmul.f32 %v7827_v12, %v6450_v61 }
 0xd94   : > { %v7829_v63 = vpop.eup %7828  ;;  %v6552_v28 = vmul.f32 0.5, %v6551_v26  ;;  %v6801_v24 = vadd.f32 %v6800_v34, %v6799_v33 }
 0xd95   : > { %v6729_v47 = vmul.f32 %v6728_v3, %v6697_v16  ;;  %v6730_v35 = vmul.f32 %v6728_v3, %v6698_v58  ;;  %v6995_v23 = vclamps-f32 %v11215_v22, 0.9999999  ;;  %7830 = vrcp.f32 %v11215_v22 }
 0xd96   : > { %7832 = vlog2.f32 %v6567_v30  ;;  %v6586_v62 = vmul.f32 %v7829_v63, %v11211_v57  ;;  %v6452_v39 = vmul.f32 0.5, %v6451_v51  ;;  %v6553_v17 = vsub.f32 1.5, %v6552_v28 }
 0xd97   : > { %v6733_v4 = vmul.f32 %v6729_v47, %v6521_v40  ;;  %v6734_v6 = vmul.f32 %v6730_v35, %v6522_v54  ;;  %v6467_v46 = vadd.f32 1.0, %v6995_v23  ;;  %v6473_v56 = vsub.f32 1.0, %v6995_v23 }
 0xd98   : > { %7834 = vlog2.f32 %v6573_v21  ;;  %v6587_v43 = vsub.f32 1.0, %v6586_v62  ;;  %v6453_v9 = vsub.f32 1.5, %v6452_v39  ;;  %v6554_v40 = vmul.f32 %v7825_v60, %v6553_v17 }
 0xd99   : > { %v6744_v48 = vsel %vm476_vm0, %v6733_v4, 0.0  ;;  %v6745_v49 = vsel %vm476_vm0, %v6734_v6, 0.0  ;;  %7836 = vlog2.f32 %v6467_v46  ;;  %vm6591_vm7 = vweird.f32 %v7829_v63 }
 0xd9a   : > { %v6746_v31 = vadd.f32 %v6745_v49, %v6744_v48  ;;  %7838 = vlog2.f32 %v6473_v56  ;;  %v6588_v16 = vmul.f32 %v7829_v63, %v6587_v43  ;;  %v6454_v3 = vmul.f32 %v7827_v12, %v6453_v9  ;;  %vm11245_vm9 = vmor %vm6590_vm1, %vm6591_vm7 }
 0xd9b   : > { %v11229_v27 = vpop.eup %7830  ;;  %v6596_v4 = vand.u32 2147483648, %v11211_v57  ;;  %v6555_v6 = vmul.f32 %v6554_v40, %v11209_v29  ;;  %v6594_v49 = vand.u32 2147483647, %v11211_v57  ;;  %vm6490_vm11 = vweird.f32 %v11215_v22 }
 0xd9c   : > { %v6747_v2 = vrot.slane %v6746_v31, 4  ;;  %v7833_v15 = vpop.eup %7832  ;;  %v6486_v45 = vmul.f32 %v11229_v27, %v11215_v22  ;;  %v6589_v47 = vadd.f32 %v7829_v63, %v6588_v16  ;;  %vm6491_vm8 = vweird.f32 %v11229_v27 }
 0xd9d   : > { %v6570_v14 = vmul.f32 0.6931472, %v7833_v15  ;;  %v6455_v20 = vmul.f32 %v6454_v3, %v11213_v19  ;;  %v6494_v23 = vand.u32 2147483647, %v11215_v22  ;;  %vm11255_vm13 = vmor %vm6490_vm11, %vm6491_vm8  ;;  %v6557_v59 = vsel %vm6556_vm12, %v11209_v29, %v6555_v6 }
 0xd9e   : > { %v6748_v55 = vadd.f32 %v6747_v2, %v6746_v31  ;;  %v7835_v1 = vpop.eup %7834  ;;  %v6487_v44 = vsub.f32 1.0, %v6486_v45  ;;  %v6496_v31 = vand.u32 2147483648, %v11215_v22  ;;  %v6593_v30 = vsel %vm11245_vm9, %v7829_v63, %v6589_v47 }
 0xd9f   : > { %v7837_v7 = vpop.eup %7836  ;;  %v6576_v37 = vmul.f32 0.6931472, %v7835_v1  ;;  %vm6595_vm15 = vcmp.eq.f32.partialorder %v6594_v49, 8.507059e+37  ;;  %v6559_v22 = vand.u32 2147483648, %v11209_v29  ;;  %vm6495_vm14 = vcmp.eq.f32.partialorder %v6494_v23, 8.507059e+37 }
 0xda0   : > { %v6749_v50 = vrot.slane %v6748_v55, 2  ;;  %v7839_v36 = vpop.eup %7838  ;;  %v6470_v52 = vmul.f32 0.6931472, %v7837_v7  ;;  %v6488_v58 = vmul.f32 %v11229_v27, %v6487_v44  ;;  %v6497_v21 = vor.u32 1.1754944e-38, %v6496_v31 }
 0xda1   : > { %v6476_v11 = vmul.f32 0.6931472, %v7839_v36  ;;  %v6579_v53 = vsub.f32 %v6570_v14, %v6576_v37  ;;  %v6459_v56 = vand.u32 2147483648, %v11213_v19 }
 0xda2   : > { %v6750_v32 = vadd.f32 %v6749_v50, %v6748_v55  ;;  %v6489_v35 = vadd.f32 %v11229_v27, %v6488_v58  ;;  %v6597_v55 = vor.u32 1.1754944e-38, %v6596_v4  ;;  %v6457_v50 = vsel %vm6456_vm2, %v11213_v19, %v6455_v20 }
 0xda3   : > { %v6479_v54 = vsub.f32 %v6470_v52, %v6476_v11  ;;  %v6581_v0 = vmul.f32 0.5, %v6579_v53  ;;  %v6460_v25 = vsel %vm6458_vm4, %v6459_v56, %v6457_v50 }
 0xda4   : > { %v6751_v10 = vrot.slane %v6750_v32, 1  ;;  %v6598_v12 = vsel %vm6595_vm15, %v6597_v55, %v6593_v30  ;;  %v11272_v63 = vmax.f32 %v6460_v25, 1e-15 }
 0xda5   : > { %v6481_v48 = vmul.f32 0.5, %v6479_v54  ;;  %v6583_v2 = vmul.f32 %v6581_v0, %v11149_v42  ;;  %v6493_v42 = vsel %vm11255_vm13, %v11229_v27, %v6489_v35 }
 0xda6   : > { %v6752_v13 = vadd.f32 %v6751_v10, %v6750_v32  ;;  %v6498_v18 = vsel %vm6495_vm14, %v6497_v21, %v6493_v42  ;;  %v6511_v55 = vand.u32 2147483648, %v11272_v63  ;;  %vm6505_vm11 = vweird.f32 %v11272_v63 }
 0xda7   : > { %v6483_v60 = vmul.f32 %v6481_v48, %v8727_v41  ;;  %v6599_v46 = vmul.f32 %v6598_v12, %v6583_v2  ;;  %v6560_v41 = vsel %vm6558_vm3, %v6559_v22, %v6557_v59 }
 0xda8   : > { %6806 = vrot.lane.b32.xlu2 %v6752_v13, %s7860_s26  ;;  %v11270_v61 = vmax.f32 %v6560_v41, 1e-15  ;;  %v6821_v26 = vpop.permute.xlu2 %6820  ;;  %v6996_v13 = vclamps-f32 %v11272_v63, 0.9999999  ;;  %v6512_v50 = vor.u32 1.1754944e-38, %v6511_v55 }
 0xda9   : > { %v6499_v32 = vmul.f32 %v6498_v18, %v6483_v60  ;;  %v6509_v60 = vand.u32 2147483647, %v11272_v63 }
 0xdaa   : > { %v6998_v27 = vclamps-f32 %v11270_v61, 0.9999999  ;;  %7840 = vrcp.f32 %v11270_v61  ;;  %v6468_v19 = vadd.f32 1.0, %v6996_v13  ;;  %v6474_v1 = vsub.f32 1.0, %v6996_v13 }
 0xdab   : > { %v6615_v10 = vmul.f32 %v6599_v46, %v6499_v32  ;;  %7842 = vrcp.f32 %v11272_v63  ;;  %v6611_v5 = vand.u32 2147483648, %v11270_v61  ;;  %vm6605_vm1 = vweird.f32 %v11270_v61 }
 0xdac   : > { %v6568_v51 = vadd.f32 1.0, %v6998_v27  ;;  %v6574_v15 = vsub.f32 1.0, %v6998_v27  ;;  %v6609_v30 = vand.u32 2147483647, %v11270_v61  ;;  %vm6510_vm15 = vcmp.eq.f32.partialorder %v6509_v60, 8.507059e+37 }
 0xdad   : > { %v6617_v29 = vsel %vm476_vm0, %v6615_v10, 0.0  ;;  %v6612_v22 = vor.u32 1.1754944e-38, %v6611_v5 }
 0xdae   : > { %v6618_v33 = vrot.slane %v6617_v29, 4  ;;  %7844 = vlog2.f32 %v6568_v51  ;;  %vm6610_vm13 = vcmp.eq.f32.partialorder %v6609_v30, 8.507059e+37 }
 0xdaf   : > { %7846 = vlog2.f32 %v6574_v15 }
 0xdb0   : > { %6822 = vrot.lane.b32.xlu2 %v6801_v24, %s7862_s27  ;;  %v6619_v62 = vadd.f32 %v6618_v33, %v6617_v29  ;;  %7848 = vlog2.f32 %v6468_v19  ;;  %v7841_v7 = vpop.eup %7840 }
 0xdb1   : > { %7850 = vlog2.f32 %v6474_v1  ;;  %v7843_v34 = vpop.eup %7842  ;;  %v6601_v39 = vmul.f32 %v7841_v7, %v11270_v61  ;;  %vm6606_vm7 = vweird.f32 %v7841_v7 }
 0xdb2   : > { %v6620_v28 = vrot.slane %v6619_v62, 2  ;;  %v6501_v43 = vmul.f32 %v7843_v34, %v11272_v63  ;;  %vm6506_vm8 = vweird.f32 %v7843_v34  ;;  %vm6607_vm9 = vmor %vm6605_vm1, %vm6606_vm7 }
 0xdb3   : > { %v6602_v9 = vsub.f32 1.0, %v6601_v39  ;;  %vm6507_vm12 = vmor %vm6505_vm11, %vm6506_vm8 }
 0xdb4   : > { %v7845_v36 = vpop.eup %7844  ;;  %v6621_v37 = vadd.f32 %v6620_v28, %v6619_v62  ;;  %v6502_v16 = vsub.f32 1.0, %v6501_v43 }
 0xdb5   : > { %v7847_v14 = vpop.eup %7846  ;;  %v6572_v52 = vmul.f32 0.6931472, %v7845_v36  ;;  %v6603_v3 = vmul.f32 %v7841_v7, %v6602_v9 }
 0xdb6   : > { %v7849_v44 = vpop.eup %7848  ;;  %v6578_v11 = vmul.f32 0.6931472, %v7847_v14  ;;  %v6622_v53 = vrot.slane %v6621_v37, 1  ;;  %v6503_v47 = vmul.f32 %v7843_v34, %v6502_v16 }
 0xdb7   : > { %v7851_v24 = vpop.eup %7850  ;;  %v6472_v58 = vmul.f32 0.6931472, %v7849_v44  ;;  %v6604_v20 = vadd.f32 %v7841_v7, %v6603_v3 }
 0xdb8   : > { %v6478_v40 = vmul.f32 0.6931472, %v7851_v24  ;;  %v6580_v54 = vsub.f32 %v6572_v52, %v6578_v11  ;;  %v6623_v0 = vadd.f32 %v6622_v53, %v6621_v37  ;;  %v6504_v31 = vadd.f32 %v7843_v34, %v6503_v47 }
 0xdb9   : > { %v6608_v42 = vsel %vm6607_vm9, %v7841_v7, %v6604_v20 }
 0xdba   : > { %v6480_v4 = vsub.f32 %v6472_v58, %v6478_v40  ;;  %v6582_v48 = vmul.f32 0.5, %v6580_v54  ;;  %v6508_v12 = vsel %vm6507_vm12, %v7843_v34, %v6504_v31  ;;  %v6613_v46 = vsel %vm6610_vm13, %v6612_v22, %v6608_v42 }
 0xdbb   : > { %v6513_v41 = vsel %vm6510_vm15, %v6512_v50, %v6508_v12 }
 0xdbc   : > { %v6482_v23 = vmul.f32 0.5, %v6480_v4  ;;  %v6584_v59 = vmul.f32 %v6582_v48, %v11140_v38 }
 0xdbe   : > { %v6484_v21 = vmul.f32 %v6482_v23, %v8784_v8  ;;  %v6614_v56 = vmul.f32 %v6613_v46, %v6584_v59 }
 0xdc0   : > { %v6514_v18 = vmul.f32 %v6513_v41, %v6484_v21 }
 0xdc2   : > { %v6616_v32 = vmul.f32 %v6614_v56, %v6514_v18 }
 0xdc4   : > { %v6624_v38 = vsel %vm476_vm0, %v6616_v32, 0.0 }
 0xdc5   : > { %v6625_v25 = vrot.slane %v6624_v38, 4 }
 0xdc7   : > { %v6626_v61 = vadd.f32 %v6625_v25, %v6624_v38 }
 0xdc9   : > { %v6627_v10 = vrot.slane %v6626_v61, 2 }
 0xdcb   : > { %v6628_v63 = vadd.f32 %v6627_v10, %v6626_v61 }
 0xdcd   : > { %v6629_v27 = vrot.slane %v6628_v63, 1 }
 0xdcf   : > { %v6630_v29 = vadd.f32 %v6629_v27, %v6628_v63 }
 0xdd2   : > { %v6813_v45 = vpop.permute.xlu2 %6812 }
 0xdda   : > { %v6815_v17 = vpop.permute.xlu2 %6814 }
 0xde5   : > { %v6805_v35 = vpop.permute.xlu2 %6804 }
 0xde6   : > { %v6826_v6 = vsel %vm476_vm0, %v6623_v0, %v6805_v35 }
 0xde7   : > { %v6828_v49 = vsel %vm658_vm10, %v6826_v6, %v6813_v45 }
 0xde8   : > { %v6831_v2 = vsel %vm6830_vm5, %v6828_v49, %v6821_v26 }
 0xde9   : > { %v6834_v57 = vsel %vm6833_vm6, %v6831_v2, 0.0 }
 0xdea   : > { %6836 = vst [vmem:[%s11287_s30] sm:$0x1] %v6834_v57 }
 0xe02   : > { %v6807_v26 = vpop.permute.xlu2 %6806 }
 0xe03   : > { %v6827_v8 = vsel %vm476_vm0, %v6630_v29, %v6807_v26 }
 0xe04   : > { %v6829_v13 = vsel %vm658_vm10, %v6827_v8, %v6815_v17 }
 0xe0a   : > { %v6823_v33 = vpop.permute.xlu2 %6822 }
 0xe0b   : > { %v6832_v51 = vsel %vm6830_vm5, %v6829_v13, %v6823_v33 }
 0xe0c   : > { %v6835_v15 = vsel %vm6833_vm6, %v6832_v51, 0.0 }
 0xe0d   : > { %6837 = vst [vmem:[%s11287_s30 + $0x1] sm:$0x1] %v6835_v15 }
 0xe0e PF: > { %s22_s21 = sadd.s32 1, %s7858_s21  }
 0xe0f   : > { %p19_p4 = scmp.ge.s32.totalorder %s22_s21, 4  }
 0xe11   :  { %21 = sbr.rel (!%p19_p4) target bundleno = 1 (0x1), region = 101 }

</bundles_post_ra>
